<compile_context>
chip_gen: v7x
topology: tpu7x:2x2x1
jax: 0.10.0
libtpu: 0.0.40
codegen_flags: <defaults>
</compile_context>

<pallas_src>
import functools

import jax
import jax.numpy as jnp
from jax.experimental import pallas as pl
from jax.experimental.pallas import tpu as pltpu


# ----------------------------------------------------------------------------
# helpers
# ----------------------------------------------------------------------------
def _round_up(x, m):
    return ((x + m - 1) // m) * m


def _largest_divisor_tile(kp, target, mult=128):
    """Largest t <= target with t % mult == 0 and kp % t == 0 (kp % mult == 0)."""
    t = min(target, kp)
    t = (t // mult) * mult
    while t >= mult:
        if kp % t == 0:
            return t
        t -= mult
    return mult


def _apply_activation(y, activation):
    if activation == "relu":
        return jnp.maximum(y, 0.0)
    if activation == "leaky_relu":
        return jnp.where(y > 0.0, y, 0.1 * y)
    return jnp.tanh(y)  # PyTorch fallback: nn.Tanh()


# ----------------------------------------------------------------------------
# Fused MLP kernel: K-tiled reduction over layer 1, all later layers in the
# last-k epilogue (their weights/biases are VMEM-resident).
# ----------------------------------------------------------------------------
def _fused_mlp_kernel(*refs, activation, num_k, num_layers):
    # refs = (x, w1, b1, w2, b2, ..., wL, bL, o, acc)
    x_ref = refs[0]
    wb_refs = refs[1:1 + 2 * num_layers]
    o_ref = refs[1 + 2 * num_layers]
    acc_ref = refs[2 + 2 * num_layers]

    k = pl.program_id(0)

    @pl.when(k == 0)
    def _():
        acc_ref[...] = jnp.zeros_like(acc_ref)

    # Layer 1 partial product for this K tile (f32 accumulation on MXU).
    acc_ref[...] += jnp.dot(
        x_ref[...], wb_refs[0][...], preferred_element_type=jnp.float32
    )

    @pl.when(k == num_k - 1)
    def _():
        # Epilogue: bias + activation for layer 1, then the tiny remaining
        # layers entirely in VMEM/vregs.
        h = acc_ref[...] + wb_refs[1][...]
        for li in range(1, num_layers):
            h = _apply_activation(h, activation)  # act after every non-final layer
            w_ref = wb_refs[2 * li]
            b_ref = wb_refs[2 * li + 1]
            h = (
                jnp.dot(
                    h.astype(w_ref.dtype),
                    w_ref[...],
                    preferred_element_type=jnp.float32,
                )
                + b_ref[...]
            )
        o_ref[...] = h.astype(o_ref.dtype)


def _fused_mlp_pallas(x, packed_params, tk, activation):
    """x: (M, Kp) already flattened & K-padded.  Returns (M, Cp) f32."""
    M, Kp = x.shape
    assert Kp % tk == 0
    num_k = Kp // tk
    num_layers = len(packed_params)
    H1 = packed_params[0][0].shape[1]
    Cp = packed_params[-1][0].shape[1]

    in_specs = [
        pl.BlockSpec((M, tk), lambda k: (0, k)),    # activations: K-tiled
        pl.BlockSpec((tk, H1), lambda k: (k, 0)),   # W1: K-tiled (the big stream)
        pl.BlockSpec((1, H1), lambda k: (0, 0)),    # b1: resident
    ]
    args = [x, packed_params[0][0], packed_params[0][1]]
    for (w, b) in packed_params[1:]:
        ni, no = w.shape
        in_specs.append(pl.BlockSpec((ni, no), lambda k: (0, 0)))  # resident
        in_specs.append(pl.BlockSpec((1, no), lambda k: (0, 0)))   # resident
        args += [w, b]

    kernel = functools.partial(
        _fused_mlp_kernel,
        activation=activation,
        num_k=num_k,
        num_layers=num_layers,
    )

    return pl.pallas_call(
        kernel,
        out_shape=jax.ShapeDtypeStruct((M, Cp), jnp.float32),
        grid_spec=pltpu.PrefetchScalarGridSpec(
            num_scalar_prefetch=0,
            grid=(num_k,),
            in_specs=in_specs,
            out_specs=pl.BlockSpec((M, Cp), lambda k: (0, 0)),
            scratch_shapes=[pltpu.VMEM((M, H1), jnp.float32)],
        ),
        compiler_params=pltpu.CompilerParams(
            dimension_semantics=("arbitrary",),
            # double-buffered (tk,64)->lane-padded-128 W1 tiles ~= 22 MiB at
            # tk=21504; raise above v5e's 16 MiB scoped default, stay well under
            # v7x's 64 MiB physical VMEM.
            vmem_limit_bytes=40 * 1024 * 1024,
        ),
        # TODO(synk): on v7x the K reduction could be split across the two
        # TensorCores (parallel leading grid axis of size 2 + partial-sum
        # combine); only worth it if one TC cannot saturate HBM.
    )(*args)


# ----------------------------------------------------------------------------
# Parameter init + one-time prepacking (all padding happens here, not per call)
# ----------------------------------------------------------------------------
def init_mlp_params(key, input_size, hidden_sizes, num_classes):
    """Deterministic PyTorch-style (Kaiming-uniform-ish) Linear init.
    Weights stored as (in_features, out_features) == torch weight.T."""
    layer_sizes = [input_size] + list(hidden_sizes) + [num_classes]
    params = []
    for i in range(len(layer_sizes) - 1):
        fan_in, fan_out = layer_sizes[i], layer_sizes[i + 1]
        key, kw, kb = jax.random.split(key, 3)
        bound = 1.0 / jnp.sqrt(fan_in)
        w = jax.random.uniform(kw, (fan_in, fan_out), jnp.float32, -bound, bound)
        b = jax.random.uniform(kb, (fan_out,), jnp.float32, -bound, bound)
        params.append((w, b))
    return params


def prepack_mlp_params(params, *, tile_k_target=21504, weights_dtype=jnp.float32):
    """One-time packing outside the hot path:
      - pad K of W1 to a multiple of 128 if needed (zeros are inert),
      - pick tk that divides Kp exactly (no per-call weight padding/copies),
      - pad the FINAL layer's output dim to 128 lanes (lane-dense stores),
      - optionally cast weights to bf16 (halves HBM traffic; f32 accumulate).
    Biases stay f32.  Returns (packed_params, meta)."""
    num_layers = len(params)
    K = params[0][0].shape[0]
    Kp = _round_up(K, 128)
    tk = _largest_divisor_tile(Kp, tile_k_target)

    num_classes = params[-1][0].shape[1]
    Cp = _round_up(num_classes, 128)

    packed = []
    for i, (w, b) in enumerate(params):
        b2d = b.reshape(1, -1).astype(jnp.float32)
        if i == 0 and Kp != K:
            w = jnp.zeros((Kp, w.shape[1]), w.dtype).at[:K, :].set(w)
        if i == num_layers - 1 and Cp != num_classes:
            w = jnp.zeros((w.shape[0], Cp), w.dtype).at[:, :num_classes].set(w)
            b2d = jnp.zeros((1, Cp), jnp.float32).at[:, :num_classes].set(b2d)
        packed.append((w.astype(weights_dtype), b2d))

    meta = dict(K=K, Kp=Kp, tk=tk, num_classes=num_classes, num_classes_padded=Cp)
    return packed, meta


# ----------------------------------------------------------------------------
# Forward (inference)
# ----------------------------------------------------------------------------
def mlp_comparator_forward(x, packed_params, meta, activation_function="relu"):
    """x: (B, 3, 224, 224) or anything flattening to (-1, 3*224*224)."""
    K, Kp = meta["K"], meta["Kp"]
    h = x.reshape(-1, K).astype(jnp.float32)       # x.view(-1, 3*224*224).float()
    M = h.shape[0]
    if Kp != K:                                    # no-op for K = 3*224*224
        h = jnp.zeros((M, Kp), jnp.float32).at[:, :K].set(h)
    h = h.astype(packed_params[0][0].dtype)        # no-op for f32 weights
    out_p = _fused_mlp_pallas(h, packed_params, meta["tk"], activation_function)
    return out_p[:, : meta["num_classes"]]


def mlp_comparator_reference(x, params, activation_function="relu"):
    feat = params[0][0].shape[0]
    h = x.reshape(-1, feat).astype(jnp.float32)
    n_layers = len(params)
    for i, (w, b) in enumerate(params):
        h = jnp.dot(h, w, precision=jax.lax.Precision.HIGHEST) + b
        if i < n_layers - 1:
            h = _apply_activation(h, activation_function)
    return h


if __name__ == "__main__":
    key = jax.random.PRNGKey(0)
    k_in, k_params = jax.random.split(key)

    # Config consistent with the module's forward (input flattens to 3*224*224).
    batch = 2
    input_size = 3 * 224 * 224
    hidden_sizes = [64, 32]
    num_classes = 10
    activation = "relu"

    x = jax.random.normal(k_in, (batch, 3, 224, 224), jnp.float32)
    params = init_mlp_params(k_params, input_size, hidden_sizes, num_classes)

    # One-time prepack (padding / tiling decisions) outside the hot path.
    packed, meta = prepack_mlp_params(params)

    fwd = jax.jit(
        lambda xx, pp: mlp_comparator_forward(xx, pp, meta, activation)
    )
    out = jax.block_until_ready(fwd(x, packed))

    ref = mlp_comparator_reference(x, params, activation)
    assert out.shape == (batch, num_classes), out.shape
    assert jnp.allclose(out, ref, atol=1e-3, rtol=1e-3), (
        float(jnp.max(jnp.abs(out - ref)))
    )

    print("KERNEL_OK")
</pallas_src>

<mosaic_0001>
module attributes {stable_mosaic.version = 11 : i64} {
  func.func @_fused_mlp_kernel(%arg0: i32, %arg1: memref<2x21504xf32, #tpu.memory_space<vmem>>, %arg2: memref<21504x64xf32, #tpu.memory_space<vmem>>, %arg3: memref<1x64xf32, #tpu.memory_space<vmem>>, %arg4: memref<64x32xf32, #tpu.memory_space<vmem>>, %arg5: memref<1x32xf32, #tpu.memory_space<vmem>>, %arg6: memref<32x128xf32, #tpu.memory_space<vmem>>, %arg7: memref<1x128xf32, #tpu.memory_space<vmem>>, %arg8: memref<2x128xf32, #tpu.memory_space<vmem>>, %arg9: memref<2x64xf32, #tpu.memory_space<vmem>>) attributes {dimension_semantics = [#tpu.dimension_semantics<arbitrary>], iteration_bounds = array<i64: 7>, scalar_prefetch = 0 : i64, scratch_operands = 1 : i64, tpu.core_type = #tpu.core_type<tc>, window_params = [{transform_indices = @transform_0, window_bounds = array<i64: 2, 21504>}, {transform_indices = @transform_1, window_bounds = array<i64: 21504, 64>}, {pipeline_mode = #tpu.pipeline_mode<synchronous>, transform_indices = @transform_2, window_bounds = array<i64: 1, 64>}, {pipeline_mode = #tpu.pipeline_mode<synchronous>, transform_indices = @transform_3, window_bounds = array<i64: 64, 32>}, {pipeline_mode = #tpu.pipeline_mode<synchronous>, transform_indices = @transform_4, window_bounds = array<i64: 1, 32>}, {pipeline_mode = #tpu.pipeline_mode<synchronous>, transform_indices = @transform_5, window_bounds = array<i64: 32, 128>}, {pipeline_mode = #tpu.pipeline_mode<synchronous>, transform_indices = @transform_6, window_bounds = array<i64: 1, 128>}, {pipeline_mode = #tpu.pipeline_mode<synchronous>, transform_indices = @transform_7, window_bounds = array<i64: 2, 128>}]} {
    %c0_i32 = arith.constant 0 : i32
    %0 = arith.cmpi eq, %arg0, %c0_i32 : i32
    %1 = arith.extui %0 : i1 to i32
    %c0_i32_0 = arith.constant 0 : i32
    %2 = arith.cmpi ne, %1, %c0_i32_0 : i32
    scf.if %2 {
      %cst_9 = arith.constant 0.000000e+00 : f32
      %12 = vector.broadcast %cst_9 : f32 to vector<2x64xf32>
      %c0_10 = arith.constant 0 : index
      %c0_11 = arith.constant 0 : index
      %13 = vector.load %arg9[%c0_10, %c0_11] : memref<2x64xf32, #tpu.memory_space<vmem>>, vector<2x64xf32>
      tpu.vector_store %arg9[%c0_10, %c0_11], %12 {strides = array<i32>} : memref<2x64xf32, #tpu.memory_space<vmem>>, vector<2x64xf32>,
    } else {
    }
    %c0 = arith.constant 0 : index
    %c0_1 = arith.constant 0 : index
    %3 = vector.load %arg9[%c0, %c0_1] : memref<2x64xf32, #tpu.memory_space<vmem>>, vector<2x64xf32>
    %c0_2 = arith.constant 0 : index
    %c0_3 = arith.constant 0 : index
    %4 = vector.load %arg1[%c0_2, %c0_3] : memref<2x21504xf32, #tpu.memory_space<vmem>>, vector<2x21504xf32>
    %c0_4 = arith.constant 0 : index
    %c0_5 = arith.constant 0 : index
    %5 = vector.load %arg2[%c0_4, %c0_5] : memref<21504x64xf32, #tpu.memory_space<vmem>>, vector<21504x64xf32>
    %cst = arith.constant dense<0.000000e+00> : vector<2x64xf32>
    %6 = tpu.matmul %4, %5, %cst {dimension_numbers = #tpu.dot_dimension_numbers<[1], [0], [0], [1], [0, 0, 1, 1], [], []>} : vector<2x21504xf32>, vector<21504x64xf32>, vector<2x64xf32> -> vector<2x64xf32>
    %7 = arith.addf %3, %6 : vector<2x64xf32>
    %c0_6 = arith.constant 0 : index
    %c0_7 = arith.constant 0 : index
    %8 = vector.load %arg9[%c0_6, %c0_7] : memref<2x64xf32, #tpu.memory_space<vmem>>, vector<2x64xf32>
    tpu.vector_store %arg9[%c0_6, %c0_7], %7 {strides = array<i32>} : memref<2x64xf32, #tpu.memory_space<vmem>>, vector<2x64xf32>,
    %c6_i32 = arith.constant 6 : i32
    %9 = arith.cmpi eq, %arg0, %c6_i32 : i32
    %10 = arith.extui %9 : i1 to i32
    %c0_i32_8 = arith.constant 0 : i32
    %11 = arith.cmpi ne, %10, %c0_i32_8 : i32
    scf.if %11 {
      %c0_9 = arith.constant 0 : index
      %c0_10 = arith.constant 0 : index
      %12 = vector.load %arg9[%c0_9, %c0_10] : memref<2x64xf32, #tpu.memory_space<vmem>>, vector<2x64xf32>
      %c0_11 = arith.constant 0 : index
      %c0_12 = arith.constant 0 : index
      %13 = vector.load %arg3[%c0_11, %c0_12] : memref<1x64xf32, #tpu.memory_space<vmem>>, vector<1x64xf32>
      %14 = vector.broadcast %13 : vector<1x64xf32> to vector<2x64xf32>
      %15 = arith.addf %12, %14 : vector<2x64xf32>
      %cst_13 = arith.constant 0.000000e+00 : f32
      %16 = vector.broadcast %cst_13 : f32 to vector<2x64xf32>
      %17 = arith.maximumf %15, %16 : vector<2x64xf32>
      %c0_14 = arith.constant 0 : index
      %c0_15 = arith.constant 0 : index
      %18 = vector.load %arg4[%c0_14, %c0_15] : memref<64x32xf32, #tpu.memory_space<vmem>>, vector<64x32xf32>
      %cst_16 = arith.constant dense<0.000000e+00> : vector<2x32xf32>
      %19 = tpu.matmul %17, %18, %cst_16 {dimension_numbers = #tpu.dot_dimension_numbers<[1], [0], [0], [1], [0, 0, 1, 1], [], []>} : vector<2x64xf32>, vector<64x32xf32>, vector<2x32xf32> -> vector<2x32xf32>
      %c0_17 = arith.constant 0 : index
      %c0_18 = arith.constant 0 : index
      %20 = vector.load %arg5[%c0_17, %c0_18] : memref<1x32xf32, #tpu.memory_space<vmem>>, vector<1x32xf32>
      %21 = vector.broadcast %20 : vector<1x32xf32> to vector<2x32xf32>
      %22 = arith.addf %19, %21 : vector<2x32xf32>
      %cst_19 = arith.constant 0.000000e+00 : f32
      %23 = vector.broadcast %cst_19 : f32 to vector<2x32xf32>
      %24 = arith.maximumf %22, %23 : vector<2x32xf32>
      %c0_20 = arith.constant 0 : index
      %c0_21 = arith.constant 0 : index
      %25 = vector.load %arg6[%c0_20, %c0_21] : memref<32x128xf32, #tpu.memory_space<vmem>>, vector<32x128xf32>
      %cst_22 = arith.constant dense<0.000000e+00> : vector<2x128xf32>
      %26 = tpu.matmul %24, %25, %cst_22 {dimension_numbers = #tpu.dot_dimension_numbers<[1], [0], [0], [1], [0, 0, 1, 1], [], []>} : vector<2x32xf32>, vector<32x128xf32>, vector<2x128xf32> -> vector<2x128xf32>
      %c0_23 = arith.constant 0 : index
      %c0_24 = arith.constant 0 : index
      %27 = vector.load %arg7[%c0_23, %c0_24] : memref<1x128xf32, #tpu.memory_space<vmem>>, vector<1x128xf32>
      %28 = vector.broadcast %27 : vector<1x128xf32> to vector<2x128xf32>
      %29 = arith.addf %26, %28 : vector<2x128xf32>
      %c0_25 = arith.constant 0 : index
      %c0_26 = arith.constant 0 : index
      %30 = vector.load %arg8[%c0_25, %c0_26] : memref<2x128xf32, #tpu.memory_space<vmem>>, vector<2x128xf32>
      tpu.vector_store %arg8[%c0_25, %c0_26], %29 {strides = array<i32>} : memref<2x128xf32, #tpu.memory_space<vmem>>, vector<2x128xf32>,
    } else {
    }
    return
  }
  func.func @transform_0(%arg0: i32) -> (i32, i32) {
    %c0_i32 = arith.constant 0 : i32
    %c0_i32_0 = arith.constant 0 : i32
    return %c0_i32, %arg0 : i32, i32
  }
  func.func @transform_1(%arg0: i32) -> (i32, i32) {
    %c0_i32 = arith.constant 0 : i32
    %c0_i32_0 = arith.constant 0 : i32
    return %arg0, %c0_i32 : i32, i32
  }
  func.func @transform_2(%arg0: i32) -> (i32, i32) {
    %c0_i32 = arith.constant 0 : i32
    %c0_i32_0 = arith.constant 0 : i32
    %c0_i32_1 = arith.constant 0 : i32
    return %c0_i32, %c0_i32_0 : i32, i32
  }
  func.func @transform_3(%arg0: i32) -> (i32, i32) {
    %c0_i32 = arith.constant 0 : i32
    %c0_i32_0 = arith.constant 0 : i32
    %c0_i32_1 = arith.constant 0 : i32
    return %c0_i32, %c0_i32_0 : i32, i32
  }
  func.func @transform_4(%arg0: i32) -> (i32, i32) {
    %c0_i32 = arith.constant 0 : i32
    %c0_i32_0 = arith.constant 0 : i32
    %c0_i32_1 = arith.constant 0 : i32
    return %c0_i32, %c0_i32_0 : i32, i32
  }
  func.func @transform_5(%arg0: i32) -> (i32, i32) {
    %c0_i32 = arith.constant 0 : i32
    %c0_i32_0 = arith.constant 0 : i32
    %c0_i32_1 = arith.constant 0 : i32
    return %c0_i32, %c0_i32_0 : i32, i32
  }
  func.func @transform_6(%arg0: i32) -> (i32, i32) {
    %c0_i32 = arith.constant 0 : i32
    %c0_i32_0 = arith.constant 0 : i32
    %c0_i32_1 = arith.constant 0 : i32
    return %c0_i32, %c0_i32_0 : i32, i32
  }
  func.func @transform_7(%arg0: i32) -> (i32, i32) {
    %c0_i32 = arith.constant 0 : i32
    %c0_i32_0 = arith.constant 0 : i32
    %c0_i32_1 = arith.constant 0 : i32
    return %c0_i32, %c0_i32_0 : i32, i32
  }
}

</mosaic_0001>

<bundles_post_ra>
// kernel: _lambda_.1
= control target key start
LH: loop header
LB: loop body
LE: loop exit
PB: predicated region body
PF: predicated region fallthrough
CT: control target
= control target key end

     0   :  { %12 = vsyncpa [#allocation4], 0  ;;  %s19570_s0 = inlined_call_operand.vmem [shape: f32[2,150528], index: 0, kind: input, shape index: {}]   ;;  %s19571_s1 = inlined_call_operand.hbm [shape: f32[150528,64], index: 1, kind: input, shape index: {}]   ;;  %s19572_s2 = inlined_call_operand.vmem [shape: f32[1,64], index: 2, kind: input, shape index: {}]   ;;  %s19573_s3 = inlined_call_operand.vmem [shape: f32[64,32], index: 3, kind: input, shape index: {}]   ;;  %s19574_s4 = inlined_call_operand.vmem [shape: f32[1,32], index: 4, kind: input, shape index: {}]   ;;  %s19575_s5 = inlined_call_operand.vmem [shape: f32[32,128], index: 5, kind: input, shape index: {}]   ;;  %s19576_s6 = inlined_call_operand.vmem [shape: f32[1,128], index: 6, kind: input, shape index: {}]   ;;  %s19577_s7 = inlined_call_operand.hbm [shape: f32[2,128], index: 7, kind: output, shape index: {}]  }
   0x1   :  { %14 = vsyncpa [#allocation4 + $0x1], 0 }
   0x2   :  { %15 = vsyncpa [#allocation5], 0  ;;  %s16061_s24 = smov 0   ;;  %s16063_s25 = smov 0  }
   0x3   :  { %s16065_s26 = smov 0   ;;  %s16067_s27 = smov 0  }
   0x4 LB: > { %s16080_s28 = sadd.s32 4294967295, %s16010_s27   ;;  %s16083_s29 = sadd.s32 1, %s16010_s27   ;;  %s16010_s27 = sphi %s16067_s27, %s19584_s27   ;;  %s16006_s26 = sphi %s16065_s26, %s19583_s26   ;;  %s16002_s25 = sphi %s16063_s25, %s19582_s25   ;;  %s15998_s24 = sphi %s16061_s24, %s19581_s24  }
   0x5   : > { %s51_s30 = ssub.s32 %s16010_s27, %s16083_s29  ;;  %s54_s8 = sadd.s32 1, %s16006_s26 }
   0x6   : > { %p52_p0 = scmp.eq.s32.totalorder %s51_s30, 0  ;;  %p61_p1 = scmp.ne.s32.totalorder %s16006_s26, %s16002_s25 }
   0x7   : > { %p62_p2 = scmp.eq.s32.totalorder %s16010_s27, 0  ;;  %p67_p3 = scmp.ne.s32.totalorder %s16002_s25, %s15998_s24 }
   0x8   : > { %s16093_s9 = scalar_select %p52_p0, %s16006_s26, %s54_s8  }
   0x9   : > { %p63_p4 = por %p62_p2, %p61_p1  ;;  %p68_p5 = scmp.eq.s32.totalorder %s16080_s28, 0 }
   0xa   : > { %p15831_p6 = scmp.lt.s32.totalorder %s16010_s27, 7  ;;  %s241_s11 = sand.u32 1, %s16006_s26  }
   0xb   : > { %p16097_p7 = por %p68_p5, %p67_p3  ;;  %s15819_s12 = smul.u32 21504, %s241_s11 }
   0xc   : > { %s10128_s13 = smul.u32 344064, %s16010_s27  ;;  %p16103_p8 = pnand %p15831_p6, %p63_p4 }
   0xd   : > { %s245_s18 = scalar_lea.vmem [#allocation3], %s15819_s12  ;;  %s16115_s20 = scalar_lea.sflag [#allocation4], %s241_s11 }
   0xe   : > { %s16110_s17 = scalar_lea.hbm %s19571_s1, %s10128_s13  ;;  %s252_s19 = sshll.u32 %s245_s18, 4  ;;  %s16112_s19 = int_to_ptr.vmem [resolvable:$true] %s252_s19 }
   0xf   : > { %s15916_s21 = scalar_lea.hbm %s16110_s17, 344064  ;;  %p15918_p11 = pneg %p16103_p8 }
  0x10   : > { %p15917_p10 = scmp.ne.s32.totalorder %s16110_s17, %s15916_s21  ;;  %s15921_s24 = scalar_lea.hbm %s19571_s1, 2408448 }
  0x11   : > { %p15922_p0 = scmp.lt.u32.totalorder %s16110_s17, %s19571_s1  ;;  %p15923_p1 = scmp.lt.u32.totalorder %s15921_s24, %s15916_s21 }
  0x12   : > { %p15919_p12 = pnand %p15918_p11, %p15917_p10  ;;  %p15925_p3 = scmp.lt.u32.totalorder %s15916_s21, %s16110_s17 }
  0x13   : > { %p15924_p2 = por %p15923_p1, %p15922_p0 }
  0x14   : > { %p15920_p13 = pneg %p15919_p12 }
  0x15   : > { %p15926_p4 = por %p15925_p3, %p15924_p2 }
  0x17   : > { %p15927_p5 = pnand %p15926_p4, %p15920_p13 }
  0x19   : > { %15930 = shalt.err (!%p15927_p5)
}
  0x1a   : > { %s15931_s11 = scalar_lea.vmem %s16112_s19, 344064  ;;  %s16012_s12 = smov [#allocation3]  }
  0x1b   : > { %p15932_p6 = scmp.ne.s32.totalorder %s16112_s19, %s15931_s11  ;;  %s15936_s13 = sshll.u32 %s16012_s12, 4  ;;  %s15937_s13 = int_to_ptr.vmem [resolvable:$false] %s15936_s13 }
  0x1c   : > { %s15938_s15 = scalar_lea.vmem %s15937_s13, 688128  ;;  %p15939_p9 = scmp.lt.s32.totalorder %s16112_s19, %s15937_s13 }
  0x1d   : > { %p15934_p10 = pnand %p15932_p6, %p15918_p11  ;;  %p15940_p0 = scmp.lt.s32.totalorder %s15938_s15, %s15931_s11 }
  0x1f   : > { %p15935_p12 = pneg %p15934_p10  ;;  %p15941_p1 = por %p15940_p0, %p15939_p9 }
  0x21   : > { %p15942_p2 = pnand %p15941_p1, %p15935_p12 }
  0x23   : > { %15945 = shalt.err (!%p15942_p2)
}
  0x24   : > { %s16013_s16 = smov 128   ;;  %s16014_s18 = smov 8  }
  0x25   : > { %15830 = dma.hbm_to_vmem [thread:$0]  (!%p16103_p8), %s16110_s17, 344064, %s16112_s19, %s16115_s20, %s16013_s16, %s16013_s16, %s16014_s18  }
  0x26   : > { %p260_p11 = scmp.lt.s32.totalorder %s16010_s27, 8  ;;  %p19580_p13 = scmp.ge.s32.totalorder %s16010_s27, 1 }
  0x28   : > { %p261_p3 = pnand %p19580_p13, %p260_p11 }
  0x29   : > { %s266_s21 = sand.u32 (!%p261_p3), 1, %s16002_s25  }
  0x2a   : > { %264 = sbr.rel (%p261_p3) target bundleno = 2096 (0x830), region = 48  ;;  %s267_s23 = scalar_lea.sflag (!%p261_p3), [#allocation4], %s266_s21 }
  0x2b   : > { %s15820_s22 = smul.u32 (!%p261_p3), 21504, %s266_s21 }
  0x2d   : > { %s16147_s24 = scalar_lea.vmem (!%p261_p3), [#allocation3], %s15820_s22 }
  0x31   : > { %15989 = dma.done.wait (%p16097_p7), %s267_s23, 344064  }
  0x32   : > { %15991 = vsyncadd (%p16097_p7), %s267_s23, 4294623232  ;;  %s301_s30 = smul.u32 168, %s16080_s28  ;;  %p10117_p8 = scmp.ne.s32.totalorder %s16080_s28, 0 }
  0x33   : > { %vm312_vm0 = vcmask (!%p10117_p8), 517120   ;;  %v16015_v0 = vmov (!%p10117_p8), 0.0  }
  0x34   : > { %p302_p9 = scmp.lt.s32.totalorder %s301_s30, 1175  ;;  %311 = sbr.rel (%p10117_p8) target bundleno = 59 (0x3b), region = 56  ;;  %313 = vst.msk [vmem:[#allocation2] sm:$0x3] (!%p10117_p8), %vm312_vm0, %v16015_v0 }
  0x36   : > { %s19586_s30 = smov (!%p302_p9, %s301_s30), 1175 }
  0x37   : > { %s10116_s14 = sshll.u32 %s19586_s30, 1 }
  0x38   : > { %s16157_s19 = scalar_lea.vmem %s19570_s0, %s10116_s14 }
  0x3b PF: > { %v373_v1 = vld [vmem:[%s16147_s24 + $0x80] sm:$0xff]  ;;  %v374_v2 = vld [vmem:[%s16147_s24 + $0x88] sm:$0xff]  ;;  %v375_v12 = vld [vmem:[%s16147_s24 + $0x90] sm:$0xff]  ;;  %v16016_v48 = vmov 1983009808   ;;  %v3091_v50 = vlaneseq  ;;  %vm9850_vm1 = vcmask 517120  }
  0x3c   : > { %v405_v3 = vld [vmem:[%s16147_s24 + $0x180] sm:$0xff]  ;;  %v13113_v4 = vpack.c.bf16 %v374_v2, %v373_v1  ;;  %v406_v5 = vld [vmem:[%s16147_s24 + $0x188] sm:$0xff]  ;;  %v376_v14 = vld [vmem:[%s16147_s24 + $0x98] sm:$0xff]  ;;  %v3089_v49 = vunpack.c.l.s4 %v16016_v48  ;;  %p10118_p7 = scmp.ne.s32.totalorder %s16080_s28, 6 }
  0x3d   : > { %v357_v6 = vld [vmem:[%s16147_s24] sm:$0xff]  ;;  %v358_v7 = vld [vmem:[%s16147_s24 + $0x8] sm:$0xff]  ;;  %v13145_v8 = vpack.c.bf16 %v406_v5, %v405_v3  ;;  %v407_v15 = vld [vmem:[%s16147_s24 + $0x190] sm:$0xff]  ;;  %v13117_v17 = vpack.c.bf16 %v376_v14, %v375_v12  ;;  %v3092_v1 = vshrl.u32 %v3091_v50, 7  ;;  %vm16018_vm2 = vmmov (!%p10118_p7), 0  }
  0x3e   : > { %v13115_v9 = vpack.c.bf16 %v358_v7, %v357_v6  ;;  %v389_v10 = vld [vmem:[%s16147_s24 + $0x100] sm:$0xff]  ;;  %v390_v11 = vld [vmem:[%s16147_s24 + $0x108] sm:$0xff]  ;;  %13114 = vmatprep.subr.bf16.mxu0 %v13113_v4  ;;  %v408_v16 = vld [vmem:[%s16147_s24 + $0x198] sm:$0xff]  ;;  %v3090_v0 = vunpack.c.0.s8 %v3089_v49  ;;  %vm9881_vm3 = vcmask (!%p10118_p7), 523264   ;;  %vm9967_vm4 = vcmask (!%p10118_p7), 261120  }
  0x3f   : > { %v13147_v13 = vpack.c.bf16 %v390_v11, %v389_v10  ;;  %13146 = vmatprep.subr.bf16.mxu1 %v13145_v8  ;;  %v13149_v18 = vpack.c.bf16 %v408_v16, %v407_v15  ;;  %v359_v19 = vld [vmem:[%s16147_s24 + $0x10] sm:$0xff]  ;;  %v360_v20 = vld [vmem:[%s16147_s24 + $0x18] sm:$0xff]  ;;  %v377_v24 = vld [vmem:[%s16147_s24 + $0xa0] sm:$0xff] }
  0x40   : > { %13116 = vmatpush3.bf16.msra.mxu0 %v13115_v9  ;;  %v391_v21 = vld [vmem:[%s16147_s24 + $0x110] sm:$0xff]  ;;  %v13119_v22 = vpack.c.bf16 %v360_v20, %v359_v19  ;;  %v392_v23 = vld [vmem:[%s16147_s24 + $0x118] sm:$0xff]  ;;  %v378_v25 = vld [vmem:[%s16147_s24 + $0xa8] sm:$0xff]  ;;  %v16210_v14 = vsub.s32 %v3090_v0, %v3092_v1 }
  0x41   : > { %13148 = vmatpush3.bf16.msra.mxu1 %v13147_v13  ;;  %13118 = vmatprep.subr.bf16.mxu0 %v13117_v17  ;;  %v13151_v26 = vpack.c.bf16 %v392_v23, %v391_v21  ;;  %v13121_v27 = vpack.c.bf16 %v378_v25, %v377_v24  ;;  %v409_v28 = vld [vmem:[%s16147_s24 + $0x1a0] sm:$0xff]  ;;  %v410_v29 = vld [vmem:[%s16147_s24 + $0x1a8] sm:$0xff]  ;;  %v379_v36 = vld [vmem:[%s16147_s24 + $0xb0] sm:$0xff] }
  0x42   : > { %13150 = vmatprep.subr.bf16.mxu1 %v13149_v18  ;;  %v361_v30 = vld [vmem:[%s16147_s24 + $0x20] sm:$0xff]  ;;  %v13153_v31 = vpack.c.bf16 %v410_v29, %v409_v28  ;;  %v362_v32 = vld [vmem:[%s16147_s24 + $0x28] sm:$0xff]  ;;  %v380_v37 = vld [vmem:[%s16147_s24 + $0xb8] sm:$0xff] }
  0x43   : > { %v393_v33 = vld [vmem:[%s16147_s24 + $0x120] sm:$0xff]  ;;  %v394_v34 = vld [vmem:[%s16147_s24 + $0x128] sm:$0xff]  ;;  %v13123_v35 = vpack.c.bf16 %v362_v32, %v361_v30  ;;  %v411_v38 = vld [vmem:[%s16147_s24 + $0x1b0] sm:$0xff]  ;;  %v13125_v40 = vpack.c.bf16 %v380_v37, %v379_v36 }
  0x44   : > { %13120 = vmatpush3.bf16.msra.mxu0 %v13119_v22  ;;  %v13155_v39 = vpack.c.bf16 %v394_v34, %v393_v33  ;;  %v412_v41 = vld [vmem:[%s16147_s24 + $0x1b8] sm:$0xff]  ;;  %v363_v42 = vld [vmem:[%s16147_s24 + $0x30] sm:$0xff]  ;;  %v381_v47 = vld [vmem:[%s16147_s24 + $0xc0] sm:$0xff] }
  0x45   : > { %13152 = vmatpush3.bf16.msra.mxu1 %v13151_v26  ;;  %13122 = vmatprep.subr.bf16.mxu0 %v13121_v27  ;;  %v364_v43 = vld [vmem:[%s16147_s24 + $0x38] sm:$0xff]  ;;  %v13157_v44 = vpack.c.bf16 %v412_v41, %v411_v38  ;;  %v395_v45 = vld [vmem:[%s16147_s24 + $0x130] sm:$0xff]  ;;  %v382_v51 = vld [vmem:[%s16147_s24 + $0xc8] sm:$0xff] }
  0x46   : > { %13154 = vmatprep.subr.bf16.mxu1 %v13153_v31  ;;  %v396_v46 = vld [vmem:[%s16147_s24 + $0x138] sm:$0xff]  ;;  %v413_v52 = vld [vmem:[%s16147_s24 + $0x1c0] sm:$0xff]  ;;  %v414_v53 = vld [vmem:[%s16147_s24 + $0x1c8] sm:$0xff]  ;;  %v13127_v54 = vpack.c.bf16 %v364_v43, %v363_v42  ;;  %v13129_v56 = vpack.c.bf16 %v382_v51, %v381_v47 }
  0x47   : > { %v13159_v55 = vpack.c.bf16 %v396_v46, %v395_v45  ;;  %v365_v57 = vld [vmem:[%s16147_s24 + $0x40] sm:$0xff]  ;;  %v366_v58 = vld [vmem:[%s16147_s24 + $0x48] sm:$0xff]  ;;  %v13161_v60 = vpack.c.bf16 %v414_v53, %v413_v52  ;;  %v383_v62 = vld [vmem:[%s16147_s24 + $0xd0] sm:$0xff] }
  0x48   : > { %13124 = vmatpush3.bf16.msra.mxu0 %v13123_v35  ;;  %v397_v59 = vld [vmem:[%s16147_s24 + $0x140] sm:$0xff]  ;;  %v398_v61 = vld [vmem:[%s16147_s24 + $0x148] sm:$0xff]  ;;  %v384_v63 = vld [vmem:[%s16147_s24 + $0xd8] sm:$0xff]  ;;  %v13131_v4 = vpack.c.bf16 %v366_v58, %v365_v57 }
  0x49   : > { %13156 = vmatpush3.bf16.msra.mxu1 %v13155_v39  ;;  %13126 = vmatprep.subr.bf16.mxu0 %v13125_v40  ;;  %v415_v2 = vld [vmem:[%s16147_s24 + $0x1d0] sm:$0xff]  ;;  %v416_v3 = vld [vmem:[%s16147_s24 + $0x1d8] sm:$0xff]  ;;  %v13163_v5 = vpack.c.bf16 %v398_v61, %v397_v59  ;;  %v13133_v6 = vpack.c.bf16 %v384_v63, %v383_v62  ;;  %v385_v12 = vld [vmem:[%s16147_s24 + $0xe0] sm:$0xff] }
  0x4a   : > { %13158 = vmatprep.subr.bf16.mxu1 %v13157_v44  ;;  %v367_v7 = vld [vmem:[%s16147_s24 + $0x50] sm:$0xff]  ;;  %v368_v8 = vld [vmem:[%s16147_s24 + $0x58] sm:$0xff]  ;;  %v13165_v10 = vpack.c.bf16 %v416_v3, %v415_v2  ;;  %v386_v13 = vld [vmem:[%s16147_s24 + $0xe8] sm:$0xff] }
  0x4b   : > { %v399_v9 = vld [vmem:[%s16147_s24 + $0x150] sm:$0xff]  ;;  %v400_v11 = vld [vmem:[%s16147_s24 + $0x158] sm:$0xff]  ;;  %v417_v15 = vld [vmem:[%s16147_s24 + $0x1e0] sm:$0xff]  ;;  %v13135_v17 = vpack.c.bf16 %v368_v8, %v367_v7  ;;  %v13137_v20 = vpack.c.bf16 %v386_v13, %v385_v12 }
  0x4c   : > { %13128 = vmatpush3.bf16.msra.mxu0 %v13127_v54  ;;  %v418_v16 = vld [vmem:[%s16147_s24 + $0x1e8] sm:$0xff]  ;;  %v369_v18 = vld [vmem:[%s16147_s24 + $0x60] sm:$0xff]  ;;  %v13167_v19 = vpack.c.bf16 %v400_v11, %v399_v9  ;;  %v387_v26 = vld [vmem:[%s16147_s24 + $0xf0] sm:$0xff] }
  0x4d   : > { %13160 = vmatpush3.bf16.msra.mxu1 %v13159_v55  ;;  %13130 = vmatprep.subr.bf16.mxu0 %v13129_v56  ;;  %v370_v21 = vld [vmem:[%s16147_s24 + $0x68] sm:$0xff]  ;;  %v401_v22 = vld [vmem:[%s16147_s24 + $0x160] sm:$0xff]  ;;  %v13169_v24 = vpack.c.bf16 %v418_v16, %v417_v15  ;;  %v388_v27 = vld [vmem:[%s16147_s24 + $0xf8] sm:$0xff] }
  0x4e   : > { %13162 = vmatprep.subr.bf16.mxu1 %v13161_v60  ;;  %v315_v23 = vld [vmem:[%s16157_s19] sm:$0xff]  ;;  %v402_v25 = vld [vmem:[%s16147_s24 + $0x168] sm:$0xff]  ;;  %v419_v30 = vld [vmem:[%s16147_s24 + $0x1f0] sm:$0xff]  ;;  %v13139_v32 = vpack.c.bf16 %v370_v21, %v369_v18  ;;  %v13141_v36 = vpack.c.bf16 %v388_v27, %v387_v26 }
  0x4f   : > { %v3094_v28 = vrot.slane %v315_v23, %v16210_v14  ;;  %v3087_v29 = vcombine.high %v315_v23, %v315_v23  ;;  %v420_v31 = vld [vmem:[%s16147_s24 + $0x1f8] sm:$0xff]  ;;  %v13171_v35 = vpack.c.bf16 %v402_v25, %v401_v22  ;;  %v371_v37 = vld [vmem:[%s16147_s24 + $0x70] sm:$0xff]  ;;  %v437_v43 = vld [vmem:[%s16147_s24 + $0x280] sm:$0xff] }
  0x50   : > { %13132 = vmatpush3.bf16.msra.mxu0 %v13131_v4  ;;  %v372_v38 = vld [vmem:[%s16147_s24 + $0x78] sm:$0xff]  ;;  %v403_v39 = vld [vmem:[%s16147_s24 + $0x170] sm:$0xff]  ;;  %v13173_v40 = vpack.c.bf16 %v420_v31, %v419_v30  ;;  %v438_v44 = vld [vmem:[%s16147_s24 + $0x288] sm:$0xff] }
  0x51   : > { %13164 = vmatpush3.bf16.msra.mxu1 %v13163_v5  ;;  %13134 = vmatprep.subr.bf16.mxu0 %v13133_v6  ;;  %v3102_v33 = vcombine.high %v3094_v28, %v3094_v28  ;;  %v3101_v34 = vrot.slane %v3087_v29, %v16210_v14  ;;  %v404_v41 = vld [vmem:[%s16147_s24 + $0x178] sm:$0xff]  ;;  %v469_v45 = vld [vmem:[%s16147_s24 + $0x380] sm:$0xff]  ;;  %v470_v46 = vld [vmem:[%s16147_s24 + $0x388] sm:$0xff]  ;;  %v13143_v47 = vpack.c.bf16 %v372_v38, %v371_v37 }
  0x52   : > { %13166 = vmatprep.subr.bf16.mxu1 %v13165_v10  ;;  %v13175_v48 = vpack.c.bf16 %v404_v41, %v403_v39  ;;  %v13177_v49 = vpack.c.bf16 %v438_v44, %v437_v43  ;;  %v421_v50 = vld [vmem:[%s16147_s24 + $0x200] sm:$0xff]  ;;  %v422_v51 = vld [vmem:[%s16147_s24 + $0x208] sm:$0xff]  ;;  %v13209_v53 = vpack.c.bf16 %v470_v46, %v469_v45  ;;  %v439_v55 = vld [vmem:[%s16147_s24 + $0x290] sm:$0xff] }
  0x53   : > { %4033 = vmatprep.mubr.f32.mxu0 %v3102_v33  ;;  %v3103_v42 = vcombine.high %v3101_v34, %v3101_v34  ;;  %v453_v52 = vld [vmem:[%s16147_s24 + $0x300] sm:$0xff]  ;;  %v454_v54 = vld [vmem:[%s16147_s24 + $0x308] sm:$0xff]  ;;  %v440_v56 = vld [vmem:[%s16147_s24 + $0x298] sm:$0xff]  ;;  %v13179_v59 = vpack.c.bf16 %v422_v51, %v421_v50 }
  0x54   : > { %13136 = vmatpush3.bf16.msra.mxu0 %v13135_v17  ;;  %v471_v57 = vld [vmem:[%s16147_s24 + $0x390] sm:$0xff]  ;;  %v472_v58 = vld [vmem:[%s16147_s24 + $0x398] sm:$0xff]  ;;  %v13211_v60 = vpack.c.bf16 %v454_v54, %v453_v52  ;;  %v13181_v61 = vpack.c.bf16 %v440_v56, %v439_v55  ;;  %v441_v3 = vld [vmem:[%s16147_s24 + $0x2a0] sm:$0xff] }
  0x55   : > { %13168 = vmatpush3.bf16.msra.mxu1 %v13167_v19  ;;  %13138 = vmatprep.subr.bf16.mxu0 %v13137_v20  ;;  %v423_v62 = vld [vmem:[%s16147_s24 + $0x210] sm:$0xff]  ;;  %v424_v63 = vld [vmem:[%s16147_s24 + $0x218] sm:$0xff]  ;;  %v13213_v1 = vpack.c.bf16 %v472_v58, %v471_v57  ;;  %v442_v4 = vld [vmem:[%s16147_s24 + $0x2a8] sm:$0xff] }
  0x56   : > { %13170 = vmatprep.subr.bf16.mxu1 %v13169_v24  ;;  %4103 = vmatprep.mubr.f32.mxu1 %v3103_v42  ;;  %v455_v0 = vld [vmem:[%s16147_s24 + $0x310] sm:$0xff]  ;;  %v456_v2 = vld [vmem:[%s16147_s24 + $0x318] sm:$0xff]  ;;  %v473_v5 = vld [vmem:[%s16147_s24 + $0x3a0] sm:$0xff]  ;;  %v13183_v7 = vpack.c.bf16 %v424_v63, %v423_v62  ;;  %v13185_v9 = vpack.c.bf16 %v442_v4, %v441_v3 }
  0x57   : > { %v474_v6 = vld [vmem:[%s16147_s24 + $0x3a8] sm:$0xff]  ;;  %v13215_v8 = vpack.c.bf16 %v456_v2, %v455_v0  ;;  %v425_v10 = vld [vmem:[%s16147_s24 + $0x220] sm:$0xff]  ;;  %v443_v16 = vld [vmem:[%s16147_s24 + $0x2b0] sm:$0xff] }
  0x58   : > { %13140 = vmatpush3.bf16.msra.mxu0 %v13139_v32  ;;  %v426_v11 = vld [vmem:[%s16147_s24 + $0x228] sm:$0xff]  ;;  %v457_v12 = vld [vmem:[%s16147_s24 + $0x320] sm:$0xff]  ;;  %v13217_v13 = vpack.c.bf16 %v474_v6, %v473_v5  ;;  %v444_v17 = vld [vmem:[%s16147_s24 + $0x2b8] sm:$0xff] }
  0x59   : > { %13172 = vmatpush3.bf16.msra.mxu1 %v13171_v35  ;;  %13142 = vmatprep.subr.bf16.mxu0 %v13141_v36  ;;  %v458_v15 = vld [vmem:[%s16147_s24 + $0x328] sm:$0xff]  ;;  %v475_v18 = vld [vmem:[%s16147_s24 + $0x3b0] sm:$0xff]  ;;  %v476_v19 = vld [vmem:[%s16147_s24 + $0x3b8] sm:$0xff]  ;;  %v13187_v20 = vpack.c.bf16 %v426_v11, %v425_v10  ;;  %v13189_v22 = vpack.c.bf16 %v444_v17, %v443_v16 }
  0x5a   : > { %13174 = vmatprep.subr.bf16.mxu1 %v13173_v40  ;;  %v13219_v21 = vpack.c.bf16 %v458_v15, %v457_v12  ;;  %v427_v23 = vld [vmem:[%s16147_s24 + $0x230] sm:$0xff]  ;;  %v428_v24 = vld [vmem:[%s16147_s24 + $0x238] sm:$0xff]  ;;  %v13221_v26 = vpack.c.bf16 %v476_v19, %v475_v18  ;;  %v446_v29 = vld [vmem:[%s16147_s24 + $0x2c8] sm:$0xff] }
  0x5b   : > { %v459_v25 = vld [vmem:[%s16147_s24 + $0x330] sm:$0xff]  ;;  %v460_v27 = vld [vmem:[%s16147_s24 + $0x338] sm:$0xff]  ;;  %v477_v30 = vld [vmem:[%s16147_s24 + $0x3c0] sm:$0xff]  ;;  %v13191_v33 = vpack.c.bf16 %v428_v24, %v427_v23 }
  0x5c   : > { %13144 = vmatpush3.bf16.msra.mxu0 %v13143_v47  ;;  %v478_v31 = vld [vmem:[%s16147_s24 + $0x3c8] sm:$0xff]  ;;  %v13223_v36 = vpack.c.bf16 %v460_v27, %v459_v25  ;;  %v429_v38 = vld [vmem:[%s16147_s24 + $0x240] sm:$0xff]  ;;  %v447_v43 = vld [vmem:[%s16147_s24 + $0x2d0] sm:$0xff] }
  0x5d   : > { %13176 = vmatpush3.bf16.msra.mxu1 %v13175_v48  ;;  %13178 = vmatprep.subr.bf16.mxu0 %v13177_v49  ;;  %v316_v32 = vld [vmem:[%s16157_s19 + $0x8] sm:$0xff]  ;;  %v13225_v41 = vpack.c.bf16 %v478_v31, %v477_v30  ;;  %v448_v44 = vld [vmem:[%s16147_s24 + $0x2d8] sm:$0xff]  ;;  %v479_v47 = vld [vmem:[%s16147_s24 + $0x3d0] sm:$0xff] }
  0x5e   : > { %13210 = vmatprep.subr.bf16.mxu1 %v13209_v53  ;;  %v3104_v35 = vcombine.high %v316_v32, %v316_v32  ;;  %v430_v39 = vld [vmem:[%s16147_s24 + $0x248] sm:$0xff]  ;;  %v461_v40 = vld [vmem:[%s16147_s24 + $0x340] sm:$0xff]  ;;  %v480_v48 = vld [vmem:[%s16147_s24 + $0x3d8] sm:$0xff]  ;;  %v13197_v52 = vpack.c.bf16 %v448_v44, %v447_v43 }
  0x5f   : > { %4034 = vmatmul.mubr.f32.vlgmr.msra.gmra.mrb[0].mxu0 %v3094_v28  ;;  %v445_v28 = vld [vmem:[%s16147_s24 + $0x2c0] sm:$0xff]  ;;  %v462_v42 = vld [vmem:[%s16147_s24 + $0x348] sm:$0xff]  ;;  %v13195_v49 = vpack.c.bf16 %v430_v39, %v429_v38  ;;  %v431_v53 = vld [vmem:[%s16147_s24 + $0x250] sm:$0xff]  ;;  %v13229_v56 = vpack.c.bf16 %v480_v48, %v479_v47 }
  0x60   : > { %4104 = vmatmul.mubr.f32.vlgmr.msra.gmra.mrb[0].mxu1 %v3101_v34  ;;  %13180 = vmatpush3.bf16.msra.mxu0 %v13179_v59  ;;  %v16267_v34 = vrot.slane %v316_v32, %v16210_v14  ;;  %v13193_v37 = vpack.c.bf16 %v446_v29, %v445_v28  ;;  %v16278_v46 = vrot.slane %v3104_v35, %v16210_v14  ;;  %v432_v54 = vld [vmem:[%s16147_s24 + $0x258] sm:$0xff]  ;;  %v463_v55 = vld [vmem:[%s16147_s24 + $0x350] sm:$0xff]  ;;  %v449_v58 = vld [vmem:[%s16147_s24 + $0x2e0] sm:$0xff] }
  0x61   : > { %13212 = vmatpush3.bf16.msra.mxu1 %v13211_v60  ;;  %13182 = vmatprep.subr.bf16.mxu0 %v13181_v61  ;;  %v13227_v51 = vpack.c.bf16 %v462_v42, %v461_v40  ;;  %v464_v57 = vld [vmem:[%s16147_s24 + $0x358] sm:$0xff]  ;;  %v450_v59 = vld [vmem:[%s16147_s24 + $0x2e8] sm:$0xff]  ;;  %v481_v60 = vld [vmem:[%s16147_s24 + $0x3e0] sm:$0xff]  ;;  %v13199_v62 = vpack.c.bf16 %v432_v54, %v431_v53 }
  0x62   : > { %13214 = vmatprep.subr.bf16.mxu1 %v13213_v1  ;;  %v3119_v45 = vcombine.high %v16267_v34, %v16267_v34  ;;  %v3120_v50 = vcombine.high %v16278_v46, %v16278_v46  ;;  %v482_v61 = vld [vmem:[%s16147_s24 + $0x3e8] sm:$0xff]  ;;  %v13231_v63 = vpack.c.bf16 %v464_v57, %v463_v55  ;;  %v13201_v0 = vpack.c.bf16 %v450_v59, %v449_v58  ;;  %v433_v1 = vld [vmem:[%s16147_s24 + $0x260] sm:$0xff]  ;;  %v451_v6 = vld [vmem:[%s16147_s24 + $0x2f0] sm:$0xff] }
  0x63   : > { %v434_v2 = vld [vmem:[%s16147_s24 + $0x268] sm:$0xff]  ;;  %v465_v3 = vld [vmem:[%s16147_s24 + $0x360] sm:$0xff]  ;;  %v13233_v4 = vpack.c.bf16 %v482_v61, %v481_v60  ;;  %v436_v15 = vld [vmem:[%s16147_s24 + $0x278] sm:$0xff] }
  0x64   : > { %13184 = vmatpush3.bf16.msra.mxu0 %v13183_v7  ;;  %4173 = vmatprep.mubr.f32.mxu0 %v3119_v45  ;;  %v466_v5 = vld [vmem:[%s16147_s24 + $0x368] sm:$0xff]  ;;  %v452_v7 = vld [vmem:[%s16147_s24 + $0x2f8] sm:$0xff]  ;;  %v13203_v10 = vpack.c.bf16 %v434_v2, %v433_v1  ;;  %v467_v16 = vld [vmem:[%s16147_s24 + $0x370] sm:$0xff] }
  0x65   : > { %13216 = vmatpush3.bf16.msra.mxu1 %v13215_v8  ;;  %13186 = vmatprep.subr.bf16.mxu0 %v13185_v9  ;;  %v483_v8 = vld [vmem:[%s16147_s24 + $0x3f0] sm:$0xff]  ;;  %v484_v9 = vld [vmem:[%s16147_s24 + $0x3f8] sm:$0xff]  ;;  %v13235_v11 = vpack.c.bf16 %v466_v5, %v465_v3  ;;  %v13205_v12 = vpack.c.bf16 %v452_v7, %v451_v6  ;;  %v501_v19 = vld [vmem:[%s16147_s24 + $0x480] sm:$0xff] }
  0x66   : > { %13218 = vmatprep.subr.bf16.mxu1 %v13217_v13  ;;  %4243 = vmatprep.mubr.f32.mxu1 %v3120_v50  ;;  %v435_v13 = vld [vmem:[%s16147_s24 + $0x270] sm:$0xff]  ;;  %v13237_v17 = vpack.c.bf16 %v484_v9, %v483_v8  ;;  %v468_v18 = vld [vmem:[%s16147_s24 + $0x378] sm:$0xff]  ;;  %v485_v24 = vld [vmem:[%s16147_s24 + $0x400] sm:$0xff] }
  0x67   : > { %v13207_v23 = vpack.c.bf16 %v436_v15, %v435_v13  ;;  %v13239_v25 = vpack.c.bf16 %v468_v18, %v467_v16  ;;  %v486_v27 = vld [vmem:[%s16147_s24 + $0x408] sm:$0xff]  ;;  %v517_v28 = vld [vmem:[%s16147_s24 + $0x500] sm:$0xff]  ;;  %v503_v31 = vld [vmem:[%s16147_s24 + $0x490] sm:$0xff] }
  0x68   : > { %13188 = vmatpush3.bf16.msra.mxu0 %v13187_v20  ;;  %v502_v20 = vld [vmem:[%s16147_s24 + $0x488] sm:$0xff]  ;;  %v504_v32 = vld [vmem:[%s16147_s24 + $0x498] sm:$0xff]  ;;  %v487_v40 = vld [vmem:[%s16147_s24 + $0x410] sm:$0xff] }
  0x69   : > { %13220 = vmatpush3.bf16.msra.mxu1 %v13219_v21  ;;  %13190 = vmatprep.subr.bf16.mxu0 %v13189_v22  ;;  %v533_v21 = vld [vmem:[%s16147_s24 + $0x580] sm:$0xff]  ;;  %v534_v22 = vld [vmem:[%s16147_s24 + $0x588] sm:$0xff]  ;;  %v536_v35 = vld [vmem:[%s16147_s24 + $0x598] sm:$0xff]  ;;  %v13245_v39 = vpack.c.bf16 %v504_v32, %v503_v31 }
  0x6a   : > { %13222 = vmatprep.subr.bf16.mxu1 %v13221_v26  ;;  %v13241_v26 = vpack.c.bf16 %v502_v20, %v501_v19  ;;  %v518_v29 = vld [vmem:[%s16147_s24 + $0x508] sm:$0xff]  ;;  %v13273_v30 = vpack.c.bf16 %v534_v22, %v533_v21  ;;  %v519_v42 = vld [vmem:[%s16147_s24 + $0x510] sm:$0xff]  ;;  %v520_v47 = vld [vmem:[%s16147_s24 + $0x518] sm:$0xff] }
  0x6b   : > { %v317_v38 = vld [vmem:[%s16157_s19 + $0x10] sm:$0xff]  ;;  %v505_v48 = vld [vmem:[%s16147_s24 + $0x4a0] sm:$0xff]  ;;  %v492_v5 = vld [vmem:[%s16147_s24 + $0x438] sm:$0xff] }
  0x6c   : > { %13192 = vmatpush3.bf16.msra.mxu0 %v13191_v33  ;;  %v535_v33 = vld [vmem:[%s16147_s24 + $0x590] sm:$0xff]  ;;  %v16321_v43 = vrot.slane %v317_v38, %v16210_v14  ;;  %v3121_v44 = vcombine.high %v317_v38, %v317_v38  ;;  %v537_v50 = vld [vmem:[%s16147_s24 + $0x5a0] sm:$0xff]  ;;  %v490_v57 = vld [vmem:[%s16147_s24 + $0x428] sm:$0xff] }
  0x6d   : > { %13224 = vmatpush3.bf16.msra.mxu1 %v13223_v36  ;;  %13194 = vmatprep.subr.bf16.mxu0 %v13193_v37  ;;  %v13243_v36 = vpack.c.bf16 %v486_v27, %v485_v24  ;;  %v13275_v37 = vpack.c.bf16 %v518_v29, %v517_v28  ;;  %v13277_v45 = vpack.c.bf16 %v536_v35, %v535_v33  ;;  %v521_v58 = vld [vmem:[%s16147_s24 + $0x520] sm:$0xff]  ;;  %v522_v61 = vld [vmem:[%s16147_s24 + $0x528] sm:$0xff]  ;;  %v523_v6 = vld [vmem:[%s16147_s24 + $0x530] sm:$0xff] }
  0x6e   : > { %13226 = vmatprep.subr.bf16.mxu1 %v13225_v41  ;;  %v488_v41 = vld [vmem:[%s16147_s24 + $0x418] sm:$0xff]  ;;  %v16332_v53 = vrot.slane %v3121_v44, %v16210_v14  ;;  %v13283_v2 = vpack.c.bf16 %v522_v61, %v521_v58  ;;  %v509_v9 = vld [vmem:[%s16147_s24 + $0x4c0] sm:$0xff]  ;;  %v494_v18 = vld [vmem:[%s16147_s24 + $0x448] sm:$0xff] }
  0x6f   : > { %v13247_v54 = vpack.c.bf16 %v488_v41, %v487_v40  ;;  %v524_v8 = vld [vmem:[%s16147_s24 + $0x538] sm:$0xff]  ;;  %v525_v19 = vld [vmem:[%s16147_s24 + $0x540] sm:$0xff]  ;;  %v526_v21 = vld [vmem:[%s16147_s24 + $0x548] sm:$0xff] }
  0x70   : > { %13196 = vmatpush3.bf16.msra.mxu0 %v13195_v49  ;;  %v506_v49 = vld [vmem:[%s16147_s24 + $0x4a8] sm:$0xff]  ;;  %v3137_v59 = vcombine.high %v16332_v53, %v16332_v53  ;;  %v13287_v15 = vpack.c.bf16 %v524_v8, %v523_v6  ;;  %v511_v22 = vld [vmem:[%s16147_s24 + $0x4d0] sm:$0xff]  ;;  %v13291_v27 = vpack.c.bf16 %v526_v21, %v525_v19  ;;  %v528_v33 = vld [vmem:[%s16147_s24 + $0x558] sm:$0xff] }
  0x71   : > { %13228 = vmatpush3.bf16.msra.mxu1 %v13227_v51  ;;  %13198 = vmatprep.subr.bf16.mxu0 %v13197_v52  ;;  %v538_v51 = vld [vmem:[%s16147_s24 + $0x5a8] sm:$0xff]  ;;  %v3136_v52 = vcombine.high %v16321_v43, %v16321_v43  ;;  %v13249_v55 = vpack.c.bf16 %v506_v49, %v505_v48  ;;  %v543_v24 = vld [vmem:[%s16147_s24 + $0x5d0] sm:$0xff]  ;;  %v513_v35 = vld [vmem:[%s16147_s24 + $0x4e0] sm:$0xff] }
  0x72   : > { %13230 = vmatprep.subr.bf16.mxu1 %v13229_v56  ;;  %v489_v56 = vld [vmem:[%s16147_s24 + $0x420] sm:$0xff]  ;;  %v13281_v60 = vpack.c.bf16 %v538_v51, %v537_v50  ;;  %v495_v29 = vld [vmem:[%s16147_s24 + $0x450] sm:$0xff]  ;;  %v546_v38 = vld [vmem:[%s16147_s24 + $0x5e8] sm:$0xff] }
  0x73   : > { %v13251_v1 = vpack.c.bf16 %v490_v57, %v489_v56  ;;  %v527_v31 = vld [vmem:[%s16147_s24 + $0x550] sm:$0xff]  ;;  %v498_v44 = vld [vmem:[%s16147_s24 + $0x468] sm:$0xff]  ;;  %v516_v50 = vld [vmem:[%s16147_s24 + $0x4f8] sm:$0xff] }
  0x74   : > { %13200 = vmatpush3.bf16.msra.mxu0 %v13199_v62  ;;  %v508_v62 = vld [vmem:[%s16147_s24 + $0x4b8] sm:$0xff]  ;;  %v13295_v40 = vpack.c.bf16 %v528_v33, %v527_v31  ;;  %v530_v48 = vld [vmem:[%s16147_s24 + $0x568] sm:$0xff]  ;;  %v515_v49 = vld [vmem:[%s16147_s24 + $0x4f0] sm:$0xff] }
  0x75   : > { %13232 = vmatpush3.bf16.msra.mxu1 %v13231_v63  ;;  %13202 = vmatprep.subr.bf16.mxu0 %v13201_v0  ;;  %v539_v63 = vld [vmem:[%s16147_s24 + $0x5b0] sm:$0xff]  ;;  %v540_v0 = vld [vmem:[%s16147_s24 + $0x5b8] sm:$0xff]  ;;  %v13269_v56 = vpack.c.bf16 %v516_v50, %v515_v49  ;;  %v550_v6 = vld [vmem:[%s16147_s24 + $0x608] sm:$0xff] }
  0x76   : > { %13234 = vmatprep.subr.bf16.mxu1 %v13233_v4  ;;  %v491_v4 = vld [vmem:[%s16147_s24 + $0x430] sm:$0xff]  ;;  %v13285_v7 = vpack.c.bf16 %v540_v0, %v539_v63  ;;  %v500_v58 = vld [vmem:[%s16147_s24 + $0x478] sm:$0xff]  ;;  %v597_v63 = vld [vmem:[%s16147_s24 + $0x780] sm:$0xff] }
  0x77   : > { %v13255_v13 = vpack.c.bf16 %v492_v5, %v491_v4  ;;  %v547_v51 = vld [vmem:[%s16147_s24 + $0x5f0] sm:$0xff]  ;;  %v532_v61 = vld [vmem:[%s16147_s24 + $0x578] sm:$0xff]  ;;  %v598_v0 = vld [vmem:[%s16147_s24 + $0x788] sm:$0xff] }
  0x78   : > { %13204 = vmatpush3.bf16.msra.mxu0 %v13203_v10  ;;  %v510_v10 = vld [vmem:[%s16147_s24 + $0x4c8] sm:$0xff]  ;;  %v499_v57 = vld [vmem:[%s16147_s24 + $0x470] sm:$0xff]  ;;  %v549_v5 = vld [vmem:[%s16147_s24 + $0x600] sm:$0xff]  ;;  %v13337_v8 = vpack.c.bf16 %v598_v0, %v597_v63 }
  0x79   : > { %13236 = vmatpush3.bf16.msra.mxu1 %v13235_v11  ;;  %13206 = vmatprep.subr.bf16.mxu0 %v13205_v12  ;;  %v541_v11 = vld [vmem:[%s16147_s24 + $0x5c0] sm:$0xff]  ;;  %v542_v12 = vld [vmem:[%s16147_s24 + $0x5c8] sm:$0xff]  ;;  %v13257_v16 = vpack.c.bf16 %v510_v10, %v509_v9  ;;  %v567_v10 = vld [vmem:[%s16147_s24 + $0x690] sm:$0xff] }
  0x7a   : > { %13238 = vmatprep.subr.bf16.mxu1 %v13237_v17  ;;  %v493_v17 = vld [vmem:[%s16147_s24 + $0x440] sm:$0xff]  ;;  %v13289_v20 = vpack.c.bf16 %v542_v12, %v541_v11  ;;  %v582_v9 = vld [vmem:[%s16147_s24 + $0x708] sm:$0xff]  ;;  %v568_v11 = vld [vmem:[%s16147_s24 + $0x698] sm:$0xff] }
  0x7b   : > { %v13309_v19 = vpack.c.bf16 %v568_v11, %v567_v10  ;;  %v552_v21 = vld [vmem:[%s16147_s24 + $0x618] sm:$0xff]  ;;  %v587_v49 = vld [vmem:[%s16147_s24 + $0x730] sm:$0xff]  ;;  %v577_v11 = vld [vmem:[%s16147_s24 + $0x6e0] sm:$0xff] }
  0x7c   : > { %13208 = vmatpush3.bf16.msra.mxu0 %v13207_v23  ;;  %v512_v23 = vld [vmem:[%s16147_s24 + $0x4d8] sm:$0xff]  ;;  %v575_v63 = vld [vmem:[%s16147_s24 + $0x6d0] sm:$0xff] }
  0x7d   : > { %13240 = vmatpush3.bf16.msra.mxu1 %v13239_v25  ;;  %13242 = vmatprep.subr.bf16.mxu0 %v13241_v26  ;;  %v544_v25 = vld [vmem:[%s16147_s24 + $0x5d8] sm:$0xff]  ;;  %v13259_v26 = vpack.c.bf16 %v494_v18, %v493_v17  ;;  %v13261_v28 = vpack.c.bf16 %v512_v23, %v511_v22  ;;  %v13307_v17 = vpack.c.bf16 %v550_v6, %v549_v5  ;;  %v583_v22 = vld [vmem:[%s16147_s24 + $0x710] sm:$0xff] }
  0x7e   : > { %13274 = vmatprep.subr.bf16.mxu1 %v13273_v30  ;;  %v496_v30 = vld [vmem:[%s16147_s24 + $0x458] sm:$0xff]  ;;  %v13293_v32 = vpack.c.bf16 %v544_v25, %v543_v24  ;;  %v569_v25 = vld [vmem:[%s16147_s24 + $0x6a0] sm:$0xff]  ;;  %v559_v6 = vld [vmem:[%s16147_s24 + $0x650] sm:$0xff] }
  0x7f   : > { %4174 = vmatmul.mubr.f32.vlgmr.msra.gmra.mrb[2].mxu0 %v16267_v34  ;;  %v13279_v34 = vpack.c.bf16 %v520_v47, %v519_v42  ;;  %v497_v42 = vld [vmem:[%s16147_s24 + $0x460] sm:$0xff]  ;;  %v584_v24 = vld [vmem:[%s16147_s24 + $0x718] sm:$0xff] }
  0x80   : > { %13244 = vmatpush3.bf16.msra.mxu0 %v13243_v36  ;;  %4244 = vmatmul.mubr.f32.vlgmr.msra.gmra.mrb[2].mxu1 %v16278_v46  ;;  %v507_v46 = vld [vmem:[%s16147_s24 + $0x4b0] sm:$0xff]  ;;  %v514_v36 = vld [vmem:[%s16147_s24 + $0x4e8] sm:$0xff]  ;;  %v576_v0 = vld [vmem:[%s16147_s24 + $0x6d8] sm:$0xff] }
  0x81   : > { %13276 = vmatpush3.bf16.msra.mxu1 %v13275_v37  ;;  %13246 = vmatprep.subr.bf16.mxu0 %v13245_v39  ;;  %v13253_v3 = vpack.c.bf16 %v508_v62, %v507_v46  ;;  %v545_v37 = vld [vmem:[%s16147_s24 + $0x5e0] sm:$0xff]  ;;  %v13263_v39 = vpack.c.bf16 %v496_v30, %v495_v29  ;;  %v13265_v41 = vpack.c.bf16 %v514_v36, %v513_v35  ;;  %v566_v62 = vld [vmem:[%s16147_s24 + $0x688] sm:$0xff]  ;;  %v592_v10 = vld [vmem:[%s16147_s24 + $0x758] sm:$0xff] }
  0x82   : > { %13278 = vmatprep.subr.bf16.mxu1 %v13277_v45  ;;  %4313 = vmatprep.mubr.f32.mxu0 %v3136_v52  ;;  %v529_v45 = vld [vmem:[%s16147_s24 + $0x560] sm:$0xff]  ;;  %v13297_v47 = vpack.c.bf16 %v546_v38, %v545_v37  ;;  %v548_v52 = vld [vmem:[%s16147_s24 + $0x5f8] sm:$0xff]  ;;  %v602_v29 = vld [vmem:[%s16147_s24 + $0x7a8] sm:$0xff]  ;;  %v13325_v5 = vpack.c.bf16 %v576_v0, %v575_v63 }
  0x83   : > { %4383 = vmatprep.mubr.f32.mxu1 %v3137_v59  ;;  %v531_v59 = vld [vmem:[%s16147_s24 + $0x570] sm:$0xff]  ;;  %v565_v46 = vld [vmem:[%s16147_s24 + $0x680] sm:$0xff]  ;;  %v586_v38 = vld [vmem:[%s16147_s24 + $0x728] sm:$0xff] }
  0x84   : > { %13248 = vmatpush3.bf16.msra.mxu0 %v13247_v54  ;;  %v13267_v54 = vpack.c.bf16 %v498_v44, %v497_v42  ;;  %v13305_v4 = vpack.c.bf16 %v566_v62, %v565_v46  ;;  %v553_v35 = vld [vmem:[%s16147_s24 + $0x620] sm:$0xff]  ;;  %v590_v62 = vld [vmem:[%s16147_s24 + $0x748] sm:$0xff]  ;;  %v647_v63 = vld [vmem:[%s16147_s24 + $0x910] sm:$0xff] }
  0x85   : > { %13280 = vmatpush3.bf16.msra.mxu1 %v13279_v34  ;;  %13250 = vmatprep.subr.bf16.mxu0 %v13249_v55  ;;  %v318_v34 = vld [vmem:[%s16157_s19 + $0x18] sm:$0xff]  ;;  %v13299_v55 = vpack.c.bf16 %v530_v48, %v529_v45  ;;  %v585_v36 = vld [vmem:[%s16147_s24 + $0x720] sm:$0xff] }
  0x86   : > { %13282 = vmatprep.subr.bf16.mxu1 %v13281_v60  ;;  %v13301_v60 = vpack.c.bf16 %v548_v52, %v547_v51  ;;  %v16393_v12 = vrot.slane %v318_v34, %v16210_v14  ;;  %v13347_v44 = vpack.c.bf16 %v586_v38, %v585_v36  ;;  %v556_v48 = vld [vmem:[%s16147_s24 + $0x638] sm:$0xff]  ;;  %v573_v52 = vld [vmem:[%s16147_s24 + $0x6c0] sm:$0xff]  ;;  %v595_v36 = vld [vmem:[%s16147_s24 + $0x770] sm:$0xff] }
  0x87   : > { %v588_v51 = vld [vmem:[%s16147_s24 + $0x738] sm:$0xff] }
  0x88   : > { %13252 = vmatpush3.bf16.msra.mxu0 %v13251_v1  ;;  %v3138_v1 = vcombine.high %v318_v34, %v318_v34  ;;  %v605_v34 = vld [vmem:[%s16147_s24 + $0x7c0] sm:$0xff]  ;;  %v596_v38 = vld [vmem:[%s16147_s24 + $0x778] sm:$0xff] }
  0x89   : > { %13284 = vmatpush3.bf16.msra.mxu1 %v13283_v2  ;;  %13254 = vmatprep.subr.bf16.mxu0 %v13253_v3  ;;  %v13271_v2 = vpack.c.bf16 %v500_v58, %v499_v57  ;;  %v13303_v3 = vpack.c.bf16 %v532_v61, %v531_v59  ;;  %v13351_v57 = vpack.c.bf16 %v588_v51, %v587_v49  ;;  %v557_v59 = vld [vmem:[%s16147_s24 + $0x640] sm:$0xff]  ;;  %v614_v49 = vld [vmem:[%s16147_s24 + $0x808] sm:$0xff] }
  0x8a   : > { %13286 = vmatprep.subr.bf16.mxu1 %v13285_v7  ;;  %v581_v7 = vld [vmem:[%s16147_s24 + $0x700] sm:$0xff] }
  0x8b   : > { %v13339_v18 = vpack.c.bf16 %v582_v9, %v581_v7  ;;  %v589_v61 = vld [vmem:[%s16147_s24 + $0x740] sm:$0xff]  ;;  %v560_v7 = vld [vmem:[%s16147_s24 + $0x658] sm:$0xff] }
  0x8c   : > { %13256 = vmatpush3.bf16.msra.mxu0 %v13255_v13  ;;  %v599_v13 = vld [vmem:[%s16147_s24 + $0x790] sm:$0xff] }
  0x8d   : > { %13288 = vmatpush3.bf16.msra.mxu1 %v13287_v15  ;;  %13258 = vmatprep.subr.bf16.mxu0 %v13257_v16  ;;  %v600_v15 = vld [vmem:[%s16147_s24 + $0x798] sm:$0xff]  ;;  %v16398_v16 = vrot.slane %v3138_v1, %v16210_v14  ;;  %v607_v1 = vld [vmem:[%s16147_s24 + $0x7d0] sm:$0xff] }
  0x8e   : > { %13290 = vmatprep.subr.bf16.mxu1 %v13289_v20  ;;  %v551_v20 = vld [vmem:[%s16147_s24 + $0x610] sm:$0xff]  ;;  %v13341_v23 = vpack.c.bf16 %v600_v15, %v599_v13  ;;  %v578_v13 = vld [vmem:[%s16147_s24 + $0x6e8] sm:$0xff]  ;;  %v609_v15 = vld [vmem:[%s16147_s24 + $0x7e0] sm:$0xff] }
  0x8f   : > { %v3154_v30 = vcombine.high %v16398_v16, %v16398_v16  ;;  %v13311_v31 = vpack.c.bf16 %v552_v21, %v551_v20  ;;  %v13329_v20 = vpack.c.bf16 %v578_v13, %v577_v11  ;;  %v561_v21 = vld [vmem:[%s16147_s24 + $0x660] sm:$0xff] }
  0x90   : > { %13260 = vmatpush3.bf16.msra.mxu0 %v13259_v26  ;;  %v570_v26 = vld [vmem:[%s16147_s24 + $0x6a8] sm:$0xff]  ;;  %v617_v11 = vld [vmem:[%s16147_s24 + $0x820] sm:$0xff] }
  0x91   : > { %13292 = vmatpush3.bf16.msra.mxu1 %v13291_v27  ;;  %13262 = vmatprep.subr.bf16.mxu0 %v13261_v28  ;;  %v3153_v27 = vcombine.high %v16393_v12, %v16393_v12  ;;  %v601_v28 = vld [vmem:[%s16147_s24 + $0x7a0] sm:$0xff]  ;;  %v13313_v33 = vpack.c.bf16 %v570_v26, %v569_v25  ;;  %v594_v25 = vld [vmem:[%s16147_s24 + $0x768] sm:$0xff]  ;;  %v579_v26 = vld [vmem:[%s16147_s24 + $0x6f0] sm:$0xff] }
  0x92   : > { %13294 = vmatprep.subr.bf16.mxu1 %v13293_v32  ;;  %v13343_v32 = vpack.c.bf16 %v584_v24, %v583_v22  ;;  %v13345_v37 = vpack.c.bf16 %v602_v29, %v601_v28  ;;  %v562_v22 = vld [vmem:[%s16147_s24 + $0x668] sm:$0xff]  ;;  %v611_v28 = vld [vmem:[%s16147_s24 + $0x7f0] sm:$0xff]  ;;  %v612_v29 = vld [vmem:[%s16147_s24 + $0x7f8] sm:$0xff] }
  0x93   : > { %v649_v13 = vld [vmem:[%s16147_s24 + $0x920] sm:$0xff] }
  0x94   : > { %13264 = vmatpush3.bf16.msra.mxu0 %v13263_v39  ;;  %v571_v39 = vld [vmem:[%s16147_s24 + $0x6b0] sm:$0xff] }
  0x95   : > { %13296 = vmatpush3.bf16.msra.mxu1 %v13295_v40  ;;  %13266 = vmatprep.subr.bf16.mxu0 %v13265_v41  ;;  %v572_v40 = vld [vmem:[%s16147_s24 + $0x6b8] sm:$0xff] }
  0x96   : > { %13298 = vmatprep.subr.bf16.mxu1 %v13297_v47  ;;  %v604_v41 = vld [vmem:[%s16147_s24 + $0x7b8] sm:$0xff]  ;;  %v13317_v45 = vpack.c.bf16 %v572_v40, %v571_v39  ;;  %v555_v47 = vld [vmem:[%s16147_s24 + $0x630] sm:$0xff]  ;;  %v629_v39 = vld [vmem:[%s16147_s24 + $0x880] sm:$0xff] }
  0x97   : > { %v630_v40 = vld [vmem:[%s16147_s24 + $0x888] sm:$0xff] }
  0x98   : > { %13268 = vmatpush3.bf16.msra.mxu0 %v13267_v54  ;;  %v574_v54 = vld [vmem:[%s16147_s24 + $0x6c8] sm:$0xff] }
  0x99   : > { %13300 = vmatpush3.bf16.msra.mxu1 %v13299_v55  ;;  %13270 = vmatprep.subr.bf16.mxu0 %v13269_v56  ;;  %v606_v55 = vld [vmem:[%s16147_s24 + $0x7c8] sm:$0xff]  ;;  %v13319_v56 = vpack.c.bf16 %v556_v48, %v555_v47  ;;  %v13321_v58 = vpack.c.bf16 %v574_v54, %v573_v52  ;;  %v13369_v47 = vpack.c.bf16 %v630_v40, %v629_v39  ;;  %v613_v48 = vld [vmem:[%s16147_s24 + $0x800] sm:$0xff]  ;;  %v631_v54 = vld [vmem:[%s16147_s24 + $0x890] sm:$0xff] }
  0x9a   : > { %13302 = vmatprep.subr.bf16.mxu1 %v13301_v60  ;;  %v558_v60 = vld [vmem:[%s16147_s24 + $0x648] sm:$0xff]  ;;  %v13353_v46 = vpack.c.bf16 %v606_v55, %v605_v34  ;;  %v632_v34 = vld [vmem:[%s16147_s24 + $0x898] sm:$0xff] }
  0x9b   : > { %v646_v52 = vld [vmem:[%s16147_s24 + $0x908] sm:$0xff] }
  0x9c   : > { %13272 = vmatpush3.bf16.msra.mxu0 %v13271_v2  ;;  %v608_v2 = vld [vmem:[%s16147_s24 + $0x7d8] sm:$0xff]  ;;  %v654_v40 = vld [vmem:[%s16147_s24 + $0x948] sm:$0xff] }
  0x9d   : > { %13304 = vmatpush3.bf16.msra.mxu1 %v13303_v3  ;;  %13306 = vmatprep.subr.bf16.mxu0 %v13305_v4  ;;  %v13323_v3 = vpack.c.bf16 %v558_v60, %v557_v59  ;;  %v13355_v4 = vpack.c.bf16 %v590_v62, %v589_v61  ;;  %v13357_v9 = vpack.c.bf16 %v608_v2, %v607_v1  ;;  %v616_v62 = vld [vmem:[%s16147_s24 + $0x818] sm:$0xff]  ;;  %v633_v2 = vld [vmem:[%s16147_s24 + $0x8a0] sm:$0xff] }
  0x9e   : > { %13338 = vmatprep.subr.bf16.mxu1 %v13337_v8  ;;  %v591_v8 = vld [vmem:[%s16147_s24 + $0x750] sm:$0xff]  ;;  %v13371_v59 = vpack.c.bf16 %v614_v49, %v613_v48  ;;  %v13373_v61 = vpack.c.bf16 %v632_v34, %v631_v54  ;;  %v648_v1 = vld [vmem:[%s16147_s24 + $0x918] sm:$0xff]  ;;  %v641_v34 = vld [vmem:[%s16147_s24 + $0x8e0] sm:$0xff] }
  0x9f   : > { %4314 = vmatmul.mubr.f32.vlgmr.msra.gmra.mrb[4].mxu0 %v16321_v43  ;;  %v554_v43 = vld [vmem:[%s16147_s24 + $0x628] sm:$0xff]  ;;  %v623_v49 = vld [vmem:[%s16147_s24 + $0x850] sm:$0xff]  ;;  %v656_v54 = vld [vmem:[%s16147_s24 + $0x958] sm:$0xff] }
  0xa0   : > { %13308 = vmatpush3.bf16.msra.mxu0 %v13307_v17  ;;  %4384 = vmatmul.mubr.f32.vlgmr.msra.gmra.mrb[4].mxu1 %v16332_v53  ;;  %v603_v53 = vld [vmem:[%s16147_s24 + $0x7b0] sm:$0xff]  ;;  %v13315_v42 = vpack.c.bf16 %v554_v43, %v553_v35  ;;  %v610_v17 = vld [vmem:[%s16147_s24 + $0x7e8] sm:$0xff]  ;;  %v564_v43 = vld [vmem:[%s16147_s24 + $0x678] sm:$0xff] }
  0xa1   : > { %13340 = vmatpush3.bf16.msra.mxu1 %v13339_v18  ;;  %13310 = vmatprep.subr.bf16.mxu0 %v13309_v19  ;;  %v13349_v50 = vpack.c.bf16 %v604_v41, %v603_v53  ;;  %v13327_v18 = vpack.c.bf16 %v560_v7, %v559_v6  ;;  %v13359_v19 = vpack.c.bf16 %v592_v10, %v591_v8  ;;  %v563_v35 = vld [vmem:[%s16147_s24 + $0x670] sm:$0xff]  ;;  %v661_v53 = vld [vmem:[%s16147_s24 + $0x980] sm:$0xff]  ;;  %v662_v41 = vld [vmem:[%s16147_s24 + $0x988] sm:$0xff] }
  0xa2   : > { %13342 = vmatprep.subr.bf16.mxu1 %v13341_v23  ;;  %4453 = vmatprep.mubr.f32.mxu0 %v3153_v27  ;;  %v593_v23 = vld [vmem:[%s16147_s24 + $0x760] sm:$0xff]  ;;  %v13361_v24 = vpack.c.bf16 %v610_v17, %v609_v15  ;;  %v580_v27 = vld [vmem:[%s16147_s24 + $0x6f8] sm:$0xff]  ;;  %v13401_v51 = vpack.c.bf16 %v662_v41, %v661_v53  ;;  %v666_v6 = vld [vmem:[%s16147_s24 + $0x9a8] sm:$0xff] }
  0xa3   : > { %4523 = vmatprep.mubr.f32.mxu1 %v3154_v30  ;;  %v13331_v30 = vpack.c.bf16 %v562_v22, %v561_v21  ;;  %v650_v17 = vld [vmem:[%s16147_s24 + $0x928] sm:$0xff]  ;;  %v639_v53 = vld [vmem:[%s16147_s24 + $0x8d0] sm:$0xff]  ;;  %v640_v41 = vld [vmem:[%s16147_s24 + $0x8d8] sm:$0xff] }
  0xa4   : > { %13312 = vmatpush3.bf16.msra.mxu0 %v13311_v31  ;;  %v319_v31 = vld [vmem:[%s16157_s19 + $0x20] sm:$0xff]  ;;  %v13411_v22 = vpack.c.bf16 %v650_v17, %v649_v13  ;;  %v13389_v48 = vpack.c.bf16 %v640_v41, %v639_v53  ;;  %v659_v13 = vld [vmem:[%s16147_s24 + $0x970] sm:$0xff] }
  0xa5   : > { %13344 = vmatpush3.bf16.msra.mxu1 %v13343_v32  ;;  %13314 = vmatprep.subr.bf16.mxu0 %v13313_v33  ;;  %v13363_v32 = vpack.c.bf16 %v594_v25, %v593_v23  ;;  %v13333_v33 = vpack.c.bf16 %v580_v27, %v579_v26  ;;  %v16470_v55 = vrot.slane %v319_v31, %v16210_v14  ;;  %v620_v25 = vld [vmem:[%s16147_s24 + $0x838] sm:$0xff]  ;;  %v651_v26 = vld [vmem:[%s16147_s24 + $0x930] sm:$0xff] }
  0xa6   : > { %13346 = vmatprep.subr.bf16.mxu1 %v13345_v37  ;;  %v13365_v37 = vpack.c.bf16 %v612_v29, %v611_v28  ;;  %v652_v28 = vld [vmem:[%s16147_s24 + $0x938] sm:$0xff]  ;;  %v637_v29 = vld [vmem:[%s16147_s24 + $0x8c0] sm:$0xff]  ;;  %v711_v53 = vld [vmem:[%s16147_s24 + $0xb10] sm:$0xff] }
  0xa7   : > { %v660_v17 = vld [vmem:[%s16147_s24 + $0x978] sm:$0xff] }
  0xa8   : > { %13316 = vmatpush3.bf16.msra.mxu0 %v13315_v42  ;;  %v3155_v42 = vcombine.high %v319_v31, %v319_v31  ;;  %v669_v31 = vld [vmem:[%s16147_s24 + $0x9c0] sm:$0xff] }
  0xa9   : > { %13348 = vmatpush3.bf16.msra.mxu1 %v13347_v44  ;;  %13318 = vmatprep.subr.bf16.mxu0 %v13317_v45  ;;  %v13335_v44 = vpack.c.bf16 %v564_v43, %v563_v35  ;;  %v13367_v45 = vpack.c.bf16 %v596_v38, %v595_v36  ;;  %v13415_v35 = vpack.c.bf16 %v652_v28, %v651_v26  ;;  %v621_v36 = vld [vmem:[%s16147_s24 + $0x840] sm:$0xff]  ;;  %v678_v26 = vld [vmem:[%s16147_s24 + $0xa08] sm:$0xff] }
  0xaa   : > { %13350 = vmatprep.subr.bf16.mxu1 %v13349_v50  ;;  %v645_v50 = vld [vmem:[%s16147_s24 + $0x900] sm:$0xff] }
  0xab   : > { %v13403_v60 = vpack.c.bf16 %v646_v52, %v645_v50  ;;  %v653_v38 = vld [vmem:[%s16147_s24 + $0x940] sm:$0xff]  ;;  %v624_v50 = vld [vmem:[%s16147_s24 + $0x858] sm:$0xff] }
  0xac   : > { %13320 = vmatpush3.bf16.msra.mxu0 %v13319_v56  ;;  %v663_v56 = vld [vmem:[%s16147_s24 + $0x990] sm:$0xff] }
  0xad   : > { %13352 = vmatpush3.bf16.msra.mxu1 %v13351_v57  ;;  %13322 = vmatprep.subr.bf16.mxu0 %v13321_v58  ;;  %v664_v57 = vld [vmem:[%s16147_s24 + $0x998] sm:$0xff]  ;;  %v16475_v58 = vrot.slane %v3155_v42, %v16210_v14  ;;  %v671_v42 = vld [vmem:[%s16147_s24 + $0x9d0] sm:$0xff] }
  0xae   : > { %13354 = vmatprep.subr.bf16.mxu1 %v13353_v46  ;;  %v615_v46 = vld [vmem:[%s16147_s24 + $0x810] sm:$0xff]  ;;  %v13405_v0 = vpack.c.bf16 %v664_v57, %v663_v56  ;;  %v642_v56 = vld [vmem:[%s16147_s24 + $0x8e8] sm:$0xff]  ;;  %v673_v57 = vld [vmem:[%s16147_s24 + $0x9e0] sm:$0xff] }
  0xaf   : > { %v3171_v7 = vcombine.high %v16475_v58, %v16475_v58  ;;  %v13375_v8 = vpack.c.bf16 %v616_v62, %v615_v46  ;;  %v13393_v46 = vpack.c.bf16 %v642_v56, %v641_v34  ;;  %v625_v62 = vld [vmem:[%s16147_s24 + $0x860] sm:$0xff] }
  0xb0   : > { %13324 = vmatpush3.bf16.msra.mxu0 %v13323_v3  ;;  %v634_v3 = vld [vmem:[%s16147_s24 + $0x8a8] sm:$0xff]  ;;  %v681_v34 = vld [vmem:[%s16147_s24 + $0xa20] sm:$0xff] }
  0xb1   : > { %13356 = vmatpush3.bf16.msra.mxu1 %v13355_v4  ;;  %13326 = vmatprep.subr.bf16.mxu0 %v13325_v5  ;;  %v3170_v4 = vcombine.high %v16470_v55, %v16470_v55  ;;  %v665_v5 = vld [vmem:[%s16147_s24 + $0x9a0] sm:$0xff]  ;;  %v13377_v10 = vpack.c.bf16 %v634_v3, %v633_v2  ;;  %v658_v2 = vld [vmem:[%s16147_s24 + $0x968] sm:$0xff]  ;;  %v643_v3 = vld [vmem:[%s16147_s24 + $0x8f0] sm:$0xff] }
  0xb2   : > { %13358 = vmatprep.subr.bf16.mxu1 %v13357_v9  ;;  %v13407_v9 = vpack.c.bf16 %v648_v1, %v647_v63  ;;  %v13409_v15 = vpack.c.bf16 %v666_v6, %v665_v5  ;;  %v626_v63 = vld [vmem:[%s16147_s24 + $0x868] sm:$0xff]  ;;  %v675_v5 = vld [vmem:[%s16147_s24 + $0x9f0] sm:$0xff]  ;;  %v676_v6 = vld [vmem:[%s16147_s24 + $0x9f8] sm:$0xff] }
  0xb3   : > { %v713_v56 = vld [vmem:[%s16147_s24 + $0xb20] sm:$0xff] }
  0xb4   : > { %13328 = vmatpush3.bf16.msra.mxu0 %v13327_v18  ;;  %v635_v18 = vld [vmem:[%s16147_s24 + $0x8b0] sm:$0xff] }
  0xb5   : > { %13360 = vmatpush3.bf16.msra.mxu1 %v13359_v19  ;;  %13330 = vmatprep.subr.bf16.mxu0 %v13329_v20  ;;  %v636_v19 = vld [vmem:[%s16147_s24 + $0x8b8] sm:$0xff] }
  0xb6   : > { %13362 = vmatprep.subr.bf16.mxu1 %v13361_v24  ;;  %v668_v20 = vld [vmem:[%s16147_s24 + $0x9b8] sm:$0xff]  ;;  %v13381_v23 = vpack.c.bf16 %v636_v19, %v635_v18  ;;  %v619_v24 = vld [vmem:[%s16147_s24 + $0x830] sm:$0xff]  ;;  %v693_v18 = vld [vmem:[%s16147_s24 + $0xa80] sm:$0xff] }
  0xb7   : > { %v694_v19 = vld [vmem:[%s16147_s24 + $0xa88] sm:$0xff] }
  0xb8   : > { %13332 = vmatpush3.bf16.msra.mxu0 %v13331_v30  ;;  %v638_v30 = vld [vmem:[%s16147_s24 + $0x8c8] sm:$0xff] }
  0xb9   : > { %13364 = vmatpush3.bf16.msra.mxu1 %v13363_v32  ;;  %13334 = vmatprep.subr.bf16.mxu0 %v13333_v33  ;;  %v670_v32 = vld [vmem:[%s16147_s24 + $0x9c8] sm:$0xff]  ;;  %v13383_v33 = vpack.c.bf16 %v620_v25, %v619_v24  ;;  %v13385_v43 = vpack.c.bf16 %v638_v30, %v637_v29  ;;  %v13433_v24 = vpack.c.bf16 %v694_v19, %v693_v18  ;;  %v677_v25 = vld [vmem:[%s16147_s24 + $0xa00] sm:$0xff]  ;;  %v695_v30 = vld [vmem:[%s16147_s24 + $0xa90] sm:$0xff] }
  0xba   : > { %13366 = vmatprep.subr.bf16.mxu1 %v13365_v37  ;;  %v622_v37 = vld [vmem:[%s16147_s24 + $0x848] sm:$0xff]  ;;  %v13417_v39 = vpack.c.bf16 %v670_v32, %v669_v31  ;;  %v696_v31 = vld [vmem:[%s16147_s24 + $0xa98] sm:$0xff] }
  0xbb   : > { %v710_v29 = vld [vmem:[%s16147_s24 + $0xb08] sm:$0xff] }
  0xbc   : > { %13336 = vmatpush3.bf16.msra.mxu0 %v13335_v44  ;;  %v672_v44 = vld [vmem:[%s16147_s24 + $0x9d8] sm:$0xff]  ;;  %v718_v19 = vld [vmem:[%s16147_s24 + $0xb48] sm:$0xff] }
  0xbd   : > { %13368 = vmatpush3.bf16.msra.mxu1 %v13367_v45  ;;  %13370 = vmatprep.subr.bf16.mxu0 %v13369_v47  ;;  %v13387_v45 = vpack.c.bf16 %v622_v37, %v621_v36  ;;  %v13419_v47 = vpack.c.bf16 %v654_v40, %v653_v38  ;;  %v13421_v52 = vpack.c.bf16 %v672_v44, %v671_v42  ;;  %v680_v40 = vld [vmem:[%s16147_s24 + $0xa18] sm:$0xff]  ;;  %v697_v44 = vld [vmem:[%s16147_s24 + $0xaa0] sm:$0xff] }
  0xbe   : > { %13402 = vmatprep.subr.bf16.mxu1 %v13401_v51  ;;  %v655_v51 = vld [vmem:[%s16147_s24 + $0x950] sm:$0xff]  ;;  %v13435_v36 = vpack.c.bf16 %v678_v26, %v677_v25  ;;  %v13437_v38 = vpack.c.bf16 %v696_v31, %v695_v30  ;;  %v712_v42 = vld [vmem:[%s16147_s24 + $0xb18] sm:$0xff]  ;;  %v705_v31 = vld [vmem:[%s16147_s24 + $0xae0] sm:$0xff] }
  0xbf   : > { %4454 = vmatmul.mubr.f32.vlgmr.msra.gmra.mrb[6].mxu0 %v16393_v12  ;;  %v618_v12 = vld [vmem:[%s16147_s24 + $0x828] sm:$0xff]  ;;  %v687_v26 = vld [vmem:[%s16147_s24 + $0xa50] sm:$0xff]  ;;  %v720_v30 = vld [vmem:[%s16147_s24 + $0xb58] sm:$0xff] }
  0xc0   : > { %13372 = vmatpush3.bf16.msra.mxu0 %v13371_v59  ;;  %4524 = vmatmul.mubr.f32.vlgmr.msra.gmra.mrb[6].mxu1 %v16398_v16  ;;  %v667_v16 = vld [vmem:[%s16147_s24 + $0x9b0] sm:$0xff]  ;;  %v13379_v21 = vpack.c.bf16 %v618_v12, %v617_v11  ;;  %v674_v59 = vld [vmem:[%s16147_s24 + $0x9e8] sm:$0xff]  ;;  %v628_v12 = vld [vmem:[%s16147_s24 + $0x878] sm:$0xff] }
  0xc1   : > { %13404 = vmatpush3.bf16.msra.mxu1 %v13403_v60  ;;  %13374 = vmatprep.subr.bf16.mxu0 %v13373_v61  ;;  %v13413_v27 = vpack.c.bf16 %v668_v20, %v667_v16  ;;  %v13391_v60 = vpack.c.bf16 %v624_v50, %v623_v49  ;;  %v13423_v61 = vpack.c.bf16 %v656_v54, %v655_v51  ;;  %v627_v11 = vld [vmem:[%s16147_s24 + $0x870] sm:$0xff]  ;;  %v725_v16 = vld [vmem:[%s16147_s24 + $0xb80] sm:$0xff]  ;;  %v726_v20 = vld [vmem:[%s16147_s24 + $0xb88] sm:$0xff] }
  0xc2   : > { %13406 = vmatprep.subr.bf16.mxu1 %v13405_v0  ;;  %4593 = vmatprep.mubr.f32.mxu0 %v3170_v4  ;;  %v657_v0 = vld [vmem:[%s16147_s24 + $0x960] sm:$0xff]  ;;  %v13425_v1 = vpack.c.bf16 %v674_v59, %v673_v57  ;;  %v644_v4 = vld [vmem:[%s16147_s24 + $0x8f8] sm:$0xff]  ;;  %v13465_v28 = vpack.c.bf16 %v726_v20, %v725_v16  ;;  %v730_v49 = vld [vmem:[%s16147_s24 + $0xba8] sm:$0xff] }
  0xc3   : > { %4663 = vmatprep.mubr.f32.mxu1 %v3171_v7  ;;  %v13395_v7 = vpack.c.bf16 %v626_v63, %v625_v62  ;;  %v714_v59 = vld [vmem:[%s16147_s24 + $0xb28] sm:$0xff]  ;;  %v703_v16 = vld [vmem:[%s16147_s24 + $0xad0] sm:$0xff]  ;;  %v704_v20 = vld [vmem:[%s16147_s24 + $0xad8] sm:$0xff] }
  0xc4   : > { %13376 = vmatpush3.bf16.msra.mxu0 %v13375_v8  ;;  %v320_v8 = vld [vmem:[%s16157_s19 + $0x28] sm:$0xff]  ;;  %v13475_v63 = vpack.c.bf16 %v714_v59, %v713_v56  ;;  %v13453_v25 = vpack.c.bf16 %v704_v20, %v703_v16  ;;  %v723_v56 = vld [vmem:[%s16147_s24 + $0xb70] sm:$0xff]  ;;  %v724_v59 = vld [vmem:[%s16147_s24 + $0xb78] sm:$0xff] }
  0xc5   : > { %13408 = vmatpush3.bf16.msra.mxu1 %v13407_v9  ;;  %13378 = vmatprep.subr.bf16.mxu0 %v13377_v10  ;;  %v13427_v9 = vpack.c.bf16 %v658_v2, %v657_v0  ;;  %v13397_v10 = vpack.c.bf16 %v644_v4, %v643_v3  ;;  %v16547_v32 = vrot.slane %v320_v8, %v16210_v14  ;;  %v684_v2 = vld [vmem:[%s16147_s24 + $0xa38] sm:$0xff]  ;;  %v715_v3 = vld [vmem:[%s16147_s24 + $0xb30] sm:$0xff] }
  0xc6   : > { %13410 = vmatprep.subr.bf16.mxu1 %v13409_v15  ;;  %v13429_v15 = vpack.c.bf16 %v676_v6, %v675_v5  ;;  %v716_v5 = vld [vmem:[%s16147_s24 + $0xb38] sm:$0xff]  ;;  %v701_v6 = vld [vmem:[%s16147_s24 + $0xac0] sm:$0xff]  ;;  %v775_v16 = vld [vmem:[%s16147_s24 + $0xd10] sm:$0xff] }
  0xc8   : > { %13380 = vmatpush3.bf16.msra.mxu0 %v13379_v21  ;;  %v3172_v21 = vcombine.high %v320_v8, %v320_v8  ;;  %v733_v8 = vld [vmem:[%s16147_s24 + $0xbc0] sm:$0xff] }
  0xc9   : > { %13412 = vmatpush3.bf16.msra.mxu1 %v13411_v22  ;;  %13382 = vmatprep.subr.bf16.mxu0 %v13381_v23  ;;  %v13399_v22 = vpack.c.bf16 %v628_v12, %v627_v11  ;;  %v13431_v23 = vpack.c.bf16 %v660_v17, %v659_v13  ;;  %v13479_v11 = vpack.c.bf16 %v716_v5, %v715_v3  ;;  %v685_v13 = vld [vmem:[%s16147_s24 + $0xa40] sm:$0xff]  ;;  %v742_v3 = vld [vmem:[%s16147_s24 + $0xc08] sm:$0xff] }
  0xca   : > { %13414 = vmatprep.subr.bf16.mxu1 %v13413_v27  ;;  %v709_v27 = vld [vmem:[%s16147_s24 + $0xb00] sm:$0xff] }
  0xcb   : > { %v13467_v37 = vpack.c.bf16 %v710_v29, %v709_v27  ;;  %v717_v17 = vld [vmem:[%s16147_s24 + $0xb40] sm:$0xff]  ;;  %v688_v27 = vld [vmem:[%s16147_s24 + $0xa58] sm:$0xff] }
  0xcc   : > { %13384 = vmatpush3.bf16.msra.mxu0 %v13383_v33  ;;  %v727_v33 = vld [vmem:[%s16147_s24 + $0xb90] sm:$0xff] }
  0xcd   : > { %13416 = vmatpush3.bf16.msra.mxu1 %v13415_v35  ;;  %13386 = vmatprep.subr.bf16.mxu0 %v13385_v43  ;;  %v728_v35 = vld [vmem:[%s16147_s24 + $0xb98] sm:$0xff]  ;;  %v16552_v43 = vrot.slane %v3172_v21, %v16210_v14  ;;  %v735_v21 = vld [vmem:[%s16147_s24 + $0xbd0] sm:$0xff] }
  0xce   : > { %13418 = vmatprep.subr.bf16.mxu1 %v13417_v39  ;;  %v679_v39 = vld [vmem:[%s16147_s24 + $0xa10] sm:$0xff]  ;;  %v13469_v41 = vpack.c.bf16 %v728_v35, %v727_v33  ;;  %v706_v33 = vld [vmem:[%s16147_s24 + $0xae8] sm:$0xff]  ;;  %v737_v35 = vld [vmem:[%s16147_s24 + $0xbe0] sm:$0xff] }
  0xcf   : > { %v3188_v50 = vcombine.high %v16552_v43, %v16552_v43  ;;  %v13439_v51 = vpack.c.bf16 %v680_v40, %v679_v39  ;;  %v13457_v39 = vpack.c.bf16 %v706_v33, %v705_v31  ;;  %v689_v40 = vld [vmem:[%s16147_s24 + $0xa60] sm:$0xff] }
  0xd0   : > { %13388 = vmatpush3.bf16.msra.mxu0 %v13387_v45  ;;  %v698_v45 = vld [vmem:[%s16147_s24 + $0xaa8] sm:$0xff]  ;;  %v745_v31 = vld [vmem:[%s16147_s24 + $0xc20] sm:$0xff] }
  0xd1   : > { %13420 = vmatpush3.bf16.msra.mxu1 %v13419_v47  ;;  %13390 = vmatprep.subr.bf16.mxu0 %v13389_v48  ;;  %v3187_v47 = vcombine.high %v16547_v32, %v16547_v32  ;;  %v729_v48 = vld [vmem:[%s16147_s24 + $0xba0] sm:$0xff]  ;;  %v13441_v54 = vpack.c.bf16 %v698_v45, %v697_v44  ;;  %v722_v44 = vld [vmem:[%s16147_s24 + $0xb68] sm:$0xff]  ;;  %v707_v45 = vld [vmem:[%s16147_s24 + $0xaf0] sm:$0xff] }
  0xd2   : > { %13422 = vmatprep.subr.bf16.mxu1 %v13421_v52  ;;  %v13471_v52 = vpack.c.bf16 %v712_v42, %v711_v53  ;;  %v13473_v57 = vpack.c.bf16 %v730_v49, %v729_v48  ;;  %v690_v53 = vld [vmem:[%s16147_s24 + $0xa68] sm:$0xff]  ;;  %v739_v48 = vld [vmem:[%s16147_s24 + $0xbf0] sm:$0xff]  ;;  %v740_v49 = vld [vmem:[%s16147_s24 + $0xbf8] sm:$0xff] }
  0xd3   : > { %v777_v33 = vld [vmem:[%s16147_s24 + $0xd20] sm:$0xff] }
  0xd4   : > { %13392 = vmatpush3.bf16.msra.mxu0 %v13391_v60  ;;  %v699_v60 = vld [vmem:[%s16147_s24 + $0xab0] sm:$0xff] }
  0xd5   : > { %13424 = vmatpush3.bf16.msra.mxu1 %v13423_v61  ;;  %13394 = vmatprep.subr.bf16.mxu0 %v13393_v46  ;;  %v700_v61 = vld [vmem:[%s16147_s24 + $0xab8] sm:$0xff] }
  0xd6   : > { %13426 = vmatprep.subr.bf16.mxu1 %v13425_v1  ;;  %v732_v46 = vld [vmem:[%s16147_s24 + $0xbb8] sm:$0xff]  ;;  %v13445_v0 = vpack.c.bf16 %v700_v61, %v699_v60  ;;  %v683_v1 = vld [vmem:[%s16147_s24 + $0xa30] sm:$0xff]  ;;  %v757_v60 = vld [vmem:[%s16147_s24 + $0xc80] sm:$0xff] }
  0xd7   : > { %v758_v61 = vld [vmem:[%s16147_s24 + $0xc88] sm:$0xff] }
  0xd8   : > { %13396 = vmatpush3.bf16.msra.mxu0 %v13395_v7  ;;  %v702_v7 = vld [vmem:[%s16147_s24 + $0xac8] sm:$0xff] }
  0xd9   : > { %13428 = vmatpush3.bf16.msra.mxu1 %v13427_v9  ;;  %13398 = vmatprep.subr.bf16.mxu0 %v13397_v10  ;;  %v734_v9 = vld [vmem:[%s16147_s24 + $0xbc8] sm:$0xff]  ;;  %v13447_v10 = vpack.c.bf16 %v684_v2, %v683_v1  ;;  %v13449_v12 = vpack.c.bf16 %v702_v7, %v701_v6  ;;  %v13497_v1 = vpack.c.bf16 %v758_v61, %v757_v60  ;;  %v741_v2 = vld [vmem:[%s16147_s24 + $0xc00] sm:$0xff]  ;;  %v759_v7 = vld [vmem:[%s16147_s24 + $0xc90] sm:$0xff] }
  0xda   : > { %13430 = vmatprep.subr.bf16.mxu1 %v13429_v15  ;;  %v686_v15 = vld [vmem:[%s16147_s24 + $0xa48] sm:$0xff]  ;;  %v13481_v18 = vpack.c.bf16 %v734_v9, %v733_v8  ;;  %v760_v8 = vld [vmem:[%s16147_s24 + $0xc98] sm:$0xff] }
  0xdb   : > { %v774_v6 = vld [vmem:[%s16147_s24 + $0xd08] sm:$0xff] }
  0xdc   : > { %13400 = vmatpush3.bf16.msra.mxu0 %v13399_v22  ;;  %v736_v22 = vld [vmem:[%s16147_s24 + $0xbd8] sm:$0xff]  ;;  %v782_v61 = vld [vmem:[%s16147_s24 + $0xd48] sm:$0xff] }
  0xdd   : > { %13432 = vmatpush3.bf16.msra.mxu1 %v13431_v23  ;;  %13434 = vmatprep.subr.bf16.mxu0 %v13433_v24  ;;  %v13451_v23 = vpack.c.bf16 %v686_v15, %v685_v13  ;;  %v13483_v24 = vpack.c.bf16 %v718_v19, %v717_v17  ;;  %v13485_v29 = vpack.c.bf16 %v736_v22, %v735_v21  ;;  %v744_v19 = vld [vmem:[%s16147_s24 + $0xc18] sm:$0xff]  ;;  %v761_v22 = vld [vmem:[%s16147_s24 + $0xca0] sm:$0xff] }
  0xde   : > { %13466 = vmatprep.subr.bf16.mxu1 %v13465_v28  ;;  %v719_v28 = vld [vmem:[%s16147_s24 + $0xb50] sm:$0xff]  ;;  %v13499_v13 = vpack.c.bf16 %v742_v3, %v741_v2  ;;  %v13501_v17 = vpack.c.bf16 %v760_v8, %v759_v7  ;;  %v776_v21 = vld [vmem:[%s16147_s24 + $0xd18] sm:$0xff]  ;;  %v769_v8 = vld [vmem:[%s16147_s24 + $0xce0] sm:$0xff] }
  0xdf   : > { %4594 = vmatmul.mubr.f32.vlgmr.msra.gmra.mrb[8].mxu0 %v16470_v55  ;;  %v682_v55 = vld [vmem:[%s16147_s24 + $0xa28] sm:$0xff]  ;;  %v751_v3 = vld [vmem:[%s16147_s24 + $0xc50] sm:$0xff]  ;;  %v784_v7 = vld [vmem:[%s16147_s24 + $0xd58] sm:$0xff] }
  0xe0   : > { %13436 = vmatpush3.bf16.msra.mxu0 %v13435_v36  ;;  %4664 = vmatmul.mubr.f32.vlgmr.msra.gmra.mrb[8].mxu1 %v16475_v58  ;;  %v731_v58 = vld [vmem:[%s16147_s24 + $0xbb0] sm:$0xff]  ;;  %v13443_v62 = vpack.c.bf16 %v682_v55, %v681_v34  ;;  %v738_v36 = vld [vmem:[%s16147_s24 + $0xbe8] sm:$0xff]  ;;  %v692_v55 = vld [vmem:[%s16147_s24 + $0xa78] sm:$0xff] }
  0xe1   : > { %13468 = vmatpush3.bf16.msra.mxu1 %v13467_v37  ;;  %13438 = vmatprep.subr.bf16.mxu0 %v13437_v38  ;;  %v13477_v4 = vpack.c.bf16 %v732_v46, %v731_v58  ;;  %v13455_v37 = vpack.c.bf16 %v688_v27, %v687_v26  ;;  %v13487_v38 = vpack.c.bf16 %v720_v30, %v719_v28  ;;  %v691_v34 = vld [vmem:[%s16147_s24 + $0xa70] sm:$0xff]  ;;  %v789_v58 = vld [vmem:[%s16147_s24 + $0xd80] sm:$0xff]  ;;  %v790_v46 = vld [vmem:[%s16147_s24 + $0xd88] sm:$0xff] }
  0xe2   : > { %13470 = vmatprep.subr.bf16.mxu1 %v13469_v41  ;;  %4733 = vmatprep.mubr.f32.mxu0 %v3187_v47  ;;  %v721_v41 = vld [vmem:[%s16147_s24 + $0xb60] sm:$0xff]  ;;  %v13489_v42 = vpack.c.bf16 %v738_v36, %v737_v35  ;;  %v708_v47 = vld [vmem:[%s16147_s24 + $0xaf8] sm:$0xff]  ;;  %v13529_v5 = vpack.c.bf16 %v790_v46, %v789_v58  ;;  %v794_v26 = vld [vmem:[%s16147_s24 + $0xda8] sm:$0xff] }
  0xe3   : > { %4803 = vmatprep.mubr.f32.mxu1 %v3188_v50  ;;  %v13459_v50 = vpack.c.bf16 %v690_v53, %v689_v40  ;;  %v778_v36 = vld [vmem:[%s16147_s24 + $0xd28] sm:$0xff]  ;;  %v767_v58 = vld [vmem:[%s16147_s24 + $0xcd0] sm:$0xff]  ;;  %v768_v46 = vld [vmem:[%s16147_s24 + $0xcd8] sm:$0xff] }
  0xe4   : > { %13440 = vmatpush3.bf16.msra.mxu0 %v13439_v51  ;;  %v321_v51 = vld [vmem:[%s16157_s19 + $0x30] sm:$0xff]  ;;  %v13539_v53 = vpack.c.bf16 %v778_v36, %v777_v33  ;;  %v13517_v2 = vpack.c.bf16 %v768_v46, %v767_v58  ;;  %v788_v36 = vld [vmem:[%s16147_s24 + $0xd78] sm:$0xff] }
  0xe5   : > { %13472 = vmatpush3.bf16.msra.mxu1 %v13471_v52  ;;  %13442 = vmatprep.subr.bf16.mxu0 %v13441_v54  ;;  %v13491_v52 = vpack.c.bf16 %v722_v44, %v721_v41  ;;  %v13461_v54 = vpack.c.bf16 %v708_v47, %v707_v45  ;;  %v16624_v9 = vrot.slane %v321_v51, %v16210_v14  ;;  %v748_v44 = vld [vmem:[%s16147_s24 + $0xc38] sm:$0xff]  ;;  %v779_v45 = vld [vmem:[%s16147_s24 + $0xd30] sm:$0xff] }
  0xe6   : > { %13474 = vmatprep.subr.bf16.mxu1 %v13473_v57  ;;  %v13493_v57 = vpack.c.bf16 %v740_v49, %v739_v48  ;;  %v780_v48 = vld [vmem:[%s16147_s24 + $0xd38] sm:$0xff]  ;;  %v765_v49 = vld [vmem:[%s16147_s24 + $0xcc0] sm:$0xff]  ;;  %v787_v33 = vld [vmem:[%s16147_s24 + $0xd70] sm:$0xff] }
  0xe7   : > { %v839_v58 = vld [vmem:[%s16147_s24 + $0xf10] sm:$0xff] }
  0xe8   : > { %13444 = vmatpush3.bf16.msra.mxu0 %v13443_v62  ;;  %v3189_v62 = vcombine.high %v321_v51, %v321_v51  ;;  %v797_v51 = vld [vmem:[%s16147_s24 + $0xdc0] sm:$0xff] }
  0xe9   : > { %13476 = vmatpush3.bf16.msra.mxu1 %v13475_v63  ;;  %13446 = vmatprep.subr.bf16.mxu0 %v13445_v0  ;;  %v13463_v63 = vpack.c.bf16 %v692_v55, %v691_v34  ;;  %v13495_v0 = vpack.c.bf16 %v724_v59, %v723_v56  ;;  %v13543_v34 = vpack.c.bf16 %v780_v48, %v779_v45  ;;  %v749_v56 = vld [vmem:[%s16147_s24 + $0xc40] sm:$0xff]  ;;  %v806_v45 = vld [vmem:[%s16147_s24 + $0xe08] sm:$0xff] }
  0xea   : > { %13478 = vmatprep.subr.bf16.mxu1 %v13477_v4  ;;  %v773_v4 = vld [vmem:[%s16147_s24 + $0xd00] sm:$0xff] }
  0xeb   : > { %v13531_v15 = vpack.c.bf16 %v774_v6, %v773_v4  ;;  %v781_v59 = vld [vmem:[%s16147_s24 + $0xd40] sm:$0xff]  ;;  %v752_v4 = vld [vmem:[%s16147_s24 + $0xc58] sm:$0xff] }
  0xec   : > { %13448 = vmatpush3.bf16.msra.mxu0 %v13447_v10  ;;  %v791_v10 = vld [vmem:[%s16147_s24 + $0xd90] sm:$0xff] }
  0xed   : > { %13480 = vmatpush3.bf16.msra.mxu1 %v13479_v11  ;;  %13450 = vmatprep.subr.bf16.mxu0 %v13449_v12  ;;  %v792_v11 = vld [vmem:[%s16147_s24 + $0xd98] sm:$0xff]  ;;  %v16629_v12 = vrot.slane %v3189_v62, %v16210_v14  ;;  %v799_v62 = vld [vmem:[%s16147_s24 + $0xdd0] sm:$0xff] }
  0xee   : > { %13482 = vmatprep.subr.bf16.mxu1 %v13481_v18  ;;  %v743_v18 = vld [vmem:[%s16147_s24 + $0xc10] sm:$0xff]  ;;  %v13533_v20 = vpack.c.bf16 %v792_v11, %v791_v10  ;;  %v770_v10 = vld [vmem:[%s16147_s24 + $0xce8] sm:$0xff]  ;;  %v801_v11 = vld [vmem:[%s16147_s24 + $0xde0] sm:$0xff] }
  0xef   : > { %v3205_v27 = vcombine.high %v16629_v12, %v16629_v12  ;;  %v13503_v28 = vpack.c.bf16 %v744_v19, %v743_v18  ;;  %v13521_v18 = vpack.c.bf16 %v770_v10, %v769_v8  ;;  %v753_v19 = vld [vmem:[%s16147_s24 + $0xc60] sm:$0xff] }
  0xf0   : > { %13452 = vmatpush3.bf16.msra.mxu0 %v13451_v23  ;;  %v762_v23 = vld [vmem:[%s16147_s24 + $0xca8] sm:$0xff]  ;;  %v809_v8 = vld [vmem:[%s16147_s24 + $0xe20] sm:$0xff] }
  0xf1   : > { %13484 = vmatpush3.bf16.msra.mxu1 %v13483_v24  ;;  %13454 = vmatprep.subr.bf16.mxu0 %v13453_v25  ;;  %v3204_v24 = vcombine.high %v16624_v9, %v16624_v9  ;;  %v793_v25 = vld [vmem:[%s16147_s24 + $0xda0] sm:$0xff]  ;;  %v13505_v30 = vpack.c.bf16 %v762_v23, %v761_v22  ;;  %v786_v22 = vld [vmem:[%s16147_s24 + $0xd68] sm:$0xff]  ;;  %v771_v23 = vld [vmem:[%s16147_s24 + $0xcf0] sm:$0xff] }
  0xf2   : > { %13486 = vmatprep.subr.bf16.mxu1 %v13485_v29  ;;  %v13535_v29 = vpack.c.bf16 %v776_v21, %v775_v16  ;;  %v13537_v35 = vpack.c.bf16 %v794_v26, %v793_v25  ;;  %v754_v16 = vld [vmem:[%s16147_s24 + $0xc68] sm:$0xff]  ;;  %v803_v25 = vld [vmem:[%s16147_s24 + $0xdf0] sm:$0xff]  ;;  %v804_v26 = vld [vmem:[%s16147_s24 + $0xdf8] sm:$0xff] }
  0xf3   : > { %v841_v10 = vld [vmem:[%s16147_s24 + $0xf20] sm:$0xff] }
  0xf4   : > { %13456 = vmatpush3.bf16.msra.mxu0 %v13455_v37  ;;  %v763_v37 = vld [vmem:[%s16147_s24 + $0xcb0] sm:$0xff] }
  0xf5   : > { %13488 = vmatpush3.bf16.msra.mxu1 %v13487_v38  ;;  %13458 = vmatprep.subr.bf16.mxu0 %v13457_v39  ;;  %v764_v38 = vld [vmem:[%s16147_s24 + $0xcb8] sm:$0xff] }
  0xf6   : > { %13490 = vmatprep.subr.bf16.mxu1 %v13489_v42  ;;  %v796_v39 = vld [vmem:[%s16147_s24 + $0xdb8] sm:$0xff]  ;;  %v13509_v41 = vpack.c.bf16 %v764_v38, %v763_v37  ;;  %v747_v42 = vld [vmem:[%s16147_s24 + $0xc30] sm:$0xff]  ;;  %v821_v37 = vld [vmem:[%s16147_s24 + $0xe80] sm:$0xff] }
  0xf7   : > { %v822_v38 = vld [vmem:[%s16147_s24 + $0xe88] sm:$0xff] }
  0xf8   : > { %13460 = vmatpush3.bf16.msra.mxu0 %v13459_v50  ;;  %v766_v50 = vld [vmem:[%s16147_s24 + $0xcc8] sm:$0xff] }
  0xf9   : > { %13492 = vmatpush3.bf16.msra.mxu1 %v13491_v52  ;;  %13462 = vmatprep.subr.bf16.mxu0 %v13461_v54  ;;  %v798_v52 = vld [vmem:[%s16147_s24 + $0xdc8] sm:$0xff]  ;;  %v13511_v54 = vpack.c.bf16 %v748_v44, %v747_v42  ;;  %v13513_v55 = vpack.c.bf16 %v766_v50, %v765_v49  ;;  %v13561_v42 = vpack.c.bf16 %v822_v38, %v821_v37  ;;  %v805_v44 = vld [vmem:[%s16147_s24 + $0xe00] sm:$0xff]  ;;  %v823_v50 = vld [vmem:[%s16147_s24 + $0xe90] sm:$0xff] }
  0xfa   : > { %13494 = vmatprep.subr.bf16.mxu1 %v13493_v57  ;;  %v750_v57 = vld [vmem:[%s16147_s24 + $0xc48] sm:$0xff]  ;;  %v13545_v60 = vpack.c.bf16 %v798_v52, %v797_v51  ;;  %v824_v51 = vld [vmem:[%s16147_s24 + $0xe98] sm:$0xff] }
  0xfb   : > { %v838_v49 = vld [vmem:[%s16147_s24 + $0xf08] sm:$0xff] }
  0xfc   : > { %13464 = vmatpush3.bf16.msra.mxu0 %v13463_v63  ;;  %v800_v63 = vld [vmem:[%s16147_s24 + $0xdd8] sm:$0xff]  ;;  %v846_v38 = vld [vmem:[%s16147_s24 + $0xf48] sm:$0xff] }
  0xfd   : > { %13496 = vmatpush3.bf16.msra.mxu1 %v13495_v0  ;;  %13498 = vmatprep.subr.bf16.mxu0 %v13497_v1  ;;  %v13515_v0 = vpack.c.bf16 %v750_v57, %v749_v56  ;;  %v13547_v1 = vpack.c.bf16 %v782_v61, %v781_v59  ;;  %v13549_v6 = vpack.c.bf16 %v800_v63, %v799_v62  ;;  %v808_v61 = vld [vmem:[%s16147_s24 + $0xe18] sm:$0xff]  ;;  %v825_v63 = vld [vmem:[%s16147_s24 + $0xea0] sm:$0xff] }
  0xfe   : > { %13530 = vmatprep.subr.bf16.mxu1 %v13529_v5  ;;  %v783_v5 = vld [vmem:[%s16147_s24 + $0xd50] sm:$0xff]  ;;  %v13563_v56 = vpack.c.bf16 %v806_v45, %v805_v44  ;;  %v13565_v59 = vpack.c.bf16 %v824_v51, %v823_v50  ;;  %v840_v62 = vld [vmem:[%s16147_s24 + $0xf18] sm:$0xff]  ;;  %v833_v51 = vld [vmem:[%s16147_s24 + $0xee0] sm:$0xff] }
  0xff   : > { %4734 = vmatmul.mubr.f32.vlgmr.msra.gmra.mrb[10].mxu0 %v16547_v32  ;;  %v746_v32 = vld [vmem:[%s16147_s24 + $0xc28] sm:$0xff]  ;;  %v815_v45 = vld [vmem:[%s16147_s24 + $0xe50] sm:$0xff]  ;;  %v848_v50 = vld [vmem:[%s16147_s24 + $0xf58] sm:$0xff] }
 0x100   : > { %13500 = vmatpush3.bf16.msra.mxu0 %v13499_v13  ;;  %4804 = vmatmul.mubr.f32.vlgmr.msra.gmra.mrb[10].mxu1 %v16552_v43  ;;  %v795_v43 = vld [vmem:[%s16147_s24 + $0xdb0] sm:$0xff]  ;;  %v13507_v40 = vpack.c.bf16 %v746_v32, %v745_v31  ;;  %v802_v13 = vld [vmem:[%s16147_s24 + $0xde8] sm:$0xff]  ;;  %v756_v32 = vld [vmem:[%s16147_s24 + $0xc78] sm:$0xff] }
 0x101   : > { %13532 = vmatpush3.bf16.msra.mxu1 %v13531_v15  ;;  %13502 = vmatprep.subr.bf16.mxu0 %v13501_v17  ;;  %v13541_v47 = vpack.c.bf16 %v796_v39, %v795_v43  ;;  %v13519_v15 = vpack.c.bf16 %v752_v4, %v751_v3  ;;  %v13551_v17 = vpack.c.bf16 %v784_v7, %v783_v5  ;;  %v755_v31 = vld [vmem:[%s16147_s24 + $0xc70] sm:$0xff]  ;;  %v853_v43 = vld [vmem:[%s16147_s24 + $0xf80] sm:$0xff]  ;;  %v854_v39 = vld [vmem:[%s16147_s24 + $0xf88] sm:$0xff] }
 0x102   : > { %13534 = vmatprep.subr.bf16.mxu1 %v13533_v20  ;;  %4873 = vmatprep.mubr.f32.mxu0 %v3204_v24  ;;  %v785_v20 = vld [vmem:[%s16147_s24 + $0xd60] sm:$0xff]  ;;  %v13553_v21 = vpack.c.bf16 %v802_v13, %v801_v11  ;;  %v772_v24 = vld [vmem:[%s16147_s24 + $0xcf8] sm:$0xff]  ;;  %v13593_v48 = vpack.c.bf16 %v854_v39, %v853_v43  ;;  %v858_v3 = vld [vmem:[%s16147_s24 + $0xfa8] sm:$0xff] }
 0x103   : > { %4943 = vmatprep.mubr.f32.mxu1 %v3205_v27  ;;  %v13523_v27 = vpack.c.bf16 %v754_v16, %v753_v19  ;;  %v842_v13 = vld [vmem:[%s16147_s24 + $0xf28] sm:$0xff]  ;;  %v831_v43 = vld [vmem:[%s16147_s24 + $0xed0] sm:$0xff]  ;;  %v832_v39 = vld [vmem:[%s16147_s24 + $0xed8] sm:$0xff] }
 0x104   : > { %13504 = vmatpush3.bf16.msra.mxu0 %v13503_v28  ;;  %v322_v28 = vld [vmem:[%s16157_s19 + $0x38] sm:$0xff]  ;;  %v13603_v16 = vpack.c.bf16 %v842_v13, %v841_v10  ;;  %v13581_v44 = vpack.c.bf16 %v832_v39, %v831_v43  ;;  %v323_v10 = vld [vmem:[%s16157_s19 + $0x40] sm:$0xff] }
 0x105   : > { %13536 = vmatpush3.bf16.msra.mxu1 %v13535_v29  ;;  %13506 = vmatprep.subr.bf16.mxu0 %v13505_v30  ;;  %v13555_v29 = vpack.c.bf16 %v786_v22, %v785_v20  ;;  %v13525_v30 = vpack.c.bf16 %v772_v24, %v771_v23  ;;  %v16701_v52 = vrot.slane %v322_v28, %v16210_v14  ;;  %v812_v22 = vld [vmem:[%s16147_s24 + $0xe38] sm:$0xff]  ;;  %v843_v23 = vld [vmem:[%s16147_s24 + $0xf30] sm:$0xff] }
 0x106   : > { %13538 = vmatprep.subr.bf16.mxu1 %v13537_v35  ;;  %v13557_v35 = vpack.c.bf16 %v804_v26, %v803_v25  ;;  %v844_v25 = vld [vmem:[%s16147_s24 + $0xf38] sm:$0xff]  ;;  %v829_v26 = vld [vmem:[%s16147_s24 + $0xec0] sm:$0xff] }
 0x107   : > { %v920_v43 = vld [vmem:[%s16147_s24 + $0x1198] sm:$0xff] }
 0x108   : > { %13508 = vmatpush3.bf16.msra.mxu0 %v13507_v40  ;;  %v3206_v40 = vcombine.high %v322_v28, %v322_v28  ;;  %v861_v28 = vld [vmem:[%s16147_s24 + $0xfc0] sm:$0xff] }
 0x109   : > { %13540 = vmatpush3.bf16.msra.mxu1 %v13539_v53  ;;  %13510 = vmatprep.subr.bf16.mxu0 %v13509_v41  ;;  %v13527_v53 = vpack.c.bf16 %v756_v32, %v755_v31  ;;  %v13559_v41 = vpack.c.bf16 %v788_v36, %v787_v33  ;;  %v13607_v31 = vpack.c.bf16 %v844_v25, %v843_v23  ;;  %v813_v33 = vld [vmem:[%s16147_s24 + $0xe40] sm:$0xff] }
 0x10a   : > { %13542 = vmatprep.subr.bf16.mxu1 %v13541_v47  ;;  %v837_v47 = vld [vmem:[%s16147_s24 + $0xf00] sm:$0xff]  ;;  %v3223_v25 = vcombine.high %v323_v10, %v323_v10 }
 0x10b   : > { %v13595_v57 = vpack.c.bf16 %v838_v49, %v837_v47  ;;  %v845_v36 = vld [vmem:[%s16147_s24 + $0xf40] sm:$0xff]  ;;  %v816_v47 = vld [vmem:[%s16147_s24 + $0xe58] sm:$0xff] }
 0x10c   : > { %13512 = vmatpush3.bf16.msra.mxu0 %v13511_v54  ;;  %v855_v54 = vld [vmem:[%s16147_s24 + $0xf90] sm:$0xff]  ;;  %v917_v23 = vld [vmem:[%s16147_s24 + $0x1180] sm:$0xff]  ;;  %v16785_v39 = vrot.slane %v3223_v25, %v16210_v14  ;;  %v896_v25 = vld [vmem:[%s16147_s24 + $0x10d8] sm:$0xff] }
 0x10d   : > { %13544 = vmatpush3.bf16.msra.mxu1 %v13543_v34  ;;  %13514 = vmatprep.subr.bf16.mxu0 %v13513_v55  ;;  %v856_v34 = vld [vmem:[%s16147_s24 + $0xf98] sm:$0xff]  ;;  %v16706_v55 = vrot.slane %v3206_v40, %v16210_v14  ;;  %v863_v40 = vld [vmem:[%s16147_s24 + $0xfd0] sm:$0xff] }
 0x10e   : > { %13546 = vmatprep.subr.bf16.mxu1 %v13545_v60  ;;  %v807_v60 = vld [vmem:[%s16147_s24 + $0xe10] sm:$0xff]  ;;  %v13597_v46 = vpack.c.bf16 %v856_v34, %v855_v54  ;;  %v834_v54 = vld [vmem:[%s16147_s24 + $0xee8] sm:$0xff]  ;;  %v865_v34 = vld [vmem:[%s16147_s24 + $0xfe0] sm:$0xff] }
 0x10f   : > { %v3222_v4 = vcombine.high %v16706_v55, %v16706_v55  ;;  %v13567_v5 = vpack.c.bf16 %v808_v61, %v807_v60  ;;  %v13585_v60 = vpack.c.bf16 %v834_v54, %v833_v51  ;;  %v817_v61 = vld [vmem:[%s16147_s24 + $0xe60] sm:$0xff] }
 0x110   : > { %13516 = vmatpush3.bf16.msra.mxu0 %v13515_v0  ;;  %v826_v0 = vld [vmem:[%s16147_s24 + $0xea8] sm:$0xff]  ;;  %v921_v54 = vld [vmem:[%s16147_s24 + $0x11a0] sm:$0xff] }
 0x111   : > { %13548 = vmatpush3.bf16.msra.mxu1 %v13547_v1  ;;  %13518 = vmatprep.subr.bf16.mxu0 %v13517_v2  ;;  %v3221_v1 = vcombine.high %v16701_v52, %v16701_v52  ;;  %v857_v2 = vld [vmem:[%s16147_s24 + $0xfa0] sm:$0xff]  ;;  %v13569_v7 = vpack.c.bf16 %v826_v0, %v825_v63  ;;  %v850_v0 = vld [vmem:[%s16147_s24 + $0xf68] sm:$0xff] }
 0x112   : > { %13550 = vmatprep.subr.bf16.mxu1 %v13549_v6  ;;  %v13599_v6 = vpack.c.bf16 %v840_v62, %v839_v58  ;;  %v13601_v11 = vpack.c.bf16 %v858_v3, %v857_v2  ;;  %v818_v58 = vld [vmem:[%s16147_s24 + $0xe68] sm:$0xff]  ;;  %v836_v2 = vld [vmem:[%s16147_s24 + $0xef8] sm:$0xff] }
 0x114   : > { %13520 = vmatpush3.bf16.msra.mxu0 %v13519_v15  ;;  %v827_v15 = vld [vmem:[%s16147_s24 + $0xeb0] sm:$0xff] }
 0x115   : > { %13552 = vmatpush3.bf16.msra.mxu1 %v13551_v17  ;;  %13522 = vmatprep.subr.bf16.mxu0 %v13521_v18  ;;  %v828_v17 = vld [vmem:[%s16147_s24 + $0xeb8] sm:$0xff] }
 0x116   : > { %13554 = vmatprep.subr.bf16.mxu1 %v13553_v21  ;;  %v860_v18 = vld [vmem:[%s16147_s24 + $0xfb8] sm:$0xff]  ;;  %v13573_v20 = vpack.c.bf16 %v828_v17, %v827_v15  ;;  %v811_v21 = vld [vmem:[%s16147_s24 + $0xe30] sm:$0xff] }
 0x117   : > { %v819_v17 = vld [vmem:[%s16147_s24 + $0xe70] sm:$0xff] }
 0x118   : > { %13524 = vmatpush3.bf16.msra.mxu0 %v13523_v27  ;;  %v830_v27 = vld [vmem:[%s16147_s24 + $0xec8] sm:$0xff] }
 0x119   : > { %13556 = vmatpush3.bf16.msra.mxu1 %v13555_v29  ;;  %13526 = vmatprep.subr.bf16.mxu0 %v13525_v30  ;;  %v862_v29 = vld [vmem:[%s16147_s24 + $0xfc8] sm:$0xff]  ;;  %v13575_v30 = vpack.c.bf16 %v812_v22, %v811_v21  ;;  %v13577_v32 = vpack.c.bf16 %v830_v27, %v829_v26 }
 0x11a   : > { %13558 = vmatprep.subr.bf16.mxu1 %v13557_v35  ;;  %v814_v35 = vld [vmem:[%s16147_s24 + $0xe48] sm:$0xff]  ;;  %v13609_v37 = vpack.c.bf16 %v862_v29, %v861_v28  ;;  %v869_v29 = vld [vmem:[%s16147_s24 + $0x1000] sm:$0xff] }
 0x11b   : > { %v886_v21 = vld [vmem:[%s16147_s24 + $0x1088] sm:$0xff] }
 0x11c   : > { %13528 = vmatpush3.bf16.msra.mxu0 %v13527_v53  ;;  %v864_v53 = vld [vmem:[%s16147_s24 + $0xfd8] sm:$0xff] }
 0x11d   : > { %13560 = vmatpush3.bf16.msra.mxu1 %v13559_v41  ;;  %13562 = vmatprep.subr.bf16.mxu0 %v13561_v42  ;;  %v13579_v41 = vpack.c.bf16 %v814_v35, %v813_v33  ;;  %v13611_v42 = vpack.c.bf16 %v846_v38, %v845_v36  ;;  %v13613_v49 = vpack.c.bf16 %v864_v53, %v863_v40  ;;  %v902_v33 = vld [vmem:[%s16147_s24 + $0x1108] sm:$0xff]  ;;  %v887_v35 = vld [vmem:[%s16147_s24 + $0x1090] sm:$0xff]  ;;  %v888_v36 = vld [vmem:[%s16147_s24 + $0x1098] sm:$0xff] }
 0x11e   : > { %13594 = vmatprep.subr.bf16.mxu1 %v13593_v48  ;;  %v847_v48 = vld [vmem:[%s16147_s24 + $0xf50] sm:$0xff] }
 0x11f   : > { %4874 = vmatmul.mubr.f32.vlgmr.msra.gmra.mrb[12].mxu0 %v16624_v9  ;;  %v810_v9 = vld [vmem:[%s16147_s24 + $0xe28] sm:$0xff]  ;;  %v919_v38 = vld [vmem:[%s16147_s24 + $0x1190] sm:$0xff] }
 0x120   : > { %13564 = vmatpush3.bf16.msra.mxu0 %v13563_v56  ;;  %4944 = vmatmul.mubr.f32.vlgmr.msra.gmra.mrb[12].mxu1 %v16629_v12  ;;  %v859_v12 = vld [vmem:[%s16147_s24 + $0xfb0] sm:$0xff]  ;;  %v13571_v19 = vpack.c.bf16 %v810_v9, %v809_v8  ;;  %v866_v56 = vld [vmem:[%s16147_s24 + $0xfe8] sm:$0xff]  ;;  %v13587_v9 = vpack.c.bf16 %v818_v58, %v817_v61  ;;  %v873_v61 = vld [vmem:[%s16147_s24 + $0x1020] sm:$0xff] }
 0x121   : > { %13596 = vmatpush3.bf16.msra.mxu1 %v13595_v57  ;;  %13566 = vmatprep.subr.bf16.mxu0 %v13565_v59  ;;  %v13605_v24 = vpack.c.bf16 %v860_v18, %v859_v12  ;;  %v13583_v57 = vpack.c.bf16 %v816_v47, %v815_v45  ;;  %v13615_v59 = vpack.c.bf16 %v848_v50, %v847_v48  ;;  %v820_v12 = vld [vmem:[%s16147_s24 + $0xe78] sm:$0xff]  ;;  %v851_v18 = vld [vmem:[%s16147_s24 + $0xf70] sm:$0xff]  ;;  %v890_v50 = vld [vmem:[%s16147_s24 + $0x10a8] sm:$0xff] }
 0x122   : > { %13598 = vmatprep.subr.bf16.mxu1 %v13597_v46  ;;  %5013 = vmatprep.mubr.f32.mxu0 %v3221_v1  ;;  %v849_v46 = vld [vmem:[%s16147_s24 + $0xf60] sm:$0xff]  ;;  %v13617_v63 = vpack.c.bf16 %v866_v56, %v865_v34  ;;  %v835_v1 = vld [vmem:[%s16147_s24 + $0xef0] sm:$0xff]  ;;  %v13591_v26 = vpack.c.bf16 %v820_v12, %v819_v17  ;;  %v13661_v47 = vpack.c.bf16 %v920_v43, %v919_v38  ;;  %v904_v48 = vld [vmem:[%s16147_s24 + $0x1118] sm:$0xff] }
 0x123   : > { %5083 = vmatprep.mubr.f32.mxu1 %v3222_v4  ;;  %v13619_v13 = vpack.c.bf16 %v850_v0, %v849_v46  ;;  %v13589_v15 = vpack.c.bf16 %v836_v2, %v835_v1  ;;  %v903_v45 = vld [vmem:[%s16147_s24 + $0x1110] sm:$0xff]  ;;  %v922_v34 = vld [vmem:[%s16147_s24 + $0x11a8] sm:$0xff]  ;;  %v3239_v56 = vcombine.high %v16785_v39, %v16785_v39  ;;  %v905_v58 = vld [vmem:[%s16147_s24 + $0x1120] sm:$0xff] }
 0x124   : > { %13568 = vmatpush3.bf16.msra.mxu0 %v13567_v5  ;;  %v867_v5 = vld [vmem:[%s16147_s24 + $0xff0] sm:$0xff]  ;;  %v13665_v46 = vpack.c.bf16 %v922_v34, %v921_v54  ;;  %v892_v0 = vld [vmem:[%s16147_s24 + $0x10b8] sm:$0xff]  ;;  %v897_v38 = vld [vmem:[%s16147_s24 + $0x10e0] sm:$0xff] }
 0x125   : > { %13600 = vmatpush3.bf16.msra.mxu1 %v13599_v6  ;;  %13570 = vmatprep.subr.bf16.mxu0 %v13569_v7  ;;  %v868_v6 = vld [vmem:[%s16147_s24 + $0xff8] sm:$0xff]  ;;  %v898_v43 = vld [vmem:[%s16147_s24 + $0x10e8] sm:$0xff]  ;;  %v899_v54 = vld [vmem:[%s16147_s24 + $0x10f0] sm:$0xff] }
 0x126   : > { %13602 = vmatprep.subr.bf16.mxu1 %v13601_v11  ;;  %v924_v1 = vld [vmem:[%s16147_s24 + $0x11b8] sm:$0xff] }
 0x127   : > { %v900_v34 = vld [vmem:[%s16147_s24 + $0x10f8] sm:$0xff] }
 0x128   : > { %13572 = vmatpush3.bf16.msra.mxu0 %v13571_v19  ;;  %v13621_v19 = vpack.c.bf16 %v868_v6, %v867_v5  ;;  %v875_v5 = vld [vmem:[%s16147_s24 + $0x1030] sm:$0xff]  ;;  %v876_v6 = vld [vmem:[%s16147_s24 + $0x1038] sm:$0xff] }
 0x129   : > { %13604 = vmatpush3.bf16.msra.mxu1 %v13603_v16  ;;  %13574 = vmatprep.subr.bf16.mxu0 %v13573_v20  ;;  %v852_v16 = vld [vmem:[%s16147_s24 + $0xf78] sm:$0xff]  ;;  %v885_v20 = vld [vmem:[%s16147_s24 + $0x1080] sm:$0xff]  ;;  %v13639_v17 = vpack.c.bf16 %v876_v6, %v875_v5 }
 0x12a   : > { %13606 = vmatprep.subr.bf16.mxu1 %v13605_v24  ;;  %v918_v24 = vld [vmem:[%s16147_s24 + $0x1188] sm:$0xff]  ;;  %v13623_v27 = vpack.c.bf16 %v852_v16, %v851_v18  ;;  %v13625_v28 = vpack.c.bf16 %v886_v21, %v885_v20  ;;  %v909_v20 = vld [vmem:[%s16147_s24 + $0x1140] sm:$0xff]  ;;  %v916_v5 = vld [vmem:[%s16147_s24 + $0x1178] sm:$0xff] }
 0x12b   : > { %v878_v16 = vld [vmem:[%s16147_s24 + $0x1048] sm:$0xff]  ;;  %v949_v6 = vld [vmem:[%s16147_s24 + $0x1280] sm:$0xff] }
 0x12c   : > { %13576 = vmatpush3.bf16.msra.mxu0 %v13575_v30  ;;  %v870_v30 = vld [vmem:[%s16147_s24 + $0x1008] sm:$0xff] }
 0x12d   : > { %13608 = vmatpush3.bf16.msra.mxu1 %v13607_v31  ;;  %13578 = vmatprep.subr.bf16.mxu0 %v13577_v32  ;;  %v901_v31 = vld [vmem:[%s16147_s24 + $0x1100] sm:$0xff]  ;;  %v13657_v32 = vpack.c.bf16 %v918_v24, %v917_v23  ;;  %v13627_v40 = vpack.c.bf16 %v870_v30, %v869_v29  ;;  %v910_v23 = vld [vmem:[%s16147_s24 + $0x1148] sm:$0xff]  ;;  %v895_v24 = vld [vmem:[%s16147_s24 + $0x10d0] sm:$0xff] }
 0x12e   : > { %13610 = vmatprep.subr.bf16.mxu1 %v13609_v37  ;;  %v16780_v37 = vrot.slane %v323_v10, %v16210_v14  ;;  %v13659_v53 = vpack.c.bf16 %v902_v33, %v901_v31  ;;  %v893_v10 = vld [vmem:[%s16147_s24 + $0x10c0] sm:$0xff]  ;;  %v13675_v29 = vpack.c.bf16 %v910_v23, %v909_v20  ;;  %v13645_v30 = vpack.c.bf16 %v896_v25, %v895_v24  ;;  %v879_v31 = vld [vmem:[%s16147_s24 + $0x1050] sm:$0xff]  ;;  %v984_v25 = vld [vmem:[%s16147_s24 + $0x1398] sm:$0xff] }
 0x12f   : > { %v911_v33 = vld [vmem:[%s16147_s24 + $0x1150] sm:$0xff] }
 0x130   : > { %13580 = vmatpush3.bf16.msra.mxu0 %v13579_v41  ;;  %v13629_v41 = vpack.c.bf16 %v888_v36, %v887_v35  ;;  %v3238_v51 = vcombine.high %v16780_v37, %v16780_v37  ;;  %v912_v36 = vld [vmem:[%s16147_s24 + $0x1158] sm:$0xff]  ;;  %v951_v20 = vld [vmem:[%s16147_s24 + $0x1290] sm:$0xff] }
 0x131   : > { %13612 = vmatpush3.bf16.msra.mxu1 %v13611_v42  ;;  %13582 = vmatprep.subr.bf16.mxu0 %v13581_v44  ;;  %v871_v42 = vld [vmem:[%s16147_s24 + $0x1010] sm:$0xff]  ;;  %v872_v44 = vld [vmem:[%s16147_s24 + $0x1018] sm:$0xff] }
 0x132   : > { %v10161_v62 = vpop.f32.mrb[0].mxu0  ;;  %13614 = vmatprep.subr.bf16.mxu1 %v13613_v49  ;;  %v889_v49 = vld [vmem:[%s16147_s24 + $0x10a0] sm:$0xff]  ;;  %v983_v24 = vld [vmem:[%s16147_s24 + $0x1390] sm:$0xff] }
 0x133   : > { %v10196_v3 = vpop.f32.mrb[0].mxu1  ;;  %v10162_v4 = vpop.f32.mrb[1].mxu0 }
 0x134   : > { %v10163_v7 = vadd.f32 %v10162_v4, %v10161_v62  ;;  %v10197_v8 = vpop.f32.mrb[1].mxu1  ;;  %13584 = vmatpush3.bf16.msra.mxu0 %v13583_v57  ;;  %v13631_v57 = vpack.c.bf16 %v872_v44, %v871_v42  ;;  %v906_v62 = vld [vmem:[%s16147_s24 + $0x1128] sm:$0xff]  ;;  %v13679_v42 = vpack.c.bf16 %v912_v36, %v911_v33  ;;  %v13649_v44 = vpack.c.bf16 %v898_v43, %v897_v38  ;;  %v953_v36 = vld [vmem:[%s16147_s24 + $0x12a0] sm:$0xff] }
 0x135   : > { %v10198_v11 = vadd.f32 %v10197_v8, %v10196_v3  ;;  %13616 = vmatpush3.bf16.msra.mxu1 %v13615_v59  ;;  %13586 = vmatprep.subr.bf16.mxu0 %v13585_v60  ;;  %v13663_v59 = vpack.c.bf16 %v904_v48, %v903_v45  ;;  %v13633_v60 = vpack.c.bf16 %v890_v50, %v889_v49  ;;  %v881_v45 = vld [vmem:[%s16147_s24 + $0x1060] sm:$0xff]  ;;  %v954_v38 = vld [vmem:[%s16147_s24 + $0x12a8] sm:$0xff] }
 0x136   : > { %13618 = vmatprep.subr.bf16.mxu1 %v13617_v63  ;;  %v891_v63 = vld [vmem:[%s16147_s24 + $0x10b0] sm:$0xff]  ;;  %v13667_v3 = vpack.c.bf16 %v906_v62, %v905_v58  ;;  %v913_v48 = vld [vmem:[%s16147_s24 + $0x1160] sm:$0xff]  ;;  %v13725_v33 = vpack.c.bf16 %v984_v25, %v983_v24  ;;  %v962_v25 = vld [vmem:[%s16147_s24 + $0x12e8] sm:$0xff] }
 0x137   : > { %v16769_v22 = vadd.f32 %v10198_v11, %v10163_v7  ;;  %v13637_v4 = vpack.c.bf16 %v892_v0, %v891_v63  ;;  %v907_v7 = vld [vmem:[%s16147_s24 + $0x1130] sm:$0xff]  ;;  %v894_v11 = vld [vmem:[%s16147_s24 + $0x10c8] sm:$0xff]  ;;  %v13653_v0 = vpack.c.bf16 %v900_v34, %v899_v54  ;;  %v956_v54 = vld [vmem:[%s16147_s24 + $0x12b8] sm:$0xff] }
 0x138   : > { %13588 = vmatpush3.bf16.msra.mxu0 %v13587_v9  ;;  %v908_v9 = vld [vmem:[%s16147_s24 + $0x1138] sm:$0xff]  ;;  %v13641_v18 = vpack.c.bf16 %v894_v11, %v893_v10  ;;  %v961_v24 = vld [vmem:[%s16147_s24 + $0x12e0] sm:$0xff] }
 0x139   : > { %13620 = vmatpush3.bf16.msra.mxu1 %v13619_v13  ;;  %13590 = vmatprep.subr.bf16.mxu0 %v13589_v15  ;;  %v925_v13 = vld [vmem:[%s16147_s24 + $0x11c0] sm:$0xff]  ;;  %v926_v15 = vld [vmem:[%s16147_s24 + $0x11c8] sm:$0xff]  ;;  %v13671_v12 = vpack.c.bf16 %v908_v9, %v907_v7  ;;  %v988_v34 = vld [vmem:[%s16147_s24 + $0x13b8] sm:$0xff] }
 0x13a   : > { %13622 = vmatprep.subr.bf16.mxu1 %v13621_v19  ;;  %v877_v19 = vld [vmem:[%s16147_s24 + $0x1040] sm:$0xff]  ;;  %v13673_v21 = vpack.c.bf16 %v926_v15, %v925_v13  ;;  %v950_v7 = vld [vmem:[%s16147_s24 + $0x1288] sm:$0xff] }
 0x13b   : > { %v982_v9 = vld [vmem:[%s16147_s24 + $0x1388] sm:$0xff]  ;;  %v13689_v15 = vpack.c.bf16 %v950_v7, %v949_v6  ;;  %v973_v6 = vld [vmem:[%s16147_s24 + $0x1340] sm:$0xff] }
 0x13c   : > { %13592 = vmatpush3.bf16.msra.mxu0 %v13591_v26  ;;  %v927_v26 = vld [vmem:[%s16147_s24 + $0x11d0] sm:$0xff] }
 0x13d   : > { %13624 = vmatpush3.bf16.msra.mxu1 %v13623_v27  ;;  %13626 = vmatprep.subr.bf16.mxu0 %v13625_v28  ;;  %v928_v27 = vld [vmem:[%s16147_s24 + $0x11d8] sm:$0xff]  ;;  %v13643_v28 = vpack.c.bf16 %v878_v16, %v877_v19  ;;  %v966_v16 = vld [vmem:[%s16147_s24 + $0x1308] sm:$0xff] }
 0x13e   : > { %13658 = vmatprep.subr.bf16.mxu1 %v13657_v32  ;;  %v880_v32 = vld [vmem:[%s16147_s24 + $0x1058] sm:$0xff]  ;;  %v13677_v35 = vpack.c.bf16 %v928_v27, %v927_v26 }
 0x13f   : > { %5014 = vmatmul.mubr.f32.vlgmr.msra.gmra.mrb[14].mxu0 %v16701_v52  ;;  %v874_v52 = vld [vmem:[%s16147_s24 + $0x1028] sm:$0xff] }
 0x140   : > { %13628 = vmatpush3.bf16.msra.mxu0 %v13627_v40  ;;  %5084 = vmatmul.mubr.f32.vlgmr.msra.gmra.mrb[14].mxu1 %v16706_v55  ;;  %v923_v55 = vld [vmem:[%s16147_s24 + $0x11b0] sm:$0xff]  ;;  %v13635_v2 = vpack.c.bf16 %v874_v52, %v873_v61  ;;  %v929_v40 = vld [vmem:[%s16147_s24 + $0x11e0] sm:$0xff] }
 0x141   : > { %13660 = vmatpush3.bf16.msra.mxu1 %v13659_v53  ;;  %13630 = vmatprep.subr.bf16.mxu0 %v13629_v41  ;;  %v13669_v8 = vpack.c.bf16 %v924_v1, %v923_v55  ;;  %v930_v53 = vld [vmem:[%s16147_s24 + $0x11e8] sm:$0xff]  ;;  %v13647_v41 = vpack.c.bf16 %v880_v32, %v879_v31  ;;  %v883_v55 = vld [vmem:[%s16147_s24 + $0x1070] sm:$0xff]  ;;  %v884_v1 = vld [vmem:[%s16147_s24 + $0x1078] sm:$0xff] }
 0x142   : > { %13662 = vmatprep.subr.bf16.mxu1 %v13661_v47  ;;  %5153 = vmatprep.mubr.f32.mxu0 %v3238_v51  ;;  %v882_v47 = vld [vmem:[%s16147_s24 + $0x1068] sm:$0xff]  ;;  %v13681_v50 = vpack.c.bf16 %v930_v53, %v929_v40  ;;  %v936_v31 = vld [vmem:[%s16147_s24 + $0x1218] sm:$0xff]  ;;  %v967_v32 = vld [vmem:[%s16147_s24 + $0x1310] sm:$0xff] }
 0x143   : > { %5223 = vmatprep.mubr.f32.mxu1 %v3239_v56  ;;  %v914_v51 = vld [vmem:[%s16147_s24 + $0x1168] sm:$0xff]  ;;  %v13651_v58 = vpack.c.bf16 %v882_v47, %v881_v45  ;;  %v985_v40 = vld [vmem:[%s16147_s24 + $0x13a0] sm:$0xff]  ;;  %v13697_v45 = vpack.c.bf16 %v954_v38, %v953_v36 }
 0x144   : > { %13632 = vmatpush3.bf16.msra.mxu0 %v13631_v57  ;;  %v13683_v63 = vpack.c.bf16 %v914_v51, %v913_v48  ;;  %v986_v53 = vld [vmem:[%s16147_s24 + $0x13a8] sm:$0xff]  ;;  %v937_v47 = vld [vmem:[%s16147_s24 + $0x1220] sm:$0xff]  ;;  %v955_v51 = vld [vmem:[%s16147_s24 + $0x12b0] sm:$0xff] }
 0x145   : > { %13664 = vmatpush3.bf16.msra.mxu1 %v13663_v59  ;;  %13634 = vmatprep.subr.bf16.mxu0 %v13633_v60  ;;  %v931_v59 = vld [vmem:[%s16147_s24 + $0x11f0] sm:$0xff]  ;;  %v932_v60 = vld [vmem:[%s16147_s24 + $0x11f8] sm:$0xff]  ;;  %v969_v48 = vld [vmem:[%s16147_s24 + $0x1320] sm:$0xff] }
 0x146   : > { %13666 = vmatprep.subr.bf16.mxu1 %v13665_v46  ;;  %v324_v46 = vld [vmem:[%s16157_s19 + $0x48] sm:$0xff] }
 0x147   : > { %v3240_v10 = vcombine.high %v324_v46, %v324_v46  ;;  %v16860_v23 = vrot.slane %v324_v46, %v16210_v14  ;;  %v972_v46 = vld [vmem:[%s16147_s24 + $0x1338] sm:$0xff] }
 0x148   : > { %13636 = vmatpush3.bf16.msra.mxu0 %v13635_v2  ;;  %v915_v2 = vld [vmem:[%s16147_s24 + $0x1170] sm:$0xff] }
 0x149   : > { %13668 = vmatpush3.bf16.msra.mxu1 %v13667_v3  ;;  %13638 = vmatprep.subr.bf16.mxu0 %v13637_v4  ;;  %v13685_v4 = vpack.c.bf16 %v932_v60, %v931_v59  ;;  %v13687_v13 = vpack.c.bf16 %v916_v5, %v915_v2  ;;  %v16865_v26 = vrot.slane %v3240_v10, %v16210_v14  ;;  %v939_v60 = vld [vmem:[%s16147_s24 + $0x1230] sm:$0xff]  ;;  %v942_v5 = vld [vmem:[%s16147_s24 + $0x1248] sm:$0xff]  ;;  %v960_v10 = vld [vmem:[%s16147_s24 + $0x12d8] sm:$0xff] }
 0x14a   : > { %13670 = vmatprep.subr.bf16.mxu1 %v13669_v8  ;;  %v981_v8 = vld [vmem:[%s16147_s24 + $0x1380] sm:$0xff]  ;;  %v3255_v43 = vcombine.high %v16860_v23, %v16860_v23  ;;  %v13701_v59 = vpack.c.bf16 %v956_v54, %v955_v51 }
 0x14b   : > { %v13721_v19 = vpack.c.bf16 %v982_v9, %v981_v8  ;;  %v974_v8 = vld [vmem:[%s16147_s24 + $0x1348] sm:$0xff]  ;;  %v959_v9 = vld [vmem:[%s16147_s24 + $0x12d0] sm:$0xff] }
 0x14c   : > { %13640 = vmatpush3.bf16.msra.mxu0 %v13639_v17  ;;  %v933_v17 = vld [vmem:[%s16147_s24 + $0x1200] sm:$0xff] }
 0x14d   : > { %13672 = vmatpush3.bf16.msra.mxu1 %v13671_v12  ;;  %13642 = vmatprep.subr.bf16.mxu0 %v13641_v18  ;;  %v934_v12 = vld [vmem:[%s16147_s24 + $0x1208] sm:$0xff]  ;;  %v965_v18 = vld [vmem:[%s16147_s24 + $0x1300] sm:$0xff] }
 0x14e   : > { %13674 = vmatprep.subr.bf16.mxu1 %v13673_v21  ;;  %v952_v21 = vld [vmem:[%s16147_s24 + $0x1298] sm:$0xff]  ;;  %v13691_v27 = vpack.c.bf16 %v934_v12, %v933_v17  ;;  %v13739_v17 = vpack.c.bf16 %v974_v8, %v973_v6  ;;  %v13709_v12 = vpack.c.bf16 %v960_v10, %v959_v9  ;;  %v1015_v6 = vld [vmem:[%s16147_s24 + $0x1490] sm:$0xff] }
 0x14f   : > { %v1047_v9 = vld [vmem:[%s16147_s24 + $0x1590] sm:$0xff]  ;;  %v1048_v10 = vld [vmem:[%s16147_s24 + $0x1598] sm:$0xff] }
 0x150   : > { %13644 = vmatpush3.bf16.msra.mxu0 %v13643_v28  ;;  %v13723_v28 = vpack.c.bf16 %v966_v16, %v965_v18  ;;  %v943_v18 = vld [vmem:[%s16147_s24 + $0x1250] sm:$0xff] }
 0x151   : > { %13676 = vmatpush3.bf16.msra.mxu1 %v13675_v29  ;;  %13646 = vmatprep.subr.bf16.mxu0 %v13645_v30  ;;  %v13693_v29 = vpack.c.bf16 %v952_v21, %v951_v20  ;;  %v935_v30 = vld [vmem:[%s16147_s24 + $0x1210] sm:$0xff]  ;;  %v976_v21 = vld [vmem:[%s16147_s24 + $0x1358] sm:$0xff] }
 0x152   : > { %v10231_v49 = vpop.f32.mrb[2].mxu0  ;;  %13678 = vmatprep.subr.bf16.mxu1 %v13677_v35  ;;  %v968_v35 = vld [vmem:[%s16147_s24 + $0x1318] sm:$0xff]  ;;  %v975_v16 = vld [vmem:[%s16147_s24 + $0x1350] sm:$0xff] }
 0x153   : > { %v10232_v56 = vpop.f32.mrb[3].mxu0  ;;  %v10266_v57 = vpop.f32.mrb[2].mxu1 }
 0x154   : > { %v10233_v61 = vadd.f32 %v10232_v56, %v10231_v49  ;;  %13648 = vmatpush3.bf16.msra.mxu0 %v13647_v41  ;;  %v10267_v52 = vpop.f32.mrb[3].mxu1  ;;  %v3256_v41 = vcombine.high %v16865_v26, %v16865_v26  ;;  %v13729_v49 = vpack.c.bf16 %v986_v53, %v985_v40  ;;  %v963_v40 = vld [vmem:[%s16147_s24 + $0x12f0] sm:$0xff]  ;;  %v964_v53 = vld [vmem:[%s16147_s24 + $0x12f8] sm:$0xff] }
 0x155   : > { %v10268_v62 = vadd.f32 %v10267_v52, %v10266_v57  ;;  %13680 = vmatpush3.bf16.msra.mxu1 %v13679_v42  ;;  %13650 = vmatprep.subr.bf16.mxu0 %v13649_v44  ;;  %v13695_v42 = vpack.c.bf16 %v936_v31, %v935_v30  ;;  %v13727_v44 = vpack.c.bf16 %v968_v35, %v967_v32  ;;  %v971_v52 = vld [vmem:[%s16147_s24 + $0x1330] sm:$0xff]  ;;  %v945_v32 = vld [vmem:[%s16147_s24 + $0x1260] sm:$0xff] }
 0x156   : > { %v4176_v3 = vadd.f32 %v10233_v61, %v16769_v22  ;;  %13682 = vmatprep.subr.bf16.mxu1 %v13681_v50  ;;  %v13655_v22 = vpack.c.bf16 %v884_v1, %v883_v55  ;;  %v970_v50 = vld [vmem:[%s16147_s24 + $0x1328] sm:$0xff]  ;;  %v940_v61 = vld [vmem:[%s16147_s24 + $0x1238] sm:$0xff]  ;;  %v13735_v2 = vpack.c.bf16 %v972_v46, %v971_v52  ;;  %v13743_v30 = vpack.c.bf16 %v976_v21, %v975_v16  ;;  %v977_v35 = vld [vmem:[%s16147_s24 + $0x1360] sm:$0xff] }
 0x157   : > { %v13731_v57 = vpack.c.bf16 %v970_v50, %v969_v48  ;;  %v990_v55 = vld [vmem:[%s16147_s24 + $0x13c8] sm:$0xff]  ;;  %v13703_v1 = vpack.c.bf16 %v940_v61, %v939_v60  ;;  %v13713_v31 = vpack.c.bf16 %v962_v25, %v961_v24  ;;  %v13717_v54 = vpack.c.bf16 %v964_v53, %v963_v40  ;;  %v980_v60 = vld [vmem:[%s16147_s24 + $0x1378] sm:$0xff]  ;;  %v1013_v61 = vld [vmem:[%s16147_s24 + $0x1480] sm:$0xff] }
 0x158   : > { %v16851_v11 = vadd.f32 %v10268_v62, %v4176_v3  ;;  %13652 = vmatpush3.bf16.msra.mxu0 %v13651_v58  ;;  %v957_v62 = vld [vmem:[%s16147_s24 + $0x12c0] sm:$0xff]  ;;  %v1014_v52 = vld [vmem:[%s16147_s24 + $0x1488] sm:$0xff]  ;;  %v13789_v16 = vpack.c.bf16 %v1048_v10, %v1047_v9  ;;  %v1020_v40 = vld [vmem:[%s16147_s24 + $0x14b8] sm:$0xff] }
 0x159   : > { %13684 = vmatpush3.bf16.msra.mxu1 %v13683_v63  ;;  %13654 = vmatprep.subr.bf16.mxu0 %v13653_v0  ;;  %v958_v63 = vld [vmem:[%s16147_s24 + $0x12c8] sm:$0xff]  ;;  %v989_v0 = vld [vmem:[%s16147_s24 + $0x13c0] sm:$0xff]  ;;  %v1052_v53 = vld [vmem:[%s16147_s24 + $0x15b8] sm:$0xff] }
 0x15a   : > { %13686 = vmatprep.subr.bf16.mxu1 %v13685_v4  ;;  %v13705_v3 = vpack.c.bf16 %v958_v63, %v957_v62  ;;  %v941_v4 = vld [vmem:[%s16147_s24 + $0x1240] sm:$0xff]  ;;  %v13737_v7 = vpack.c.bf16 %v990_v55, %v989_v0  ;;  %v1046_v46 = vld [vmem:[%s16147_s24 + $0x1588] sm:$0xff]  ;;  %v13753_v55 = vpack.c.bf16 %v1014_v52, %v1013_v61 }
 0x15b   : > { %v1017_v21 = vld [vmem:[%s16147_s24 + $0x14a0] sm:$0xff]  ;;  %v1018_v24 = vld [vmem:[%s16147_s24 + $0x14a8] sm:$0xff] }
 0x15c   : > { %13656 = vmatpush3.bf16.msra.mxu0 %v13655_v22  ;;  %v991_v22 = vld [vmem:[%s16147_s24 + $0x13d0] sm:$0xff]  ;;  %v1037_v61 = vld [vmem:[%s16147_s24 + $0x1540] sm:$0xff]  ;;  %v1026_v10 = vld [vmem:[%s16147_s24 + $0x14e8] sm:$0xff] }
 0x15d   : > { %13688 = vmatpush3.bf16.msra.mxu1 %v13687_v13  ;;  %13690 = vmatprep.subr.bf16.mxu0 %v13689_v15  ;;  %v992_v13 = vld [vmem:[%s16147_s24 + $0x13d8] sm:$0xff]  ;;  %v13707_v15 = vpack.c.bf16 %v942_v5, %v941_v4  ;;  %v1030_v5 = vld [vmem:[%s16147_s24 + $0x1508] sm:$0xff]  ;;  %v1025_v9 = vld [vmem:[%s16147_s24 + $0x14e0] sm:$0xff] }
 0x15e   : > { %13722 = vmatprep.subr.bf16.mxu1 %v13721_v19  ;;  %v944_v19 = vld [vmem:[%s16147_s24 + $0x1258] sm:$0xff]  ;;  %v13741_v20 = vpack.c.bf16 %v992_v13, %v991_v22 }
 0x15f   : > { %5154 = vmatmul.mubr.f32.vlgmr.msra.gmra.mrb[16].mxu0 %v16780_v37  ;;  %v938_v37 = vld [vmem:[%s16147_s24 + $0x1228] sm:$0xff] }
 0x160   : > { %13692 = vmatpush3.bf16.msra.mxu0 %v13691_v27  ;;  %5224 = vmatmul.mubr.f32.vlgmr.msra.gmra.mrb[16].mxu1 %v16785_v39  ;;  %v987_v39 = vld [vmem:[%s16147_s24 + $0x13b0] sm:$0xff]  ;;  %v13699_v56 = vpack.c.bf16 %v938_v37, %v937_v47  ;;  %v993_v27 = vld [vmem:[%s16147_s24 + $0x13e0] sm:$0xff] }
 0x161   : > { %13724 = vmatpush3.bf16.msra.mxu1 %v13723_v28  ;;  %13694 = vmatprep.subr.bf16.mxu0 %v13693_v29  ;;  %v13733_v58 = vpack.c.bf16 %v988_v34, %v987_v39  ;;  %v994_v28 = vld [vmem:[%s16147_s24 + $0x13e8] sm:$0xff]  ;;  %v13711_v29 = vpack.c.bf16 %v944_v19, %v943_v18  ;;  %v947_v39 = vld [vmem:[%s16147_s24 + $0x1270] sm:$0xff]  ;;  %v948_v34 = vld [vmem:[%s16147_s24 + $0x1278] sm:$0xff] }
 0x162   : > { %13726 = vmatprep.subr.bf16.mxu1 %v13725_v33  ;;  %5293 = vmatprep.mubr.f32.mxu0 %v3255_v43  ;;  %v946_v33 = vld [vmem:[%s16147_s24 + $0x1268] sm:$0xff]  ;;  %v13745_v38 = vpack.c.bf16 %v994_v28, %v993_v27  ;;  %v1000_v18 = vld [vmem:[%s16147_s24 + $0x1418] sm:$0xff]  ;;  %v1031_v19 = vld [vmem:[%s16147_s24 + $0x1510] sm:$0xff] }
 0x163   : > { %5363 = vmatprep.mubr.f32.mxu1 %v3256_v41  ;;  %v978_v43 = vld [vmem:[%s16147_s24 + $0x1368] sm:$0xff]  ;;  %v13715_v48 = vpack.c.bf16 %v946_v33, %v945_v32  ;;  %v1049_v27 = vld [vmem:[%s16147_s24 + $0x15a0] sm:$0xff]  ;;  %v13761_v32 = vpack.c.bf16 %v1018_v24, %v1017_v21 }
 0x164   : > { %13696 = vmatpush3.bf16.msra.mxu0 %v13695_v42  ;;  %v13747_v51 = vpack.c.bf16 %v978_v43, %v977_v35  ;;  %v1050_v28 = vld [vmem:[%s16147_s24 + $0x15a8] sm:$0xff]  ;;  %v1001_v33 = vld [vmem:[%s16147_s24 + $0x1420] sm:$0xff]  ;;  %v1019_v43 = vld [vmem:[%s16147_s24 + $0x14b0] sm:$0xff] }
 0x165   : > { %13728 = vmatpush3.bf16.msra.mxu1 %v13727_v44  ;;  %13698 = vmatprep.subr.bf16.mxu0 %v13697_v45  ;;  %v995_v44 = vld [vmem:[%s16147_s24 + $0x13f0] sm:$0xff]  ;;  %v996_v45 = vld [vmem:[%s16147_s24 + $0x13f8] sm:$0xff]  ;;  %v1033_v35 = vld [vmem:[%s16147_s24 + $0x1520] sm:$0xff] }
 0x166   : > { %13730 = vmatprep.subr.bf16.mxu1 %v13729_v49  ;;  %v325_v49 = vld [vmem:[%s16157_s19 + $0x50] sm:$0xff] }
 0x167   : > { %v3257_v62 = vcombine.high %v325_v49, %v325_v49  ;;  %v16940_v8 = vrot.slane %v325_v49, %v16210_v14  ;;  %v1036_v49 = vld [vmem:[%s16147_s24 + $0x1538] sm:$0xff] }
 0x168   : > { %13700 = vmatpush3.bf16.msra.mxu0 %v13699_v56  ;;  %v979_v56 = vld [vmem:[%s16147_s24 + $0x1370] sm:$0xff] }
 0x169   : > { %13732 = vmatpush3.bf16.msra.mxu1 %v13731_v57  ;;  %13702 = vmatprep.subr.bf16.mxu0 %v13701_v59  ;;  %v13749_v59 = vpack.c.bf16 %v996_v45, %v995_v44  ;;  %v13751_v0 = vpack.c.bf16 %v980_v60, %v979_v56  ;;  %v16945_v22 = vrot.slane %v3257_v62, %v16210_v14  ;;  %v1003_v45 = vld [vmem:[%s16147_s24 + $0x1430] sm:$0xff]  ;;  %v1006_v60 = vld [vmem:[%s16147_s24 + $0x1448] sm:$0xff]  ;;  %v1024_v62 = vld [vmem:[%s16147_s24 + $0x14d8] sm:$0xff] }
 0x16a   : > { %13734 = vmatprep.subr.bf16.mxu1 %v13733_v58  ;;  %v1045_v58 = vld [vmem:[%s16147_s24 + $0x1580] sm:$0xff]  ;;  %v3272_v25 = vcombine.high %v16940_v8, %v16940_v8  ;;  %v13765_v44 = vpack.c.bf16 %v1020_v40, %v1019_v43 }
 0x16b   : > { %v13785_v4 = vpack.c.bf16 %v1046_v46, %v1045_v58  ;;  %v1038_v58 = vld [vmem:[%s16147_s24 + $0x1548] sm:$0xff]  ;;  %v1023_v46 = vld [vmem:[%s16147_s24 + $0x14d0] sm:$0xff] }
 0x16c   : > { %13704 = vmatpush3.bf16.msra.mxu0 %v13703_v1  ;;  %v997_v1 = vld [vmem:[%s16147_s24 + $0x1400] sm:$0xff] }
 0x16d   : > { %13736 = vmatpush3.bf16.msra.mxu1 %v13735_v2  ;;  %13706 = vmatprep.subr.bf16.mxu0 %v13705_v3  ;;  %v998_v2 = vld [vmem:[%s16147_s24 + $0x1408] sm:$0xff]  ;;  %v1029_v3 = vld [vmem:[%s16147_s24 + $0x1500] sm:$0xff] }
 0x16e   : > { %13738 = vmatprep.subr.bf16.mxu1 %v13737_v7  ;;  %v1016_v7 = vld [vmem:[%s16147_s24 + $0x1498] sm:$0xff]  ;;  %v13755_v13 = vpack.c.bf16 %v998_v2, %v997_v1  ;;  %v13803_v1 = vpack.c.bf16 %v1038_v58, %v1037_v61  ;;  %v13773_v2 = vpack.c.bf16 %v1024_v62, %v1023_v46  ;;  %v1079_v61 = vld [vmem:[%s16147_s24 + $0x1690] sm:$0xff] }
 0x16f   : > { %v1111_v46 = vld [vmem:[%s16147_s24 + $0x1790] sm:$0xff]  ;;  %v1112_v62 = vld [vmem:[%s16147_s24 + $0x1798] sm:$0xff] }
 0x170   : > { %13708 = vmatpush3.bf16.msra.mxu0 %v13707_v15  ;;  %v13787_v15 = vpack.c.bf16 %v1030_v5, %v1029_v3  ;;  %v1007_v3 = vld [vmem:[%s16147_s24 + $0x1450] sm:$0xff] }
 0x171   : > { %13740 = vmatpush3.bf16.msra.mxu1 %v13739_v17  ;;  %13710 = vmatprep.subr.bf16.mxu0 %v13709_v12  ;;  %v13757_v17 = vpack.c.bf16 %v1016_v7, %v1015_v6  ;;  %v999_v12 = vld [vmem:[%s16147_s24 + $0x1410] sm:$0xff]  ;;  %v1040_v7 = vld [vmem:[%s16147_s24 + $0x1558] sm:$0xff] }
 0x172   : > { %v10301_v36 = vpop.f32.mrb[4].mxu0  ;;  %13742 = vmatprep.subr.bf16.mxu1 %v13741_v20  ;;  %v1032_v20 = vld [vmem:[%s16147_s24 + $0x1518] sm:$0xff]  ;;  %v1039_v5 = vld [vmem:[%s16147_s24 + $0x1550] sm:$0xff] }
 0x173   : > { %v10302_v41 = vpop.f32.mrb[5].mxu0  ;;  %v10336_v42 = vpop.f32.mrb[4].mxu1 }
 0x174   : > { %v10303_v47 = vadd.f32 %v10302_v41, %v10301_v36  ;;  %13712 = vmatpush3.bf16.msra.mxu0 %v13711_v29  ;;  %v10337_v37 = vpop.f32.mrb[5].mxu1  ;;  %v3273_v29 = vcombine.high %v16945_v22, %v16945_v22  ;;  %v13793_v36 = vpack.c.bf16 %v1050_v28, %v1049_v27  ;;  %v1027_v27 = vld [vmem:[%s16147_s24 + $0x14f0] sm:$0xff]  ;;  %v1028_v28 = vld [vmem:[%s16147_s24 + $0x14f8] sm:$0xff] }
 0x175   : > { %v10338_v50 = vadd.f32 %v10337_v37, %v10336_v42  ;;  %13744 = vmatpush3.bf16.msra.mxu1 %v13743_v30  ;;  %13714 = vmatprep.subr.bf16.mxu0 %v13713_v31  ;;  %v13759_v30 = vpack.c.bf16 %v1000_v18, %v999_v12  ;;  %v13791_v31 = vpack.c.bf16 %v1032_v20, %v1031_v19  ;;  %v1035_v37 = vld [vmem:[%s16147_s24 + $0x1530] sm:$0xff]  ;;  %v1009_v19 = vld [vmem:[%s16147_s24 + $0x1460] sm:$0xff] }
 0x176   : > { %v4316_v57 = vadd.f32 %v10303_v47, %v16851_v11  ;;  %13746 = vmatprep.subr.bf16.mxu1 %v13745_v38  ;;  %v13719_v11 = vpack.c.bf16 %v948_v34, %v947_v39  ;;  %v1034_v38 = vld [vmem:[%s16147_s24 + $0x1528] sm:$0xff]  ;;  %v1004_v47 = vld [vmem:[%s16147_s24 + $0x1438] sm:$0xff]  ;;  %v13799_v56 = vpack.c.bf16 %v1036_v49, %v1035_v37  ;;  %v13807_v12 = vpack.c.bf16 %v1040_v7, %v1039_v5  ;;  %v1041_v20 = vld [vmem:[%s16147_s24 + $0x1560] sm:$0xff] }
 0x177   : > { %v13795_v42 = vpack.c.bf16 %v1034_v38, %v1033_v35  ;;  %v1054_v39 = vld [vmem:[%s16147_s24 + $0x15c8] sm:$0xff]  ;;  %v13767_v34 = vpack.c.bf16 %v1004_v47, %v1003_v45  ;;  %v13777_v18 = vpack.c.bf16 %v1026_v10, %v1025_v9  ;;  %v13781_v40 = vpack.c.bf16 %v1028_v28, %v1027_v27  ;;  %v1044_v45 = vld [vmem:[%s16147_s24 + $0x1578] sm:$0xff]  ;;  %v1077_v47 = vld [vmem:[%s16147_s24 + $0x1680] sm:$0xff] }
 0x178   : > { %v16931_v63 = vadd.f32 %v10338_v50, %v4316_v57  ;;  %13716 = vmatpush3.bf16.msra.mxu0 %v13715_v48  ;;  %v1021_v50 = vld [vmem:[%s16147_s24 + $0x14c0] sm:$0xff]  ;;  %v1078_v37 = vld [vmem:[%s16147_s24 + $0x1688] sm:$0xff]  ;;  %v13853_v5 = vpack.c.bf16 %v1112_v62, %v1111_v46  ;;  %v1084_v27 = vld [vmem:[%s16147_s24 + $0x16b8] sm:$0xff] }
 0x179   : > { %13748 = vmatpush3.bf16.msra.mxu1 %v13747_v51  ;;  %13718 = vmatprep.subr.bf16.mxu0 %v13717_v54  ;;  %v1022_v51 = vld [vmem:[%s16147_s24 + $0x14c8] sm:$0xff]  ;;  %v1053_v54 = vld [vmem:[%s16147_s24 + $0x15c0] sm:$0xff]  ;;  %v1116_v28 = vld [vmem:[%s16147_s24 + $0x17b8] sm:$0xff] }
 0x17a   : > { %13750 = vmatprep.subr.bf16.mxu1 %v13749_v59  ;;  %v13769_v57 = vpack.c.bf16 %v1022_v51, %v1021_v50  ;;  %v1005_v59 = vld [vmem:[%s16147_s24 + $0x1440] sm:$0xff]  ;;  %v13801_v52 = vpack.c.bf16 %v1054_v39, %v1053_v54  ;;  %v1110_v49 = vld [vmem:[%s16147_s24 + $0x1788] sm:$0xff]  ;;  %v13817_v39 = vpack.c.bf16 %v1078_v37, %v1077_v47 }
 0x17b   : > { %v1081_v7 = vld [vmem:[%s16147_s24 + $0x16a0] sm:$0xff]  ;;  %v1082_v9 = vld [vmem:[%s16147_s24 + $0x16a8] sm:$0xff] }
 0x17c   : > { %13720 = vmatpush3.bf16.msra.mxu0 %v13719_v11  ;;  %v1055_v11 = vld [vmem:[%s16147_s24 + $0x15d0] sm:$0xff]  ;;  %v1101_v47 = vld [vmem:[%s16147_s24 + $0x1740] sm:$0xff]  ;;  %v1090_v62 = vld [vmem:[%s16147_s24 + $0x16e8] sm:$0xff] }
 0x17d   : > { %13752 = vmatpush3.bf16.msra.mxu1 %v13751_v0  ;;  %13754 = vmatprep.subr.bf16.mxu0 %v13753_v55  ;;  %v1056_v0 = vld [vmem:[%s16147_s24 + $0x15d8] sm:$0xff]  ;;  %v13771_v55 = vpack.c.bf16 %v1006_v60, %v1005_v59  ;;  %v1094_v60 = vld [vmem:[%s16147_s24 + $0x1708] sm:$0xff]  ;;  %v1089_v46 = vld [vmem:[%s16147_s24 + $0x16e0] sm:$0xff] }
 0x17e   : > { %13786 = vmatprep.subr.bf16.mxu1 %v13785_v4  ;;  %v1008_v4 = vld [vmem:[%s16147_s24 + $0x1458] sm:$0xff]  ;;  %v13805_v6 = vpack.c.bf16 %v1056_v0, %v1055_v11 }
 0x17f   : > { %5294 = vmatmul.mubr.f32.vlgmr.msra.gmra.mrb[18].mxu0 %v16860_v23  ;;  %v1002_v23 = vld [vmem:[%s16147_s24 + $0x1428] sm:$0xff] }
 0x180   : > { %13756 = vmatpush3.bf16.msra.mxu0 %v13755_v13  ;;  %5364 = vmatmul.mubr.f32.vlgmr.msra.gmra.mrb[18].mxu1 %v16865_v26  ;;  %v1051_v26 = vld [vmem:[%s16147_s24 + $0x15b0] sm:$0xff]  ;;  %v13763_v41 = vpack.c.bf16 %v1002_v23, %v1001_v33  ;;  %v1057_v13 = vld [vmem:[%s16147_s24 + $0x15e0] sm:$0xff] }
 0x181   : > { %13788 = vmatpush3.bf16.msra.mxu1 %v13787_v15  ;;  %13758 = vmatprep.subr.bf16.mxu0 %v13757_v17  ;;  %v13797_v48 = vpack.c.bf16 %v1052_v53, %v1051_v26  ;;  %v1058_v15 = vld [vmem:[%s16147_s24 + $0x15e8] sm:$0xff]  ;;  %v13775_v17 = vpack.c.bf16 %v1008_v4, %v1007_v3  ;;  %v1011_v26 = vld [vmem:[%s16147_s24 + $0x1470] sm:$0xff]  ;;  %v1012_v53 = vld [vmem:[%s16147_s24 + $0x1478] sm:$0xff] }
 0x182   : > { %13790 = vmatprep.subr.bf16.mxu1 %v13789_v16  ;;  %5433 = vmatprep.mubr.f32.mxu0 %v3272_v25  ;;  %v1010_v16 = vld [vmem:[%s16147_s24 + $0x1468] sm:$0xff]  ;;  %v13809_v24 = vpack.c.bf16 %v1058_v15, %v1057_v13  ;;  %v1064_v3 = vld [vmem:[%s16147_s24 + $0x1618] sm:$0xff]  ;;  %v1095_v4 = vld [vmem:[%s16147_s24 + $0x1710] sm:$0xff] }
 0x183   : > { %5503 = vmatprep.mubr.f32.mxu1 %v3273_v29  ;;  %v1042_v25 = vld [vmem:[%s16147_s24 + $0x1568] sm:$0xff]  ;;  %v13779_v35 = vpack.c.bf16 %v1010_v16, %v1009_v19  ;;  %v1113_v13 = vld [vmem:[%s16147_s24 + $0x17a0] sm:$0xff]  ;;  %v13825_v19 = vpack.c.bf16 %v1082_v9, %v1081_v7 }
 0x184   : > { %13760 = vmatpush3.bf16.msra.mxu0 %v13759_v30  ;;  %v13811_v43 = vpack.c.bf16 %v1042_v25, %v1041_v20  ;;  %v1114_v15 = vld [vmem:[%s16147_s24 + $0x17a8] sm:$0xff]  ;;  %v1065_v16 = vld [vmem:[%s16147_s24 + $0x1620] sm:$0xff]  ;;  %v1083_v25 = vld [vmem:[%s16147_s24 + $0x16b0] sm:$0xff] }
 0x185   : > { %13792 = vmatpush3.bf16.msra.mxu1 %v13791_v31  ;;  %13762 = vmatprep.subr.bf16.mxu0 %v13761_v32  ;;  %v1059_v31 = vld [vmem:[%s16147_s24 + $0x15f0] sm:$0xff]  ;;  %v1060_v32 = vld [vmem:[%s16147_s24 + $0x15f8] sm:$0xff]  ;;  %v1097_v20 = vld [vmem:[%s16147_s24 + $0x1720] sm:$0xff] }
 0x186   : > { %13794 = vmatprep.subr.bf16.mxu1 %v13793_v36  ;;  %v326_v36 = vld [vmem:[%s16157_s19 + $0x58] sm:$0xff] }
 0x187   : > { %v3274_v50 = vcombine.high %v326_v36, %v326_v36  ;;  %v17020_v58 = vrot.slane %v326_v36, %v16210_v14  ;;  %v1100_v36 = vld [vmem:[%s16147_s24 + $0x1738] sm:$0xff] }
 0x188   : > { %13764 = vmatpush3.bf16.msra.mxu0 %v13763_v41  ;;  %v1043_v41 = vld [vmem:[%s16147_s24 + $0x1570] sm:$0xff] }
 0x189   : > { %13796 = vmatpush3.bf16.msra.mxu1 %v13795_v42  ;;  %13766 = vmatprep.subr.bf16.mxu0 %v13765_v44  ;;  %v13813_v44 = vpack.c.bf16 %v1060_v32, %v1059_v31  ;;  %v13815_v54 = vpack.c.bf16 %v1044_v45, %v1043_v41  ;;  %v17025_v11 = vrot.slane %v3274_v50, %v16210_v14  ;;  %v1067_v32 = vld [vmem:[%s16147_s24 + $0x1630] sm:$0xff]  ;;  %v1070_v45 = vld [vmem:[%s16147_s24 + $0x1648] sm:$0xff]  ;;  %v1088_v50 = vld [vmem:[%s16147_s24 + $0x16d8] sm:$0xff] }
 0x18a   : > { %13798 = vmatprep.subr.bf16.mxu1 %v13797_v48  ;;  %v1109_v48 = vld [vmem:[%s16147_s24 + $0x1780] sm:$0xff]  ;;  %v3289_v10 = vcombine.high %v17020_v58, %v17020_v58  ;;  %v13829_v31 = vpack.c.bf16 %v1084_v27, %v1083_v25 }
 0x18b   : > { %v13849_v59 = vpack.c.bf16 %v1110_v49, %v1109_v48  ;;  %v1102_v48 = vld [vmem:[%s16147_s24 + $0x1748] sm:$0xff]  ;;  %v1087_v49 = vld [vmem:[%s16147_s24 + $0x16d0] sm:$0xff] }
 0x18c   : > { %13768 = vmatpush3.bf16.msra.mxu0 %v13767_v34  ;;  %v1061_v34 = vld [vmem:[%s16147_s24 + $0x1600] sm:$0xff] }
 0x18d   : > { %13800 = vmatpush3.bf16.msra.mxu1 %v13799_v56  ;;  %13770 = vmatprep.subr.bf16.mxu0 %v13769_v57  ;;  %v1062_v56 = vld [vmem:[%s16147_s24 + $0x1608] sm:$0xff]  ;;  %v1093_v57 = vld [vmem:[%s16147_s24 + $0x1700] sm:$0xff] }
 0x18e   : > { %13802 = vmatprep.subr.bf16.mxu1 %v13801_v52  ;;  %v1080_v52 = vld [vmem:[%s16147_s24 + $0x1698] sm:$0xff]  ;;  %v13819_v0 = vpack.c.bf16 %v1062_v56, %v1061_v34  ;;  %v13867_v34 = vpack.c.bf16 %v1102_v48, %v1101_v47  ;;  %v13837_v56 = vpack.c.bf16 %v1088_v50, %v1087_v49  ;;  %v1143_v47 = vld [vmem:[%s16147_s24 + $0x1890] sm:$0xff] }
 0x18f   : > { %v1175_v49 = vld [vmem:[%s16147_s24 + $0x1990] sm:$0xff]  ;;  %v1176_v50 = vld [vmem:[%s16147_s24 + $0x1998] sm:$0xff] }
 0x190   : > { %13772 = vmatpush3.bf16.msra.mxu0 %v13771_v55  ;;  %v13851_v55 = vpack.c.bf16 %v1094_v60, %v1093_v57  ;;  %v1071_v57 = vld [vmem:[%s16147_s24 + $0x1650] sm:$0xff] }
 0x191   : > { %13804 = vmatpush3.bf16.msra.mxu1 %v13803_v1  ;;  %13774 = vmatprep.subr.bf16.mxu0 %v13773_v2  ;;  %v13821_v1 = vpack.c.bf16 %v1080_v52, %v1079_v61  ;;  %v1063_v2 = vld [vmem:[%s16147_s24 + $0x1610] sm:$0xff]  ;;  %v1104_v52 = vld [vmem:[%s16147_s24 + $0x1758] sm:$0xff] }
 0x192   : > { %v10371_v21 = vpop.f32.mrb[6].mxu0  ;;  %13806 = vmatprep.subr.bf16.mxu1 %v13805_v6  ;;  %v1096_v6 = vld [vmem:[%s16147_s24 + $0x1718] sm:$0xff]  ;;  %v1103_v60 = vld [vmem:[%s16147_s24 + $0x1750] sm:$0xff] }
 0x193   : > { %v10372_v29 = vpop.f32.mrb[7].mxu0  ;;  %v10406_v30 = vpop.f32.mrb[6].mxu1 }
 0x194   : > { %v10373_v33 = vadd.f32 %v10372_v29, %v10371_v21  ;;  %13776 = vmatpush3.bf16.msra.mxu0 %v13775_v17  ;;  %v10407_v23 = vpop.f32.mrb[7].mxu1  ;;  %v3290_v17 = vcombine.high %v17025_v11, %v17025_v11  ;;  %v13857_v21 = vpack.c.bf16 %v1114_v15, %v1113_v13  ;;  %v1091_v13 = vld [vmem:[%s16147_s24 + $0x16f0] sm:$0xff]  ;;  %v1092_v15 = vld [vmem:[%s16147_s24 + $0x16f8] sm:$0xff] }
 0x195   : > { %v10408_v38 = vadd.f32 %v10407_v23, %v10406_v30  ;;  %13808 = vmatpush3.bf16.msra.mxu1 %v13807_v12  ;;  %13778 = vmatprep.subr.bf16.mxu0 %v13777_v18  ;;  %v13823_v12 = vpack.c.bf16 %v1064_v3, %v1063_v2  ;;  %v13855_v18 = vpack.c.bf16 %v1096_v6, %v1095_v4  ;;  %v1099_v23 = vld [vmem:[%s16147_s24 + $0x1730] sm:$0xff]  ;;  %v1073_v4 = vld [vmem:[%s16147_s24 + $0x1660] sm:$0xff] }
 0x196   : > { %v4456_v42 = vadd.f32 %v10373_v33, %v16931_v63  ;;  %13810 = vmatprep.subr.bf16.mxu1 %v13809_v24  ;;  %v13783_v63 = vpack.c.bf16 %v1012_v53, %v1011_v26  ;;  %v1098_v24 = vld [vmem:[%s16147_s24 + $0x1728] sm:$0xff]  ;;  %v1068_v33 = vld [vmem:[%s16147_s24 + $0x1638] sm:$0xff]  ;;  %v13863_v41 = vpack.c.bf16 %v1100_v36, %v1099_v23  ;;  %v13871_v2 = vpack.c.bf16 %v1104_v52, %v1103_v60  ;;  %v1105_v6 = vld [vmem:[%s16147_s24 + $0x1760] sm:$0xff] }
 0x197   : > { %v13859_v30 = vpack.c.bf16 %v1098_v24, %v1097_v20  ;;  %v1118_v26 = vld [vmem:[%s16147_s24 + $0x17c8] sm:$0xff]  ;;  %v13831_v53 = vpack.c.bf16 %v1068_v33, %v1067_v32  ;;  %v13841_v3 = vpack.c.bf16 %v1090_v62, %v1089_v46  ;;  %v13845_v27 = vpack.c.bf16 %v1092_v15, %v1091_v13  ;;  %v1108_v32 = vld [vmem:[%s16147_s24 + $0x1778] sm:$0xff]  ;;  %v1141_v33 = vld [vmem:[%s16147_s24 + $0x1880] sm:$0xff] }
 0x198   : > { %v17011_v51 = vadd.f32 %v10408_v38, %v4456_v42  ;;  %13780 = vmatpush3.bf16.msra.mxu0 %v13779_v35  ;;  %v1085_v38 = vld [vmem:[%s16147_s24 + $0x16c0] sm:$0xff]  ;;  %v1142_v23 = vld [vmem:[%s16147_s24 + $0x1888] sm:$0xff]  ;;  %v13917_v60 = vpack.c.bf16 %v1176_v50, %v1175_v49  ;;  %v1148_v13 = vld [vmem:[%s16147_s24 + $0x18b8] sm:$0xff] }
 0x199   : > { %13812 = vmatpush3.bf16.msra.mxu1 %v13811_v43  ;;  %13782 = vmatprep.subr.bf16.mxu0 %v13781_v40  ;;  %v1086_v43 = vld [vmem:[%s16147_s24 + $0x16c8] sm:$0xff]  ;;  %v1117_v40 = vld [vmem:[%s16147_s24 + $0x17c0] sm:$0xff]  ;;  %v1180_v15 = vld [vmem:[%s16147_s24 + $0x19b8] sm:$0xff] }
 0x19a   : > { %13814 = vmatprep.subr.bf16.mxu1 %v13813_v44  ;;  %v13833_v42 = vpack.c.bf16 %v1086_v43, %v1085_v38  ;;  %v1069_v44 = vld [vmem:[%s16147_s24 + $0x1640] sm:$0xff]  ;;  %v13865_v37 = vpack.c.bf16 %v1118_v26, %v1117_v40  ;;  %v1174_v36 = vld [vmem:[%s16147_s24 + $0x1988] sm:$0xff]  ;;  %v13881_v26 = vpack.c.bf16 %v1142_v23, %v1141_v33 }
 0x19b   : > { %v1145_v52 = vld [vmem:[%s16147_s24 + $0x18a0] sm:$0xff]  ;;  %v1146_v46 = vld [vmem:[%s16147_s24 + $0x18a8] sm:$0xff] }
 0x19c   : > { %13784 = vmatpush3.bf16.msra.mxu0 %v13783_v63  ;;  %v1119_v63 = vld [vmem:[%s16147_s24 + $0x17d0] sm:$0xff]  ;;  %v1165_v33 = vld [vmem:[%s16147_s24 + $0x1940] sm:$0xff]  ;;  %v1154_v50 = vld [vmem:[%s16147_s24 + $0x18e8] sm:$0xff] }
 0x19d   : > { %13816 = vmatpush3.bf16.msra.mxu1 %v13815_v54  ;;  %13818 = vmatprep.subr.bf16.mxu0 %v13817_v39  ;;  %v1120_v54 = vld [vmem:[%s16147_s24 + $0x17d8] sm:$0xff]  ;;  %v13835_v39 = vpack.c.bf16 %v1070_v45, %v1069_v44  ;;  %v1158_v45 = vld [vmem:[%s16147_s24 + $0x1908] sm:$0xff]  ;;  %v1153_v49 = vld [vmem:[%s16147_s24 + $0x18e0] sm:$0xff] }
 0x19e   : > { %13850 = vmatprep.subr.bf16.mxu1 %v13849_v59  ;;  %v1072_v59 = vld [vmem:[%s16147_s24 + $0x1658] sm:$0xff]  ;;  %v13869_v61 = vpack.c.bf16 %v1120_v54, %v1119_v63 }
 0x19f   : > { %5434 = vmatmul.mubr.f32.vlgmr.msra.gmra.mrb[20].mxu0 %v16940_v8  ;;  %v1066_v8 = vld [vmem:[%s16147_s24 + $0x1628] sm:$0xff] }
 0x1a0   : > { %13820 = vmatpush3.bf16.msra.mxu0 %v13819_v0  ;;  %5504 = vmatmul.mubr.f32.vlgmr.msra.gmra.mrb[20].mxu1 %v16945_v22  ;;  %v1115_v22 = vld [vmem:[%s16147_s24 + $0x17b0] sm:$0xff]  ;;  %v13827_v29 = vpack.c.bf16 %v1066_v8, %v1065_v16  ;;  %v1121_v0 = vld [vmem:[%s16147_s24 + $0x17e0] sm:$0xff] }
 0x1a1   : > { %13852 = vmatpush3.bf16.msra.mxu1 %v13851_v55  ;;  %13822 = vmatprep.subr.bf16.mxu0 %v13821_v1  ;;  %v13861_v35 = vpack.c.bf16 %v1116_v28, %v1115_v22  ;;  %v1122_v55 = vld [vmem:[%s16147_s24 + $0x17e8] sm:$0xff]  ;;  %v13839_v1 = vpack.c.bf16 %v1072_v59, %v1071_v57  ;;  %v1075_v22 = vld [vmem:[%s16147_s24 + $0x1670] sm:$0xff]  ;;  %v1076_v28 = vld [vmem:[%s16147_s24 + $0x1678] sm:$0xff] }
 0x1a2   : > { %13854 = vmatprep.subr.bf16.mxu1 %v13853_v5  ;;  %5573 = vmatprep.mubr.f32.mxu0 %v3289_v10  ;;  %v1074_v5 = vld [vmem:[%s16147_s24 + $0x1668] sm:$0xff]  ;;  %v13873_v9 = vpack.c.bf16 %v1122_v55, %v1121_v0  ;;  %v1128_v57 = vld [vmem:[%s16147_s24 + $0x1818] sm:$0xff]  ;;  %v1159_v59 = vld [vmem:[%s16147_s24 + $0x1910] sm:$0xff] }
 0x1a3   : > { %5643 = vmatprep.mubr.f32.mxu1 %v3290_v17  ;;  %v1106_v10 = vld [vmem:[%s16147_s24 + $0x1768] sm:$0xff]  ;;  %v13843_v20 = vpack.c.bf16 %v1074_v5, %v1073_v4  ;;  %v1177_v0 = vld [vmem:[%s16147_s24 + $0x19a0] sm:$0xff]  ;;  %v13889_v4 = vpack.c.bf16 %v1146_v46, %v1145_v52 }
 0x1a4   : > { %13824 = vmatpush3.bf16.msra.mxu0 %v13823_v12  ;;  %v13875_v25 = vpack.c.bf16 %v1106_v10, %v1105_v6  ;;  %v1178_v55 = vld [vmem:[%s16147_s24 + $0x19a8] sm:$0xff]  ;;  %v1129_v5 = vld [vmem:[%s16147_s24 + $0x1820] sm:$0xff]  ;;  %v1147_v10 = vld [vmem:[%s16147_s24 + $0x18b0] sm:$0xff] }
 0x1a5   : > { %13856 = vmatpush3.bf16.msra.mxu1 %v13855_v18  ;;  %13826 = vmatprep.subr.bf16.mxu0 %v13825_v19  ;;  %v1123_v18 = vld [vmem:[%s16147_s24 + $0x17f0] sm:$0xff]  ;;  %v1124_v19 = vld [vmem:[%s16147_s24 + $0x17f8] sm:$0xff]  ;;  %v1161_v6 = vld [vmem:[%s16147_s24 + $0x1920] sm:$0xff] }
 0x1a6   : > { %13858 = vmatprep.subr.bf16.mxu1 %v13857_v21  ;;  %v327_v21 = vld [vmem:[%s16157_s19 + $0x60] sm:$0xff] }
 0x1a7   : > { %v3291_v38 = vcombine.high %v327_v21, %v327_v21  ;;  %v17100_v48 = vrot.slane %v327_v21, %v16210_v14  ;;  %v1164_v21 = vld [vmem:[%s16147_s24 + $0x1938] sm:$0xff] }
 0x1a8   : > { %13828 = vmatpush3.bf16.msra.mxu0 %v13827_v29  ;;  %v1107_v29 = vld [vmem:[%s16147_s24 + $0x1770] sm:$0xff] }
 0x1a9   : > { %13860 = vmatpush3.bf16.msra.mxu1 %v13859_v30  ;;  %13830 = vmatprep.subr.bf16.mxu0 %v13829_v31  ;;  %v13877_v31 = vpack.c.bf16 %v1124_v19, %v1123_v18  ;;  %v13879_v40 = vpack.c.bf16 %v1108_v32, %v1107_v29  ;;  %v17105_v63 = vrot.slane %v3291_v38, %v16210_v14  ;;  %v1131_v19 = vld [vmem:[%s16147_s24 + $0x1830] sm:$0xff]  ;;  %v1134_v32 = vld [vmem:[%s16147_s24 + $0x1848] sm:$0xff]  ;;  %v1152_v38 = vld [vmem:[%s16147_s24 + $0x18d8] sm:$0xff] }
 0x1aa   : > { %13862 = vmatprep.subr.bf16.mxu1 %v13861_v35  ;;  %v1173_v35 = vld [vmem:[%s16147_s24 + $0x1980] sm:$0xff]  ;;  %v3306_v62 = vcombine.high %v17100_v48, %v17100_v48  ;;  %v13893_v18 = vpack.c.bf16 %v1148_v13, %v1147_v10 }
 0x1ab   : > { %v13913_v44 = vpack.c.bf16 %v1174_v36, %v1173_v35  ;;  %v1166_v35 = vld [vmem:[%s16147_s24 + $0x1948] sm:$0xff]  ;;  %v1151_v36 = vld [vmem:[%s16147_s24 + $0x18d0] sm:$0xff] }
 0x1ac   : > { %13832 = vmatpush3.bf16.msra.mxu0 %v13831_v53  ;;  %v1125_v53 = vld [vmem:[%s16147_s24 + $0x1800] sm:$0xff] }
 0x1ad   : > { %13864 = vmatpush3.bf16.msra.mxu1 %v13863_v41  ;;  %13834 = vmatprep.subr.bf16.mxu0 %v13833_v42  ;;  %v1126_v41 = vld [vmem:[%s16147_s24 + $0x1808] sm:$0xff]  ;;  %v1157_v42 = vld [vmem:[%s16147_s24 + $0x1900] sm:$0xff] }
 0x1ae   : > { %13866 = vmatprep.subr.bf16.mxu1 %v13865_v37  ;;  %v1144_v37 = vld [vmem:[%s16147_s24 + $0x1898] sm:$0xff]  ;;  %v13883_v54 = vpack.c.bf16 %v1126_v41, %v1125_v53  ;;  %v13931_v53 = vpack.c.bf16 %v1166_v35, %v1165_v33  ;;  %v13901_v41 = vpack.c.bf16 %v1152_v38, %v1151_v36  ;;  %v1207_v33 = vld [vmem:[%s16147_s24 + $0x1a90] sm:$0xff] }
 0x1af   : > { %v1239_v36 = vld [vmem:[%s16147_s24 + $0x1b90] sm:$0xff]  ;;  %v1240_v38 = vld [vmem:[%s16147_s24 + $0x1b98] sm:$0xff] }
 0x1b0   : > { %13836 = vmatpush3.bf16.msra.mxu0 %v13835_v39  ;;  %v13915_v39 = vpack.c.bf16 %v1158_v45, %v1157_v42  ;;  %v1135_v42 = vld [vmem:[%s16147_s24 + $0x1850] sm:$0xff] }
 0x1b1   : > { %13868 = vmatpush3.bf16.msra.mxu1 %v13867_v34  ;;  %13838 = vmatprep.subr.bf16.mxu0 %v13837_v56  ;;  %v13885_v34 = vpack.c.bf16 %v1144_v37, %v1143_v47  ;;  %v1127_v56 = vld [vmem:[%s16147_s24 + $0x1810] sm:$0xff]  ;;  %v1168_v37 = vld [vmem:[%s16147_s24 + $0x1958] sm:$0xff] }
 0x1b2   : > { %v10441_v7 = vpop.f32.mrb[8].mxu0  ;;  %13870 = vmatprep.subr.bf16.mxu1 %v13869_v61  ;;  %v1160_v61 = vld [vmem:[%s16147_s24 + $0x1918] sm:$0xff]  ;;  %v1167_v45 = vld [vmem:[%s16147_s24 + $0x1950] sm:$0xff] }
 0x1b3   : > { %v10442_v17 = vpop.f32.mrb[9].mxu0  ;;  %v10476_v12 = vpop.f32.mrb[8].mxu1 }
 0x1b4   : > { %v10443_v16 = vadd.f32 %v10442_v17, %v10441_v7  ;;  %13840 = vmatpush3.bf16.msra.mxu0 %v13839_v1  ;;  %v10477_v8 = vpop.f32.mrb[9].mxu1  ;;  %v3307_v1 = vcombine.high %v17105_v63, %v17105_v63  ;;  %v13921_v7 = vpack.c.bf16 %v1178_v55, %v1177_v0  ;;  %v1155_v0 = vld [vmem:[%s16147_s24 + $0x18f0] sm:$0xff]  ;;  %v1156_v55 = vld [vmem:[%s16147_s24 + $0x18f8] sm:$0xff] }
 0x1b5   : > { %v10478_v24 = vadd.f32 %v10477_v8, %v10476_v12  ;;  %13872 = vmatpush3.bf16.msra.mxu1 %v13871_v2  ;;  %13842 = vmatprep.subr.bf16.mxu0 %v13841_v3  ;;  %v13887_v2 = vpack.c.bf16 %v1128_v57, %v1127_v56  ;;  %v13919_v3 = vpack.c.bf16 %v1160_v61, %v1159_v59  ;;  %v1163_v8 = vld [vmem:[%s16147_s24 + $0x1930] sm:$0xff]  ;;  %v1137_v59 = vld [vmem:[%s16147_s24 + $0x1860] sm:$0xff] }
 0x1b6   : > { %v4596_v30 = vadd.f32 %v10443_v16, %v17011_v51  ;;  %13874 = vmatprep.subr.bf16.mxu1 %v13873_v9  ;;  %v13847_v51 = vpack.c.bf16 %v1076_v28, %v1075_v22  ;;  %v1162_v9 = vld [vmem:[%s16147_s24 + $0x1928] sm:$0xff]  ;;  %v1132_v16 = vld [vmem:[%s16147_s24 + $0x1838] sm:$0xff]  ;;  %v13927_v29 = vpack.c.bf16 %v1164_v21, %v1163_v8  ;;  %v13935_v56 = vpack.c.bf16 %v1168_v37, %v1167_v45  ;;  %v1169_v61 = vld [vmem:[%s16147_s24 + $0x1960] sm:$0xff] }
 0x1b7   : > { %v13923_v12 = vpack.c.bf16 %v1162_v9, %v1161_v6  ;;  %v1182_v22 = vld [vmem:[%s16147_s24 + $0x19c8] sm:$0xff]  ;;  %v13895_v28 = vpack.c.bf16 %v1132_v16, %v1131_v19  ;;  %v13905_v57 = vpack.c.bf16 %v1154_v50, %v1153_v49  ;;  %v13909_v13 = vpack.c.bf16 %v1156_v55, %v1155_v0  ;;  %v1172_v19 = vld [vmem:[%s16147_s24 + $0x1978] sm:$0xff]  ;;  %v1205_v16 = vld [vmem:[%s16147_s24 + $0x1a80] sm:$0xff] }
 0x1b8   : > { %v17091_v43 = vadd.f32 %v10478_v24, %v4596_v30  ;;  %13844 = vmatpush3.bf16.msra.mxu0 %v13843_v20  ;;  %v1149_v24 = vld [vmem:[%s16147_s24 + $0x18c0] sm:$0xff]  ;;  %v1206_v8 = vld [vmem:[%s16147_s24 + $0x1a88] sm:$0xff]  ;;  %v13981_v45 = vpack.c.bf16 %v1240_v38, %v1239_v36  ;;  %v1212_v0 = vld [vmem:[%s16147_s24 + $0x1ab8] sm:$0xff] }
 0x1b9   : > { %13876 = vmatpush3.bf16.msra.mxu1 %v13875_v25  ;;  %13846 = vmatprep.subr.bf16.mxu0 %v13845_v27  ;;  %v1150_v25 = vld [vmem:[%s16147_s24 + $0x18c8] sm:$0xff]  ;;  %v1181_v27 = vld [vmem:[%s16147_s24 + $0x19c0] sm:$0xff]  ;;  %v1244_v55 = vld [vmem:[%s16147_s24 + $0x1bb8] sm:$0xff] }
 0x1ba   : > { %13878 = vmatprep.subr.bf16.mxu1 %v13877_v31  ;;  %v13897_v30 = vpack.c.bf16 %v1150_v25, %v1149_v24  ;;  %v1133_v31 = vld [vmem:[%s16147_s24 + $0x1840] sm:$0xff]  ;;  %v13929_v23 = vpack.c.bf16 %v1182_v22, %v1181_v27  ;;  %v1238_v21 = vld [vmem:[%s16147_s24 + $0x1b88] sm:$0xff]  ;;  %v13945_v22 = vpack.c.bf16 %v1206_v8, %v1205_v16 }
 0x1bb   : > { %v1209_v37 = vld [vmem:[%s16147_s24 + $0x1aa0] sm:$0xff]  ;;  %v1210_v49 = vld [vmem:[%s16147_s24 + $0x1aa8] sm:$0xff] }
 0x1bc   : > { %13848 = vmatpush3.bf16.msra.mxu0 %v13847_v51  ;;  %v1183_v51 = vld [vmem:[%s16147_s24 + $0x19d0] sm:$0xff]  ;;  %v1229_v16 = vld [vmem:[%s16147_s24 + $0x1b40] sm:$0xff]  ;;  %v1218_v38 = vld [vmem:[%s16147_s24 + $0x1ae8] sm:$0xff] }
 0x1bd   : > { %13880 = vmatpush3.bf16.msra.mxu1 %v13879_v40  ;;  %13882 = vmatprep.subr.bf16.mxu0 %v13881_v26  ;;  %v1184_v40 = vld [vmem:[%s16147_s24 + $0x19d8] sm:$0xff]  ;;  %v13899_v26 = vpack.c.bf16 %v1134_v32, %v1133_v31  ;;  %v1222_v32 = vld [vmem:[%s16147_s24 + $0x1b08] sm:$0xff]  ;;  %v1217_v36 = vld [vmem:[%s16147_s24 + $0x1ae0] sm:$0xff] }
 0x1be   : > { %13914 = vmatprep.subr.bf16.mxu1 %v13913_v44  ;;  %v1136_v44 = vld [vmem:[%s16147_s24 + $0x1858] sm:$0xff]  ;;  %v13933_v47 = vpack.c.bf16 %v1184_v40, %v1183_v51 }
 0x1bf   : > { %5574 = vmatmul.mubr.f32.vlgmr.msra.gmra.mrb[22].mxu0 %v17020_v58  ;;  %v1130_v58 = vld [vmem:[%s16147_s24 + $0x1828] sm:$0xff] }
 0x1c0   : > { %13884 = vmatpush3.bf16.msra.mxu0 %v13883_v54  ;;  %5644 = vmatmul.mubr.f32.vlgmr.msra.gmra.mrb[22].mxu1 %v17025_v11  ;;  %v1179_v11 = vld [vmem:[%s16147_s24 + $0x19b0] sm:$0xff]  ;;  %v13891_v17 = vpack.c.bf16 %v1130_v58, %v1129_v5  ;;  %v1185_v54 = vld [vmem:[%s16147_s24 + $0x19e0] sm:$0xff] }
 0x1c1   : > { %13916 = vmatpush3.bf16.msra.mxu1 %v13915_v39  ;;  %13886 = vmatprep.subr.bf16.mxu0 %v13885_v34  ;;  %v13925_v20 = vpack.c.bf16 %v1180_v15, %v1179_v11  ;;  %v1186_v39 = vld [vmem:[%s16147_s24 + $0x19e8] sm:$0xff]  ;;  %v13903_v34 = vpack.c.bf16 %v1136_v44, %v1135_v42  ;;  %v1139_v11 = vld [vmem:[%s16147_s24 + $0x1870] sm:$0xff]  ;;  %v1140_v15 = vld [vmem:[%s16147_s24 + $0x1878] sm:$0xff] }
 0x1c2   : > { %13918 = vmatprep.subr.bf16.mxu1 %v13917_v60  ;;  %5713 = vmatprep.mubr.f32.mxu0 %v3306_v62  ;;  %v1138_v60 = vld [vmem:[%s16147_s24 + $0x1868] sm:$0xff]  ;;  %v13937_v46 = vpack.c.bf16 %v1186_v39, %v1185_v54  ;;  %v1192_v42 = vld [vmem:[%s16147_s24 + $0x1a18] sm:$0xff]  ;;  %v1223_v44 = vld [vmem:[%s16147_s24 + $0x1b10] sm:$0xff] }
 0x1c3   : > { %5783 = vmatprep.mubr.f32.mxu1 %v3307_v1  ;;  %v1170_v62 = vld [vmem:[%s16147_s24 + $0x1968] sm:$0xff]  ;;  %v13907_v6 = vpack.c.bf16 %v1138_v60, %v1137_v59  ;;  %v1241_v54 = vld [vmem:[%s16147_s24 + $0x1ba0] sm:$0xff]  ;;  %v13953_v59 = vpack.c.bf16 %v1210_v49, %v1209_v37 }
 0x1c4   : > { %13888 = vmatpush3.bf16.msra.mxu0 %v13887_v2  ;;  %v13939_v10 = vpack.c.bf16 %v1170_v62, %v1169_v61  ;;  %v1242_v39 = vld [vmem:[%s16147_s24 + $0x1ba8] sm:$0xff]  ;;  %v1193_v60 = vld [vmem:[%s16147_s24 + $0x1a20] sm:$0xff]  ;;  %v1211_v62 = vld [vmem:[%s16147_s24 + $0x1ab0] sm:$0xff] }
 0x1c5   : > { %13920 = vmatpush3.bf16.msra.mxu1 %v13919_v3  ;;  %13890 = vmatprep.subr.bf16.mxu0 %v13889_v4  ;;  %v1187_v3 = vld [vmem:[%s16147_s24 + $0x19f0] sm:$0xff]  ;;  %v1188_v4 = vld [vmem:[%s16147_s24 + $0x19f8] sm:$0xff]  ;;  %v1225_v61 = vld [vmem:[%s16147_s24 + $0x1b20] sm:$0xff] }
 0x1c6   : > { %13922 = vmatprep.subr.bf16.mxu1 %v13921_v7  ;;  %v328_v7 = vld [vmem:[%s16157_s19 + $0x68] sm:$0xff] }
 0x1c7   : > { %v3308_v24 = vcombine.high %v328_v7, %v328_v7  ;;  %v17180_v35 = vrot.slane %v328_v7, %v16210_v14  ;;  %v1228_v7 = vld [vmem:[%s16147_s24 + $0x1b38] sm:$0xff] }
 0x1c8   : > { %13892 = vmatpush3.bf16.msra.mxu0 %v13891_v17  ;;  %v1171_v17 = vld [vmem:[%s16147_s24 + $0x1970] sm:$0xff] }
 0x1c9   : > { %13924 = vmatpush3.bf16.msra.mxu1 %v13923_v12  ;;  %13894 = vmatprep.subr.bf16.mxu0 %v13893_v18  ;;  %v13941_v18 = vpack.c.bf16 %v1188_v4, %v1187_v3  ;;  %v13943_v27 = vpack.c.bf16 %v1172_v19, %v1171_v17  ;;  %v17185_v51 = vrot.slane %v3308_v24, %v16210_v14  ;;  %v1195_v4 = vld [vmem:[%s16147_s24 + $0x1a30] sm:$0xff]  ;;  %v1198_v19 = vld [vmem:[%s16147_s24 + $0x1a48] sm:$0xff]  ;;  %v1216_v24 = vld [vmem:[%s16147_s24 + $0x1ad8] sm:$0xff] }
 0x1ca   : > { %13926 = vmatprep.subr.bf16.mxu1 %v13925_v20  ;;  %v1237_v20 = vld [vmem:[%s16147_s24 + $0x1b80] sm:$0xff]  ;;  %v3323_v50 = vcombine.high %v17180_v35, %v17180_v35  ;;  %v13957_v3 = vpack.c.bf16 %v1212_v0, %v1211_v62 }
 0x1cb   : > { %v13977_v31 = vpack.c.bf16 %v1238_v21, %v1237_v20  ;;  %v1230_v20 = vld [vmem:[%s16147_s24 + $0x1b48] sm:$0xff]  ;;  %v1215_v21 = vld [vmem:[%s16147_s24 + $0x1ad0] sm:$0xff] }
 0x1cc   : > { %13896 = vmatpush3.bf16.msra.mxu0 %v13895_v28  ;;  %v1189_v28 = vld [vmem:[%s16147_s24 + $0x1a00] sm:$0xff] }
 0x1cd   : > { %13928 = vmatpush3.bf16.msra.mxu1 %v13927_v29  ;;  %13898 = vmatprep.subr.bf16.mxu0 %v13897_v30  ;;  %v1190_v29 = vld [vmem:[%s16147_s24 + $0x1a08] sm:$0xff]  ;;  %v1221_v30 = vld [vmem:[%s16147_s24 + $0x1b00] sm:$0xff] }
 0x1ce   : > { %13930 = vmatprep.subr.bf16.mxu1 %v13929_v23  ;;  %v1208_v23 = vld [vmem:[%s16147_s24 + $0x1a98] sm:$0xff]  ;;  %v13947_v40 = vpack.c.bf16 %v1190_v29, %v1189_v28  ;;  %v13995_v28 = vpack.c.bf16 %v1230_v20, %v1229_v16  ;;  %v13965_v29 = vpack.c.bf16 %v1216_v24, %v1215_v21  ;;  %v1271_v16 = vld [vmem:[%s16147_s24 + $0x1c90] sm:$0xff] }
 0x1cf   : > { %v1303_v21 = vld [vmem:[%s16147_s24 + $0x1d90] sm:$0xff]  ;;  %v1304_v24 = vld [vmem:[%s16147_s24 + $0x1d98] sm:$0xff] }
 0x1d0   : > { %13900 = vmatpush3.bf16.msra.mxu0 %v13899_v26  ;;  %v13979_v26 = vpack.c.bf16 %v1222_v32, %v1221_v30  ;;  %v1199_v30 = vld [vmem:[%s16147_s24 + $0x1a50] sm:$0xff] }
 0x1d1   : > { %13932 = vmatpush3.bf16.msra.mxu1 %v13931_v53  ;;  %13902 = vmatprep.subr.bf16.mxu0 %v13901_v41  ;;  %v13949_v53 = vpack.c.bf16 %v1208_v23, %v1207_v33  ;;  %v1191_v41 = vld [vmem:[%s16147_s24 + $0x1a10] sm:$0xff]  ;;  %v1232_v23 = vld [vmem:[%s16147_s24 + $0x1b58] sm:$0xff] }
 0x1d2   : > { %v10511_v52 = vpop.f32.mrb[10].mxu0  ;;  %13934 = vmatprep.subr.bf16.mxu1 %v13933_v47  ;;  %v1224_v47 = vld [vmem:[%s16147_s24 + $0x1b18] sm:$0xff]  ;;  %v1231_v32 = vld [vmem:[%s16147_s24 + $0x1b50] sm:$0xff] }
 0x1d3   : > { %v10512_v1 = vpop.f32.mrb[11].mxu0  ;;  %v10546_v2 = vpop.f32.mrb[10].mxu1 }
 0x1d4   : > { %v10513_v5 = vadd.f32 %v10512_v1, %v10511_v52  ;;  %13904 = vmatpush3.bf16.msra.mxu0 %v13903_v34  ;;  %v10547_v58 = vpop.f32.mrb[11].mxu1  ;;  %v3324_v34 = vcombine.high %v17185_v51, %v17185_v51  ;;  %v13985_v52 = vpack.c.bf16 %v1242_v39, %v1241_v54  ;;  %v1219_v54 = vld [vmem:[%s16147_s24 + $0x1af0] sm:$0xff]  ;;  %v1220_v39 = vld [vmem:[%s16147_s24 + $0x1af8] sm:$0xff] }
 0x1d5   : > { %v10548_v9 = vadd.f32 %v10547_v58, %v10546_v2  ;;  %13936 = vmatpush3.bf16.msra.mxu1 %v13935_v56  ;;  %13906 = vmatprep.subr.bf16.mxu0 %v13905_v57  ;;  %v13951_v56 = vpack.c.bf16 %v1192_v42, %v1191_v41  ;;  %v13983_v57 = vpack.c.bf16 %v1224_v47, %v1223_v44  ;;  %v1227_v58 = vld [vmem:[%s16147_s24 + $0x1b30] sm:$0xff]  ;;  %v1201_v44 = vld [vmem:[%s16147_s24 + $0x1a60] sm:$0xff] }
 0x1d6   : > { %v4736_v12 = vadd.f32 %v10513_v5, %v17091_v43  ;;  %13938 = vmatprep.subr.bf16.mxu1 %v13937_v46  ;;  %v13911_v43 = vpack.c.bf16 %v1140_v15, %v1139_v11  ;;  %v1226_v46 = vld [vmem:[%s16147_s24 + $0x1b28] sm:$0xff]  ;;  %v1196_v5 = vld [vmem:[%s16147_s24 + $0x1a38] sm:$0xff]  ;;  %v13991_v17 = vpack.c.bf16 %v1228_v7, %v1227_v58  ;;  %v13999_v41 = vpack.c.bf16 %v1232_v23, %v1231_v32  ;;  %v1233_v47 = vld [vmem:[%s16147_s24 + $0x1b60] sm:$0xff] }
 0x1d7   : > { %v13987_v2 = vpack.c.bf16 %v1226_v46, %v1225_v61  ;;  %v1246_v11 = vld [vmem:[%s16147_s24 + $0x1bc8] sm:$0xff]  ;;  %v13959_v15 = vpack.c.bf16 %v1196_v5, %v1195_v4  ;;  %v13969_v42 = vpack.c.bf16 %v1218_v38, %v1217_v36  ;;  %v13973_v0 = vpack.c.bf16 %v1220_v39, %v1219_v54  ;;  %v1236_v4 = vld [vmem:[%s16147_s24 + $0x1b78] sm:$0xff]  ;;  %v1269_v5 = vld [vmem:[%s16147_s24 + $0x1c80] sm:$0xff] }
 0x1d8   : > { %v17171_v25 = vadd.f32 %v10548_v9, %v4736_v12  ;;  %13908 = vmatpush3.bf16.msra.mxu0 %v13907_v6  ;;  %v1213_v9 = vld [vmem:[%s16147_s24 + $0x1ac0] sm:$0xff]  ;;  %v1270_v58 = vld [vmem:[%s16147_s24 + $0x1c88] sm:$0xff]  ;;  %v14045_v32 = vpack.c.bf16 %v1304_v24, %v1303_v21  ;;  %v1276_v54 = vld [vmem:[%s16147_s24 + $0x1cb8] sm:$0xff] }
 0x1d9   : > { %13940 = vmatpush3.bf16.msra.mxu1 %v13939_v10  ;;  %13910 = vmatprep.subr.bf16.mxu0 %v13909_v13  ;;  %v1214_v10 = vld [vmem:[%s16147_s24 + $0x1ac8] sm:$0xff]  ;;  %v1245_v13 = vld [vmem:[%s16147_s24 + $0x1bc0] sm:$0xff]  ;;  %v1308_v39 = vld [vmem:[%s16147_s24 + $0x1db8] sm:$0xff] }
 0x1da   : > { %13942 = vmatprep.subr.bf16.mxu1 %v13941_v18  ;;  %v13961_v12 = vpack.c.bf16 %v1214_v10, %v1213_v9  ;;  %v1197_v18 = vld [vmem:[%s16147_s24 + $0x1a40] sm:$0xff]  ;;  %v13993_v8 = vpack.c.bf16 %v1246_v11, %v1245_v13  ;;  %v1302_v7 = vld [vmem:[%s16147_s24 + $0x1d88] sm:$0xff]  ;;  %v14009_v11 = vpack.c.bf16 %v1270_v58, %v1269_v5 }
 0x1db   : > { %v1273_v23 = vld [vmem:[%s16147_s24 + $0x1ca0] sm:$0xff]  ;;  %v1274_v36 = vld [vmem:[%s16147_s24 + $0x1ca8] sm:$0xff] }
 0x1dc   : > { %13912 = vmatpush3.bf16.msra.mxu0 %v13911_v43  ;;  %v1247_v43 = vld [vmem:[%s16147_s24 + $0x1bd0] sm:$0xff]  ;;  %v1293_v5 = vld [vmem:[%s16147_s24 + $0x1d40] sm:$0xff]  ;;  %v1282_v24 = vld [vmem:[%s16147_s24 + $0x1ce8] sm:$0xff] }
 0x1dd   : > { %13944 = vmatpush3.bf16.msra.mxu1 %v13943_v27  ;;  %13946 = vmatprep.subr.bf16.mxu0 %v13945_v22  ;;  %v1248_v27 = vld [vmem:[%s16147_s24 + $0x1bd8] sm:$0xff]  ;;  %v13963_v22 = vpack.c.bf16 %v1198_v19, %v1197_v18  ;;  %v1286_v19 = vld [vmem:[%s16147_s24 + $0x1d08] sm:$0xff]  ;;  %v1281_v21 = vld [vmem:[%s16147_s24 + $0x1ce0] sm:$0xff] }
 0x1de   : > { %13978 = vmatprep.subr.bf16.mxu1 %v13977_v31  ;;  %v1200_v31 = vld [vmem:[%s16147_s24 + $0x1a58] sm:$0xff]  ;;  %v13997_v33 = vpack.c.bf16 %v1248_v27, %v1247_v43 }
 0x1df   : > { %5714 = vmatmul.mubr.f32.vlgmr.msra.gmra.mrb[24].mxu0 %v17100_v48  ;;  %v1194_v48 = vld [vmem:[%s16147_s24 + $0x1a28] sm:$0xff] }
 0x1e0   : > { %13948 = vmatpush3.bf16.msra.mxu0 %v13947_v40  ;;  %5784 = vmatmul.mubr.f32.vlgmr.msra.gmra.mrb[24].mxu1 %v17105_v63  ;;  %v1243_v63 = vld [vmem:[%s16147_s24 + $0x1bb0] sm:$0xff]  ;;  %v13955_v1 = vpack.c.bf16 %v1194_v48, %v1193_v60  ;;  %v1249_v40 = vld [vmem:[%s16147_s24 + $0x1be0] sm:$0xff] }
 0x1e1   : > { %13980 = vmatpush3.bf16.msra.mxu1 %v13979_v26  ;;  %13950 = vmatprep.subr.bf16.mxu0 %v13949_v53  ;;  %v13989_v6 = vpack.c.bf16 %v1244_v55, %v1243_v63  ;;  %v1250_v26 = vld [vmem:[%s16147_s24 + $0x1be8] sm:$0xff]  ;;  %v13967_v53 = vpack.c.bf16 %v1200_v31, %v1199_v30  ;;  %v1203_v63 = vld [vmem:[%s16147_s24 + $0x1a70] sm:$0xff]  ;;  %v1204_v55 = vld [vmem:[%s16147_s24 + $0x1a78] sm:$0xff] }
 0x1e2   : > { %13982 = vmatprep.subr.bf16.mxu1 %v13981_v45  ;;  %5853 = vmatprep.mubr.f32.mxu0 %v3323_v50  ;;  %v1202_v45 = vld [vmem:[%s16147_s24 + $0x1a68] sm:$0xff]  ;;  %v14001_v49 = vpack.c.bf16 %v1250_v26, %v1249_v40  ;;  %v1256_v30 = vld [vmem:[%s16147_s24 + $0x1c18] sm:$0xff]  ;;  %v1287_v31 = vld [vmem:[%s16147_s24 + $0x1d10] sm:$0xff] }
 0x1e3   : > { %5923 = vmatprep.mubr.f32.mxu1 %v3324_v34  ;;  %v1234_v50 = vld [vmem:[%s16147_s24 + $0x1b68] sm:$0xff]  ;;  %v13971_v61 = vpack.c.bf16 %v1202_v45, %v1201_v44  ;;  %v1305_v40 = vld [vmem:[%s16147_s24 + $0x1da0] sm:$0xff]  ;;  %v14017_v44 = vpack.c.bf16 %v1274_v36, %v1273_v23 }
 0x1e4   : > { %13952 = vmatpush3.bf16.msra.mxu0 %v13951_v56  ;;  %v14003_v62 = vpack.c.bf16 %v1234_v50, %v1233_v47  ;;  %v1306_v26 = vld [vmem:[%s16147_s24 + $0x1da8] sm:$0xff]  ;;  %v1257_v45 = vld [vmem:[%s16147_s24 + $0x1c20] sm:$0xff]  ;;  %v1275_v50 = vld [vmem:[%s16147_s24 + $0x1cb0] sm:$0xff] }
 0x1e5   : > { %13984 = vmatpush3.bf16.msra.mxu1 %v13983_v57  ;;  %13954 = vmatprep.subr.bf16.mxu0 %v13953_v59  ;;  %v1251_v57 = vld [vmem:[%s16147_s24 + $0x1bf0] sm:$0xff]  ;;  %v1252_v59 = vld [vmem:[%s16147_s24 + $0x1bf8] sm:$0xff]  ;;  %v1289_v47 = vld [vmem:[%s16147_s24 + $0x1d20] sm:$0xff] }
 0x1e6   : > { %13986 = vmatprep.subr.bf16.mxu1 %v13985_v52  ;;  %v329_v52 = vld [vmem:[%s16157_s19 + $0x70] sm:$0xff] }
 0x1e7   : > { %v3325_v9 = vcombine.high %v329_v52, %v329_v52  ;;  %v17260_v20 = vrot.slane %v329_v52, %v16210_v14  ;;  %v1292_v52 = vld [vmem:[%s16147_s24 + $0x1d38] sm:$0xff] }
 0x1e8   : > { %13956 = vmatpush3.bf16.msra.mxu0 %v13955_v1  ;;  %v1235_v1 = vld [vmem:[%s16147_s24 + $0x1b70] sm:$0xff] }
 0x1e9   : > { %13988 = vmatpush3.bf16.msra.mxu1 %v13987_v2  ;;  %13958 = vmatprep.subr.bf16.mxu0 %v13957_v3  ;;  %v14005_v3 = vpack.c.bf16 %v1252_v59, %v1251_v57  ;;  %v14007_v13 = vpack.c.bf16 %v1236_v4, %v1235_v1  ;;  %v17265_v43 = vrot.slane %v3325_v9, %v16210_v14  ;;  %v1259_v59 = vld [vmem:[%s16147_s24 + $0x1c30] sm:$0xff]  ;;  %v1262_v4 = vld [vmem:[%s16147_s24 + $0x1c48] sm:$0xff]  ;;  %v1280_v9 = vld [vmem:[%s16147_s24 + $0x1cd8] sm:$0xff] }
 0x1ea   : > { %13990 = vmatprep.subr.bf16.mxu1 %v13989_v6  ;;  %v1301_v6 = vld [vmem:[%s16147_s24 + $0x1d80] sm:$0xff]  ;;  %v3340_v38 = vcombine.high %v17260_v20, %v17260_v20  ;;  %v14021_v57 = vpack.c.bf16 %v1276_v54, %v1275_v50 }
 0x1eb   : > { %v14041_v18 = vpack.c.bf16 %v1302_v7, %v1301_v6  ;;  %v1294_v6 = vld [vmem:[%s16147_s24 + $0x1d48] sm:$0xff]  ;;  %v1279_v7 = vld [vmem:[%s16147_s24 + $0x1cd0] sm:$0xff] }
 0x1ec   : > { %13960 = vmatpush3.bf16.msra.mxu0 %v13959_v15  ;;  %v1253_v15 = vld [vmem:[%s16147_s24 + $0x1c00] sm:$0xff] }
 0x1ed   : > { %13992 = vmatpush3.bf16.msra.mxu1 %v13991_v17  ;;  %13962 = vmatprep.subr.bf16.mxu0 %v13961_v12  ;;  %v1254_v17 = vld [vmem:[%s16147_s24 + $0x1c08] sm:$0xff]  ;;  %v1285_v12 = vld [vmem:[%s16147_s24 + $0x1d00] sm:$0xff] }
 0x1ee   : > { %13994 = vmatprep.subr.bf16.mxu1 %v13993_v8  ;;  %v1272_v8 = vld [vmem:[%s16147_s24 + $0x1c98] sm:$0xff]  ;;  %v14011_v27 = vpack.c.bf16 %v1254_v17, %v1253_v15  ;;  %v14059_v15 = vpack.c.bf16 %v1294_v6, %v1293_v5  ;;  %v14029_v17 = vpack.c.bf16 %v1280_v9, %v1279_v7  ;;  %v1335_v5 = vld [vmem:[%s16147_s24 + $0x1e90] sm:$0xff] }
 0x1ef   : > { %v1367_v7 = vld [vmem:[%s16147_s24 + $0x1f90] sm:$0xff]  ;;  %v1368_v9 = vld [vmem:[%s16147_s24 + $0x1f98] sm:$0xff] }
 0x1f0   : > { %13964 = vmatpush3.bf16.msra.mxu0 %v13963_v22  ;;  %v14043_v22 = vpack.c.bf16 %v1286_v19, %v1285_v12  ;;  %v1263_v12 = vld [vmem:[%s16147_s24 + $0x1c50] sm:$0xff] }
 0x1f1   : > { %13996 = vmatpush3.bf16.msra.mxu1 %v13995_v28  ;;  %13966 = vmatprep.subr.bf16.mxu0 %v13965_v29  ;;  %v14013_v28 = vpack.c.bf16 %v1272_v8, %v1271_v16  ;;  %v1255_v29 = vld [vmem:[%s16147_s24 + $0x1c10] sm:$0xff]  ;;  %v1296_v8 = vld [vmem:[%s16147_s24 + $0x1d58] sm:$0xff] }
 0x1f2   : > { %v10581_v37 = vpop.f32.mrb[12].mxu0  ;;  %13998 = vmatprep.subr.bf16.mxu1 %v13997_v33  ;;  %v1288_v33 = vld [vmem:[%s16147_s24 + $0x1d18] sm:$0xff]  ;;  %v1295_v19 = vld [vmem:[%s16147_s24 + $0x1d50] sm:$0xff] }
 0x1f3   : > { %v10582_v34 = vpop.f32.mrb[13].mxu0  ;;  %v10616_v56 = vpop.f32.mrb[12].mxu1 }
 0x1f4   : > { %v10583_v60 = vadd.f32 %v10582_v34, %v10581_v37  ;;  %13968 = vmatpush3.bf16.msra.mxu0 %v13967_v53  ;;  %v10617_v48 = vpop.f32.mrb[13].mxu1  ;;  %v3341_v53 = vcombine.high %v17265_v43, %v17265_v43  ;;  %v14049_v37 = vpack.c.bf16 %v1306_v26, %v1305_v40  ;;  %v1283_v40 = vld [vmem:[%s16147_s24 + $0x1cf0] sm:$0xff]  ;;  %v1284_v26 = vld [vmem:[%s16147_s24 + $0x1cf8] sm:$0xff] }
 0x1f5   : > { %v10618_v46 = vadd.f32 %v10617_v48, %v10616_v56  ;;  %14000 = vmatpush3.bf16.msra.mxu1 %v13999_v41  ;;  %13970 = vmatprep.subr.bf16.mxu0 %v13969_v42  ;;  %v14015_v41 = vpack.c.bf16 %v1256_v30, %v1255_v29  ;;  %v14047_v42 = vpack.c.bf16 %v1288_v33, %v1287_v31  ;;  %v1291_v48 = vld [vmem:[%s16147_s24 + $0x1d30] sm:$0xff]  ;;  %v1265_v31 = vld [vmem:[%s16147_s24 + $0x1c60] sm:$0xff] }
 0x1f6   : > { %v4876_v2 = vadd.f32 %v10583_v60, %v17171_v25  ;;  %14002 = vmatprep.subr.bf16.mxu1 %v14001_v49  ;;  %v13975_v25 = vpack.c.bf16 %v1204_v55, %v1203_v63  ;;  %v1290_v49 = vld [vmem:[%s16147_s24 + $0x1d28] sm:$0xff]  ;;  %v1260_v60 = vld [vmem:[%s16147_s24 + $0x1c38] sm:$0xff]  ;;  %v14055_v1 = vpack.c.bf16 %v1292_v52, %v1291_v48  ;;  %v14063_v29 = vpack.c.bf16 %v1296_v8, %v1295_v19  ;;  %v1297_v33 = vld [vmem:[%s16147_s24 + $0x1d60] sm:$0xff] }
 0x1f7   : > { %v14051_v56 = vpack.c.bf16 %v1290_v49, %v1289_v47  ;;  %v1310_v63 = vld [vmem:[%s16147_s24 + $0x1dc8] sm:$0xff]  ;;  %v14023_v55 = vpack.c.bf16 %v1260_v60, %v1259_v59  ;;  %v14033_v30 = vpack.c.bf16 %v1282_v24, %v1281_v21  ;;  %v14037_v54 = vpack.c.bf16 %v1284_v26, %v1283_v40  ;;  %v1300_v59 = vld [vmem:[%s16147_s24 + $0x1d78] sm:$0xff]  ;;  %v1333_v60 = vld [vmem:[%s16147_s24 + $0x1e80] sm:$0xff] }
 0x1f8   : > { %v17251_v10 = vadd.f32 %v10618_v46, %v4876_v2  ;;  %13972 = vmatpush3.bf16.msra.mxu0 %v13971_v61  ;;  %v1277_v46 = vld [vmem:[%s16147_s24 + $0x1cc0] sm:$0xff]  ;;  %v1334_v48 = vld [vmem:[%s16147_s24 + $0x1e88] sm:$0xff]  ;;  %v14109_v19 = vpack.c.bf16 %v1368_v9, %v1367_v7  ;;  %v1340_v40 = vld [vmem:[%s16147_s24 + $0x1eb8] sm:$0xff] }
 0x1f9   : > { %14004 = vmatpush3.bf16.msra.mxu1 %v14003_v62  ;;  %13974 = vmatprep.subr.bf16.mxu0 %v13973_v0  ;;  %v1278_v62 = vld [vmem:[%s16147_s24 + $0x1cc8] sm:$0xff]  ;;  %v1309_v0 = vld [vmem:[%s16147_s24 + $0x1dc0] sm:$0xff]  ;;  %v1372_v26 = vld [vmem:[%s16147_s24 + $0x1fb8] sm:$0xff] }
 0x1fa   : > { %14006 = vmatprep.subr.bf16.mxu1 %v14005_v3  ;;  %v14025_v2 = vpack.c.bf16 %v1278_v62, %v1277_v46  ;;  %v1261_v3 = vld [vmem:[%s16147_s24 + $0x1c40] sm:$0xff]  ;;  %v14057_v58 = vpack.c.bf16 %v1310_v63, %v1309_v0  ;;  %v1366_v52 = vld [vmem:[%s16147_s24 + $0x1f88] sm:$0xff]  ;;  %v14073_v63 = vpack.c.bf16 %v1334_v48, %v1333_v60 }
 0x1fb   : > { %v1337_v8 = vld [vmem:[%s16147_s24 + $0x1ea0] sm:$0xff]  ;;  %v1338_v21 = vld [vmem:[%s16147_s24 + $0x1ea8] sm:$0xff] }
 0x1fc   : > { %13976 = vmatpush3.bf16.msra.mxu0 %v13975_v25  ;;  %v1311_v25 = vld [vmem:[%s16147_s24 + $0x1dd0] sm:$0xff]  ;;  %v1357_v60 = vld [vmem:[%s16147_s24 + $0x1f40] sm:$0xff]  ;;  %v1346_v9 = vld [vmem:[%s16147_s24 + $0x1ee8] sm:$0xff] }
 0x1fd   : > { %14008 = vmatpush3.bf16.msra.mxu1 %v14007_v13  ;;  %14010 = vmatprep.subr.bf16.mxu0 %v14009_v11  ;;  %v1312_v13 = vld [vmem:[%s16147_s24 + $0x1dd8] sm:$0xff]  ;;  %v14027_v11 = vpack.c.bf16 %v1262_v4, %v1261_v3  ;;  %v1350_v4 = vld [vmem:[%s16147_s24 + $0x1f08] sm:$0xff]  ;;  %v1345_v7 = vld [vmem:[%s16147_s24 + $0x1ee0] sm:$0xff] }
 0x1fe   : > { %14042 = vmatprep.subr.bf16.mxu1 %v14041_v18  ;;  %v1264_v18 = vld [vmem:[%s16147_s24 + $0x1c58] sm:$0xff]  ;;  %v14061_v16 = vpack.c.bf16 %v1312_v13, %v1311_v25 }
 0x1ff   : > { %5854 = vmatmul.mubr.f32.vlgmr.msra.gmra.mrb[26].mxu0 %v17180_v35  ;;  %v1258_v35 = vld [vmem:[%s16147_s24 + $0x1c28] sm:$0xff] }
 0x200   : > { %14012 = vmatpush3.bf16.msra.mxu0 %v14011_v27  ;;  %5924 = vmatmul.mubr.f32.vlgmr.msra.gmra.mrb[26].mxu1 %v17185_v51  ;;  %v1307_v51 = vld [vmem:[%s16147_s24 + $0x1db0] sm:$0xff]  ;;  %v14019_v34 = vpack.c.bf16 %v1258_v35, %v1257_v45  ;;  %v1313_v27 = vld [vmem:[%s16147_s24 + $0x1de0] sm:$0xff] }
 0x201   : > { %14044 = vmatpush3.bf16.msra.mxu1 %v14043_v22  ;;  %14014 = vmatprep.subr.bf16.mxu0 %v14013_v28  ;;  %v14053_v61 = vpack.c.bf16 %v1308_v39, %v1307_v51  ;;  %v1314_v22 = vld [vmem:[%s16147_s24 + $0x1de8] sm:$0xff]  ;;  %v14031_v28 = vpack.c.bf16 %v1264_v18, %v1263_v12  ;;  %v1267_v51 = vld [vmem:[%s16147_s24 + $0x1c70] sm:$0xff]  ;;  %v1268_v39 = vld [vmem:[%s16147_s24 + $0x1c78] sm:$0xff] }
 0x202   : > { %14046 = vmatprep.subr.bf16.mxu1 %v14045_v32  ;;  %5993 = vmatprep.mubr.f32.mxu0 %v3340_v38  ;;  %v1266_v32 = vld [vmem:[%s16147_s24 + $0x1c68] sm:$0xff]  ;;  %v14065_v36 = vpack.c.bf16 %v1314_v22, %v1313_v27  ;;  %v1320_v12 = vld [vmem:[%s16147_s24 + $0x1e18] sm:$0xff]  ;;  %v1351_v18 = vld [vmem:[%s16147_s24 + $0x1f10] sm:$0xff] }
 0x203   : > { %6063 = vmatprep.mubr.f32.mxu1 %v3341_v53  ;;  %v1298_v38 = vld [vmem:[%s16147_s24 + $0x1d68] sm:$0xff]  ;;  %v14035_v47 = vpack.c.bf16 %v1266_v32, %v1265_v31  ;;  %v1369_v27 = vld [vmem:[%s16147_s24 + $0x1fa0] sm:$0xff]  ;;  %v14081_v31 = vpack.c.bf16 %v1338_v21, %v1337_v8 }
 0x204   : > { %14016 = vmatpush3.bf16.msra.mxu0 %v14015_v41  ;;  %v14067_v50 = vpack.c.bf16 %v1298_v38, %v1297_v33  ;;  %v1370_v22 = vld [vmem:[%s16147_s24 + $0x1fa8] sm:$0xff]  ;;  %v1321_v32 = vld [vmem:[%s16147_s24 + $0x1e20] sm:$0xff]  ;;  %v1339_v38 = vld [vmem:[%s16147_s24 + $0x1eb0] sm:$0xff] }
 0x205   : > { %14048 = vmatpush3.bf16.msra.mxu1 %v14047_v42  ;;  %14018 = vmatprep.subr.bf16.mxu0 %v14017_v44  ;;  %v1315_v42 = vld [vmem:[%s16147_s24 + $0x1df0] sm:$0xff]  ;;  %v1316_v44 = vld [vmem:[%s16147_s24 + $0x1df8] sm:$0xff]  ;;  %v1353_v33 = vld [vmem:[%s16147_s24 + $0x1f20] sm:$0xff] }
 0x206   : > { %14050 = vmatprep.subr.bf16.mxu1 %v14049_v37  ;;  %v330_v37 = vld [vmem:[%s16157_s19 + $0x78] sm:$0xff] }
 0x207   : > { %v3342_v46 = vcombine.high %v330_v37, %v330_v37  ;;  %v17340_v6 = vrot.slane %v330_v37, %v16210_v14  ;;  %v1356_v37 = vld [vmem:[%s16147_s24 + $0x1f38] sm:$0xff] }
 0x208   : > { %14020 = vmatpush3.bf16.msra.mxu0 %v14019_v34  ;;  %v1299_v34 = vld [vmem:[%s16147_s24 + $0x1d70] sm:$0xff] }
 0x209   : > { %14052 = vmatpush3.bf16.msra.mxu1 %v14051_v56  ;;  %14022 = vmatprep.subr.bf16.mxu0 %v14021_v57  ;;  %v14069_v57 = vpack.c.bf16 %v1316_v44, %v1315_v42  ;;  %v14071_v0 = vpack.c.bf16 %v1300_v59, %v1299_v34  ;;  %v17345_v25 = vrot.slane %v3342_v46, %v16210_v14  ;;  %v1323_v44 = vld [vmem:[%s16147_s24 + $0x1e30] sm:$0xff]  ;;  %v1326_v59 = vld [vmem:[%s16147_s24 + $0x1e48] sm:$0xff]  ;;  %v1344_v46 = vld [vmem:[%s16147_s24 + $0x1ed8] sm:$0xff] }
 0x20a   : > { %14054 = vmatprep.subr.bf16.mxu1 %v14053_v61  ;;  %v1365_v61 = vld [vmem:[%s16147_s24 + $0x1f80] sm:$0xff]  ;;  %v3357_v24 = vcombine.high %v17340_v6, %v17340_v6  ;;  %v14085_v42 = vpack.c.bf16 %v1340_v40, %v1339_v38 }
 0x20b   : > { %v14105_v3 = vpack.c.bf16 %v1366_v52, %v1365_v61  ;;  %v1358_v61 = vld [vmem:[%s16147_s24 + $0x1f48] sm:$0xff]  ;;  %v1343_v52 = vld [vmem:[%s16147_s24 + $0x1ed0] sm:$0xff] }
 0x20c   : > { %14024 = vmatpush3.bf16.msra.mxu0 %v14023_v55  ;;  %v1317_v55 = vld [vmem:[%s16147_s24 + $0x1e00] sm:$0xff] }
 0x20d   : > { %14056 = vmatpush3.bf16.msra.mxu1 %v14055_v1  ;;  %14026 = vmatprep.subr.bf16.mxu0 %v14025_v2  ;;  %v1318_v1 = vld [vmem:[%s16147_s24 + $0x1e08] sm:$0xff]  ;;  %v1349_v2 = vld [vmem:[%s16147_s24 + $0x1f00] sm:$0xff] }
 0x20e   : > { %14058 = vmatprep.subr.bf16.mxu1 %v14057_v58  ;;  %v1336_v58 = vld [vmem:[%s16147_s24 + $0x1e98] sm:$0xff]  ;;  %v14075_v13 = vpack.c.bf16 %v1318_v1, %v1317_v55  ;;  %v14123_v55 = vpack.c.bf16 %v1358_v61, %v1357_v60  ;;  %v14093_v1 = vpack.c.bf16 %v1344_v46, %v1343_v52  ;;  %v1399_v60 = vld [vmem:[%s16147_s24 + $0x2090] sm:$0xff] }
 0x20f   : > { %v1431_v52 = vld [vmem:[%s16147_s24 + $0x2190] sm:$0xff]  ;;  %v1432_v46 = vld [vmem:[%s16147_s24 + $0x2198] sm:$0xff] }
 0x210   : > { %14028 = vmatpush3.bf16.msra.mxu0 %v14027_v11  ;;  %v14107_v11 = vpack.c.bf16 %v1350_v4, %v1349_v2  ;;  %v1327_v2 = vld [vmem:[%s16147_s24 + $0x1e50] sm:$0xff] }
 0x211   : > { %14060 = vmatpush3.bf16.msra.mxu1 %v14059_v15  ;;  %14030 = vmatprep.subr.bf16.mxu0 %v14029_v17  ;;  %v14077_v15 = vpack.c.bf16 %v1336_v58, %v1335_v5  ;;  %v1319_v17 = vld [vmem:[%s16147_s24 + $0x1e10] sm:$0xff]  ;;  %v1360_v58 = vld [vmem:[%s16147_s24 + $0x1f58] sm:$0xff] }
 0x212   : > { %v10651_v23 = vpop.f32.mrb[14].mxu0  ;;  %14062 = vmatprep.subr.bf16.mxu1 %v14061_v16  ;;  %v1352_v16 = vld [vmem:[%s16147_s24 + $0x1f18] sm:$0xff]  ;;  %v1359_v4 = vld [vmem:[%s16147_s24 + $0x1f50] sm:$0xff] }
 0x213   : > { %v10652_v53 = vpop.f32.mrb[15].mxu0  ;;  %v10686_v41 = vpop.f32.mrb[14].mxu1 }
 0x214   : > { %v10653_v45 = vadd.f32 %v10652_v53, %v10651_v23  ;;  %14032 = vmatpush3.bf16.msra.mxu0 %v14031_v28  ;;  %v10687_v35 = vpop.f32.mrb[15].mxu1  ;;  %v3358_v28 = vcombine.high %v17345_v25, %v17345_v25  ;;  %v14113_v23 = vpack.c.bf16 %v1370_v22, %v1369_v27  ;;  %v1347_v27 = vld [vmem:[%s16147_s24 + $0x1ef0] sm:$0xff]  ;;  %v1348_v22 = vld [vmem:[%s16147_s24 + $0x1ef8] sm:$0xff] }
 0x215   : > { %v10688_v49 = vadd.f32 %v10687_v35, %v10686_v41  ;;  %14064 = vmatpush3.bf16.msra.mxu1 %v14063_v29  ;;  %14034 = vmatprep.subr.bf16.mxu0 %v14033_v30  ;;  %v14079_v29 = vpack.c.bf16 %v1320_v12, %v1319_v17  ;;  %v14111_v30 = vpack.c.bf16 %v1352_v16, %v1351_v18  ;;  %v1355_v35 = vld [vmem:[%s16147_s24 + $0x1f30] sm:$0xff]  ;;  %v1329_v18 = vld [vmem:[%s16147_s24 + $0x1e60] sm:$0xff] }
 0x216   : > { %v5016_v56 = vadd.f32 %v10653_v45, %v17251_v10  ;;  %14066 = vmatprep.subr.bf16.mxu1 %v14065_v36  ;;  %v14039_v10 = vpack.c.bf16 %v1268_v39, %v1267_v51  ;;  %v1354_v36 = vld [vmem:[%s16147_s24 + $0x1f28] sm:$0xff]  ;;  %v1324_v45 = vld [vmem:[%s16147_s24 + $0x1e38] sm:$0xff]  ;;  %v14119_v34 = vpack.c.bf16 %v1356_v37, %v1355_v35  ;;  %v14127_v17 = vpack.c.bf16 %v1360_v58, %v1359_v4  ;;  %v1361_v16 = vld [vmem:[%s16147_s24 + $0x1f60] sm:$0xff] }
 0x217   : > { %v14115_v41 = vpack.c.bf16 %v1354_v36, %v1353_v33  ;;  %v1374_v51 = vld [vmem:[%s16147_s24 + $0x1fc8] sm:$0xff]  ;;  %v14087_v39 = vpack.c.bf16 %v1324_v45, %v1323_v44  ;;  %v14097_v12 = vpack.c.bf16 %v1346_v9, %v1345_v7  ;;  %v14101_v40 = vpack.c.bf16 %v1348_v22, %v1347_v27  ;;  %v1364_v44 = vld [vmem:[%s16147_s24 + $0x1f78] sm:$0xff]  ;;  %v1397_v45 = vld [vmem:[%s16147_s24 + $0x2080] sm:$0xff] }
 0x218   : > { %v17331_v62 = vadd.f32 %v10688_v49, %v5016_v56  ;;  %14036 = vmatpush3.bf16.msra.mxu0 %v14035_v47  ;;  %v1341_v49 = vld [vmem:[%s16147_s24 + $0x1ec0] sm:$0xff]  ;;  %v1398_v35 = vld [vmem:[%s16147_s24 + $0x2088] sm:$0xff]  ;;  %v14173_v4 = vpack.c.bf16 %v1432_v46, %v1431_v52  ;;  %v1404_v27 = vld [vmem:[%s16147_s24 + $0x20b8] sm:$0xff] }
 0x219   : > { %14068 = vmatpush3.bf16.msra.mxu1 %v14067_v50  ;;  %14038 = vmatprep.subr.bf16.mxu0 %v14037_v54  ;;  %v1342_v50 = vld [vmem:[%s16147_s24 + $0x1ec8] sm:$0xff]  ;;  %v1373_v54 = vld [vmem:[%s16147_s24 + $0x1fc0] sm:$0xff]  ;;  %v1436_v22 = vld [vmem:[%s16147_s24 + $0x21b8] sm:$0xff] }
 0x21a   : > { %14070 = vmatprep.subr.bf16.mxu1 %v14069_v57  ;;  %v14089_v56 = vpack.c.bf16 %v1342_v50, %v1341_v49  ;;  %v1325_v57 = vld [vmem:[%s16147_s24 + $0x1e40] sm:$0xff]  ;;  %v14121_v48 = vpack.c.bf16 %v1374_v51, %v1373_v54  ;;  %v1430_v37 = vld [vmem:[%s16147_s24 + $0x2188] sm:$0xff]  ;;  %v14137_v51 = vpack.c.bf16 %v1398_v35, %v1397_v45 }
 0x21b   : > { %v1401_v58 = vld [vmem:[%s16147_s24 + $0x20a0] sm:$0xff]  ;;  %v1402_v7 = vld [vmem:[%s16147_s24 + $0x20a8] sm:$0xff] }
 0x21c   : > { %14040 = vmatpush3.bf16.msra.mxu0 %v14039_v10  ;;  %v1375_v10 = vld [vmem:[%s16147_s24 + $0x1fd0] sm:$0xff]  ;;  %v1421_v45 = vld [vmem:[%s16147_s24 + $0x2140] sm:$0xff]  ;;  %v1410_v46 = vld [vmem:[%s16147_s24 + $0x20e8] sm:$0xff] }
 0x21d   : > { %14072 = vmatpush3.bf16.msra.mxu1 %v14071_v0  ;;  %14074 = vmatprep.subr.bf16.mxu0 %v14073_v63  ;;  %v1376_v0 = vld [vmem:[%s16147_s24 + $0x1fd8] sm:$0xff]  ;;  %v14091_v63 = vpack.c.bf16 %v1326_v59, %v1325_v57  ;;  %v1414_v59 = vld [vmem:[%s16147_s24 + $0x2108] sm:$0xff]  ;;  %v1409_v52 = vld [vmem:[%s16147_s24 + $0x20e0] sm:$0xff] }
 0x21e   : > { %14106 = vmatprep.subr.bf16.mxu1 %v14105_v3  ;;  %v1328_v3 = vld [vmem:[%s16147_s24 + $0x1e58] sm:$0xff]  ;;  %v14125_v5 = vpack.c.bf16 %v1376_v0, %v1375_v10 }
 0x21f   : > { %5994 = vmatmul.mubr.f32.vlgmr.msra.gmra.mrb[28].mxu0 %v17260_v20  ;;  %v1322_v20 = vld [vmem:[%s16147_s24 + $0x1e28] sm:$0xff] }
 0x220   : > { %14076 = vmatpush3.bf16.msra.mxu0 %v14075_v13  ;;  %6064 = vmatmul.mubr.f32.vlgmr.msra.gmra.mrb[28].mxu1 %v17265_v43  ;;  %v1371_v43 = vld [vmem:[%s16147_s24 + $0x1fb0] sm:$0xff]  ;;  %v14083_v53 = vpack.c.bf16 %v1322_v20, %v1321_v32  ;;  %v1377_v13 = vld [vmem:[%s16147_s24 + $0x1fe0] sm:$0xff] }
 0x221   : > { %14108 = vmatpush3.bf16.msra.mxu1 %v14107_v11  ;;  %14078 = vmatprep.subr.bf16.mxu0 %v14077_v15  ;;  %v14117_v47 = vpack.c.bf16 %v1372_v26, %v1371_v43  ;;  %v1378_v11 = vld [vmem:[%s16147_s24 + $0x1fe8] sm:$0xff]  ;;  %v14095_v15 = vpack.c.bf16 %v1328_v3, %v1327_v2  ;;  %v1331_v43 = vld [vmem:[%s16147_s24 + $0x1e70] sm:$0xff]  ;;  %v1332_v26 = vld [vmem:[%s16147_s24 + $0x1e78] sm:$0xff] }
 0x222   : > { %14110 = vmatprep.subr.bf16.mxu1 %v14109_v19  ;;  %6133 = vmatprep.mubr.f32.mxu0 %v3357_v24  ;;  %v1330_v19 = vld [vmem:[%s16147_s24 + $0x1e68] sm:$0xff]  ;;  %v14129_v21 = vpack.c.bf16 %v1378_v11, %v1377_v13  ;;  %v1384_v2 = vld [vmem:[%s16147_s24 + $0x2018] sm:$0xff]  ;;  %v1415_v3 = vld [vmem:[%s16147_s24 + $0x2110] sm:$0xff] }
 0x223   : > { %6203 = vmatprep.mubr.f32.mxu1 %v3358_v28  ;;  %v1362_v24 = vld [vmem:[%s16147_s24 + $0x1f68] sm:$0xff]  ;;  %v14099_v33 = vpack.c.bf16 %v1330_v19, %v1329_v18  ;;  %v1433_v13 = vld [vmem:[%s16147_s24 + $0x21a0] sm:$0xff]  ;;  %v14145_v18 = vpack.c.bf16 %v1402_v7, %v1401_v58 }
 0x224   : > { %14080 = vmatpush3.bf16.msra.mxu0 %v14079_v29  ;;  %v14131_v38 = vpack.c.bf16 %v1362_v24, %v1361_v16  ;;  %v1434_v11 = vld [vmem:[%s16147_s24 + $0x21a8] sm:$0xff]  ;;  %v1385_v19 = vld [vmem:[%s16147_s24 + $0x2020] sm:$0xff]  ;;  %v1403_v24 = vld [vmem:[%s16147_s24 + $0x20b0] sm:$0xff] }
 0x225   : > { %14112 = vmatpush3.bf16.msra.mxu1 %v14111_v30  ;;  %14082 = vmatprep.subr.bf16.mxu0 %v14081_v31  ;;  %v1379_v30 = vld [vmem:[%s16147_s24 + $0x1ff0] sm:$0xff]  ;;  %v1380_v31 = vld [vmem:[%s16147_s24 + $0x1ff8] sm:$0xff]  ;;  %v1417_v16 = vld [vmem:[%s16147_s24 + $0x2120] sm:$0xff] }
 0x226   : > { %14114 = vmatprep.subr.bf16.mxu1 %v14113_v23  ;;  %v331_v23 = vld [vmem:[%s16157_s19 + $0x80] sm:$0xff] }
 0x227   : > { %v3359_v49 = vcombine.high %v331_v23, %v331_v23  ;;  %v17420_v61 = vrot.slane %v331_v23, %v16210_v14  ;;  %v1420_v23 = vld [vmem:[%s16147_s24 + $0x2138] sm:$0xff] }
 0x228   : > { %14084 = vmatpush3.bf16.msra.mxu0 %v14083_v53  ;;  %v1363_v53 = vld [vmem:[%s16147_s24 + $0x1f70] sm:$0xff] }
 0x229   : > { %14116 = vmatpush3.bf16.msra.mxu1 %v14115_v41  ;;  %14086 = vmatprep.subr.bf16.mxu0 %v14085_v42  ;;  %v14133_v42 = vpack.c.bf16 %v1380_v31, %v1379_v30  ;;  %v14135_v54 = vpack.c.bf16 %v1364_v44, %v1363_v53  ;;  %v17425_v10 = vrot.slane %v3359_v49, %v16210_v14  ;;  %v1387_v31 = vld [vmem:[%s16147_s24 + $0x2030] sm:$0xff]  ;;  %v1390_v44 = vld [vmem:[%s16147_s24 + $0x2048] sm:$0xff]  ;;  %v1408_v49 = vld [vmem:[%s16147_s24 + $0x20d8] sm:$0xff] }
 0x22a   : > { %14118 = vmatprep.subr.bf16.mxu1 %v14117_v47  ;;  %v1429_v47 = vld [vmem:[%s16147_s24 + $0x2180] sm:$0xff]  ;;  %v3374_v9 = vcombine.high %v17420_v61, %v17420_v61  ;;  %v14149_v30 = vpack.c.bf16 %v1404_v27, %v1403_v24 }
 0x22b   : > { %v14169_v57 = vpack.c.bf16 %v1430_v37, %v1429_v47  ;;  %v1422_v47 = vld [vmem:[%s16147_s24 + $0x2148] sm:$0xff]  ;;  %v1407_v37 = vld [vmem:[%s16147_s24 + $0x20d0] sm:$0xff] }
 0x22c   : > { %14088 = vmatpush3.bf16.msra.mxu0 %v14087_v39  ;;  %v1381_v39 = vld [vmem:[%s16147_s24 + $0x2000] sm:$0xff] }
 0x22d   : > { %14120 = vmatpush3.bf16.msra.mxu1 %v14119_v34  ;;  %14090 = vmatprep.subr.bf16.mxu0 %v14089_v56  ;;  %v1382_v34 = vld [vmem:[%s16147_s24 + $0x2008] sm:$0xff]  ;;  %v1413_v56 = vld [vmem:[%s16147_s24 + $0x2100] sm:$0xff] }
 0x22e   : > { %14122 = vmatprep.subr.bf16.mxu1 %v14121_v48  ;;  %v1400_v48 = vld [vmem:[%s16147_s24 + $0x2098] sm:$0xff]  ;;  %v14139_v0 = vpack.c.bf16 %v1382_v34, %v1381_v39  ;;  %v14187_v39 = vpack.c.bf16 %v1422_v47, %v1421_v45  ;;  %v14157_v34 = vpack.c.bf16 %v1408_v49, %v1407_v37  ;;  %v1463_v45 = vld [vmem:[%s16147_s24 + $0x2290] sm:$0xff] }
 0x22f   : > { %v1495_v37 = vld [vmem:[%s16147_s24 + $0x2390] sm:$0xff]  ;;  %v1496_v49 = vld [vmem:[%s16147_s24 + $0x2398] sm:$0xff] }
 0x230   : > { %14092 = vmatpush3.bf16.msra.mxu0 %v14091_v63  ;;  %v14171_v63 = vpack.c.bf16 %v1414_v59, %v1413_v56  ;;  %v1391_v56 = vld [vmem:[%s16147_s24 + $0x2050] sm:$0xff] }
 0x231   : > { %14124 = vmatpush3.bf16.msra.mxu1 %v14123_v55  ;;  %14094 = vmatprep.subr.bf16.mxu0 %v14093_v1  ;;  %v14141_v55 = vpack.c.bf16 %v1400_v48, %v1399_v60  ;;  %v1383_v1 = vld [vmem:[%s16147_s24 + $0x2010] sm:$0xff]  ;;  %v1424_v48 = vld [vmem:[%s16147_s24 + $0x2158] sm:$0xff] }
 0x232   : > { %v10721_v8 = vpop.f32.mrb[16].mxu0  ;;  %14126 = vmatprep.subr.bf16.mxu1 %v14125_v5  ;;  %v1416_v5 = vld [vmem:[%s16147_s24 + $0x2118] sm:$0xff]  ;;  %v1423_v59 = vld [vmem:[%s16147_s24 + $0x2150] sm:$0xff] }
 0x233   : > { %v10722_v28 = vpop.f32.mrb[17].mxu0  ;;  %v10756_v29 = vpop.f32.mrb[16].mxu1 }
 0x234   : > { %v10723_v32 = vadd.f32 %v10722_v28, %v10721_v8  ;;  %14096 = vmatpush3.bf16.msra.mxu0 %v14095_v15  ;;  %v10757_v20 = vpop.f32.mrb[17].mxu1  ;;  %v3375_v15 = vcombine.high %v17425_v10, %v17425_v10  ;;  %v14177_v8 = vpack.c.bf16 %v1434_v11, %v1433_v13  ;;  %v1411_v13 = vld [vmem:[%s16147_s24 + $0x20f0] sm:$0xff]  ;;  %v1412_v11 = vld [vmem:[%s16147_s24 + $0x20f8] sm:$0xff] }
 0x235   : > { %v10758_v36 = vadd.f32 %v10757_v20, %v10756_v29  ;;  %14128 = vmatpush3.bf16.msra.mxu1 %v14127_v17  ;;  %14098 = vmatprep.subr.bf16.mxu0 %v14097_v12  ;;  %v14143_v17 = vpack.c.bf16 %v1384_v2, %v1383_v1  ;;  %v14175_v12 = vpack.c.bf16 %v1416_v5, %v1415_v3  ;;  %v1419_v20 = vld [vmem:[%s16147_s24 + $0x2130] sm:$0xff]  ;;  %v1393_v3 = vld [vmem:[%s16147_s24 + $0x2060] sm:$0xff] }
 0x236   : > { %v5156_v41 = vadd.f32 %v10723_v32, %v17331_v62  ;;  %14130 = vmatprep.subr.bf16.mxu1 %v14129_v21  ;;  %v14103_v62 = vpack.c.bf16 %v1332_v26, %v1331_v43  ;;  %v1418_v21 = vld [vmem:[%s16147_s24 + $0x2128] sm:$0xff]  ;;  %v1388_v32 = vld [vmem:[%s16147_s24 + $0x2038] sm:$0xff]  ;;  %v14183_v53 = vpack.c.bf16 %v1420_v23, %v1419_v20  ;;  %v14191_v1 = vpack.c.bf16 %v1424_v48, %v1423_v59  ;;  %v1425_v5 = vld [vmem:[%s16147_s24 + $0x2160] sm:$0xff] }
 0x237   : > { %v14179_v29 = vpack.c.bf16 %v1418_v21, %v1417_v16  ;;  %v1438_v43 = vld [vmem:[%s16147_s24 + $0x21c8] sm:$0xff]  ;;  %v14151_v26 = vpack.c.bf16 %v1388_v32, %v1387_v31  ;;  %v14161_v2 = vpack.c.bf16 %v1410_v46, %v1409_v52  ;;  %v14165_v27 = vpack.c.bf16 %v1412_v11, %v1411_v13  ;;  %v1428_v31 = vld [vmem:[%s16147_s24 + $0x2178] sm:$0xff]  ;;  %v1461_v32 = vld [vmem:[%s16147_s24 + $0x2280] sm:$0xff] }
 0x238   : > { %v17411_v50 = vadd.f32 %v10758_v36, %v5156_v41  ;;  %14100 = vmatpush3.bf16.msra.mxu0 %v14099_v33  ;;  %v1405_v36 = vld [vmem:[%s16147_s24 + $0x20c0] sm:$0xff]  ;;  %v1462_v20 = vld [vmem:[%s16147_s24 + $0x2288] sm:$0xff]  ;;  %v14237_v59 = vpack.c.bf16 %v1496_v49, %v1495_v37  ;;  %v1468_v13 = vld [vmem:[%s16147_s24 + $0x22b8] sm:$0xff] }
 0x239   : > { %14132 = vmatpush3.bf16.msra.mxu1 %v14131_v38  ;;  %14102 = vmatprep.subr.bf16.mxu0 %v14101_v40  ;;  %v1406_v38 = vld [vmem:[%s16147_s24 + $0x20c8] sm:$0xff]  ;;  %v1437_v40 = vld [vmem:[%s16147_s24 + $0x21c0] sm:$0xff]  ;;  %v1500_v11 = vld [vmem:[%s16147_s24 + $0x23b8] sm:$0xff] }
 0x23a   : > { %14134 = vmatprep.subr.bf16.mxu1 %v14133_v42  ;;  %v14153_v41 = vpack.c.bf16 %v1406_v38, %v1405_v36  ;;  %v1389_v42 = vld [vmem:[%s16147_s24 + $0x2040] sm:$0xff]  ;;  %v14185_v35 = vpack.c.bf16 %v1438_v43, %v1437_v40  ;;  %v1494_v23 = vld [vmem:[%s16147_s24 + $0x2388] sm:$0xff]  ;;  %v14201_v43 = vpack.c.bf16 %v1462_v20, %v1461_v32 }
 0x23b   : > { %v1465_v48 = vld [vmem:[%s16147_s24 + $0x22a0] sm:$0xff]  ;;  %v1466_v52 = vld [vmem:[%s16147_s24 + $0x22a8] sm:$0xff] }
 0x23c   : > { %14104 = vmatpush3.bf16.msra.mxu0 %v14103_v62  ;;  %v1439_v62 = vld [vmem:[%s16147_s24 + $0x21d0] sm:$0xff]  ;;  %v1485_v32 = vld [vmem:[%s16147_s24 + $0x2340] sm:$0xff]  ;;  %v1474_v49 = vld [vmem:[%s16147_s24 + $0x22e8] sm:$0xff] }
 0x23d   : > { %14136 = vmatpush3.bf16.msra.mxu1 %v14135_v54  ;;  %14138 = vmatprep.subr.bf16.mxu0 %v14137_v51  ;;  %v1440_v54 = vld [vmem:[%s16147_s24 + $0x21d8] sm:$0xff]  ;;  %v14155_v51 = vpack.c.bf16 %v1390_v44, %v1389_v42  ;;  %v1478_v44 = vld [vmem:[%s16147_s24 + $0x2308] sm:$0xff]  ;;  %v1473_v37 = vld [vmem:[%s16147_s24 + $0x22e0] sm:$0xff] }
 0x23e   : > { %14170 = vmatprep.subr.bf16.mxu1 %v14169_v57  ;;  %v1392_v57 = vld [vmem:[%s16147_s24 + $0x2058] sm:$0xff]  ;;  %v14189_v60 = vpack.c.bf16 %v1440_v54, %v1439_v62 }
 0x23f   : > { %6134 = vmatmul.mubr.f32.vlgmr.msra.gmra.mrb[30].mxu0 %v17340_v6  ;;  %v1386_v6 = vld [vmem:[%s16147_s24 + $0x2028] sm:$0xff] }
 0x240   : > { %14140 = vmatpush3.bf16.msra.mxu0 %v14139_v0  ;;  %6204 = vmatmul.mubr.f32.vlgmr.msra.gmra.mrb[30].mxu1 %v17345_v25  ;;  %v1435_v25 = vld [vmem:[%s16147_s24 + $0x21b0] sm:$0xff]  ;;  %v14147_v28 = vpack.c.bf16 %v1386_v6, %v1385_v19  ;;  %v1441_v0 = vld [vmem:[%s16147_s24 + $0x21e0] sm:$0xff] }
 0x241   : > { %14172 = vmatpush3.bf16.msra.mxu1 %v14171_v63  ;;  %14142 = vmatprep.subr.bf16.mxu0 %v14141_v55  ;;  %v14181_v33 = vpack.c.bf16 %v1436_v22, %v1435_v25  ;;  %v1442_v63 = vld [vmem:[%s16147_s24 + $0x21e8] sm:$0xff]  ;;  %v14159_v55 = vpack.c.bf16 %v1392_v57, %v1391_v56  ;;  %v1395_v25 = vld [vmem:[%s16147_s24 + $0x2070] sm:$0xff]  ;;  %v1396_v22 = vld [vmem:[%s16147_s24 + $0x2078] sm:$0xff] }
 0x242   : > { %14174 = vmatprep.subr.bf16.mxu1 %v14173_v4  ;;  %6273 = vmatprep.mubr.f32.mxu0 %v3374_v9  ;;  %v1394_v4 = vld [vmem:[%s16147_s24 + $0x2068] sm:$0xff]  ;;  %v14193_v7 = vpack.c.bf16 %v1442_v63, %v1441_v0  ;;  %v1448_v56 = vld [vmem:[%s16147_s24 + $0x2218] sm:$0xff]  ;;  %v1479_v57 = vld [vmem:[%s16147_s24 + $0x2310] sm:$0xff] }
 0x243   : > { %6343 = vmatprep.mubr.f32.mxu1 %v3375_v15  ;;  %v1426_v9 = vld [vmem:[%s16147_s24 + $0x2168] sm:$0xff]  ;;  %v14163_v16 = vpack.c.bf16 %v1394_v4, %v1393_v3  ;;  %v1497_v0 = vld [vmem:[%s16147_s24 + $0x23a0] sm:$0xff]  ;;  %v14209_v3 = vpack.c.bf16 %v1466_v52, %v1465_v48 }
 0x244   : > { %14144 = vmatpush3.bf16.msra.mxu0 %v14143_v17  ;;  %v14195_v24 = vpack.c.bf16 %v1426_v9, %v1425_v5  ;;  %v1498_v63 = vld [vmem:[%s16147_s24 + $0x23a8] sm:$0xff]  ;;  %v1449_v4 = vld [vmem:[%s16147_s24 + $0x2220] sm:$0xff]  ;;  %v1467_v9 = vld [vmem:[%s16147_s24 + $0x22b0] sm:$0xff] }
 0x245   : > { %14176 = vmatpush3.bf16.msra.mxu1 %v14175_v12  ;;  %14146 = vmatprep.subr.bf16.mxu0 %v14145_v18  ;;  %v1443_v12 = vld [vmem:[%s16147_s24 + $0x21f0] sm:$0xff]  ;;  %v1444_v18 = vld [vmem:[%s16147_s24 + $0x21f8] sm:$0xff]  ;;  %v1481_v5 = vld [vmem:[%s16147_s24 + $0x2320] sm:$0xff] }
 0x246   : > { %14178 = vmatprep.subr.bf16.mxu1 %v14177_v8  ;;  %v332_v8 = vld [vmem:[%s16157_s19 + $0x88] sm:$0xff] }
 0x247   : > { %v3376_v36 = vcombine.high %v332_v8, %v332_v8  ;;  %v17500_v47 = vrot.slane %v332_v8, %v16210_v14  ;;  %v1484_v8 = vld [vmem:[%s16147_s24 + $0x2338] sm:$0xff] }
 0x248   : > { %14148 = vmatpush3.bf16.msra.mxu0 %v14147_v28  ;;  %v1427_v28 = vld [vmem:[%s16147_s24 + $0x2170] sm:$0xff] }
 0x249   : > { %14180 = vmatpush3.bf16.msra.mxu1 %v14179_v29  ;;  %14150 = vmatprep.subr.bf16.mxu0 %v14149_v30  ;;  %v14197_v30 = vpack.c.bf16 %v1444_v18, %v1443_v12  ;;  %v14199_v40 = vpack.c.bf16 %v1428_v31, %v1427_v28  ;;  %v17505_v62 = vrot.slane %v3376_v36, %v16210_v14  ;;  %v1451_v18 = vld [vmem:[%s16147_s24 + $0x2230] sm:$0xff]  ;;  %v1454_v31 = vld [vmem:[%s16147_s24 + $0x2248] sm:$0xff]  ;;  %v1472_v36 = vld [vmem:[%s16147_s24 + $0x22d8] sm:$0xff] }
 0x24a   : > { %14182 = vmatprep.subr.bf16.mxu1 %v14181_v33  ;;  %v1493_v33 = vld [vmem:[%s16147_s24 + $0x2380] sm:$0xff]  ;;  %v3391_v46 = vcombine.high %v17500_v47, %v17500_v47  ;;  %v14213_v12 = vpack.c.bf16 %v1468_v13, %v1467_v9 }
 0x24b   : > { %v14233_v42 = vpack.c.bf16 %v1494_v23, %v1493_v33  ;;  %v1486_v33 = vld [vmem:[%s16147_s24 + $0x2348] sm:$0xff]  ;;  %v1471_v23 = vld [vmem:[%s16147_s24 + $0x22d0] sm:$0xff] }
 0x24c   : > { %14152 = vmatpush3.bf16.msra.mxu0 %v14151_v26  ;;  %v1445_v26 = vld [vmem:[%s16147_s24 + $0x2200] sm:$0xff] }
 0x24d   : > { %14184 = vmatpush3.bf16.msra.mxu1 %v14183_v53  ;;  %14154 = vmatprep.subr.bf16.mxu0 %v14153_v41  ;;  %v1446_v53 = vld [vmem:[%s16147_s24 + $0x2208] sm:$0xff]  ;;  %v1477_v41 = vld [vmem:[%s16147_s24 + $0x2300] sm:$0xff] }
 0x24e   : > { %14186 = vmatprep.subr.bf16.mxu1 %v14185_v35  ;;  %v1464_v35 = vld [vmem:[%s16147_s24 + $0x2298] sm:$0xff]  ;;  %v14203_v54 = vpack.c.bf16 %v1446_v53, %v1445_v26  ;;  %v14251_v26 = vpack.c.bf16 %v1486_v33, %v1485_v32  ;;  %v14221_v53 = vpack.c.bf16 %v1472_v36, %v1471_v23  ;;  %v1527_v32 = vld [vmem:[%s16147_s24 + $0x2490] sm:$0xff] }
 0x24f   : > { %v1559_v23 = vld [vmem:[%s16147_s24 + $0x2590] sm:$0xff]  ;;  %v1560_v36 = vld [vmem:[%s16147_s24 + $0x2598] sm:$0xff] }
 0x250   : > { %14156 = vmatpush3.bf16.msra.mxu0 %v14155_v51  ;;  %v14235_v51 = vpack.c.bf16 %v1478_v44, %v1477_v41  ;;  %v1455_v41 = vld [vmem:[%s16147_s24 + $0x2250] sm:$0xff] }
 0x251   : > { %14188 = vmatpush3.bf16.msra.mxu1 %v14187_v39  ;;  %14158 = vmatprep.subr.bf16.mxu0 %v14157_v34  ;;  %v14205_v39 = vpack.c.bf16 %v1464_v35, %v1463_v45  ;;  %v1447_v34 = vld [vmem:[%s16147_s24 + $0x2210] sm:$0xff]  ;;  %v1488_v35 = vld [vmem:[%s16147_s24 + $0x2358] sm:$0xff] }
 0x252   : > { %v10791_v58 = vpop.f32.mrb[18].mxu0  ;;  %14190 = vmatprep.subr.bf16.mxu1 %v14189_v60  ;;  %v1480_v60 = vld [vmem:[%s16147_s24 + $0x2318] sm:$0xff]  ;;  %v1487_v44 = vld [vmem:[%s16147_s24 + $0x2350] sm:$0xff] }
 0x253   : > { %v10792_v15 = vpop.f32.mrb[19].mxu0  ;;  %v10826_v17 = vpop.f32.mrb[18].mxu1 }
 0x254   : > { %v10793_v19 = vadd.f32 %v10792_v15, %v10791_v58  ;;  %14160 = vmatpush3.bf16.msra.mxu0 %v14159_v55  ;;  %v10827_v6 = vpop.f32.mrb[19].mxu1  ;;  %v3392_v55 = vcombine.high %v17505_v62, %v17505_v62  ;;  %v14241_v58 = vpack.c.bf16 %v1498_v63, %v1497_v0  ;;  %v1475_v0 = vld [vmem:[%s16147_s24 + $0x22f0] sm:$0xff]  ;;  %v1476_v63 = vld [vmem:[%s16147_s24 + $0x22f8] sm:$0xff] }
 0x255   : > { %v10828_v21 = vadd.f32 %v10827_v6, %v10826_v17  ;;  %14192 = vmatpush3.bf16.msra.mxu1 %v14191_v1  ;;  %14162 = vmatprep.subr.bf16.mxu0 %v14161_v2  ;;  %v14207_v1 = vpack.c.bf16 %v1448_v56, %v1447_v34  ;;  %v14239_v2 = vpack.c.bf16 %v1480_v60, %v1479_v57  ;;  %v1483_v6 = vld [vmem:[%s16147_s24 + $0x2330] sm:$0xff]  ;;  %v1457_v57 = vld [vmem:[%s16147_s24 + $0x2260] sm:$0xff] }
 0x256   : > { %v5296_v29 = vadd.f32 %v10793_v19, %v17411_v50  ;;  %14194 = vmatprep.subr.bf16.mxu1 %v14193_v7  ;;  %v14167_v50 = vpack.c.bf16 %v1396_v22, %v1395_v25  ;;  %v1482_v7 = vld [vmem:[%s16147_s24 + $0x2328] sm:$0xff]  ;;  %v1452_v19 = vld [vmem:[%s16147_s24 + $0x2238] sm:$0xff]  ;;  %v14247_v28 = vpack.c.bf16 %v1484_v8, %v1483_v6  ;;  %v14255_v34 = vpack.c.bf16 %v1488_v35, %v1487_v44  ;;  %v1489_v60 = vld [vmem:[%s16147_s24 + $0x2360] sm:$0xff] }
 0x257   : > { %v14243_v17 = vpack.c.bf16 %v1482_v7, %v1481_v5  ;;  %v1502_v25 = vld [vmem:[%s16147_s24 + $0x23c8] sm:$0xff]  ;;  %v14215_v22 = vpack.c.bf16 %v1452_v19, %v1451_v18  ;;  %v14225_v56 = vpack.c.bf16 %v1474_v49, %v1473_v37  ;;  %v14229_v13 = vpack.c.bf16 %v1476_v63, %v1475_v0  ;;  %v1492_v18 = vld [vmem:[%s16147_s24 + $0x2378] sm:$0xff]  ;;  %v1525_v19 = vld [vmem:[%s16147_s24 + $0x2480] sm:$0xff] }
 0x258   : > { %v17491_v38 = vadd.f32 %v10828_v21, %v5296_v29  ;;  %14164 = vmatpush3.bf16.msra.mxu0 %v14163_v16  ;;  %v1469_v21 = vld [vmem:[%s16147_s24 + $0x22c0] sm:$0xff]  ;;  %v1526_v6 = vld [vmem:[%s16147_s24 + $0x2488] sm:$0xff]  ;;  %v14301_v44 = vpack.c.bf16 %v1560_v36, %v1559_v23  ;;  %v1532_v0 = vld [vmem:[%s16147_s24 + $0x24b8] sm:$0xff] }
 0x259   : > { %14196 = vmatpush3.bf16.msra.mxu1 %v14195_v24  ;;  %14166 = vmatprep.subr.bf16.mxu0 %v14165_v27  ;;  %v1470_v24 = vld [vmem:[%s16147_s24 + $0x22c8] sm:$0xff]  ;;  %v1501_v27 = vld [vmem:[%s16147_s24 + $0x23c0] sm:$0xff]  ;;  %v1564_v63 = vld [vmem:[%s16147_s24 + $0x25b8] sm:$0xff] }
 0x25a   : > { %14198 = vmatprep.subr.bf16.mxu1 %v14197_v30  ;;  %v14217_v29 = vpack.c.bf16 %v1470_v24, %v1469_v21  ;;  %v1453_v30 = vld [vmem:[%s16147_s24 + $0x2240] sm:$0xff]  ;;  %v14249_v20 = vpack.c.bf16 %v1502_v25, %v1501_v27  ;;  %v1558_v8 = vld [vmem:[%s16147_s24 + $0x2588] sm:$0xff]  ;;  %v14265_v25 = vpack.c.bf16 %v1526_v6, %v1525_v19 }
 0x25b   : > { %v1529_v35 = vld [vmem:[%s16147_s24 + $0x24a0] sm:$0xff]  ;;  %v1530_v37 = vld [vmem:[%s16147_s24 + $0x24a8] sm:$0xff] }
 0x25c   : > { %14168 = vmatpush3.bf16.msra.mxu0 %v14167_v50  ;;  %v1503_v50 = vld [vmem:[%s16147_s24 + $0x23d0] sm:$0xff]  ;;  %v1549_v19 = vld [vmem:[%s16147_s24 + $0x2540] sm:$0xff]  ;;  %v1538_v36 = vld [vmem:[%s16147_s24 + $0x24e8] sm:$0xff] }
 0x25d   : > { %14200 = vmatpush3.bf16.msra.mxu1 %v14199_v40  ;;  %14202 = vmatprep.subr.bf16.mxu0 %v14201_v43  ;;  %v1504_v40 = vld [vmem:[%s16147_s24 + $0x23d8] sm:$0xff]  ;;  %v14219_v43 = vpack.c.bf16 %v1454_v31, %v1453_v30  ;;  %v1542_v31 = vld [vmem:[%s16147_s24 + $0x2508] sm:$0xff]  ;;  %v1537_v23 = vld [vmem:[%s16147_s24 + $0x24e0] sm:$0xff] }
 0x25e   : > { %14234 = vmatprep.subr.bf16.mxu1 %v14233_v42  ;;  %v1456_v42 = vld [vmem:[%s16147_s24 + $0x2258] sm:$0xff]  ;;  %v14253_v45 = vpack.c.bf16 %v1504_v40, %v1503_v50 }
 0x25f   : > { %6274 = vmatmul.mubr.f32.vlgmr.msra.gmra.mrb[32].mxu0 %v17420_v61  ;;  %v1450_v61 = vld [vmem:[%s16147_s24 + $0x2228] sm:$0xff] }
 0x260   : > { %14204 = vmatpush3.bf16.msra.mxu0 %v14203_v54  ;;  %6344 = vmatmul.mubr.f32.vlgmr.msra.gmra.mrb[32].mxu1 %v17425_v10  ;;  %v1499_v10 = vld [vmem:[%s16147_s24 + $0x23b0] sm:$0xff]  ;;  %v14211_v15 = vpack.c.bf16 %v1450_v61, %v1449_v4  ;;  %v1505_v54 = vld [vmem:[%s16147_s24 + $0x23e0] sm:$0xff] }
 0x261   : > { %14236 = vmatpush3.bf16.msra.mxu1 %v14235_v51  ;;  %14206 = vmatprep.subr.bf16.mxu0 %v14205_v39  ;;  %v14245_v16 = vpack.c.bf16 %v1500_v11, %v1499_v10  ;;  %v1506_v51 = vld [vmem:[%s16147_s24 + $0x23e8] sm:$0xff]  ;;  %v14223_v39 = vpack.c.bf16 %v1456_v42, %v1455_v41  ;;  %v1459_v10 = vld [vmem:[%s16147_s24 + $0x2270] sm:$0xff]  ;;  %v1460_v11 = vld [vmem:[%s16147_s24 + $0x2278] sm:$0xff] }
 0x262   : > { %14238 = vmatprep.subr.bf16.mxu1 %v14237_v59  ;;  %6413 = vmatprep.mubr.f32.mxu0 %v3391_v46  ;;  %v1458_v59 = vld [vmem:[%s16147_s24 + $0x2268] sm:$0xff]  ;;  %v14257_v52 = vpack.c.bf16 %v1506_v51, %v1505_v54  ;;  %v1512_v41 = vld [vmem:[%s16147_s24 + $0x2418] sm:$0xff]  ;;  %v1543_v42 = vld [vmem:[%s16147_s24 + $0x2510] sm:$0xff] }
 0x263   : > { %6483 = vmatprep.mubr.f32.mxu1 %v3392_v55  ;;  %v1490_v46 = vld [vmem:[%s16147_s24 + $0x2368] sm:$0xff]  ;;  %v14227_v5 = vpack.c.bf16 %v1458_v59, %v1457_v57  ;;  %v1561_v54 = vld [vmem:[%s16147_s24 + $0x25a0] sm:$0xff]  ;;  %v14273_v57 = vpack.c.bf16 %v1530_v37, %v1529_v35 }
 0x264   : > { %14208 = vmatpush3.bf16.msra.mxu0 %v14207_v1  ;;  %v14259_v9 = vpack.c.bf16 %v1490_v46, %v1489_v60  ;;  %v1562_v51 = vld [vmem:[%s16147_s24 + $0x25a8] sm:$0xff]  ;;  %v1513_v59 = vld [vmem:[%s16147_s24 + $0x2420] sm:$0xff]  ;;  %v1531_v46 = vld [vmem:[%s16147_s24 + $0x24b0] sm:$0xff] }
 0x265   : > { %14240 = vmatpush3.bf16.msra.mxu1 %v14239_v2  ;;  %14210 = vmatprep.subr.bf16.mxu0 %v14209_v3  ;;  %v1507_v2 = vld [vmem:[%s16147_s24 + $0x23f0] sm:$0xff]  ;;  %v1508_v3 = vld [vmem:[%s16147_s24 + $0x23f8] sm:$0xff]  ;;  %v1545_v60 = vld [vmem:[%s16147_s24 + $0x2520] sm:$0xff] }
 0x266   : > { %14242 = vmatprep.subr.bf16.mxu1 %v14241_v58  ;;  %v333_v58 = vld [vmem:[%s16157_s19 + $0x90] sm:$0xff] }
 0x267   : > { %v3393_v21 = vcombine.high %v333_v58, %v333_v58  ;;  %v17580_v33 = vrot.slane %v333_v58, %v16210_v14  ;;  %v1548_v58 = vld [vmem:[%s16147_s24 + $0x2538] sm:$0xff] }
 0x268   : > { %14212 = vmatpush3.bf16.msra.mxu0 %v14211_v15  ;;  %v1491_v15 = vld [vmem:[%s16147_s24 + $0x2370] sm:$0xff] }
 0x269   : > { %14244 = vmatpush3.bf16.msra.mxu1 %v14243_v17  ;;  %14214 = vmatprep.subr.bf16.mxu0 %v14213_v12  ;;  %v14261_v12 = vpack.c.bf16 %v1508_v3, %v1507_v2  ;;  %v14263_v27 = vpack.c.bf16 %v1492_v18, %v1491_v15  ;;  %v17585_v50 = vrot.slane %v3393_v21, %v16210_v14  ;;  %v1515_v3 = vld [vmem:[%s16147_s24 + $0x2430] sm:$0xff]  ;;  %v1518_v18 = vld [vmem:[%s16147_s24 + $0x2448] sm:$0xff]  ;;  %v1536_v21 = vld [vmem:[%s16147_s24 + $0x24d8] sm:$0xff] }
 0x26a   : > { %14246 = vmatprep.subr.bf16.mxu1 %v14245_v16  ;;  %v1557_v16 = vld [vmem:[%s16147_s24 + $0x2580] sm:$0xff]  ;;  %v3408_v49 = vcombine.high %v17580_v33, %v17580_v33  ;;  %v14277_v2 = vpack.c.bf16 %v1532_v0, %v1531_v46 }
 0x26b   : > { %v14297_v30 = vpack.c.bf16 %v1558_v8, %v1557_v16  ;;  %v1550_v16 = vld [vmem:[%s16147_s24 + $0x2548] sm:$0xff]  ;;  %v1535_v8 = vld [vmem:[%s16147_s24 + $0x24d0] sm:$0xff] }
 0x26c   : > { %14216 = vmatpush3.bf16.msra.mxu0 %v14215_v22  ;;  %v1509_v22 = vld [vmem:[%s16147_s24 + $0x2400] sm:$0xff] }
 0x26d   : > { %14248 = vmatpush3.bf16.msra.mxu1 %v14247_v28  ;;  %14218 = vmatprep.subr.bf16.mxu0 %v14217_v29  ;;  %v1510_v28 = vld [vmem:[%s16147_s24 + $0x2408] sm:$0xff]  ;;  %v1541_v29 = vld [vmem:[%s16147_s24 + $0x2500] sm:$0xff] }
 0x26e   : > { %14250 = vmatprep.subr.bf16.mxu1 %v14249_v20  ;;  %v1528_v20 = vld [vmem:[%s16147_s24 + $0x2498] sm:$0xff]  ;;  %v14267_v40 = vpack.c.bf16 %v1510_v28, %v1509_v22  ;;  %v14315_v22 = vpack.c.bf16 %v1550_v16, %v1549_v19  ;;  %v14285_v28 = vpack.c.bf16 %v1536_v21, %v1535_v8  ;;  %v1591_v19 = vld [vmem:[%s16147_s24 + $0x2690] sm:$0xff] }
 0x26f   : > { %v1623_v8 = vld [vmem:[%s16147_s24 + $0x2790] sm:$0xff]  ;;  %v1624_v21 = vld [vmem:[%s16147_s24 + $0x2798] sm:$0xff] }
 0x270   : > { %14220 = vmatpush3.bf16.msra.mxu0 %v14219_v43  ;;  %v14299_v43 = vpack.c.bf16 %v1542_v31, %v1541_v29  ;;  %v1519_v29 = vld [vmem:[%s16147_s24 + $0x2450] sm:$0xff] }
 0x271   : > { %14252 = vmatpush3.bf16.msra.mxu1 %v14251_v26  ;;  %14222 = vmatprep.subr.bf16.mxu0 %v14221_v53  ;;  %v14269_v26 = vpack.c.bf16 %v1528_v20, %v1527_v32  ;;  %v1511_v53 = vld [vmem:[%s16147_s24 + $0x2410] sm:$0xff]  ;;  %v1552_v20 = vld [vmem:[%s16147_s24 + $0x2558] sm:$0xff] }
 0x272   : > { %v10861_v48 = vpop.f32.mrb[20].mxu0  ;;  %14254 = vmatprep.subr.bf16.mxu1 %v14253_v45  ;;  %v1544_v45 = vld [vmem:[%s16147_s24 + $0x2518] sm:$0xff]  ;;  %v1551_v31 = vld [vmem:[%s16147_s24 + $0x2550] sm:$0xff] }
 0x273   : > { %v10862_v55 = vpop.f32.mrb[21].mxu0  ;;  %v10896_v1 = vpop.f32.mrb[20].mxu1 }
 0x274   : > { %v10863_v4 = vadd.f32 %v10862_v55, %v10861_v48  ;;  %14224 = vmatpush3.bf16.msra.mxu0 %v14223_v39  ;;  %v10897_v61 = vpop.f32.mrb[21].mxu1  ;;  %v3409_v39 = vcombine.high %v17585_v50, %v17585_v50  ;;  %v14305_v48 = vpack.c.bf16 %v1562_v51, %v1561_v54  ;;  %v1539_v54 = vld [vmem:[%s16147_s24 + $0x24f0] sm:$0xff]  ;;  %v1540_v51 = vld [vmem:[%s16147_s24 + $0x24f8] sm:$0xff] }
 0x275   : > { %v10898_v7 = vadd.f32 %v10897_v61, %v10896_v1  ;;  %14256 = vmatpush3.bf16.msra.mxu1 %v14255_v34  ;;  %14226 = vmatprep.subr.bf16.mxu0 %v14225_v56  ;;  %v14271_v34 = vpack.c.bf16 %v1512_v41, %v1511_v53  ;;  %v14303_v56 = vpack.c.bf16 %v1544_v45, %v1543_v42  ;;  %v1547_v61 = vld [vmem:[%s16147_s24 + $0x2530] sm:$0xff]  ;;  %v1521_v42 = vld [vmem:[%s16147_s24 + $0x2460] sm:$0xff] }
 0x276   : > { %v5436_v17 = vadd.f32 %v10863_v4, %v17491_v38  ;;  %14258 = vmatprep.subr.bf16.mxu1 %v14257_v52  ;;  %v14231_v38 = vpack.c.bf16 %v1460_v11, %v1459_v10  ;;  %v1546_v52 = vld [vmem:[%s16147_s24 + $0x2528] sm:$0xff]  ;;  %v1516_v4 = vld [vmem:[%s16147_s24 + $0x2438] sm:$0xff]  ;;  %v14311_v15 = vpack.c.bf16 %v1548_v58, %v1547_v61  ;;  %v14319_v53 = vpack.c.bf16 %v1552_v20, %v1551_v31  ;;  %v1553_v45 = vld [vmem:[%s16147_s24 + $0x2560] sm:$0xff] }
 0x277   : > { %v14307_v1 = vpack.c.bf16 %v1546_v52, %v1545_v60  ;;  %v1566_v10 = vld [vmem:[%s16147_s24 + $0x25c8] sm:$0xff]  ;;  %v14279_v11 = vpack.c.bf16 %v1516_v4, %v1515_v3  ;;  %v14289_v41 = vpack.c.bf16 %v1538_v36, %v1537_v23  ;;  %v14293_v0 = vpack.c.bf16 %v1540_v51, %v1539_v54  ;;  %v1556_v3 = vld [vmem:[%s16147_s24 + $0x2578] sm:$0xff]  ;;  %v1589_v4 = vld [vmem:[%s16147_s24 + $0x2680] sm:$0xff] }
 0x278   : > { %v17571_v24 = vadd.f32 %v10898_v7, %v5436_v17  ;;  %14228 = vmatpush3.bf16.msra.mxu0 %v14227_v5  ;;  %v1533_v7 = vld [vmem:[%s16147_s24 + $0x24c0] sm:$0xff]  ;;  %v1590_v61 = vld [vmem:[%s16147_s24 + $0x2688] sm:$0xff]  ;;  %v14365_v31 = vpack.c.bf16 %v1624_v21, %v1623_v8  ;;  %v1596_v54 = vld [vmem:[%s16147_s24 + $0x26b8] sm:$0xff] }
 0x279   : > { %14260 = vmatpush3.bf16.msra.mxu1 %v14259_v9  ;;  %14230 = vmatprep.subr.bf16.mxu0 %v14229_v13  ;;  %v1534_v9 = vld [vmem:[%s16147_s24 + $0x24c8] sm:$0xff]  ;;  %v1565_v13 = vld [vmem:[%s16147_s24 + $0x25c0] sm:$0xff]  ;;  %v1628_v51 = vld [vmem:[%s16147_s24 + $0x27b8] sm:$0xff] }
 0x27a   : > { %14262 = vmatprep.subr.bf16.mxu1 %v14261_v12  ;;  %v14281_v17 = vpack.c.bf16 %v1534_v9, %v1533_v7  ;;  %v1517_v12 = vld [vmem:[%s16147_s24 + $0x2440] sm:$0xff]  ;;  %v14313_v6 = vpack.c.bf16 %v1566_v10, %v1565_v13  ;;  %v1622_v58 = vld [vmem:[%s16147_s24 + $0x2788] sm:$0xff]  ;;  %v14329_v10 = vpack.c.bf16 %v1590_v61, %v1589_v4 }
 0x27b   : > { %v1593_v20 = vld [vmem:[%s16147_s24 + $0x26a0] sm:$0xff]  ;;  %v1594_v23 = vld [vmem:[%s16147_s24 + $0x26a8] sm:$0xff] }
 0x27c   : > { %14232 = vmatpush3.bf16.msra.mxu0 %v14231_v38  ;;  %v1567_v38 = vld [vmem:[%s16147_s24 + $0x25d0] sm:$0xff]  ;;  %v1613_v4 = vld [vmem:[%s16147_s24 + $0x2740] sm:$0xff]  ;;  %v1602_v21 = vld [vmem:[%s16147_s24 + $0x26e8] sm:$0xff] }
 0x27d   : > { %14264 = vmatpush3.bf16.msra.mxu1 %v14263_v27  ;;  %14266 = vmatprep.subr.bf16.mxu0 %v14265_v25  ;;  %v1568_v27 = vld [vmem:[%s16147_s24 + $0x25d8] sm:$0xff]  ;;  %v14283_v25 = vpack.c.bf16 %v1518_v18, %v1517_v12  ;;  %v1606_v18 = vld [vmem:[%s16147_s24 + $0x2708] sm:$0xff]  ;;  %v1601_v8 = vld [vmem:[%s16147_s24 + $0x26e0] sm:$0xff] }
 0x27e   : > { %14298 = vmatprep.subr.bf16.mxu1 %v14297_v30  ;;  %v1520_v30 = vld [vmem:[%s16147_s24 + $0x2458] sm:$0xff]  ;;  %v14317_v32 = vpack.c.bf16 %v1568_v27, %v1567_v38 }
 0x27f   : > { %6414 = vmatmul.mubr.f32.vlgmr.msra.gmra.mrb[34].mxu0 %v17500_v47  ;;  %v1514_v47 = vld [vmem:[%s16147_s24 + $0x2428] sm:$0xff] }
 0x280   : > { %14268 = vmatpush3.bf16.msra.mxu0 %v14267_v40  ;;  %6484 = vmatmul.mubr.f32.vlgmr.msra.gmra.mrb[34].mxu1 %v17505_v62  ;;  %v1563_v62 = vld [vmem:[%s16147_s24 + $0x25b0] sm:$0xff]  ;;  %v14275_v55 = vpack.c.bf16 %v1514_v47, %v1513_v59  ;;  %v1569_v40 = vld [vmem:[%s16147_s24 + $0x25e0] sm:$0xff] }
 0x281   : > { %14300 = vmatpush3.bf16.msra.mxu1 %v14299_v43  ;;  %14270 = vmatprep.subr.bf16.mxu0 %v14269_v26  ;;  %v14309_v5 = vpack.c.bf16 %v1564_v63, %v1563_v62  ;;  %v1570_v43 = vld [vmem:[%s16147_s24 + $0x25e8] sm:$0xff]  ;;  %v14287_v26 = vpack.c.bf16 %v1520_v30, %v1519_v29  ;;  %v1523_v62 = vld [vmem:[%s16147_s24 + $0x2470] sm:$0xff]  ;;  %v1524_v63 = vld [vmem:[%s16147_s24 + $0x2478] sm:$0xff] }
 0x282   : > { %14302 = vmatprep.subr.bf16.mxu1 %v14301_v44  ;;  %6553 = vmatprep.mubr.f32.mxu0 %v3408_v49  ;;  %v1522_v44 = vld [vmem:[%s16147_s24 + $0x2468] sm:$0xff]  ;;  %v14321_v37 = vpack.c.bf16 %v1570_v43, %v1569_v40  ;;  %v1576_v29 = vld [vmem:[%s16147_s24 + $0x2618] sm:$0xff]  ;;  %v1607_v30 = vld [vmem:[%s16147_s24 + $0x2710] sm:$0xff] }
 0x283   : > { %6623 = vmatprep.mubr.f32.mxu1 %v3409_v39  ;;  %v1554_v49 = vld [vmem:[%s16147_s24 + $0x2568] sm:$0xff]  ;;  %v14291_v60 = vpack.c.bf16 %v1522_v44, %v1521_v42  ;;  %v1625_v40 = vld [vmem:[%s16147_s24 + $0x27a0] sm:$0xff]  ;;  %v14337_v42 = vpack.c.bf16 %v1594_v23, %v1593_v20 }
 0x284   : > { %14272 = vmatpush3.bf16.msra.mxu0 %v14271_v34  ;;  %v14323_v46 = vpack.c.bf16 %v1554_v49, %v1553_v45  ;;  %v1626_v43 = vld [vmem:[%s16147_s24 + $0x27a8] sm:$0xff]  ;;  %v1577_v44 = vld [vmem:[%s16147_s24 + $0x2620] sm:$0xff]  ;;  %v1595_v49 = vld [vmem:[%s16147_s24 + $0x26b0] sm:$0xff] }
 0x285   : > { %14304 = vmatpush3.bf16.msra.mxu1 %v14303_v56  ;;  %14274 = vmatprep.subr.bf16.mxu0 %v14273_v57  ;;  %v1571_v56 = vld [vmem:[%s16147_s24 + $0x25f0] sm:$0xff]  ;;  %v1572_v57 = vld [vmem:[%s16147_s24 + $0x25f8] sm:$0xff]  ;;  %v1609_v45 = vld [vmem:[%s16147_s24 + $0x2720] sm:$0xff] }
 0x286   : > { %14306 = vmatprep.subr.bf16.mxu1 %v14305_v48  ;;  %v334_v48 = vld [vmem:[%s16157_s19 + $0x98] sm:$0xff] }
 0x287   : > { %v3410_v7 = vcombine.high %v334_v48, %v334_v48  ;;  %v17660_v16 = vrot.slane %v334_v48, %v16210_v14  ;;  %v1612_v48 = vld [vmem:[%s16147_s24 + $0x2738] sm:$0xff] }
 0x288   : > { %14276 = vmatpush3.bf16.msra.mxu0 %v14275_v55  ;;  %v1555_v55 = vld [vmem:[%s16147_s24 + $0x2570] sm:$0xff] }
 0x289   : > { %14308 = vmatpush3.bf16.msra.mxu1 %v14307_v1  ;;  %14278 = vmatprep.subr.bf16.mxu0 %v14277_v2  ;;  %v14325_v2 = vpack.c.bf16 %v1572_v57, %v1571_v56  ;;  %v14327_v13 = vpack.c.bf16 %v1556_v3, %v1555_v55  ;;  %v17665_v38 = vrot.slane %v3410_v7, %v16210_v14  ;;  %v1579_v57 = vld [vmem:[%s16147_s24 + $0x2630] sm:$0xff]  ;;  %v1582_v3 = vld [vmem:[%s16147_s24 + $0x2648] sm:$0xff]  ;;  %v1600_v7 = vld [vmem:[%s16147_s24 + $0x26d8] sm:$0xff] }
 0x28a   : > { %14310 = vmatprep.subr.bf16.mxu1 %v14309_v5  ;;  %v1621_v5 = vld [vmem:[%s16147_s24 + $0x2780] sm:$0xff]  ;;  %v3425_v36 = vcombine.high %v17660_v16, %v17660_v16  ;;  %v14341_v56 = vpack.c.bf16 %v1596_v54, %v1595_v49 }
 0x28b   : > { %v14361_v12 = vpack.c.bf16 %v1622_v58, %v1621_v5  ;;  %v1614_v5 = vld [vmem:[%s16147_s24 + $0x2748] sm:$0xff]  ;;  %v1599_v58 = vld [vmem:[%s16147_s24 + $0x26d0] sm:$0xff] }
 0x28c   : > { %14280 = vmatpush3.bf16.msra.mxu0 %v14279_v11  ;;  %v1573_v11 = vld [vmem:[%s16147_s24 + $0x2600] sm:$0xff] }
 0x28d   : > { %14312 = vmatpush3.bf16.msra.mxu1 %v14311_v15  ;;  %14282 = vmatprep.subr.bf16.mxu0 %v14281_v17  ;;  %v1574_v15 = vld [vmem:[%s16147_s24 + $0x2608] sm:$0xff]  ;;  %v1605_v17 = vld [vmem:[%s16147_s24 + $0x2700] sm:$0xff] }
 0x28e   : > { %14314 = vmatprep.subr.bf16.mxu1 %v14313_v6  ;;  %v1592_v6 = vld [vmem:[%s16147_s24 + $0x2698] sm:$0xff]  ;;  %v14331_v27 = vpack.c.bf16 %v1574_v15, %v1573_v11  ;;  %v14379_v11 = vpack.c.bf16 %v1614_v5, %v1613_v4  ;;  %v14349_v15 = vpack.c.bf16 %v1600_v7, %v1599_v58  ;;  %v1655_v4 = vld [vmem:[%s16147_s24 + $0x2890] sm:$0xff] }
 0x28f   : > { %v1687_v58 = vld [vmem:[%s16147_s24 + $0x2990] sm:$0xff]  ;;  %v1688_v7 = vld [vmem:[%s16147_s24 + $0x2998] sm:$0xff] }
 0x290   : > { %14284 = vmatpush3.bf16.msra.mxu0 %v14283_v25  ;;  %v14363_v25 = vpack.c.bf16 %v1606_v18, %v1605_v17  ;;  %v1583_v17 = vld [vmem:[%s16147_s24 + $0x2650] sm:$0xff] }
 0x291   : > { %14316 = vmatpush3.bf16.msra.mxu1 %v14315_v22  ;;  %14286 = vmatprep.subr.bf16.mxu0 %v14285_v28  ;;  %v14333_v22 = vpack.c.bf16 %v1592_v6, %v1591_v19  ;;  %v1575_v28 = vld [vmem:[%s16147_s24 + $0x2610] sm:$0xff]  ;;  %v1616_v6 = vld [vmem:[%s16147_s24 + $0x2758] sm:$0xff] }
 0x292   : > { %v10931_v35 = vpop.f32.mrb[22].mxu0  ;;  %14318 = vmatprep.subr.bf16.mxu1 %v14317_v32  ;;  %v1608_v32 = vld [vmem:[%s16147_s24 + $0x2718] sm:$0xff]  ;;  %v1615_v18 = vld [vmem:[%s16147_s24 + $0x2750] sm:$0xff] }
 0x293   : > { %v10932_v39 = vpop.f32.mrb[23].mxu0  ;;  %v10966_v34 = vpop.f32.mrb[22].mxu1 }
 0x294   : > { %v10933_v59 = vadd.f32 %v10932_v39, %v10931_v35  ;;  %14288 = vmatpush3.bf16.msra.mxu0 %v14287_v26  ;;  %v10967_v47 = vpop.f32.mrb[23].mxu1  ;;  %v3426_v26 = vcombine.high %v17665_v38, %v17665_v38  ;;  %v14369_v35 = vpack.c.bf16 %v1626_v43, %v1625_v40  ;;  %v1603_v40 = vld [vmem:[%s16147_s24 + $0x26f0] sm:$0xff]  ;;  %v1604_v43 = vld [vmem:[%s16147_s24 + $0x26f8] sm:$0xff] }
 0x295   : > { %v10968_v52 = vadd.f32 %v10967_v47, %v10966_v34  ;;  %14320 = vmatpush3.bf16.msra.mxu1 %v14319_v53  ;;  %14290 = vmatprep.subr.bf16.mxu0 %v14289_v41  ;;  %v14335_v53 = vpack.c.bf16 %v1576_v29, %v1575_v28  ;;  %v14367_v41 = vpack.c.bf16 %v1608_v32, %v1607_v30  ;;  %v1611_v47 = vld [vmem:[%s16147_s24 + $0x2730] sm:$0xff]  ;;  %v1585_v30 = vld [vmem:[%s16147_s24 + $0x2660] sm:$0xff] }
 0x296   : > { %v5576_v1 = vadd.f32 %v10933_v59, %v17571_v24  ;;  %14322 = vmatprep.subr.bf16.mxu1 %v14321_v37  ;;  %v14295_v24 = vpack.c.bf16 %v1524_v63, %v1523_v62  ;;  %v1610_v37 = vld [vmem:[%s16147_s24 + $0x2728] sm:$0xff]  ;;  %v1580_v59 = vld [vmem:[%s16147_s24 + $0x2638] sm:$0xff]  ;;  %v14375_v55 = vpack.c.bf16 %v1612_v48, %v1611_v47  ;;  %v14383_v28 = vpack.c.bf16 %v1616_v6, %v1615_v18  ;;  %v1617_v32 = vld [vmem:[%s16147_s24 + $0x2760] sm:$0xff] }
 0x297   : > { %v14371_v34 = vpack.c.bf16 %v1610_v37, %v1609_v45  ;;  %v1630_v62 = vld [vmem:[%s16147_s24 + $0x27c8] sm:$0xff]  ;;  %v14343_v63 = vpack.c.bf16 %v1580_v59, %v1579_v57  ;;  %v14353_v29 = vpack.c.bf16 %v1602_v21, %v1601_v8  ;;  %v14357_v54 = vpack.c.bf16 %v1604_v43, %v1603_v40  ;;  %v1620_v57 = vld [vmem:[%s16147_s24 + $0x2778] sm:$0xff]  ;;  %v1653_v59 = vld [vmem:[%s16147_s24 + $0x2880] sm:$0xff] }
 0x298   : > { %v17651_v9 = vadd.f32 %v10968_v52, %v5576_v1  ;;  %14292 = vmatpush3.bf16.msra.mxu0 %v14291_v60  ;;  %v1597_v52 = vld [vmem:[%s16147_s24 + $0x26c0] sm:$0xff]  ;;  %v1654_v47 = vld [vmem:[%s16147_s24 + $0x2888] sm:$0xff]  ;;  %v14429_v18 = vpack.c.bf16 %v1688_v7, %v1687_v58  ;;  %v1660_v40 = vld [vmem:[%s16147_s24 + $0x28b8] sm:$0xff] }
 0x299   : > { %14324 = vmatpush3.bf16.msra.mxu1 %v14323_v46  ;;  %14294 = vmatprep.subr.bf16.mxu0 %v14293_v0  ;;  %v1598_v46 = vld [vmem:[%s16147_s24 + $0x26c8] sm:$0xff]  ;;  %v1629_v0 = vld [vmem:[%s16147_s24 + $0x27c0] sm:$0xff]  ;;  %v1692_v43 = vld [vmem:[%s16147_s24 + $0x29b8] sm:$0xff] }
 0x29a   : > { %14326 = vmatprep.subr.bf16.mxu1 %v14325_v2  ;;  %v14345_v1 = vpack.c.bf16 %v1598_v46, %v1597_v52  ;;  %v1581_v2 = vld [vmem:[%s16147_s24 + $0x2640] sm:$0xff]  ;;  %v14377_v61 = vpack.c.bf16 %v1630_v62, %v1629_v0  ;;  %v1686_v48 = vld [vmem:[%s16147_s24 + $0x2988] sm:$0xff]  ;;  %v14393_v62 = vpack.c.bf16 %v1654_v47, %v1653_v59 }
 0x29b   : > { %v1657_v6 = vld [vmem:[%s16147_s24 + $0x28a0] sm:$0xff]  ;;  %v1658_v8 = vld [vmem:[%s16147_s24 + $0x28a8] sm:$0xff] }
 0x29c   : > { %14296 = vmatpush3.bf16.msra.mxu0 %v14295_v24  ;;  %v1631_v24 = vld [vmem:[%s16147_s24 + $0x27d0] sm:$0xff]  ;;  %v1677_v59 = vld [vmem:[%s16147_s24 + $0x2940] sm:$0xff]  ;;  %v1666_v7 = vld [vmem:[%s16147_s24 + $0x28e8] sm:$0xff] }
 0x29d   : > { %14328 = vmatpush3.bf16.msra.mxu1 %v14327_v13  ;;  %14330 = vmatprep.subr.bf16.mxu0 %v14329_v10  ;;  %v1632_v13 = vld [vmem:[%s16147_s24 + $0x27d8] sm:$0xff]  ;;  %v14347_v10 = vpack.c.bf16 %v1582_v3, %v1581_v2  ;;  %v1670_v3 = vld [vmem:[%s16147_s24 + $0x2908] sm:$0xff]  ;;  %v1665_v58 = vld [vmem:[%s16147_s24 + $0x28e0] sm:$0xff] }
 0x29e   : > { %14362 = vmatprep.subr.bf16.mxu1 %v14361_v12  ;;  %v1584_v12 = vld [vmem:[%s16147_s24 + $0x2658] sm:$0xff]  ;;  %v14381_v19 = vpack.c.bf16 %v1632_v13, %v1631_v24 }
 0x29f   : > { %6554 = vmatmul.mubr.f32.vlgmr.msra.gmra.mrb[36].mxu0 %v17580_v33  ;;  %v1578_v33 = vld [vmem:[%s16147_s24 + $0x2628] sm:$0xff] }
 0x2a0   : > { %14332 = vmatpush3.bf16.msra.mxu0 %v14331_v27  ;;  %6624 = vmatmul.mubr.f32.vlgmr.msra.gmra.mrb[36].mxu1 %v17585_v50  ;;  %v1627_v50 = vld [vmem:[%s16147_s24 + $0x27b0] sm:$0xff]  ;;  %v14339_v39 = vpack.c.bf16 %v1578_v33, %v1577_v44  ;;  %v1633_v27 = vld [vmem:[%s16147_s24 + $0x27e0] sm:$0xff] }
 0x2a1   : > { %14364 = vmatpush3.bf16.msra.mxu1 %v14363_v25  ;;  %14334 = vmatprep.subr.bf16.mxu0 %v14333_v22  ;;  %v14373_v60 = vpack.c.bf16 %v1628_v51, %v1627_v50  ;;  %v1634_v25 = vld [vmem:[%s16147_s24 + $0x27e8] sm:$0xff]  ;;  %v14351_v22 = vpack.c.bf16 %v1584_v12, %v1583_v17  ;;  %v1587_v50 = vld [vmem:[%s16147_s24 + $0x2670] sm:$0xff]  ;;  %v1588_v51 = vld [vmem:[%s16147_s24 + $0x2678] sm:$0xff] }
 0x2a2   : > { %14366 = vmatprep.subr.bf16.mxu1 %v14365_v31  ;;  %6693 = vmatprep.mubr.f32.mxu0 %v3425_v36  ;;  %v1586_v31 = vld [vmem:[%s16147_s24 + $0x2668] sm:$0xff]  ;;  %v14385_v23 = vpack.c.bf16 %v1634_v25, %v1633_v27  ;;  %v1640_v17 = vld [vmem:[%s16147_s24 + $0x2818] sm:$0xff]  ;;  %v1671_v12 = vld [vmem:[%s16147_s24 + $0x2910] sm:$0xff] }
 0x2a3   : > { %6763 = vmatprep.mubr.f32.mxu1 %v3426_v26  ;;  %v1618_v36 = vld [vmem:[%s16147_s24 + $0x2768] sm:$0xff]  ;;  %v14355_v45 = vpack.c.bf16 %v1586_v31, %v1585_v30  ;;  %v1689_v27 = vld [vmem:[%s16147_s24 + $0x29a0] sm:$0xff]  ;;  %v14401_v30 = vpack.c.bf16 %v1658_v8, %v1657_v6 }
 0x2a4   : > { %14336 = vmatpush3.bf16.msra.mxu0 %v14335_v53  ;;  %v14387_v49 = vpack.c.bf16 %v1618_v36, %v1617_v32  ;;  %v1690_v25 = vld [vmem:[%s16147_s24 + $0x29a8] sm:$0xff]  ;;  %v1641_v31 = vld [vmem:[%s16147_s24 + $0x2820] sm:$0xff]  ;;  %v1659_v36 = vld [vmem:[%s16147_s24 + $0x28b0] sm:$0xff] }
 0x2a5   : > { %14368 = vmatpush3.bf16.msra.mxu1 %v14367_v41  ;;  %14338 = vmatprep.subr.bf16.mxu0 %v14337_v42  ;;  %v1635_v41 = vld [vmem:[%s16147_s24 + $0x27f0] sm:$0xff]  ;;  %v1636_v42 = vld [vmem:[%s16147_s24 + $0x27f8] sm:$0xff]  ;;  %v1673_v32 = vld [vmem:[%s16147_s24 + $0x2920] sm:$0xff] }
 0x2a6   : > { %14370 = vmatprep.subr.bf16.mxu1 %v14369_v35  ;;  %v335_v35 = vld [vmem:[%s16157_s19 + $0xa0] sm:$0xff] }
 0x2a7   : > { %v3427_v52 = vcombine.high %v335_v35, %v335_v35  ;;  %v17740_v5 = vrot.slane %v335_v35, %v16210_v14  ;;  %v1676_v35 = vld [vmem:[%s16147_s24 + $0x2938] sm:$0xff] }
 0x2a8   : > { %14340 = vmatpush3.bf16.msra.mxu0 %v14339_v39  ;;  %v1619_v39 = vld [vmem:[%s16147_s24 + $0x2770] sm:$0xff] }
 0x2a9   : > { %14372 = vmatpush3.bf16.msra.mxu1 %v14371_v34  ;;  %14342 = vmatprep.subr.bf16.mxu0 %v14341_v56  ;;  %v14389_v56 = vpack.c.bf16 %v1636_v42, %v1635_v41  ;;  %v14391_v0 = vpack.c.bf16 %v1620_v57, %v1619_v39  ;;  %v17745_v24 = vrot.slane %v3427_v52, %v16210_v14  ;;  %v1643_v42 = vld [vmem:[%s16147_s24 + $0x2830] sm:$0xff]  ;;  %v1646_v57 = vld [vmem:[%s16147_s24 + $0x2848] sm:$0xff]  ;;  %v1664_v52 = vld [vmem:[%s16147_s24 + $0x28d8] sm:$0xff] }
 0x2aa   : > { %14374 = vmatprep.subr.bf16.mxu1 %v14373_v60  ;;  %v1685_v60 = vld [vmem:[%s16147_s24 + $0x2980] sm:$0xff]  ;;  %v3442_v21 = vcombine.high %v17740_v5, %v17740_v5  ;;  %v14405_v41 = vpack.c.bf16 %v1660_v40, %v1659_v36 }
 0x2ab   : > { %v14425_v2 = vpack.c.bf16 %v1686_v48, %v1685_v60  ;;  %v1678_v60 = vld [vmem:[%s16147_s24 + $0x2948] sm:$0xff]  ;;  %v1663_v48 = vld [vmem:[%s16147_s24 + $0x28d0] sm:$0xff] }
 0x2ac   : > { %14344 = vmatpush3.bf16.msra.mxu0 %v14343_v63  ;;  %v1637_v63 = vld [vmem:[%s16147_s24 + $0x2800] sm:$0xff] }
 0x2ad   : > { %14376 = vmatpush3.bf16.msra.mxu1 %v14375_v55  ;;  %14346 = vmatprep.subr.bf16.mxu0 %v14345_v1  ;;  %v1638_v55 = vld [vmem:[%s16147_s24 + $0x2808] sm:$0xff]  ;;  %v1669_v1 = vld [vmem:[%s16147_s24 + $0x2900] sm:$0xff] }
 0x2ae   : > { %14378 = vmatprep.subr.bf16.mxu1 %v14377_v61  ;;  %v1656_v61 = vld [vmem:[%s16147_s24 + $0x2898] sm:$0xff]  ;;  %v14395_v13 = vpack.c.bf16 %v1638_v55, %v1637_v63  ;;  %v14443_v63 = vpack.c.bf16 %v1678_v60, %v1677_v59  ;;  %v14413_v55 = vpack.c.bf16 %v1664_v52, %v1663_v48  ;;  %v1719_v59 = vld [vmem:[%s16147_s24 + $0x2a90] sm:$0xff] }
 0x2af   : > { %v1751_v48 = vld [vmem:[%s16147_s24 + $0x2b90] sm:$0xff]  ;;  %v1752_v52 = vld [vmem:[%s16147_s24 + $0x2b98] sm:$0xff] }
 0x2b0   : > { %14348 = vmatpush3.bf16.msra.mxu0 %v14347_v10  ;;  %v14427_v10 = vpack.c.bf16 %v1670_v3, %v1669_v1  ;;  %v1647_v1 = vld [vmem:[%s16147_s24 + $0x2850] sm:$0xff] }
 0x2b1   : > { %14380 = vmatpush3.bf16.msra.mxu1 %v14379_v11  ;;  %14350 = vmatprep.subr.bf16.mxu0 %v14349_v15  ;;  %v14397_v11 = vpack.c.bf16 %v1656_v61, %v1655_v4  ;;  %v1639_v15 = vld [vmem:[%s16147_s24 + $0x2810] sm:$0xff]  ;;  %v1680_v61 = vld [vmem:[%s16147_s24 + $0x2958] sm:$0xff] }
 0x2b2   : > { %v11001_v20 = vpop.f32.mrb[24].mxu0  ;;  %14382 = vmatprep.subr.bf16.mxu1 %v14381_v19  ;;  %v1672_v19 = vld [vmem:[%s16147_s24 + $0x2918] sm:$0xff]  ;;  %v1679_v3 = vld [vmem:[%s16147_s24 + $0x2950] sm:$0xff] }
 0x2b3   : > { %v11002_v26 = vpop.f32.mrb[25].mxu0  ;;  %v11036_v53 = vpop.f32.mrb[24].mxu1 }
 0x2b4   : > { %v11003_v44 = vadd.f32 %v11002_v26, %v11001_v20  ;;  %14352 = vmatpush3.bf16.msra.mxu0 %v14351_v22  ;;  %v11037_v33 = vpop.f32.mrb[25].mxu1  ;;  %v3443_v22 = vcombine.high %v17745_v24, %v17745_v24  ;;  %v14433_v20 = vpack.c.bf16 %v1690_v25, %v1689_v27  ;;  %v1667_v27 = vld [vmem:[%s16147_s24 + $0x28f0] sm:$0xff]  ;;  %v1668_v25 = vld [vmem:[%s16147_s24 + $0x28f8] sm:$0xff] }
 0x2b5   : > { %v11038_v37 = vadd.f32 %v11037_v33, %v11036_v53  ;;  %14384 = vmatpush3.bf16.msra.mxu1 %v14383_v28  ;;  %14354 = vmatprep.subr.bf16.mxu0 %v14353_v29  ;;  %v14399_v28 = vpack.c.bf16 %v1640_v17, %v1639_v15  ;;  %v14431_v29 = vpack.c.bf16 %v1672_v19, %v1671_v12  ;;  %v1675_v33 = vld [vmem:[%s16147_s24 + $0x2930] sm:$0xff]  ;;  %v1649_v12 = vld [vmem:[%s16147_s24 + $0x2860] sm:$0xff] }
 0x2b6   : > { %v5716_v34 = vadd.f32 %v11003_v44, %v17651_v9  ;;  %14386 = vmatprep.subr.bf16.mxu1 %v14385_v23  ;;  %v14359_v9 = vpack.c.bf16 %v1588_v51, %v1587_v50  ;;  %v1674_v23 = vld [vmem:[%s16147_s24 + $0x2928] sm:$0xff]  ;;  %v1644_v44 = vld [vmem:[%s16147_s24 + $0x2838] sm:$0xff]  ;;  %v14439_v39 = vpack.c.bf16 %v1676_v35, %v1675_v33  ;;  %v14447_v15 = vpack.c.bf16 %v1680_v61, %v1679_v3  ;;  %v1681_v19 = vld [vmem:[%s16147_s24 + $0x2960] sm:$0xff] }
 0x2b7   : > { %v14435_v53 = vpack.c.bf16 %v1674_v23, %v1673_v32  ;;  %v1694_v50 = vld [vmem:[%s16147_s24 + $0x29c8] sm:$0xff]  ;;  %v14407_v51 = vpack.c.bf16 %v1644_v44, %v1643_v42  ;;  %v14417_v17 = vpack.c.bf16 %v1666_v7, %v1665_v58  ;;  %v14421_v40 = vpack.c.bf16 %v1668_v25, %v1667_v27  ;;  %v1684_v42 = vld [vmem:[%s16147_s24 + $0x2978] sm:$0xff]  ;;  %v1717_v44 = vld [vmem:[%s16147_s24 + $0x2a80] sm:$0xff] }
 0x2b8   : > { %v17731_v46 = vadd.f32 %v11038_v37, %v5716_v34  ;;  %14356 = vmatpush3.bf16.msra.mxu0 %v14355_v45  ;;  %v1661_v37 = vld [vmem:[%s16147_s24 + $0x28c0] sm:$0xff]  ;;  %v1718_v33 = vld [vmem:[%s16147_s24 + $0x2a88] sm:$0xff]  ;;  %v14493_v3 = vpack.c.bf16 %v1752_v52, %v1751_v48  ;;  %v1724_v27 = vld [vmem:[%s16147_s24 + $0x2ab8] sm:$0xff] }
 0x2b9   : > { %14388 = vmatpush3.bf16.msra.mxu1 %v14387_v49  ;;  %14358 = vmatprep.subr.bf16.mxu0 %v14357_v54  ;;  %v1662_v49 = vld [vmem:[%s16147_s24 + $0x28c8] sm:$0xff]  ;;  %v1693_v54 = vld [vmem:[%s16147_s24 + $0x29c0] sm:$0xff]  ;;  %v1756_v25 = vld [vmem:[%s16147_s24 + $0x2bb8] sm:$0xff] }
 0x2ba   : > { %14390 = vmatprep.subr.bf16.mxu1 %v14389_v56  ;;  %v14409_v34 = vpack.c.bf16 %v1662_v49, %v1661_v37  ;;  %v1645_v56 = vld [vmem:[%s16147_s24 + $0x2840] sm:$0xff]  ;;  %v14441_v47 = vpack.c.bf16 %v1694_v50, %v1693_v54  ;;  %v1750_v35 = vld [vmem:[%s16147_s24 + $0x2b88] sm:$0xff]  ;;  %v14457_v50 = vpack.c.bf16 %v1718_v33, %v1717_v44 }
 0x2bb   : > { %v1721_v61 = vld [vmem:[%s16147_s24 + $0x2aa0] sm:$0xff]  ;;  %v1722_v58 = vld [vmem:[%s16147_s24 + $0x2aa8] sm:$0xff] }
 0x2bc   : > { %14360 = vmatpush3.bf16.msra.mxu0 %v14359_v9  ;;  %v1695_v9 = vld [vmem:[%s16147_s24 + $0x29d0] sm:$0xff]  ;;  %v1741_v44 = vld [vmem:[%s16147_s24 + $0x2b40] sm:$0xff]  ;;  %v1730_v52 = vld [vmem:[%s16147_s24 + $0x2ae8] sm:$0xff] }
 0x2bd   : > { %14392 = vmatpush3.bf16.msra.mxu1 %v14391_v0  ;;  %14394 = vmatprep.subr.bf16.mxu0 %v14393_v62  ;;  %v1696_v0 = vld [vmem:[%s16147_s24 + $0x29d8] sm:$0xff]  ;;  %v14411_v62 = vpack.c.bf16 %v1646_v57, %v1645_v56  ;;  %v1734_v57 = vld [vmem:[%s16147_s24 + $0x2b08] sm:$0xff]  ;;  %v1729_v48 = vld [vmem:[%s16147_s24 + $0x2ae0] sm:$0xff] }
 0x2be   : > { %14426 = vmatprep.subr.bf16.mxu1 %v14425_v2  ;;  %v1648_v2 = vld [vmem:[%s16147_s24 + $0x2858] sm:$0xff]  ;;  %v14445_v4 = vpack.c.bf16 %v1696_v0, %v1695_v9 }
 0x2bf   : > { %6694 = vmatmul.mubr.f32.vlgmr.msra.gmra.mrb[38].mxu0 %v17660_v16  ;;  %v1642_v16 = vld [vmem:[%s16147_s24 + $0x2828] sm:$0xff] }
 0x2c0   : > { %14396 = vmatpush3.bf16.msra.mxu0 %v14395_v13  ;;  %6764 = vmatmul.mubr.f32.vlgmr.msra.gmra.mrb[38].mxu1 %v17665_v38  ;;  %v1691_v38 = vld [vmem:[%s16147_s24 + $0x29b0] sm:$0xff]  ;;  %v14403_v26 = vpack.c.bf16 %v1642_v16, %v1641_v31  ;;  %v1697_v13 = vld [vmem:[%s16147_s24 + $0x29e0] sm:$0xff] }
 0x2c1   : > { %14428 = vmatpush3.bf16.msra.mxu1 %v14427_v10  ;;  %14398 = vmatprep.subr.bf16.mxu0 %v14397_v11  ;;  %v14437_v45 = vpack.c.bf16 %v1692_v43, %v1691_v38  ;;  %v1698_v10 = vld [vmem:[%s16147_s24 + $0x29e8] sm:$0xff]  ;;  %v14415_v11 = vpack.c.bf16 %v1648_v2, %v1647_v1  ;;  %v1651_v38 = vld [vmem:[%s16147_s24 + $0x2870] sm:$0xff]  ;;  %v1652_v43 = vld [vmem:[%s16147_s24 + $0x2878] sm:$0xff] }
 0x2c2   : > { %14430 = vmatprep.subr.bf16.mxu1 %v14429_v18  ;;  %6833 = vmatprep.mubr.f32.mxu0 %v3442_v21  ;;  %v1650_v18 = vld [vmem:[%s16147_s24 + $0x2868] sm:$0xff]  ;;  %v14449_v8 = vpack.c.bf16 %v1698_v10, %v1697_v13  ;;  %v1704_v1 = vld [vmem:[%s16147_s24 + $0x2a18] sm:$0xff]  ;;  %v1735_v2 = vld [vmem:[%s16147_s24 + $0x2b10] sm:$0xff] }
 0x2c3   : > { %6903 = vmatprep.mubr.f32.mxu1 %v3443_v22  ;;  %v1682_v21 = vld [vmem:[%s16147_s24 + $0x2968] sm:$0xff]  ;;  %v14419_v32 = vpack.c.bf16 %v1650_v18, %v1649_v12  ;;  %v1753_v13 = vld [vmem:[%s16147_s24 + $0x2ba0] sm:$0xff]  ;;  %v14465_v12 = vpack.c.bf16 %v1722_v58, %v1721_v61 }
 0x2c4   : > { %14400 = vmatpush3.bf16.msra.mxu0 %v14399_v28  ;;  %v14451_v36 = vpack.c.bf16 %v1682_v21, %v1681_v19  ;;  %v1754_v10 = vld [vmem:[%s16147_s24 + $0x2ba8] sm:$0xff]  ;;  %v1705_v18 = vld [vmem:[%s16147_s24 + $0x2a20] sm:$0xff]  ;;  %v1723_v21 = vld [vmem:[%s16147_s24 + $0x2ab0] sm:$0xff] }
 0x2c5   : > { %14432 = vmatpush3.bf16.msra.mxu1 %v14431_v29  ;;  %14402 = vmatprep.subr.bf16.mxu0 %v14401_v30  ;;  %v1699_v29 = vld [vmem:[%s16147_s24 + $0x29f0] sm:$0xff]  ;;  %v1700_v30 = vld [vmem:[%s16147_s24 + $0x29f8] sm:$0xff]  ;;  %v1737_v19 = vld [vmem:[%s16147_s24 + $0x2b20] sm:$0xff] }
 0x2c6   : > { %14434 = vmatprep.subr.bf16.mxu1 %v14433_v20  ;;  %v336_v20 = vld [vmem:[%s16157_s19 + $0xa8] sm:$0xff] }
 0x2c7   : > { %v3444_v37 = vcombine.high %v336_v20, %v336_v20  ;;  %v17820_v60 = vrot.slane %v336_v20, %v16210_v14  ;;  %v1740_v20 = vld [vmem:[%s16147_s24 + $0x2b38] sm:$0xff] }
 0x2c8   : > { %14404 = vmatpush3.bf16.msra.mxu0 %v14403_v26  ;;  %v1683_v26 = vld [vmem:[%s16147_s24 + $0x2970] sm:$0xff] }
 0x2c9   : > { %14436 = vmatpush3.bf16.msra.mxu1 %v14435_v53  ;;  %14406 = vmatprep.subr.bf16.mxu0 %v14405_v41  ;;  %v14453_v41 = vpack.c.bf16 %v1700_v30, %v1699_v29  ;;  %v14455_v54 = vpack.c.bf16 %v1684_v42, %v1683_v26  ;;  %v17825_v9 = vrot.slane %v3444_v37, %v16210_v14  ;;  %v1707_v30 = vld [vmem:[%s16147_s24 + $0x2a30] sm:$0xff]  ;;  %v1710_v42 = vld [vmem:[%s16147_s24 + $0x2a48] sm:$0xff]  ;;  %v1728_v37 = vld [vmem:[%s16147_s24 + $0x2ad8] sm:$0xff] }
 0x2ca   : > { %14438 = vmatprep.subr.bf16.mxu1 %v14437_v45  ;;  %v1749_v45 = vld [vmem:[%s16147_s24 + $0x2b80] sm:$0xff]  ;;  %v3459_v7 = vcombine.high %v17820_v60, %v17820_v60  ;;  %v14469_v29 = vpack.c.bf16 %v1724_v27, %v1723_v21 }
 0x2cb   : > { %v14489_v56 = vpack.c.bf16 %v1750_v35, %v1749_v45  ;;  %v1742_v45 = vld [vmem:[%s16147_s24 + $0x2b48] sm:$0xff]  ;;  %v1727_v35 = vld [vmem:[%s16147_s24 + $0x2ad0] sm:$0xff] }
 0x2cc   : > { %14408 = vmatpush3.bf16.msra.mxu0 %v14407_v51  ;;  %v1701_v51 = vld [vmem:[%s16147_s24 + $0x2a00] sm:$0xff] }
 0x2cd   : > { %14440 = vmatpush3.bf16.msra.mxu1 %v14439_v39  ;;  %14410 = vmatprep.subr.bf16.mxu0 %v14409_v34  ;;  %v1702_v39 = vld [vmem:[%s16147_s24 + $0x2a08] sm:$0xff]  ;;  %v1733_v34 = vld [vmem:[%s16147_s24 + $0x2b00] sm:$0xff] }
 0x2ce   : > { %14442 = vmatprep.subr.bf16.mxu1 %v14441_v47  ;;  %v1720_v47 = vld [vmem:[%s16147_s24 + $0x2a98] sm:$0xff]  ;;  %v14459_v0 = vpack.c.bf16 %v1702_v39, %v1701_v51  ;;  %v14507_v51 = vpack.c.bf16 %v1742_v45, %v1741_v44  ;;  %v14477_v39 = vpack.c.bf16 %v1728_v37, %v1727_v35  ;;  %v1783_v44 = vld [vmem:[%s16147_s24 + $0x2c90] sm:$0xff] }
 0x2cf   : > { %v1815_v35 = vld [vmem:[%s16147_s24 + $0x2d90] sm:$0xff]  ;;  %v1816_v37 = vld [vmem:[%s16147_s24 + $0x2d98] sm:$0xff] }
 0x2d0   : > { %14412 = vmatpush3.bf16.msra.mxu0 %v14411_v62  ;;  %v14491_v62 = vpack.c.bf16 %v1734_v57, %v1733_v34  ;;  %v1711_v34 = vld [vmem:[%s16147_s24 + $0x2a50] sm:$0xff] }
 0x2d1   : > { %14444 = vmatpush3.bf16.msra.mxu1 %v14443_v63  ;;  %14414 = vmatprep.subr.bf16.mxu0 %v14413_v55  ;;  %v14461_v63 = vpack.c.bf16 %v1720_v47, %v1719_v59  ;;  %v1703_v55 = vld [vmem:[%s16147_s24 + $0x2a10] sm:$0xff]  ;;  %v1744_v47 = vld [vmem:[%s16147_s24 + $0x2b58] sm:$0xff] }
 0x2d2   : > { %v11071_v6 = vpop.f32.mrb[26].mxu0  ;;  %14446 = vmatprep.subr.bf16.mxu1 %v14445_v4  ;;  %v1736_v4 = vld [vmem:[%s16147_s24 + $0x2b18] sm:$0xff]  ;;  %v1743_v57 = vld [vmem:[%s16147_s24 + $0x2b50] sm:$0xff] }
 0x2d3   : > { %v11072_v22 = vpop.f32.mrb[27].mxu0  ;;  %v11106_v28 = vpop.f32.mrb[26].mxu1 }
 0x2d4   : > { %v11073_v31 = vadd.f32 %v11072_v22, %v11071_v6  ;;  %14416 = vmatpush3.bf16.msra.mxu0 %v14415_v11  ;;  %v11107_v16 = vpop.f32.mrb[27].mxu1  ;;  %v3460_v11 = vcombine.high %v17825_v9, %v17825_v9  ;;  %v14497_v6 = vpack.c.bf16 %v1754_v10, %v1753_v13  ;;  %v1731_v13 = vld [vmem:[%s16147_s24 + $0x2af0] sm:$0xff]  ;;  %v1732_v10 = vld [vmem:[%s16147_s24 + $0x2af8] sm:$0xff] }
 0x2d5   : > { %v11108_v23 = vadd.f32 %v11107_v16, %v11106_v28  ;;  %14448 = vmatpush3.bf16.msra.mxu1 %v14447_v15  ;;  %14418 = vmatprep.subr.bf16.mxu0 %v14417_v17  ;;  %v14463_v15 = vpack.c.bf16 %v1704_v1, %v1703_v55  ;;  %v14495_v17 = vpack.c.bf16 %v1736_v4, %v1735_v2  ;;  %v1739_v16 = vld [vmem:[%s16147_s24 + $0x2b30] sm:$0xff]  ;;  %v1713_v2 = vld [vmem:[%s16147_s24 + $0x2a60] sm:$0xff] }
 0x2d6   : > { %v5856_v53 = vadd.f32 %v11073_v31, %v17731_v46  ;;  %14450 = vmatprep.subr.bf16.mxu1 %v14449_v8  ;;  %v14423_v46 = vpack.c.bf16 %v1652_v43, %v1651_v38  ;;  %v1738_v8 = vld [vmem:[%s16147_s24 + $0x2b28] sm:$0xff]  ;;  %v1708_v31 = vld [vmem:[%s16147_s24 + $0x2a38] sm:$0xff]  ;;  %v14503_v26 = vpack.c.bf16 %v1740_v20, %v1739_v16  ;;  %v14511_v55 = vpack.c.bf16 %v1744_v47, %v1743_v57  ;;  %v1745_v4 = vld [vmem:[%s16147_s24 + $0x2b60] sm:$0xff] }
 0x2d7   : > { %v14499_v28 = vpack.c.bf16 %v1738_v8, %v1737_v19  ;;  %v1758_v38 = vld [vmem:[%s16147_s24 + $0x2bc8] sm:$0xff]  ;;  %v14471_v43 = vpack.c.bf16 %v1708_v31, %v1707_v30  ;;  %v14481_v1 = vpack.c.bf16 %v1730_v52, %v1729_v48  ;;  %v14485_v27 = vpack.c.bf16 %v1732_v10, %v1731_v13  ;;  %v1748_v30 = vld [vmem:[%s16147_s24 + $0x2b78] sm:$0xff]  ;;  %v1781_v31 = vld [vmem:[%s16147_s24 + $0x2c80] sm:$0xff] }
 0x2d8   : > { %v17811_v49 = vadd.f32 %v11108_v23, %v5856_v53  ;;  %14420 = vmatpush3.bf16.msra.mxu0 %v14419_v32  ;;  %v1725_v23 = vld [vmem:[%s16147_s24 + $0x2ac0] sm:$0xff]  ;;  %v1782_v16 = vld [vmem:[%s16147_s24 + $0x2c88] sm:$0xff]  ;;  %v14557_v57 = vpack.c.bf16 %v1816_v37, %v1815_v35  ;;  %v1788_v13 = vld [vmem:[%s16147_s24 + $0x2cb8] sm:$0xff] }
 0x2d9   : > { %14452 = vmatpush3.bf16.msra.mxu1 %v14451_v36  ;;  %14422 = vmatprep.subr.bf16.mxu0 %v14421_v40  ;;  %v1726_v36 = vld [vmem:[%s16147_s24 + $0x2ac8] sm:$0xff]  ;;  %v1757_v40 = vld [vmem:[%s16147_s24 + $0x2bc0] sm:$0xff]  ;;  %v1820_v10 = vld [vmem:[%s16147_s24 + $0x2db8] sm:$0xff] }
 0x2da   : > { %14454 = vmatprep.subr.bf16.mxu1 %v14453_v41  ;;  %v14473_v53 = vpack.c.bf16 %v1726_v36, %v1725_v23  ;;  %v1709_v41 = vld [vmem:[%s16147_s24 + $0x2a40] sm:$0xff]  ;;  %v14505_v33 = vpack.c.bf16 %v1758_v38, %v1757_v40  ;;  %v1814_v20 = vld [vmem:[%s16147_s24 + $0x2d88] sm:$0xff]  ;;  %v14521_v38 = vpack.c.bf16 %v1782_v16, %v1781_v31 }
 0x2db   : > { %v1785_v47 = vld [vmem:[%s16147_s24 + $0x2ca0] sm:$0xff]  ;;  %v1786_v48 = vld [vmem:[%s16147_s24 + $0x2ca8] sm:$0xff] }
 0x2dc   : > { %14424 = vmatpush3.bf16.msra.mxu0 %v14423_v46  ;;  %v1759_v46 = vld [vmem:[%s16147_s24 + $0x2bd0] sm:$0xff]  ;;  %v1805_v31 = vld [vmem:[%s16147_s24 + $0x2d40] sm:$0xff]  ;;  %v1794_v37 = vld [vmem:[%s16147_s24 + $0x2ce8] sm:$0xff] }
 0x2dd   : > { %14456 = vmatpush3.bf16.msra.mxu1 %v14455_v54  ;;  %14458 = vmatprep.subr.bf16.mxu0 %v14457_v50  ;;  %v1760_v54 = vld [vmem:[%s16147_s24 + $0x2bd8] sm:$0xff]  ;;  %v14475_v50 = vpack.c.bf16 %v1710_v42, %v1709_v41  ;;  %v1798_v42 = vld [vmem:[%s16147_s24 + $0x2d08] sm:$0xff]  ;;  %v1793_v35 = vld [vmem:[%s16147_s24 + $0x2ce0] sm:$0xff] }
 0x2de   : > { %14490 = vmatprep.subr.bf16.mxu1 %v14489_v56  ;;  %v1712_v56 = vld [vmem:[%s16147_s24 + $0x2a58] sm:$0xff]  ;;  %v14509_v59 = vpack.c.bf16 %v1760_v54, %v1759_v46 }
 0x2df   : > { %6834 = vmatmul.mubr.f32.vlgmr.msra.gmra.mrb[40].mxu0 %v17740_v5  ;;  %v1706_v5 = vld [vmem:[%s16147_s24 + $0x2a28] sm:$0xff] }
 0x2e0   : > { %14460 = vmatpush3.bf16.msra.mxu0 %v14459_v0  ;;  %6904 = vmatmul.mubr.f32.vlgmr.msra.gmra.mrb[40].mxu1 %v17745_v24  ;;  %v1755_v24 = vld [vmem:[%s16147_s24 + $0x2bb0] sm:$0xff]  ;;  %v14467_v22 = vpack.c.bf16 %v1706_v5, %v1705_v18  ;;  %v1761_v0 = vld [vmem:[%s16147_s24 + $0x2be0] sm:$0xff] }
 0x2e1   : > { %14492 = vmatpush3.bf16.msra.mxu1 %v14491_v62  ;;  %14462 = vmatprep.subr.bf16.mxu0 %v14461_v63  ;;  %v14501_v32 = vpack.c.bf16 %v1756_v25, %v1755_v24  ;;  %v1762_v62 = vld [vmem:[%s16147_s24 + $0x2be8] sm:$0xff]  ;;  %v14479_v63 = vpack.c.bf16 %v1712_v56, %v1711_v34  ;;  %v1715_v24 = vld [vmem:[%s16147_s24 + $0x2a70] sm:$0xff]  ;;  %v1716_v25 = vld [vmem:[%s16147_s24 + $0x2a78] sm:$0xff] }
 0x2e2   : > { %14494 = vmatprep.subr.bf16.mxu1 %v14493_v3  ;;  %6973 = vmatprep.mubr.f32.mxu0 %v3459_v7  ;;  %v1714_v3 = vld [vmem:[%s16147_s24 + $0x2a68] sm:$0xff]  ;;  %v14513_v58 = vpack.c.bf16 %v1762_v62, %v1761_v0  ;;  %v1768_v34 = vld [vmem:[%s16147_s24 + $0x2c18] sm:$0xff]  ;;  %v1799_v56 = vld [vmem:[%s16147_s24 + $0x2d10] sm:$0xff] }
 0x2e3   : > { %7043 = vmatprep.mubr.f32.mxu1 %v3460_v11  ;;  %v1746_v7 = vld [vmem:[%s16147_s24 + $0x2b68] sm:$0xff]  ;;  %v14483_v19 = vpack.c.bf16 %v1714_v3, %v1713_v2  ;;  %v1817_v0 = vld [vmem:[%s16147_s24 + $0x2da0] sm:$0xff]  ;;  %v14529_v2 = vpack.c.bf16 %v1786_v48, %v1785_v47 }
 0x2e4   : > { %14464 = vmatpush3.bf16.msra.mxu0 %v14463_v15  ;;  %v14515_v21 = vpack.c.bf16 %v1746_v7, %v1745_v4  ;;  %v1818_v62 = vld [vmem:[%s16147_s24 + $0x2da8] sm:$0xff]  ;;  %v1769_v3 = vld [vmem:[%s16147_s24 + $0x2c20] sm:$0xff]  ;;  %v1787_v7 = vld [vmem:[%s16147_s24 + $0x2cb0] sm:$0xff] }
 0x2e5   : > { %14496 = vmatpush3.bf16.msra.mxu1 %v14495_v17  ;;  %14466 = vmatprep.subr.bf16.mxu0 %v14465_v12  ;;  %v1763_v17 = vld [vmem:[%s16147_s24 + $0x2bf0] sm:$0xff]  ;;  %v1764_v12 = vld [vmem:[%s16147_s24 + $0x2bf8] sm:$0xff]  ;;  %v1801_v4 = vld [vmem:[%s16147_s24 + $0x2d20] sm:$0xff] }
 0x2e6   : > { %14498 = vmatprep.subr.bf16.mxu1 %v14497_v6  ;;  %v337_v6 = vld [vmem:[%s16157_s19 + $0xb0] sm:$0xff] }
 0x2e7   : > { %v3461_v23 = vcombine.high %v337_v6, %v337_v6  ;;  %v17900_v45 = vrot.slane %v337_v6, %v16210_v14  ;;  %v1804_v6 = vld [vmem:[%s16147_s24 + $0x2d38] sm:$0xff] }
 0x2e8   : > { %14468 = vmatpush3.bf16.msra.mxu0 %v14467_v22  ;;  %v1747_v22 = vld [vmem:[%s16147_s24 + $0x2b70] sm:$0xff] }
 0x2e9   : > { %14500 = vmatpush3.bf16.msra.mxu1 %v14499_v28  ;;  %14470 = vmatprep.subr.bf16.mxu0 %v14469_v29  ;;  %v14517_v29 = vpack.c.bf16 %v1764_v12, %v1763_v17  ;;  %v14519_v40 = vpack.c.bf16 %v1748_v30, %v1747_v22  ;;  %v17905_v46 = vrot.slane %v3461_v23, %v16210_v14  ;;  %v1771_v12 = vld [vmem:[%s16147_s24 + $0x2c30] sm:$0xff]  ;;  %v1774_v30 = vld [vmem:[%s16147_s24 + $0x2c48] sm:$0xff]  ;;  %v1792_v23 = vld [vmem:[%s16147_s24 + $0x2cd8] sm:$0xff] }
 0x2ea   : > { %14502 = vmatprep.subr.bf16.mxu1 %v14501_v32  ;;  %v1813_v32 = vld [vmem:[%s16147_s24 + $0x2d80] sm:$0xff]  ;;  %v3476_v52 = vcombine.high %v17900_v45, %v17900_v45  ;;  %v14533_v17 = vpack.c.bf16 %v1788_v13, %v1787_v7 }
 0x2eb   : > { %v14553_v41 = vpack.c.bf16 %v1814_v20, %v1813_v32  ;;  %v1806_v32 = vld [vmem:[%s16147_s24 + $0x2d48] sm:$0xff]  ;;  %v1791_v20 = vld [vmem:[%s16147_s24 + $0x2cd0] sm:$0xff] }
 0x2ec   : > { %14472 = vmatpush3.bf16.msra.mxu0 %v14471_v43  ;;  %v1765_v43 = vld [vmem:[%s16147_s24 + $0x2c00] sm:$0xff] }
 0x2ed   : > { %14504 = vmatpush3.bf16.msra.mxu1 %v14503_v26  ;;  %14474 = vmatprep.subr.bf16.mxu0 %v14473_v53  ;;  %v1766_v26 = vld [vmem:[%s16147_s24 + $0x2c08] sm:$0xff]  ;;  %v1797_v53 = vld [vmem:[%s16147_s24 + $0x2d00] sm:$0xff] }
 0x2ee   : > { %14506 = vmatprep.subr.bf16.mxu1 %v14505_v33  ;;  %v1784_v33 = vld [vmem:[%s16147_s24 + $0x2c98] sm:$0xff]  ;;  %v14523_v54 = vpack.c.bf16 %v1766_v26, %v1765_v43  ;;  %v14571_v43 = vpack.c.bf16 %v1806_v32, %v1805_v31  ;;  %v14541_v26 = vpack.c.bf16 %v1792_v23, %v1791_v20  ;;  %v1847_v31 = vld [vmem:[%s16147_s24 + $0x2e90] sm:$0xff] }
 0x2ef   : > { %v1879_v20 = vld [vmem:[%s16147_s24 + $0x2f90] sm:$0xff]  ;;  %v1880_v23 = vld [vmem:[%s16147_s24 + $0x2f98] sm:$0xff] }
 0x2f0   : > { %14476 = vmatpush3.bf16.msra.mxu0 %v14475_v50  ;;  %v14555_v50 = vpack.c.bf16 %v1798_v42, %v1797_v53  ;;  %v1775_v53 = vld [vmem:[%s16147_s24 + $0x2c50] sm:$0xff] }
 0x2f1   : > { %14508 = vmatpush3.bf16.msra.mxu1 %v14507_v51  ;;  %14478 = vmatprep.subr.bf16.mxu0 %v14477_v39  ;;  %v14525_v51 = vpack.c.bf16 %v1784_v33, %v1783_v44  ;;  %v1767_v39 = vld [vmem:[%s16147_s24 + $0x2c10] sm:$0xff]  ;;  %v1808_v33 = vld [vmem:[%s16147_s24 + $0x2d58] sm:$0xff] }
 0x2f2   : > { %v11141_v61 = vpop.f32.mrb[28].mxu0  ;;  %14510 = vmatprep.subr.bf16.mxu1 %v14509_v59  ;;  %v1800_v59 = vld [vmem:[%s16147_s24 + $0x2d18] sm:$0xff]  ;;  %v1807_v42 = vld [vmem:[%s16147_s24 + $0x2d50] sm:$0xff] }
 0x2f3   : > { %v11142_v11 = vpop.f32.mrb[29].mxu0  ;;  %v11176_v15 = vpop.f32.mrb[28].mxu1 }
 0x2f4   : > { %v11143_v18 = vadd.f32 %v11142_v11, %v11141_v61  ;;  %14480 = vmatpush3.bf16.msra.mxu0 %v14479_v63  ;;  %v11177_v5 = vpop.f32.mrb[29].mxu1  ;;  %v3477_v63 = vcombine.high %v17905_v46, %v17905_v46  ;;  %v14561_v61 = vpack.c.bf16 %v1818_v62, %v1817_v0  ;;  %v1795_v0 = vld [vmem:[%s16147_s24 + $0x2cf0] sm:$0xff]  ;;  %v1796_v62 = vld [vmem:[%s16147_s24 + $0x2cf8] sm:$0xff] }
 0x2f5   : > { %v11178_v8 = vadd.f32 %v11177_v5, %v11176_v15  ;;  %14512 = vmatpush3.bf16.msra.mxu1 %v14511_v55  ;;  %14482 = vmatprep.subr.bf16.mxu0 %v14481_v1  ;;  %v14527_v55 = vpack.c.bf16 %v1768_v34, %v1767_v39  ;;  %v14559_v1 = vpack.c.bf16 %v1800_v59, %v1799_v56  ;;  %v1803_v5 = vld [vmem:[%s16147_s24 + $0x2d30] sm:$0xff]  ;;  %v1777_v56 = vld [vmem:[%s16147_s24 + $0x2c60] sm:$0xff] }
 0x2f6   : > { %v5996_v28 = vadd.f32 %v11143_v18, %v17811_v49  ;;  %14514 = vmatprep.subr.bf16.mxu1 %v14513_v58  ;;  %v14487_v49 = vpack.c.bf16 %v1716_v25, %v1715_v24  ;;  %v1802_v58 = vld [vmem:[%s16147_s24 + $0x2d28] sm:$0xff]  ;;  %v1772_v18 = vld [vmem:[%s16147_s24 + $0x2c38] sm:$0xff]  ;;  %v14567_v22 = vpack.c.bf16 %v1804_v6, %v1803_v5  ;;  %v14575_v39 = vpack.c.bf16 %v1808_v33, %v1807_v42  ;;  %v1809_v59 = vld [vmem:[%s16147_s24 + $0x2d60] sm:$0xff] }
 0x2f7   : > { %v14563_v15 = vpack.c.bf16 %v1802_v58, %v1801_v4  ;;  %v1822_v24 = vld [vmem:[%s16147_s24 + $0x2dc8] sm:$0xff]  ;;  %v14535_v25 = vpack.c.bf16 %v1772_v18, %v1771_v12  ;;  %v14545_v34 = vpack.c.bf16 %v1794_v37, %v1793_v35  ;;  %v14549_v13 = vpack.c.bf16 %v1796_v62, %v1795_v0  ;;  %v1812_v12 = vld [vmem:[%s16147_s24 + $0x2d78] sm:$0xff]  ;;  %v1845_v18 = vld [vmem:[%s16147_s24 + $0x2e80] sm:$0xff] }
 0x2f8   : > { %v17891_v36 = vadd.f32 %v11178_v8, %v5996_v28  ;;  %14484 = vmatpush3.bf16.msra.mxu0 %v14483_v19  ;;  %v1789_v8 = vld [vmem:[%s16147_s24 + $0x2cc0] sm:$0xff]  ;;  %v1846_v5 = vld [vmem:[%s16147_s24 + $0x2e88] sm:$0xff]  ;;  %v14621_v42 = vpack.c.bf16 %v1880_v23, %v1879_v20  ;;  %v1852_v0 = vld [vmem:[%s16147_s24 + $0x2eb8] sm:$0xff] }
 0x2f9   : > { %14516 = vmatpush3.bf16.msra.mxu1 %v14515_v21  ;;  %14486 = vmatprep.subr.bf16.mxu0 %v14485_v27  ;;  %v1790_v21 = vld [vmem:[%s16147_s24 + $0x2cc8] sm:$0xff]  ;;  %v1821_v27 = vld [vmem:[%s16147_s24 + $0x2dc0] sm:$0xff]  ;;  %v1884_v62 = vld [vmem:[%s16147_s24 + $0x2fb8] sm:$0xff] }
 0x2fa   : > { %14518 = vmatprep.subr.bf16.mxu1 %v14517_v29  ;;  %v14537_v28 = vpack.c.bf16 %v1790_v21, %v1789_v8  ;;  %v1773_v29 = vld [vmem:[%s16147_s24 + $0x2c40] sm:$0xff]  ;;  %v14569_v16 = vpack.c.bf16 %v1822_v24, %v1821_v27  ;;  %v1878_v6 = vld [vmem:[%s16147_s24 + $0x2f88] sm:$0xff]  ;;  %v14585_v24 = vpack.c.bf16 %v1846_v5, %v1845_v18 }
 0x2fb   : > { %v1849_v33 = vld [vmem:[%s16147_s24 + $0x2ea0] sm:$0xff]  ;;  %v1850_v35 = vld [vmem:[%s16147_s24 + $0x2ea8] sm:$0xff] }
 0x2fc   : > { %14488 = vmatpush3.bf16.msra.mxu0 %v14487_v49  ;;  %v1823_v49 = vld [vmem:[%s16147_s24 + $0x2dd0] sm:$0xff]  ;;  %v1869_v18 = vld [vmem:[%s16147_s24 + $0x2f40] sm:$0xff]  ;;  %v1858_v23 = vld [vmem:[%s16147_s24 + $0x2ee8] sm:$0xff] }
 0x2fd   : > { %14520 = vmatpush3.bf16.msra.mxu1 %v14519_v40  ;;  %14522 = vmatprep.subr.bf16.mxu0 %v14521_v38  ;;  %v1824_v40 = vld [vmem:[%s16147_s24 + $0x2dd8] sm:$0xff]  ;;  %v14539_v38 = vpack.c.bf16 %v1774_v30, %v1773_v29  ;;  %v1862_v30 = vld [vmem:[%s16147_s24 + $0x2f08] sm:$0xff]  ;;  %v1857_v20 = vld [vmem:[%s16147_s24 + $0x2ee0] sm:$0xff] }
 0x2fe   : > { %14554 = vmatprep.subr.bf16.mxu1 %v14553_v41  ;;  %v1776_v41 = vld [vmem:[%s16147_s24 + $0x2c58] sm:$0xff]  ;;  %v14573_v44 = vpack.c.bf16 %v1824_v40, %v1823_v49 }
 0x2ff   : > { %6974 = vmatmul.mubr.f32.vlgmr.msra.gmra.mrb[42].mxu0 %v17820_v60  ;;  %v1770_v60 = vld [vmem:[%s16147_s24 + $0x2c28] sm:$0xff] }
 0x300   : > { %14524 = vmatpush3.bf16.msra.mxu0 %v14523_v54  ;;  %7044 = vmatmul.mubr.f32.vlgmr.msra.gmra.mrb[42].mxu1 %v17825_v9  ;;  %v1819_v9 = vld [vmem:[%s16147_s24 + $0x2db0] sm:$0xff]  ;;  %v14531_v11 = vpack.c.bf16 %v1770_v60, %v1769_v3  ;;  %v1825_v54 = vld [vmem:[%s16147_s24 + $0x2de0] sm:$0xff] }
 0x301   : > { %14556 = vmatpush3.bf16.msra.mxu1 %v14555_v50  ;;  %14526 = vmatprep.subr.bf16.mxu0 %v14525_v51  ;;  %v14565_v19 = vpack.c.bf16 %v1820_v10, %v1819_v9  ;;  %v1826_v50 = vld [vmem:[%s16147_s24 + $0x2de8] sm:$0xff]  ;;  %v14543_v51 = vpack.c.bf16 %v1776_v41, %v1775_v53  ;;  %v1779_v9 = vld [vmem:[%s16147_s24 + $0x2c70] sm:$0xff]  ;;  %v1780_v10 = vld [vmem:[%s16147_s24 + $0x2c78] sm:$0xff] }
 0x302   : > { %14558 = vmatprep.subr.bf16.mxu1 %v14557_v57  ;;  %7113 = vmatprep.mubr.f32.mxu0 %v3476_v52  ;;  %v1778_v57 = vld [vmem:[%s16147_s24 + $0x2c68] sm:$0xff]  ;;  %v14577_v48 = vpack.c.bf16 %v1826_v50, %v1825_v54  ;;  %v1832_v53 = vld [vmem:[%s16147_s24 + $0x2e18] sm:$0xff]  ;;  %v1863_v41 = vld [vmem:[%s16147_s24 + $0x2f10] sm:$0xff] }
 0x303   : > { %7183 = vmatprep.mubr.f32.mxu1 %v3477_v63  ;;  %v1810_v52 = vld [vmem:[%s16147_s24 + $0x2d68] sm:$0xff]  ;;  %v14547_v4 = vpack.c.bf16 %v1778_v57, %v1777_v56  ;;  %v1881_v54 = vld [vmem:[%s16147_s24 + $0x2fa0] sm:$0xff]  ;;  %v14593_v56 = vpack.c.bf16 %v1850_v35, %v1849_v33 }
 0x304   : > { %14528 = vmatpush3.bf16.msra.mxu0 %v14527_v55  ;;  %v14579_v7 = vpack.c.bf16 %v1810_v52, %v1809_v59  ;;  %v1882_v50 = vld [vmem:[%s16147_s24 + $0x2fa8] sm:$0xff]  ;;  %v1833_v57 = vld [vmem:[%s16147_s24 + $0x2e20] sm:$0xff]  ;;  %v1851_v52 = vld [vmem:[%s16147_s24 + $0x2eb0] sm:$0xff] }
 0x305   : > { %14560 = vmatpush3.bf16.msra.mxu1 %v14559_v1  ;;  %14530 = vmatprep.subr.bf16.mxu0 %v14529_v2  ;;  %v1827_v1 = vld [vmem:[%s16147_s24 + $0x2df0] sm:$0xff]  ;;  %v1828_v2 = vld [vmem:[%s16147_s24 + $0x2df8] sm:$0xff]  ;;  %v1865_v59 = vld [vmem:[%s16147_s24 + $0x2f20] sm:$0xff] }
 0x306   : > { %14562 = vmatprep.subr.bf16.mxu1 %v14561_v61  ;;  %v338_v61 = vld [vmem:[%s16157_s19 + $0xb8] sm:$0xff] }
 0x307   : > { %v3478_v8 = vcombine.high %v338_v61, %v338_v61  ;;  %v17980_v32 = vrot.slane %v338_v61, %v16210_v14  ;;  %v1868_v61 = vld [vmem:[%s16147_s24 + $0x2f38] sm:$0xff] }
 0x308   : > { %14532 = vmatpush3.bf16.msra.mxu0 %v14531_v11  ;;  %v1811_v11 = vld [vmem:[%s16147_s24 + $0x2d70] sm:$0xff] }
 0x309   : > { %14564 = vmatpush3.bf16.msra.mxu1 %v14563_v15  ;;  %14534 = vmatprep.subr.bf16.mxu0 %v14533_v17  ;;  %v14581_v17 = vpack.c.bf16 %v1828_v2, %v1827_v1  ;;  %v14583_v27 = vpack.c.bf16 %v1812_v12, %v1811_v11  ;;  %v17985_v49 = vrot.slane %v3478_v8, %v16210_v14  ;;  %v1835_v2 = vld [vmem:[%s16147_s24 + $0x2e30] sm:$0xff]  ;;  %v1838_v12 = vld [vmem:[%s16147_s24 + $0x2e48] sm:$0xff]  ;;  %v1856_v8 = vld [vmem:[%s16147_s24 + $0x2ed8] sm:$0xff] }
 0x30a   : > { %14566 = vmatprep.subr.bf16.mxu1 %v14565_v19  ;;  %v1877_v19 = vld [vmem:[%s16147_s24 + $0x2f80] sm:$0xff]  ;;  %v3493_v37 = vcombine.high %v17980_v32, %v17980_v32  ;;  %v14597_v1 = vpack.c.bf16 %v1852_v0, %v1851_v52 }
 0x30b   : > { %v14617_v29 = vpack.c.bf16 %v1878_v6, %v1877_v19  ;;  %v1870_v19 = vld [vmem:[%s16147_s24 + $0x2f48] sm:$0xff]  ;;  %v1855_v6 = vld [vmem:[%s16147_s24 + $0x2ed0] sm:$0xff] }
 0x30c   : > { %14536 = vmatpush3.bf16.msra.mxu0 %v14535_v25  ;;  %v1829_v25 = vld [vmem:[%s16147_s24 + $0x2e00] sm:$0xff] }
 0x30d   : > { %14568 = vmatpush3.bf16.msra.mxu1 %v14567_v22  ;;  %14538 = vmatprep.subr.bf16.mxu0 %v14537_v28  ;;  %v1830_v22 = vld [vmem:[%s16147_s24 + $0x2e08] sm:$0xff]  ;;  %v1861_v28 = vld [vmem:[%s16147_s24 + $0x2f00] sm:$0xff] }
 0x30e   : > { %14570 = vmatprep.subr.bf16.mxu1 %v14569_v16  ;;  %v1848_v16 = vld [vmem:[%s16147_s24 + $0x2e98] sm:$0xff]  ;;  %v14587_v40 = vpack.c.bf16 %v1830_v22, %v1829_v25  ;;  %v14635_v25 = vpack.c.bf16 %v1870_v19, %v1869_v18  ;;  %v14605_v22 = vpack.c.bf16 %v1856_v8, %v1855_v6  ;;  %v1911_v18 = vld [vmem:[%s16147_s24 + $0x3090] sm:$0xff] }
 0x30f   : > { %v1943_v6 = vld [vmem:[%s16147_s24 + $0x3190] sm:$0xff]  ;;  %v1944_v8 = vld [vmem:[%s16147_s24 + $0x3198] sm:$0xff] }
 0x310   : > { %14540 = vmatpush3.bf16.msra.mxu0 %v14539_v38  ;;  %v14619_v38 = vpack.c.bf16 %v1862_v30, %v1861_v28  ;;  %v1839_v28 = vld [vmem:[%s16147_s24 + $0x2e50] sm:$0xff] }
 0x311   : > { %14572 = vmatpush3.bf16.msra.mxu1 %v14571_v43  ;;  %14542 = vmatprep.subr.bf16.mxu0 %v14541_v26  ;;  %v14589_v43 = vpack.c.bf16 %v1848_v16, %v1847_v31  ;;  %v1831_v26 = vld [vmem:[%s16147_s24 + $0x2e10] sm:$0xff]  ;;  %v1872_v16 = vld [vmem:[%s16147_s24 + $0x2f58] sm:$0xff] }
 0x312   : > { %v11211_v47 = vpop.f32.mrb[30].mxu0  ;;  %14574 = vmatprep.subr.bf16.mxu1 %v14573_v44  ;;  %v1864_v44 = vld [vmem:[%s16147_s24 + $0x2f18] sm:$0xff]  ;;  %v1871_v30 = vld [vmem:[%s16147_s24 + $0x2f50] sm:$0xff] }
 0x313   : > { %v11212_v63 = vpop.f32.mrb[31].mxu0  ;;  %v11246_v55 = vpop.f32.mrb[30].mxu1 }
 0x314   : > { %v11213_v3 = vadd.f32 %v11212_v63, %v11211_v47  ;;  %14544 = vmatpush3.bf16.msra.mxu0 %v14543_v51  ;;  %v11247_v60 = vpop.f32.mrb[31].mxu1  ;;  %v3494_v51 = vcombine.high %v17985_v49, %v17985_v49  ;;  %v14625_v47 = vpack.c.bf16 %v1882_v50, %v1881_v54  ;;  %v1859_v54 = vld [vmem:[%s16147_s24 + $0x2ef0] sm:$0xff]  ;;  %v1860_v50 = vld [vmem:[%s16147_s24 + $0x2ef8] sm:$0xff] }
 0x315   : > { %v11248_v58 = vadd.f32 %v11247_v60, %v11246_v55  ;;  %14576 = vmatpush3.bf16.msra.mxu1 %v14575_v39  ;;  %14546 = vmatprep.subr.bf16.mxu0 %v14545_v34  ;;  %v14591_v39 = vpack.c.bf16 %v1832_v53, %v1831_v26  ;;  %v14623_v34 = vpack.c.bf16 %v1864_v44, %v1863_v41  ;;  %v1867_v60 = vld [vmem:[%s16147_s24 + $0x2f30] sm:$0xff]  ;;  %v1841_v41 = vld [vmem:[%s16147_s24 + $0x2e60] sm:$0xff] }
 0x316   : > { %v6136_v15 = vadd.f32 %v11213_v3, %v17891_v36  ;;  %14578 = vmatprep.subr.bf16.mxu1 %v14577_v48  ;;  %v14551_v36 = vpack.c.bf16 %v1780_v10, %v1779_v9  ;;  %v1866_v48 = vld [vmem:[%s16147_s24 + $0x2f28] sm:$0xff]  ;;  %v1836_v3 = vld [vmem:[%s16147_s24 + $0x2e38] sm:$0xff]  ;;  %v14631_v11 = vpack.c.bf16 %v1868_v61, %v1867_v60  ;;  %v14639_v26 = vpack.c.bf16 %v1872_v16, %v1871_v30  ;;  %v1873_v44 = vld [vmem:[%s16147_s24 + $0x2f60] sm:$0xff] }
 0x317   : > { %v14627_v55 = vpack.c.bf16 %v1866_v48, %v1865_v59  ;;  %v1886_v9 = vld [vmem:[%s16147_s24 + $0x2fc8] sm:$0xff]  ;;  %v14599_v10 = vpack.c.bf16 %v1836_v3, %v1835_v2  ;;  %v14609_v53 = vpack.c.bf16 %v1858_v23, %v1857_v20  ;;  %v14613_v0 = vpack.c.bf16 %v1860_v50, %v1859_v54  ;;  %v1876_v2 = vld [vmem:[%s16147_s24 + $0x2f78] sm:$0xff]  ;;  %v1909_v3 = vld [vmem:[%s16147_s24 + $0x3080] sm:$0xff] }
 0x318   : > { %v17971_v21 = vadd.f32 %v11248_v58, %v6136_v15  ;;  %14548 = vmatpush3.bf16.msra.mxu0 %v14547_v4  ;;  %v1853_v58 = vld [vmem:[%s16147_s24 + $0x2ec0] sm:$0xff]  ;;  %v1910_v60 = vld [vmem:[%s16147_s24 + $0x3088] sm:$0xff]  ;;  %v14685_v30 = vpack.c.bf16 %v1944_v8, %v1943_v6  ;;  %v1916_v54 = vld [vmem:[%s16147_s24 + $0x30b8] sm:$0xff] }
 0x319   : > { %14580 = vmatpush3.bf16.msra.mxu1 %v14579_v7  ;;  %14550 = vmatprep.subr.bf16.mxu0 %v14549_v13  ;;  %v1854_v7 = vld [vmem:[%s16147_s24 + $0x2ec8] sm:$0xff]  ;;  %v1885_v13 = vld [vmem:[%s16147_s24 + $0x2fc0] sm:$0xff]  ;;  %v1948_v50 = vld [vmem:[%s16147_s24 + $0x31b8] sm:$0xff] }
 0x31a   : > { %14582 = vmatprep.subr.bf16.mxu1 %v14581_v17  ;;  %v14601_v15 = vpack.c.bf16 %v1854_v7, %v1853_v58  ;;  %v1837_v17 = vld [vmem:[%s16147_s24 + $0x2e40] sm:$0xff]  ;;  %v14633_v5 = vpack.c.bf16 %v1886_v9, %v1885_v13  ;;  %v1942_v61 = vld [vmem:[%s16147_s24 + $0x3188] sm:$0xff]  ;;  %v14649_v9 = vpack.c.bf16 %v1910_v60, %v1909_v3 }
 0x31b   : > { %v1913_v16 = vld [vmem:[%s16147_s24 + $0x30a0] sm:$0xff]  ;;  %v1914_v20 = vld [vmem:[%s16147_s24 + $0x30a8] sm:$0xff] }
 0x31c   : > { %14552 = vmatpush3.bf16.msra.mxu0 %v14551_v36  ;;  %v1887_v36 = vld [vmem:[%s16147_s24 + $0x2fd0] sm:$0xff]  ;;  %v1933_v3 = vld [vmem:[%s16147_s24 + $0x3140] sm:$0xff]  ;;  %v1922_v8 = vld [vmem:[%s16147_s24 + $0x30e8] sm:$0xff] }
 0x31d   : > { %14584 = vmatpush3.bf16.msra.mxu1 %v14583_v27  ;;  %14586 = vmatprep.subr.bf16.mxu0 %v14585_v24  ;;  %v1888_v27 = vld [vmem:[%s16147_s24 + $0x2fd8] sm:$0xff]  ;;  %v14603_v24 = vpack.c.bf16 %v1838_v12, %v1837_v17  ;;  %v1926_v12 = vld [vmem:[%s16147_s24 + $0x3108] sm:$0xff]  ;;  %v1921_v6 = vld [vmem:[%s16147_s24 + $0x30e0] sm:$0xff] }
 0x31e   : > { %14618 = vmatprep.subr.bf16.mxu1 %v14617_v29  ;;  %v1840_v29 = vld [vmem:[%s16147_s24 + $0x2e58] sm:$0xff]  ;;  %v14637_v31 = vpack.c.bf16 %v1888_v27, %v1887_v36 }
 0x31f   : > { %7114 = vmatmul.mubr.f32.vlgmr.msra.gmra.mrb[44].mxu0 %v17900_v45  ;;  %v1834_v45 = vld [vmem:[%s16147_s24 + $0x2e28] sm:$0xff] }
 0x320   : > { %14588 = vmatpush3.bf16.msra.mxu0 %v14587_v40  ;;  %7184 = vmatmul.mubr.f32.vlgmr.msra.gmra.mrb[44].mxu1 %v17905_v46  ;;  %v1883_v46 = vld [vmem:[%s16147_s24 + $0x2fb0] sm:$0xff]  ;;  %v14595_v63 = vpack.c.bf16 %v1834_v45, %v1833_v57  ;;  %v1889_v40 = vld [vmem:[%s16147_s24 + $0x2fe0] sm:$0xff] }
 0x321   : > { %14620 = vmatpush3.bf16.msra.mxu1 %v14619_v38  ;;  %14590 = vmatprep.subr.bf16.mxu0 %v14589_v43  ;;  %v14629_v4 = vpack.c.bf16 %v1884_v62, %v1883_v46  ;;  %v1890_v38 = vld [vmem:[%s16147_s24 + $0x2fe8] sm:$0xff]  ;;  %v14607_v43 = vpack.c.bf16 %v1840_v29, %v1839_v28  ;;  %v1843_v46 = vld [vmem:[%s16147_s24 + $0x2e70] sm:$0xff]  ;;  %v1844_v62 = vld [vmem:[%s16147_s24 + $0x2e78] sm:$0xff] }
 0x322   : > { %14622 = vmatprep.subr.bf16.mxu1 %v14621_v42  ;;  %7253 = vmatprep.mubr.f32.mxu0 %v3493_v37  ;;  %v1842_v42 = vld [vmem:[%s16147_s24 + $0x2e68] sm:$0xff]  ;;  %v14641_v35 = vpack.c.bf16 %v1890_v38, %v1889_v40  ;;  %v1896_v28 = vld [vmem:[%s16147_s24 + $0x3018] sm:$0xff]  ;;  %v1927_v29 = vld [vmem:[%s16147_s24 + $0x3110] sm:$0xff] }
 0x323   : > { %7323 = vmatprep.mubr.f32.mxu1 %v3494_v51  ;;  %v1874_v37 = vld [vmem:[%s16147_s24 + $0x2f68] sm:$0xff]  ;;  %v14611_v59 = vpack.c.bf16 %v1842_v42, %v1841_v41  ;;  %v1945_v40 = vld [vmem:[%s16147_s24 + $0x31a0] sm:$0xff]  ;;  %v14657_v41 = vpack.c.bf16 %v1914_v20, %v1913_v16 }
 0x324   : > { %14592 = vmatpush3.bf16.msra.mxu0 %v14591_v39  ;;  %v14643_v52 = vpack.c.bf16 %v1874_v37, %v1873_v44  ;;  %v1946_v38 = vld [vmem:[%s16147_s24 + $0x31a8] sm:$0xff]  ;;  %v1897_v42 = vld [vmem:[%s16147_s24 + $0x3020] sm:$0xff]  ;;  %v1915_v37 = vld [vmem:[%s16147_s24 + $0x30b0] sm:$0xff] }
 0x325   : > { %14624 = vmatpush3.bf16.msra.mxu1 %v14623_v34  ;;  %14594 = vmatprep.subr.bf16.mxu0 %v14593_v56  ;;  %v1891_v34 = vld [vmem:[%s16147_s24 + $0x2ff0] sm:$0xff]  ;;  %v1892_v56 = vld [vmem:[%s16147_s24 + $0x2ff8] sm:$0xff]  ;;  %v1929_v44 = vld [vmem:[%s16147_s24 + $0x3120] sm:$0xff] }
 0x326   : > { %14626 = vmatprep.subr.bf16.mxu1 %v14625_v47  ;;  %v339_v47 = vld [vmem:[%s16157_s19 + $0xc0] sm:$0xff] }
 0x327   : > { %v3495_v58 = vcombine.high %v339_v47, %v339_v47  ;;  %v18060_v19 = vrot.slane %v339_v47, %v16210_v14  ;;  %v1932_v47 = vld [vmem:[%s16147_s24 + $0x3138] sm:$0xff] }
 0x328   : > { %14596 = vmatpush3.bf16.msra.mxu0 %v14595_v63  ;;  %v1875_v63 = vld [vmem:[%s16147_s24 + $0x2f70] sm:$0xff] }
 0x329   : > { %14628 = vmatpush3.bf16.msra.mxu1 %v14627_v55  ;;  %14598 = vmatprep.subr.bf16.mxu0 %v14597_v1  ;;  %v14645_v1 = vpack.c.bf16 %v1892_v56, %v1891_v34  ;;  %v14647_v13 = vpack.c.bf16 %v1876_v2, %v1875_v63  ;;  %v18065_v36 = vrot.slane %v3495_v58, %v16210_v14  ;;  %v1899_v56 = vld [vmem:[%s16147_s24 + $0x3030] sm:$0xff]  ;;  %v1902_v2 = vld [vmem:[%s16147_s24 + $0x3048] sm:$0xff]  ;;  %v1920_v58 = vld [vmem:[%s16147_s24 + $0x30d8] sm:$0xff] }
 0x32a   : > { %14630 = vmatprep.subr.bf16.mxu1 %v14629_v4  ;;  %v1941_v4 = vld [vmem:[%s16147_s24 + $0x3180] sm:$0xff]  ;;  %v3510_v23 = vcombine.high %v18060_v19, %v18060_v19  ;;  %v14661_v34 = vpack.c.bf16 %v1916_v54, %v1915_v37 }
 0x32b   : > { %v14681_v17 = vpack.c.bf16 %v1942_v61, %v1941_v4  ;;  %v1934_v4 = vld [vmem:[%s16147_s24 + $0x3148] sm:$0xff]  ;;  %v1919_v61 = vld [vmem:[%s16147_s24 + $0x30d0] sm:$0xff] }
 0x32c   : > { %14600 = vmatpush3.bf16.msra.mxu0 %v14599_v10  ;;  %v1893_v10 = vld [vmem:[%s16147_s24 + $0x3000] sm:$0xff] }
 0x32d   : > { %14632 = vmatpush3.bf16.msra.mxu1 %v14631_v11  ;;  %14602 = vmatprep.subr.bf16.mxu0 %v14601_v15  ;;  %v1894_v11 = vld [vmem:[%s16147_s24 + $0x3008] sm:$0xff]  ;;  %v1925_v15 = vld [vmem:[%s16147_s24 + $0x3100] sm:$0xff] }
 0x32e   : > { %14634 = vmatprep.subr.bf16.mxu1 %v14633_v5  ;;  %v1912_v5 = vld [vmem:[%s16147_s24 + $0x3098] sm:$0xff]  ;;  %v14651_v27 = vpack.c.bf16 %v1894_v11, %v1893_v10  ;;  %v14699_v10 = vpack.c.bf16 %v1934_v4, %v1933_v3  ;;  %v14669_v11 = vpack.c.bf16 %v1920_v58, %v1919_v61  ;;  %v1975_v3 = vld [vmem:[%s16147_s24 + $0x3290] sm:$0xff] }
 0x32f   : > { %v2007_v61 = vld [vmem:[%s16147_s24 + $0x3390] sm:$0xff]  ;;  %v2008_v58 = vld [vmem:[%s16147_s24 + $0x3398] sm:$0xff] }
 0x330   : > { %14604 = vmatpush3.bf16.msra.mxu0 %v14603_v24  ;;  %v14683_v24 = vpack.c.bf16 %v1926_v12, %v1925_v15  ;;  %v1903_v15 = vld [vmem:[%s16147_s24 + $0x3050] sm:$0xff] }
 0x331   : > { %14636 = vmatpush3.bf16.msra.mxu1 %v14635_v25  ;;  %14606 = vmatprep.subr.bf16.mxu0 %v14605_v22  ;;  %v14653_v25 = vpack.c.bf16 %v1912_v5, %v1911_v18  ;;  %v1895_v22 = vld [vmem:[%s16147_s24 + $0x3010] sm:$0xff]  ;;  %v1936_v5 = vld [vmem:[%s16147_s24 + $0x3158] sm:$0xff] }
 0x332   : > { %v11281_v33 = vpop.f32.mrb[32].mxu0  ;;  %14638 = vmatprep.subr.bf16.mxu1 %v14637_v31  ;;  %v1928_v31 = vld [vmem:[%s16147_s24 + $0x3118] sm:$0xff]  ;;  %v1935_v12 = vld [vmem:[%s16147_s24 + $0x3150] sm:$0xff] }
 0x333   : > { %v11282_v51 = vpop.f32.mrb[33].mxu0  ;;  %v11316_v39 = vpop.f32.mrb[32].mxu1 }
 0x334   : > { %v11283_v57 = vadd.f32 %v11282_v51, %v11281_v33  ;;  %14608 = vmatpush3.bf16.msra.mxu0 %v14607_v43  ;;  %v11317_v45 = vpop.f32.mrb[33].mxu1  ;;  %v3511_v43 = vcombine.high %v18065_v36, %v18065_v36  ;;  %v14689_v33 = vpack.c.bf16 %v1946_v38, %v1945_v40  ;;  %v1923_v40 = vld [vmem:[%s16147_s24 + $0x30f0] sm:$0xff]  ;;  %v1924_v38 = vld [vmem:[%s16147_s24 + $0x30f8] sm:$0xff] }
 0x335   : > { %v11318_v48 = vadd.f32 %v11317_v45, %v11316_v39  ;;  %14640 = vmatpush3.bf16.msra.mxu1 %v14639_v26  ;;  %14610 = vmatprep.subr.bf16.mxu0 %v14609_v53  ;;  %v14655_v26 = vpack.c.bf16 %v1896_v28, %v1895_v22  ;;  %v14687_v53 = vpack.c.bf16 %v1928_v31, %v1927_v29  ;;  %v1931_v45 = vld [vmem:[%s16147_s24 + $0x3130] sm:$0xff]  ;;  %v1905_v29 = vld [vmem:[%s16147_s24 + $0x3060] sm:$0xff] }
 0x336   : > { %v6276_v55 = vadd.f32 %v11283_v57, %v17971_v21  ;;  %14642 = vmatprep.subr.bf16.mxu1 %v14641_v35  ;;  %v14615_v21 = vpack.c.bf16 %v1844_v62, %v1843_v46  ;;  %v1930_v35 = vld [vmem:[%s16147_s24 + $0x3128] sm:$0xff]  ;;  %v1900_v57 = vld [vmem:[%s16147_s24 + $0x3038] sm:$0xff]  ;;  %v14695_v63 = vpack.c.bf16 %v1932_v47, %v1931_v45  ;;  %v14703_v22 = vpack.c.bf16 %v1936_v5, %v1935_v12  ;;  %v1937_v31 = vld [vmem:[%s16147_s24 + $0x3160] sm:$0xff] }
 0x337   : > { %v14691_v39 = vpack.c.bf16 %v1930_v35, %v1929_v44  ;;  %v1950_v46 = vld [vmem:[%s16147_s24 + $0x31c8] sm:$0xff]  ;;  %v14663_v62 = vpack.c.bf16 %v1900_v57, %v1899_v56  ;;  %v14673_v28 = vpack.c.bf16 %v1922_v8, %v1921_v6  ;;  %v14677_v54 = vpack.c.bf16 %v1924_v38, %v1923_v40  ;;  %v1940_v56 = vld [vmem:[%s16147_s24 + $0x3178] sm:$0xff]  ;;  %v1973_v57 = vld [vmem:[%s16147_s24 + $0x3280] sm:$0xff] }
 0x338   : > { %v18051_v7 = vadd.f32 %v11318_v48, %v6276_v55  ;;  %14612 = vmatpush3.bf16.msra.mxu0 %v14611_v59  ;;  %v1917_v48 = vld [vmem:[%s16147_s24 + $0x30c0] sm:$0xff]  ;;  %v1974_v45 = vld [vmem:[%s16147_s24 + $0x3288] sm:$0xff]  ;;  %v14749_v12 = vpack.c.bf16 %v2008_v58, %v2007_v61  ;;  %v1980_v40 = vld [vmem:[%s16147_s24 + $0x32b8] sm:$0xff] }
 0x339   : > { %14644 = vmatpush3.bf16.msra.mxu1 %v14643_v52  ;;  %14614 = vmatprep.subr.bf16.mxu0 %v14613_v0  ;;  %v1918_v52 = vld [vmem:[%s16147_s24 + $0x30c8] sm:$0xff]  ;;  %v1949_v0 = vld [vmem:[%s16147_s24 + $0x31c0] sm:$0xff]  ;;  %v2012_v38 = vld [vmem:[%s16147_s24 + $0x33b8] sm:$0xff] }
 0x33a   : > { %14646 = vmatprep.subr.bf16.mxu1 %v14645_v1  ;;  %v14665_v55 = vpack.c.bf16 %v1918_v52, %v1917_v48  ;;  %v1901_v1 = vld [vmem:[%s16147_s24 + $0x3040] sm:$0xff]  ;;  %v14697_v60 = vpack.c.bf16 %v1950_v46, %v1949_v0  ;;  %v2006_v47 = vld [vmem:[%s16147_s24 + $0x3388] sm:$0xff]  ;;  %v14713_v46 = vpack.c.bf16 %v1974_v45, %v1973_v57 }
 0x33b   : > { %v1977_v5 = vld [vmem:[%s16147_s24 + $0x32a0] sm:$0xff]  ;;  %v1978_v6 = vld [vmem:[%s16147_s24 + $0x32a8] sm:$0xff] }
 0x33c   : > { %14616 = vmatpush3.bf16.msra.mxu0 %v14615_v21  ;;  %v1951_v21 = vld [vmem:[%s16147_s24 + $0x31d0] sm:$0xff]  ;;  %v1997_v57 = vld [vmem:[%s16147_s24 + $0x3340] sm:$0xff]  ;;  %v1986_v58 = vld [vmem:[%s16147_s24 + $0x32e8] sm:$0xff] }
 0x33d   : > { %14648 = vmatpush3.bf16.msra.mxu1 %v14647_v13  ;;  %14650 = vmatprep.subr.bf16.mxu0 %v14649_v9  ;;  %v1952_v13 = vld [vmem:[%s16147_s24 + $0x31d8] sm:$0xff]  ;;  %v14667_v9 = vpack.c.bf16 %v1902_v2, %v1901_v1  ;;  %v1990_v2 = vld [vmem:[%s16147_s24 + $0x3308] sm:$0xff]  ;;  %v1985_v61 = vld [vmem:[%s16147_s24 + $0x32e0] sm:$0xff] }
 0x33e   : > { %14682 = vmatprep.subr.bf16.mxu1 %v14681_v17  ;;  %v1904_v17 = vld [vmem:[%s16147_s24 + $0x3058] sm:$0xff]  ;;  %v14701_v18 = vpack.c.bf16 %v1952_v13, %v1951_v21 }
 0x33f   : > { %7254 = vmatmul.mubr.f32.vlgmr.msra.gmra.mrb[46].mxu0 %v17980_v32  ;;  %v1898_v32 = vld [vmem:[%s16147_s24 + $0x3028] sm:$0xff] }
 0x340   : > { %14652 = vmatpush3.bf16.msra.mxu0 %v14651_v27  ;;  %7324 = vmatmul.mubr.f32.vlgmr.msra.gmra.mrb[46].mxu1 %v17985_v49  ;;  %v1947_v49 = vld [vmem:[%s16147_s24 + $0x31b0] sm:$0xff]  ;;  %v14659_v51 = vpack.c.bf16 %v1898_v32, %v1897_v42  ;;  %v1953_v27 = vld [vmem:[%s16147_s24 + $0x31e0] sm:$0xff] }
 0x341   : > { %14684 = vmatpush3.bf16.msra.mxu1 %v14683_v24  ;;  %14654 = vmatprep.subr.bf16.mxu0 %v14653_v25  ;;  %v14693_v59 = vpack.c.bf16 %v1948_v50, %v1947_v49  ;;  %v1954_v24 = vld [vmem:[%s16147_s24 + $0x31e8] sm:$0xff]  ;;  %v14671_v25 = vpack.c.bf16 %v1904_v17, %v1903_v15  ;;  %v1907_v49 = vld [vmem:[%s16147_s24 + $0x3070] sm:$0xff]  ;;  %v1908_v50 = vld [vmem:[%s16147_s24 + $0x3078] sm:$0xff] }
 0x342   : > { %14686 = vmatprep.subr.bf16.mxu1 %v14685_v30  ;;  %7393 = vmatprep.mubr.f32.mxu0 %v3510_v23  ;;  %v1906_v30 = vld [vmem:[%s16147_s24 + $0x3068] sm:$0xff]  ;;  %v14705_v20 = vpack.c.bf16 %v1954_v24, %v1953_v27  ;;  %v1960_v15 = vld [vmem:[%s16147_s24 + $0x3218] sm:$0xff]  ;;  %v1991_v17 = vld [vmem:[%s16147_s24 + $0x3310] sm:$0xff] }
 0x343   : > { %7463 = vmatprep.mubr.f32.mxu1 %v3511_v43  ;;  %v1938_v23 = vld [vmem:[%s16147_s24 + $0x3168] sm:$0xff]  ;;  %v14675_v44 = vpack.c.bf16 %v1906_v30, %v1905_v29  ;;  %v2009_v27 = vld [vmem:[%s16147_s24 + $0x33a0] sm:$0xff]  ;;  %v14721_v29 = vpack.c.bf16 %v1978_v6, %v1977_v5 }
 0x344   : > { %14656 = vmatpush3.bf16.msra.mxu0 %v14655_v26  ;;  %v14707_v37 = vpack.c.bf16 %v1938_v23, %v1937_v31  ;;  %v2010_v24 = vld [vmem:[%s16147_s24 + $0x33a8] sm:$0xff]  ;;  %v1961_v30 = vld [vmem:[%s16147_s24 + $0x3220] sm:$0xff]  ;;  %v1979_v23 = vld [vmem:[%s16147_s24 + $0x32b0] sm:$0xff] }
 0x345   : > { %14688 = vmatpush3.bf16.msra.mxu1 %v14687_v53  ;;  %14658 = vmatprep.subr.bf16.mxu0 %v14657_v41  ;;  %v1955_v53 = vld [vmem:[%s16147_s24 + $0x31f0] sm:$0xff]  ;;  %v1956_v41 = vld [vmem:[%s16147_s24 + $0x31f8] sm:$0xff]  ;;  %v1993_v31 = vld [vmem:[%s16147_s24 + $0x3320] sm:$0xff] }
 0x346   : > { %14690 = vmatprep.subr.bf16.mxu1 %v14689_v33  ;;  %v340_v33 = vld [vmem:[%s16157_s19 + $0xc8] sm:$0xff] }
 0x347   : > { %v3512_v48 = vcombine.high %v340_v33, %v340_v33  ;;  %v18140_v4 = vrot.slane %v340_v33, %v16210_v14  ;;  %v1996_v33 = vld [vmem:[%s16147_s24 + $0x3338] sm:$0xff] }
 0x348   : > { %14660 = vmatpush3.bf16.msra.mxu0 %v14659_v51  ;;  %v1939_v51 = vld [vmem:[%s16147_s24 + $0x3170] sm:$0xff] }
 0x349   : > { %14692 = vmatpush3.bf16.msra.mxu1 %v14691_v39  ;;  %14662 = vmatprep.subr.bf16.mxu0 %v14661_v34  ;;  %v14709_v34 = vpack.c.bf16 %v1956_v41, %v1955_v53  ;;  %v14711_v0 = vpack.c.bf16 %v1940_v56, %v1939_v51  ;;  %v18145_v21 = vrot.slane %v3512_v48, %v16210_v14  ;;  %v1963_v41 = vld [vmem:[%s16147_s24 + $0x3230] sm:$0xff]  ;;  %v1966_v56 = vld [vmem:[%s16147_s24 + $0x3248] sm:$0xff]  ;;  %v1984_v48 = vld [vmem:[%s16147_s24 + $0x32d8] sm:$0xff] }
 0x34a   : > { %14694 = vmatprep.subr.bf16.mxu1 %v14693_v59  ;;  %v2005_v59 = vld [vmem:[%s16147_s24 + $0x3380] sm:$0xff]  ;;  %v3527_v8 = vcombine.high %v18140_v4, %v18140_v4  ;;  %v14725_v53 = vpack.c.bf16 %v1980_v40, %v1979_v23 }
 0x34b   : > { %v14745_v1 = vpack.c.bf16 %v2006_v47, %v2005_v59  ;;  %v1998_v59 = vld [vmem:[%s16147_s24 + $0x3348] sm:$0xff]  ;;  %v1983_v47 = vld [vmem:[%s16147_s24 + $0x32d0] sm:$0xff] }
 0x34c   : > { %14664 = vmatpush3.bf16.msra.mxu0 %v14663_v62  ;;  %v1957_v62 = vld [vmem:[%s16147_s24 + $0x3200] sm:$0xff] }
 0x34d   : > { %14696 = vmatpush3.bf16.msra.mxu1 %v14695_v63  ;;  %14666 = vmatprep.subr.bf16.mxu0 %v14665_v55  ;;  %v1958_v63 = vld [vmem:[%s16147_s24 + $0x3208] sm:$0xff]  ;;  %v1989_v55 = vld [vmem:[%s16147_s24 + $0x3300] sm:$0xff] }
 0x34e   : > { %14698 = vmatprep.subr.bf16.mxu1 %v14697_v60  ;;  %v1976_v60 = vld [vmem:[%s16147_s24 + $0x3298] sm:$0xff]  ;;  %v14715_v13 = vpack.c.bf16 %v1958_v63, %v1957_v62  ;;  %v14763_v62 = vpack.c.bf16 %v1998_v59, %v1997_v57  ;;  %v14733_v63 = vpack.c.bf16 %v1984_v48, %v1983_v47  ;;  %v2039_v57 = vld [vmem:[%s16147_s24 + $0x3490] sm:$0xff] }
 0x34f   : > { %v2071_v47 = vld [vmem:[%s16147_s24 + $0x3590] sm:$0xff]  ;;  %v2072_v48 = vld [vmem:[%s16147_s24 + $0x3598] sm:$0xff] }
 0x350   : > { %14668 = vmatpush3.bf16.msra.mxu0 %v14667_v9  ;;  %v14747_v9 = vpack.c.bf16 %v1990_v2, %v1989_v55  ;;  %v1967_v55 = vld [vmem:[%s16147_s24 + $0x3250] sm:$0xff] }
 0x351   : > { %14700 = vmatpush3.bf16.msra.mxu1 %v14699_v10  ;;  %14670 = vmatprep.subr.bf16.mxu0 %v14669_v11  ;;  %v14717_v10 = vpack.c.bf16 %v1976_v60, %v1975_v3  ;;  %v1959_v11 = vld [vmem:[%s16147_s24 + $0x3210] sm:$0xff]  ;;  %v2000_v60 = vld [vmem:[%s16147_s24 + $0x3358] sm:$0xff] }
 0x352   : > { %v11351_v16 = vpop.f32.mrb[34].mxu0  ;;  %14702 = vmatprep.subr.bf16.mxu1 %v14701_v18  ;;  %v1992_v18 = vld [vmem:[%s16147_s24 + $0x3318] sm:$0xff]  ;;  %v1999_v2 = vld [vmem:[%s16147_s24 + $0x3350] sm:$0xff] }
 0x353   : > { %v11352_v43 = vpop.f32.mrb[35].mxu0  ;;  %v11386_v26 = vpop.f32.mrb[34].mxu1 }
 0x354   : > { %v11353_v42 = vadd.f32 %v11352_v43, %v11351_v16  ;;  %14672 = vmatpush3.bf16.msra.mxu0 %v14671_v25  ;;  %v11387_v32 = vpop.f32.mrb[35].mxu1  ;;  %v3528_v25 = vcombine.high %v18145_v21, %v18145_v21  ;;  %v14753_v16 = vpack.c.bf16 %v2010_v24, %v2009_v27  ;;  %v1987_v27 = vld [vmem:[%s16147_s24 + $0x32f0] sm:$0xff]  ;;  %v1988_v24 = vld [vmem:[%s16147_s24 + $0x32f8] sm:$0xff] }
 0x355   : > { %v11388_v35 = vadd.f32 %v11387_v32, %v11386_v26  ;;  %14704 = vmatpush3.bf16.msra.mxu1 %v14703_v22  ;;  %14674 = vmatprep.subr.bf16.mxu0 %v14673_v28  ;;  %v14719_v22 = vpack.c.bf16 %v1960_v15, %v1959_v11  ;;  %v14751_v28 = vpack.c.bf16 %v1992_v18, %v1991_v17  ;;  %v1995_v32 = vld [vmem:[%s16147_s24 + $0x3330] sm:$0xff]  ;;  %v1969_v17 = vld [vmem:[%s16147_s24 + $0x3260] sm:$0xff] }
 0x356   : > { %v6416_v39 = vadd.f32 %v11353_v42, %v18051_v7  ;;  %14706 = vmatprep.subr.bf16.mxu1 %v14705_v20  ;;  %v14679_v7 = vpack.c.bf16 %v1908_v50, %v1907_v49  ;;  %v1994_v20 = vld [vmem:[%s16147_s24 + $0x3328] sm:$0xff]  ;;  %v1964_v42 = vld [vmem:[%s16147_s24 + $0x3238] sm:$0xff]  ;;  %v14759_v51 = vpack.c.bf16 %v1996_v33, %v1995_v32  ;;  %v14767_v11 = vpack.c.bf16 %v2000_v60, %v1999_v2  ;;  %v2001_v18 = vld [vmem:[%s16147_s24 + $0x3360] sm:$0xff] }
 0x357   : > { %v14755_v26 = vpack.c.bf16 %v1994_v20, %v1993_v31  ;;  %v2014_v49 = vld [vmem:[%s16147_s24 + $0x33c8] sm:$0xff]  ;;  %v14727_v50 = vpack.c.bf16 %v1964_v42, %v1963_v41  ;;  %v14737_v15 = vpack.c.bf16 %v1986_v58, %v1985_v61  ;;  %v14741_v40 = vpack.c.bf16 %v1988_v24, %v1987_v27  ;;  %v2004_v41 = vld [vmem:[%s16147_s24 + $0x3378] sm:$0xff]  ;;  %v2037_v42 = vld [vmem:[%s16147_s24 + $0x3480] sm:$0xff] }
 0x358   : > { %v18131_v52 = vadd.f32 %v11388_v35, %v6416_v39  ;;  %14676 = vmatpush3.bf16.msra.mxu0 %v14675_v44  ;;  %v1981_v35 = vld [vmem:[%s16147_s24 + $0x32c0] sm:$0xff]  ;;  %v2038_v32 = vld [vmem:[%s16147_s24 + $0x3488] sm:$0xff]  ;;  %v14813_v2 = vpack.c.bf16 %v2072_v48, %v2071_v47  ;;  %v2044_v27 = vld [vmem:[%s16147_s24 + $0x34b8] sm:$0xff] }
 0x359   : > { %14708 = vmatpush3.bf16.msra.mxu1 %v14707_v37  ;;  %14678 = vmatprep.subr.bf16.mxu0 %v14677_v54  ;;  %v1982_v37 = vld [vmem:[%s16147_s24 + $0x32c8] sm:$0xff]  ;;  %v2013_v54 = vld [vmem:[%s16147_s24 + $0x33c0] sm:$0xff]  ;;  %v2076_v24 = vld [vmem:[%s16147_s24 + $0x35b8] sm:$0xff] }
 0x35a   : > { %14710 = vmatprep.subr.bf16.mxu1 %v14709_v34  ;;  %v14729_v39 = vpack.c.bf16 %v1982_v37, %v1981_v35  ;;  %v1965_v34 = vld [vmem:[%s16147_s24 + $0x3240] sm:$0xff]  ;;  %v14761_v45 = vpack.c.bf16 %v2014_v49, %v2013_v54  ;;  %v2070_v33 = vld [vmem:[%s16147_s24 + $0x3588] sm:$0xff]  ;;  %v14777_v49 = vpack.c.bf16 %v2038_v32, %v2037_v42 }
 0x35b   : > { %v2041_v60 = vld [vmem:[%s16147_s24 + $0x34a0] sm:$0xff]  ;;  %v2042_v61 = vld [vmem:[%s16147_s24 + $0x34a8] sm:$0xff] }
 0x35c   : > { %14680 = vmatpush3.bf16.msra.mxu0 %v14679_v7  ;;  %v2015_v7 = vld [vmem:[%s16147_s24 + $0x33d0] sm:$0xff]  ;;  %v2061_v42 = vld [vmem:[%s16147_s24 + $0x3540] sm:$0xff]  ;;  %v2050_v48 = vld [vmem:[%s16147_s24 + $0x34e8] sm:$0xff] }
 0x35d   : > { %14712 = vmatpush3.bf16.msra.mxu1 %v14711_v0  ;;  %14714 = vmatprep.subr.bf16.mxu0 %v14713_v46  ;;  %v2016_v0 = vld [vmem:[%s16147_s24 + $0x33d8] sm:$0xff]  ;;  %v14731_v46 = vpack.c.bf16 %v1966_v56, %v1965_v34  ;;  %v2054_v56 = vld [vmem:[%s16147_s24 + $0x3508] sm:$0xff]  ;;  %v2049_v47 = vld [vmem:[%s16147_s24 + $0x34e0] sm:$0xff] }
 0x35e   : > { %14746 = vmatprep.subr.bf16.mxu1 %v14745_v1  ;;  %v1968_v1 = vld [vmem:[%s16147_s24 + $0x3258] sm:$0xff]  ;;  %v14765_v3 = vpack.c.bf16 %v2016_v0, %v2015_v7 }
 0x35f   : > { %7394 = vmatmul.mubr.f32.vlgmr.msra.gmra.mrb[48].mxu0 %v18060_v19  ;;  %v1962_v19 = vld [vmem:[%s16147_s24 + $0x3228] sm:$0xff] }
 0x360   : > { %14716 = vmatpush3.bf16.msra.mxu0 %v14715_v13  ;;  %7464 = vmatmul.mubr.f32.vlgmr.msra.gmra.mrb[48].mxu1 %v18065_v36  ;;  %v2011_v36 = vld [vmem:[%s16147_s24 + $0x33b0] sm:$0xff]  ;;  %v14723_v43 = vpack.c.bf16 %v1962_v19, %v1961_v30  ;;  %v2017_v13 = vld [vmem:[%s16147_s24 + $0x33e0] sm:$0xff] }
 0x361   : > { %14748 = vmatpush3.bf16.msra.mxu1 %v14747_v9  ;;  %14718 = vmatprep.subr.bf16.mxu0 %v14717_v10  ;;  %v14757_v44 = vpack.c.bf16 %v2012_v38, %v2011_v36  ;;  %v2018_v9 = vld [vmem:[%s16147_s24 + $0x33e8] sm:$0xff]  ;;  %v14735_v10 = vpack.c.bf16 %v1968_v1, %v1967_v55  ;;  %v1971_v36 = vld [vmem:[%s16147_s24 + $0x3270] sm:$0xff]  ;;  %v1972_v38 = vld [vmem:[%s16147_s24 + $0x3278] sm:$0xff] }
 0x362   : > { %14750 = vmatprep.subr.bf16.mxu1 %v14749_v12  ;;  %7533 = vmatprep.mubr.f32.mxu0 %v3527_v8  ;;  %v1970_v12 = vld [vmem:[%s16147_s24 + $0x3268] sm:$0xff]  ;;  %v14769_v6 = vpack.c.bf16 %v2018_v9, %v2017_v13  ;;  %v2024_v55 = vld [vmem:[%s16147_s24 + $0x3418] sm:$0xff]  ;;  %v2055_v1 = vld [vmem:[%s16147_s24 + $0x3510] sm:$0xff] }
 0x363   : > { %7603 = vmatprep.mubr.f32.mxu1 %v3528_v25  ;;  %v2002_v8 = vld [vmem:[%s16147_s24 + $0x3368] sm:$0xff]  ;;  %v14739_v31 = vpack.c.bf16 %v1970_v12, %v1969_v17  ;;  %v2073_v13 = vld [vmem:[%s16147_s24 + $0x35a0] sm:$0xff]  ;;  %v14785_v17 = vpack.c.bf16 %v2042_v61, %v2041_v60 }
 0x364   : > { %14720 = vmatpush3.bf16.msra.mxu0 %v14719_v22  ;;  %v14771_v23 = vpack.c.bf16 %v2002_v8, %v2001_v18  ;;  %v2074_v9 = vld [vmem:[%s16147_s24 + $0x35a8] sm:$0xff]  ;;  %v2025_v12 = vld [vmem:[%s16147_s24 + $0x3420] sm:$0xff]  ;;  %v2043_v8 = vld [vmem:[%s16147_s24 + $0x34b0] sm:$0xff] }
 0x365   : > { %14752 = vmatpush3.bf16.msra.mxu1 %v14751_v28  ;;  %14722 = vmatprep.subr.bf16.mxu0 %v14721_v29  ;;  %v2019_v28 = vld [vmem:[%s16147_s24 + $0x33f0] sm:$0xff]  ;;  %v2020_v29 = vld [vmem:[%s16147_s24 + $0x33f8] sm:$0xff]  ;;  %v2057_v18 = vld [vmem:[%s16147_s24 + $0x3520] sm:$0xff] }
 0x366   : > { %14754 = vmatprep.subr.bf16.mxu1 %v14753_v16  ;;  %v341_v16 = vld [vmem:[%s16157_s19 + $0xd0] sm:$0xff] }
 0x367   : > { %v3529_v35 = vcombine.high %v341_v16, %v341_v16  ;;  %v18220_v59 = vrot.slane %v341_v16, %v16210_v14  ;;  %v2060_v16 = vld [vmem:[%s16147_s24 + $0x3538] sm:$0xff] }
 0x368   : > { %14724 = vmatpush3.bf16.msra.mxu0 %v14723_v43  ;;  %v2003_v43 = vld [vmem:[%s16147_s24 + $0x3370] sm:$0xff] }
 0x369   : > { %14756 = vmatpush3.bf16.msra.mxu1 %v14755_v26  ;;  %14726 = vmatprep.subr.bf16.mxu0 %v14725_v53  ;;  %v14773_v53 = vpack.c.bf16 %v2020_v29, %v2019_v28  ;;  %v14775_v54 = vpack.c.bf16 %v2004_v41, %v2003_v43  ;;  %v18225_v7 = vrot.slane %v3529_v35, %v16210_v14  ;;  %v2027_v29 = vld [vmem:[%s16147_s24 + $0x3430] sm:$0xff]  ;;  %v2030_v41 = vld [vmem:[%s16147_s24 + $0x3448] sm:$0xff]  ;;  %v2048_v35 = vld [vmem:[%s16147_s24 + $0x34d8] sm:$0xff] }
 0x36a   : > { %14758 = vmatprep.subr.bf16.mxu1 %v14757_v44  ;;  %v2069_v44 = vld [vmem:[%s16147_s24 + $0x3580] sm:$0xff]  ;;  %v3544_v58 = vcombine.high %v18220_v59, %v18220_v59  ;;  %v14789_v28 = vpack.c.bf16 %v2044_v27, %v2043_v8 }
 0x36b   : > { %v14809_v34 = vpack.c.bf16 %v2070_v33, %v2069_v44  ;;  %v2062_v44 = vld [vmem:[%s16147_s24 + $0x3548] sm:$0xff]  ;;  %v2047_v33 = vld [vmem:[%s16147_s24 + $0x34d0] sm:$0xff] }
 0x36c   : > { %14728 = vmatpush3.bf16.msra.mxu0 %v14727_v50  ;;  %v2021_v50 = vld [vmem:[%s16147_s24 + $0x3400] sm:$0xff] }
 0x36d   : > { %14760 = vmatpush3.bf16.msra.mxu1 %v14759_v51  ;;  %14730 = vmatprep.subr.bf16.mxu0 %v14729_v39  ;;  %v2022_v51 = vld [vmem:[%s16147_s24 + $0x3408] sm:$0xff]  ;;  %v2053_v39 = vld [vmem:[%s16147_s24 + $0x3500] sm:$0xff] }
 0x36e   : > { %14762 = vmatprep.subr.bf16.mxu1 %v14761_v45  ;;  %v2040_v45 = vld [vmem:[%s16147_s24 + $0x3498] sm:$0xff]  ;;  %v14779_v0 = vpack.c.bf16 %v2022_v51, %v2021_v50  ;;  %v14827_v50 = vpack.c.bf16 %v2062_v44, %v2061_v42  ;;  %v14797_v51 = vpack.c.bf16 %v2048_v35, %v2047_v33  ;;  %v2103_v42 = vld [vmem:[%s16147_s24 + $0x3690] sm:$0xff] }
 0x36f   : > { %v2135_v33 = vld [vmem:[%s16147_s24 + $0x3790] sm:$0xff]  ;;  %v2136_v35 = vld [vmem:[%s16147_s24 + $0x3798] sm:$0xff] }
 0x370   : > { %14732 = vmatpush3.bf16.msra.mxu0 %v14731_v46  ;;  %v14811_v46 = vpack.c.bf16 %v2054_v56, %v2053_v39  ;;  %v2031_v39 = vld [vmem:[%s16147_s24 + $0x3450] sm:$0xff] }
 0x371   : > { %14764 = vmatpush3.bf16.msra.mxu1 %v14763_v62  ;;  %14734 = vmatprep.subr.bf16.mxu0 %v14733_v63  ;;  %v14781_v62 = vpack.c.bf16 %v2040_v45, %v2039_v57  ;;  %v2023_v63 = vld [vmem:[%s16147_s24 + $0x3410] sm:$0xff]  ;;  %v2064_v45 = vld [vmem:[%s16147_s24 + $0x3558] sm:$0xff] }
 0x372   : > { %v11421_v5 = vpop.f32.mrb[36].mxu0  ;;  %14766 = vmatprep.subr.bf16.mxu1 %v14765_v3  ;;  %v2056_v3 = vld [vmem:[%s16147_s24 + $0x3518] sm:$0xff]  ;;  %v2063_v56 = vld [vmem:[%s16147_s24 + $0x3550] sm:$0xff] }
 0x373   : > { %v11422_v25 = vpop.f32.mrb[37].mxu0  ;;  %v11456_v22 = vpop.f32.mrb[36].mxu1 }
 0x374   : > { %v11423_v30 = vadd.f32 %v11422_v25, %v11421_v5  ;;  %14736 = vmatpush3.bf16.msra.mxu0 %v14735_v10  ;;  %v11457_v19 = vpop.f32.mrb[37].mxu1  ;;  %v3545_v10 = vcombine.high %v18225_v7, %v18225_v7  ;;  %v14817_v5 = vpack.c.bf16 %v2074_v9, %v2073_v13  ;;  %v2051_v13 = vld [vmem:[%s16147_s24 + $0x34f0] sm:$0xff]  ;;  %v2052_v9 = vld [vmem:[%s16147_s24 + $0x34f8] sm:$0xff] }
 0x375   : > { %v11458_v20 = vadd.f32 %v11457_v19, %v11456_v22  ;;  %14768 = vmatpush3.bf16.msra.mxu1 %v14767_v11  ;;  %14738 = vmatprep.subr.bf16.mxu0 %v14737_v15  ;;  %v14783_v11 = vpack.c.bf16 %v2024_v55, %v2023_v63  ;;  %v14815_v15 = vpack.c.bf16 %v2056_v3, %v2055_v1  ;;  %v2059_v19 = vld [vmem:[%s16147_s24 + $0x3530] sm:$0xff]  ;;  %v2033_v1 = vld [vmem:[%s16147_s24 + $0x3460] sm:$0xff] }
 0x376   : > { %v6556_v26 = vadd.f32 %v11423_v30, %v18131_v52  ;;  %14770 = vmatprep.subr.bf16.mxu1 %v14769_v6  ;;  %v14743_v52 = vpack.c.bf16 %v1972_v38, %v1971_v36  ;;  %v2058_v6 = vld [vmem:[%s16147_s24 + $0x3528] sm:$0xff]  ;;  %v2028_v30 = vld [vmem:[%s16147_s24 + $0x3438] sm:$0xff]  ;;  %v14823_v43 = vpack.c.bf16 %v2060_v16, %v2059_v19  ;;  %v14831_v63 = vpack.c.bf16 %v2064_v45, %v2063_v56  ;;  %v2065_v3 = vld [vmem:[%s16147_s24 + $0x3560] sm:$0xff] }
 0x377   : > { %v14819_v22 = vpack.c.bf16 %v2058_v6, %v2057_v18  ;;  %v2078_v36 = vld [vmem:[%s16147_s24 + $0x35c8] sm:$0xff]  ;;  %v14791_v38 = vpack.c.bf16 %v2028_v30, %v2027_v29  ;;  %v14801_v55 = vpack.c.bf16 %v2050_v48, %v2049_v47  ;;  %v14805_v27 = vpack.c.bf16 %v2052_v9, %v2051_v13  ;;  %v2068_v29 = vld [vmem:[%s16147_s24 + $0x3578] sm:$0xff]  ;;  %v2101_v30 = vld [vmem:[%s16147_s24 + $0x3680] sm:$0xff] }
 0x378   : > { %v18211_v37 = vadd.f32 %v11458_v20, %v6556_v26  ;;  %14740 = vmatpush3.bf16.msra.mxu0 %v14739_v31  ;;  %v2045_v20 = vld [vmem:[%s16147_s24 + $0x34c0] sm:$0xff]  ;;  %v2102_v19 = vld [vmem:[%s16147_s24 + $0x3688] sm:$0xff]  ;;  %v14877_v56 = vpack.c.bf16 %v2136_v35, %v2135_v33  ;;  %v2108_v13 = vld [vmem:[%s16147_s24 + $0x36b8] sm:$0xff] }
 0x379   : > { %14772 = vmatpush3.bf16.msra.mxu1 %v14771_v23  ;;  %14742 = vmatprep.subr.bf16.mxu0 %v14741_v40  ;;  %v2046_v23 = vld [vmem:[%s16147_s24 + $0x34c8] sm:$0xff]  ;;  %v2077_v40 = vld [vmem:[%s16147_s24 + $0x35c0] sm:$0xff]  ;;  %v2140_v9 = vld [vmem:[%s16147_s24 + $0x37b8] sm:$0xff] }
 0x37a   : > { %14774 = vmatprep.subr.bf16.mxu1 %v14773_v53  ;;  %v14793_v26 = vpack.c.bf16 %v2046_v23, %v2045_v20  ;;  %v2029_v53 = vld [vmem:[%s16147_s24 + $0x3440] sm:$0xff]  ;;  %v14825_v32 = vpack.c.bf16 %v2078_v36, %v2077_v40  ;;  %v2134_v16 = vld [vmem:[%s16147_s24 + $0x3788] sm:$0xff]  ;;  %v14841_v36 = vpack.c.bf16 %v2102_v19, %v2101_v30 }
 0x37b   : > { %v2105_v45 = vld [vmem:[%s16147_s24 + $0x36a0] sm:$0xff]  ;;  %v2106_v47 = vld [vmem:[%s16147_s24 + $0x36a8] sm:$0xff] }
 0x37c   : > { %14744 = vmatpush3.bf16.msra.mxu0 %v14743_v52  ;;  %v2079_v52 = vld [vmem:[%s16147_s24 + $0x35d0] sm:$0xff]  ;;  %v2125_v30 = vld [vmem:[%s16147_s24 + $0x3740] sm:$0xff]  ;;  %v2114_v35 = vld [vmem:[%s16147_s24 + $0x36e8] sm:$0xff] }
 0x37d   : > { %14776 = vmatpush3.bf16.msra.mxu1 %v14775_v54  ;;  %14778 = vmatprep.subr.bf16.mxu0 %v14777_v49  ;;  %v2080_v54 = vld [vmem:[%s16147_s24 + $0x35d8] sm:$0xff]  ;;  %v14795_v49 = vpack.c.bf16 %v2030_v41, %v2029_v53  ;;  %v2118_v41 = vld [vmem:[%s16147_s24 + $0x3708] sm:$0xff]  ;;  %v2113_v33 = vld [vmem:[%s16147_s24 + $0x36e0] sm:$0xff] }
 0x37e   : > { %14810 = vmatprep.subr.bf16.mxu1 %v14809_v34  ;;  %v2032_v34 = vld [vmem:[%s16147_s24 + $0x3458] sm:$0xff]  ;;  %v14829_v57 = vpack.c.bf16 %v2080_v54, %v2079_v52 }
 0x37f   : > { %7534 = vmatmul.mubr.f32.vlgmr.msra.gmra.mrb[50].mxu0 %v18140_v4  ;;  %v2026_v4 = vld [vmem:[%s16147_s24 + $0x3428] sm:$0xff] }
 0x380   : > { %14780 = vmatpush3.bf16.msra.mxu0 %v14779_v0  ;;  %7604 = vmatmul.mubr.f32.vlgmr.msra.gmra.mrb[50].mxu1 %v18145_v21  ;;  %v2075_v21 = vld [vmem:[%s16147_s24 + $0x35b0] sm:$0xff]  ;;  %v14787_v25 = vpack.c.bf16 %v2026_v4, %v2025_v12  ;;  %v2081_v0 = vld [vmem:[%s16147_s24 + $0x35e0] sm:$0xff] }
 0x381   : > { %14812 = vmatpush3.bf16.msra.mxu1 %v14811_v46  ;;  %14782 = vmatprep.subr.bf16.mxu0 %v14781_v62  ;;  %v14821_v31 = vpack.c.bf16 %v2076_v24, %v2075_v21  ;;  %v2082_v46 = vld [vmem:[%s16147_s24 + $0x35e8] sm:$0xff]  ;;  %v14799_v62 = vpack.c.bf16 %v2032_v34, %v2031_v39  ;;  %v2035_v21 = vld [vmem:[%s16147_s24 + $0x3470] sm:$0xff]  ;;  %v2036_v24 = vld [vmem:[%s16147_s24 + $0x3478] sm:$0xff] }
 0x382   : > { %14814 = vmatprep.subr.bf16.mxu1 %v14813_v2  ;;  %7673 = vmatprep.mubr.f32.mxu0 %v3544_v58  ;;  %v2034_v2 = vld [vmem:[%s16147_s24 + $0x3468] sm:$0xff]  ;;  %v14833_v61 = vpack.c.bf16 %v2082_v46, %v2081_v0  ;;  %v2088_v39 = vld [vmem:[%s16147_s24 + $0x3618] sm:$0xff]  ;;  %v2119_v34 = vld [vmem:[%s16147_s24 + $0x3710] sm:$0xff] }
 0x383   : > { %7743 = vmatprep.mubr.f32.mxu1 %v3545_v10  ;;  %v2066_v58 = vld [vmem:[%s16147_s24 + $0x3568] sm:$0xff]  ;;  %v14803_v18 = vpack.c.bf16 %v2034_v2, %v2033_v1  ;;  %v2137_v0 = vld [vmem:[%s16147_s24 + $0x37a0] sm:$0xff]  ;;  %v14849_v1 = vpack.c.bf16 %v2106_v47, %v2105_v45 }
 0x384   : > { %14784 = vmatpush3.bf16.msra.mxu0 %v14783_v11  ;;  %v14835_v8 = vpack.c.bf16 %v2066_v58, %v2065_v3  ;;  %v2138_v46 = vld [vmem:[%s16147_s24 + $0x37a8] sm:$0xff]  ;;  %v2089_v2 = vld [vmem:[%s16147_s24 + $0x3620] sm:$0xff]  ;;  %v2107_v58 = vld [vmem:[%s16147_s24 + $0x36b0] sm:$0xff] }
 0x385   : > { %14816 = vmatpush3.bf16.msra.mxu1 %v14815_v15  ;;  %14786 = vmatprep.subr.bf16.mxu0 %v14785_v17  ;;  %v2083_v15 = vld [vmem:[%s16147_s24 + $0x35f0] sm:$0xff]  ;;  %v2084_v17 = vld [vmem:[%s16147_s24 + $0x35f8] sm:$0xff]  ;;  %v2121_v3 = vld [vmem:[%s16147_s24 + $0x3720] sm:$0xff] }
 0x386   : > { %14818 = vmatprep.subr.bf16.mxu1 %v14817_v5  ;;  %v342_v5 = vld [vmem:[%s16157_s19 + $0xd8] sm:$0xff] }
 0x387   : > { %v3546_v20 = vcombine.high %v342_v5, %v342_v5  ;;  %v18300_v44 = vrot.slane %v342_v5, %v16210_v14  ;;  %v2124_v5 = vld [vmem:[%s16147_s24 + $0x3738] sm:$0xff] }
 0x388   : > { %14788 = vmatpush3.bf16.msra.mxu0 %v14787_v25  ;;  %v2067_v25 = vld [vmem:[%s16147_s24 + $0x3570] sm:$0xff] }
 0x389   : > { %14820 = vmatpush3.bf16.msra.mxu1 %v14819_v22  ;;  %14790 = vmatprep.subr.bf16.mxu0 %v14789_v28  ;;  %v14837_v28 = vpack.c.bf16 %v2084_v17, %v2083_v15  ;;  %v14839_v40 = vpack.c.bf16 %v2068_v29, %v2067_v25  ;;  %v18305_v52 = vrot.slane %v3546_v20, %v16210_v14  ;;  %v2091_v17 = vld [vmem:[%s16147_s24 + $0x3630] sm:$0xff]  ;;  %v2094_v29 = vld [vmem:[%s16147_s24 + $0x3648] sm:$0xff]  ;;  %v2112_v20 = vld [vmem:[%s16147_s24 + $0x36d8] sm:$0xff] }
 0x38a   : > { %14822 = vmatprep.subr.bf16.mxu1 %v14821_v31  ;;  %v2133_v31 = vld [vmem:[%s16147_s24 + $0x3780] sm:$0xff]  ;;  %v3561_v48 = vcombine.high %v18300_v44, %v18300_v44  ;;  %v14853_v15 = vpack.c.bf16 %v2108_v13, %v2107_v58 }
 0x38b   : > { %v14873_v53 = vpack.c.bf16 %v2134_v16, %v2133_v31  ;;  %v2126_v31 = vld [vmem:[%s16147_s24 + $0x3748] sm:$0xff]  ;;  %v2111_v16 = vld [vmem:[%s16147_s24 + $0x36d0] sm:$0xff] }
 0x38c   : > { %14792 = vmatpush3.bf16.msra.mxu0 %v14791_v38  ;;  %v2085_v38 = vld [vmem:[%s16147_s24 + $0x3600] sm:$0xff] }
 0x38d   : > { %14824 = vmatpush3.bf16.msra.mxu1 %v14823_v43  ;;  %14794 = vmatprep.subr.bf16.mxu0 %v14793_v26  ;;  %v2086_v43 = vld [vmem:[%s16147_s24 + $0x3608] sm:$0xff]  ;;  %v2117_v26 = vld [vmem:[%s16147_s24 + $0x3700] sm:$0xff] }
 0x38e   : > { %14826 = vmatprep.subr.bf16.mxu1 %v14825_v32  ;;  %v2104_v32 = vld [vmem:[%s16147_s24 + $0x3698] sm:$0xff]  ;;  %v14843_v54 = vpack.c.bf16 %v2086_v43, %v2085_v38  ;;  %v14891_v38 = vpack.c.bf16 %v2126_v31, %v2125_v30  ;;  %v14861_v43 = vpack.c.bf16 %v2112_v20, %v2111_v16  ;;  %v2167_v30 = vld [vmem:[%s16147_s24 + $0x3890] sm:$0xff] }
 0x38f   : > { %v2199_v16 = vld [vmem:[%s16147_s24 + $0x3990] sm:$0xff]  ;;  %v2200_v20 = vld [vmem:[%s16147_s24 + $0x3998] sm:$0xff] }
 0x390   : > { %14796 = vmatpush3.bf16.msra.mxu0 %v14795_v49  ;;  %v14875_v49 = vpack.c.bf16 %v2118_v41, %v2117_v26  ;;  %v2095_v26 = vld [vmem:[%s16147_s24 + $0x3650] sm:$0xff] }
 0x391   : > { %14828 = vmatpush3.bf16.msra.mxu1 %v14827_v50  ;;  %14798 = vmatprep.subr.bf16.mxu0 %v14797_v51  ;;  %v14845_v50 = vpack.c.bf16 %v2104_v32, %v2103_v42  ;;  %v2087_v51 = vld [vmem:[%s16147_s24 + $0x3610] sm:$0xff]  ;;  %v2128_v32 = vld [vmem:[%s16147_s24 + $0x3758] sm:$0xff] }
 0x392   : > { %v11491_v60 = vpop.f32.mrb[38].mxu0  ;;  %14830 = vmatprep.subr.bf16.mxu1 %v14829_v57  ;;  %v2120_v57 = vld [vmem:[%s16147_s24 + $0x3718] sm:$0xff]  ;;  %v2127_v41 = vld [vmem:[%s16147_s24 + $0x3750] sm:$0xff] }
 0x393   : > { %v11492_v10 = vpop.f32.mrb[39].mxu0  ;;  %v11526_v11 = vpop.f32.mrb[38].mxu1 }
 0x394   : > { %v11493_v12 = vadd.f32 %v11492_v10, %v11491_v60  ;;  %14800 = vmatpush3.bf16.msra.mxu0 %v14799_v62  ;;  %v11527_v4 = vpop.f32.mrb[39].mxu1  ;;  %v3562_v62 = vcombine.high %v18305_v52, %v18305_v52  ;;  %v14881_v60 = vpack.c.bf16 %v2138_v46, %v2137_v0  ;;  %v2115_v0 = vld [vmem:[%s16147_s24 + $0x36f0] sm:$0xff]  ;;  %v2116_v46 = vld [vmem:[%s16147_s24 + $0x36f8] sm:$0xff] }
 0x395   : > { %v11528_v6 = vadd.f32 %v11527_v4, %v11526_v11  ;;  %14832 = vmatpush3.bf16.msra.mxu1 %v14831_v63  ;;  %14802 = vmatprep.subr.bf16.mxu0 %v14801_v55  ;;  %v14847_v63 = vpack.c.bf16 %v2088_v39, %v2087_v51  ;;  %v14879_v55 = vpack.c.bf16 %v2120_v57, %v2119_v34  ;;  %v2123_v4 = vld [vmem:[%s16147_s24 + $0x3730] sm:$0xff]  ;;  %v2097_v34 = vld [vmem:[%s16147_s24 + $0x3660] sm:$0xff] }
 0x396   : > { %v6696_v22 = vadd.f32 %v11493_v12, %v18211_v37  ;;  %14834 = vmatprep.subr.bf16.mxu1 %v14833_v61  ;;  %v14807_v37 = vpack.c.bf16 %v2036_v24, %v2035_v21  ;;  %v2122_v61 = vld [vmem:[%s16147_s24 + $0x3728] sm:$0xff]  ;;  %v2092_v12 = vld [vmem:[%s16147_s24 + $0x3638] sm:$0xff]  ;;  %v14887_v25 = vpack.c.bf16 %v2124_v5, %v2123_v4  ;;  %v14895_v51 = vpack.c.bf16 %v2128_v32, %v2127_v41  ;;  %v2129_v57 = vld [vmem:[%s16147_s24 + $0x3760] sm:$0xff] }
 0x397   : > { %v14883_v11 = vpack.c.bf16 %v2122_v61, %v2121_v3  ;;  %v2142_v21 = vld [vmem:[%s16147_s24 + $0x37c8] sm:$0xff]  ;;  %v14855_v24 = vpack.c.bf16 %v2092_v12, %v2091_v17  ;;  %v14865_v39 = vpack.c.bf16 %v2114_v35, %v2113_v33  ;;  %v14869_v13 = vpack.c.bf16 %v2116_v46, %v2115_v0  ;;  %v2132_v17 = vld [vmem:[%s16147_s24 + $0x3778] sm:$0xff]  ;;  %v2165_v12 = vld [vmem:[%s16147_s24 + $0x3880] sm:$0xff] }
 0x398   : > { %v18291_v23 = vadd.f32 %v11528_v6, %v6696_v22  ;;  %14804 = vmatpush3.bf16.msra.mxu0 %v14803_v18  ;;  %v2109_v6 = vld [vmem:[%s16147_s24 + $0x36c0] sm:$0xff]  ;;  %v2166_v4 = vld [vmem:[%s16147_s24 + $0x3888] sm:$0xff]  ;;  %v14941_v41 = vpack.c.bf16 %v2200_v20, %v2199_v16  ;;  %v2172_v0 = vld [vmem:[%s16147_s24 + $0x38b8] sm:$0xff] }
 0x399   : > { %14836 = vmatpush3.bf16.msra.mxu1 %v14835_v8  ;;  %14806 = vmatprep.subr.bf16.mxu0 %v14805_v27  ;;  %v2110_v8 = vld [vmem:[%s16147_s24 + $0x36c8] sm:$0xff]  ;;  %v2141_v27 = vld [vmem:[%s16147_s24 + $0x37c0] sm:$0xff]  ;;  %v2204_v46 = vld [vmem:[%s16147_s24 + $0x39b8] sm:$0xff] }
 0x39a   : > { %14838 = vmatprep.subr.bf16.mxu1 %v14837_v28  ;;  %v14857_v22 = vpack.c.bf16 %v2110_v8, %v2109_v6  ;;  %v2093_v28 = vld [vmem:[%s16147_s24 + $0x3640] sm:$0xff]  ;;  %v14889_v19 = vpack.c.bf16 %v2142_v21, %v2141_v27  ;;  %v2198_v5 = vld [vmem:[%s16147_s24 + $0x3988] sm:$0xff]  ;;  %v14905_v21 = vpack.c.bf16 %v2166_v4, %v2165_v12 }
 0x39b   : > { %v2169_v32 = vld [vmem:[%s16147_s24 + $0x38a0] sm:$0xff]  ;;  %v2170_v33 = vld [vmem:[%s16147_s24 + $0x38a8] sm:$0xff] }
 0x39c   : > { %14808 = vmatpush3.bf16.msra.mxu0 %v14807_v37  ;;  %v2143_v37 = vld [vmem:[%s16147_s24 + $0x37d0] sm:$0xff]  ;;  %v2189_v12 = vld [vmem:[%s16147_s24 + $0x3940] sm:$0xff]  ;;  %v2178_v20 = vld [vmem:[%s16147_s24 + $0x38e8] sm:$0xff] }
 0x39d   : > { %14840 = vmatpush3.bf16.msra.mxu1 %v14839_v40  ;;  %14842 = vmatprep.subr.bf16.mxu0 %v14841_v36  ;;  %v2144_v40 = vld [vmem:[%s16147_s24 + $0x37d8] sm:$0xff]  ;;  %v14859_v36 = vpack.c.bf16 %v2094_v29, %v2093_v28  ;;  %v2182_v29 = vld [vmem:[%s16147_s24 + $0x3908] sm:$0xff]  ;;  %v2177_v16 = vld [vmem:[%s16147_s24 + $0x38e0] sm:$0xff] }
 0x39e   : > { %14874 = vmatprep.subr.bf16.mxu1 %v14873_v53  ;;  %v2096_v53 = vld [vmem:[%s16147_s24 + $0x3658] sm:$0xff]  ;;  %v14893_v42 = vpack.c.bf16 %v2144_v40, %v2143_v37 }
 0x39f   : > { %7674 = vmatmul.mubr.f32.vlgmr.msra.gmra.mrb[52].mxu0 %v18220_v59  ;;  %v2090_v59 = vld [vmem:[%s16147_s24 + $0x3628] sm:$0xff] }
 0x3a0   : > { %14844 = vmatpush3.bf16.msra.mxu0 %v14843_v54  ;;  %7744 = vmatmul.mubr.f32.vlgmr.msra.gmra.mrb[52].mxu1 %v18225_v7  ;;  %v2139_v7 = vld [vmem:[%s16147_s24 + $0x37b0] sm:$0xff]  ;;  %v14851_v10 = vpack.c.bf16 %v2090_v59, %v2089_v2  ;;  %v2145_v54 = vld [vmem:[%s16147_s24 + $0x37e0] sm:$0xff] }
 0x3a1   : > { %14876 = vmatpush3.bf16.msra.mxu1 %v14875_v49  ;;  %14846 = vmatprep.subr.bf16.mxu0 %v14845_v50  ;;  %v14885_v18 = vpack.c.bf16 %v2140_v9, %v2139_v7  ;;  %v2146_v49 = vld [vmem:[%s16147_s24 + $0x37e8] sm:$0xff]  ;;  %v14863_v50 = vpack.c.bf16 %v2096_v53, %v2095_v26  ;;  %v2099_v7 = vld [vmem:[%s16147_s24 + $0x3670] sm:$0xff]  ;;  %v2100_v9 = vld [vmem:[%s16147_s24 + $0x3678] sm:$0xff] }
 0x3a2   : > { %14878 = vmatprep.subr.bf16.mxu1 %v14877_v56  ;;  %7813 = vmatprep.mubr.f32.mxu0 %v3561_v48  ;;  %v2098_v56 = vld [vmem:[%s16147_s24 + $0x3668] sm:$0xff]  ;;  %v14897_v47 = vpack.c.bf16 %v2146_v49, %v2145_v54  ;;  %v2152_v26 = vld [vmem:[%s16147_s24 + $0x3818] sm:$0xff]  ;;  %v2183_v53 = vld [vmem:[%s16147_s24 + $0x3910] sm:$0xff] }
 0x3a3   : > { %7883 = vmatprep.mubr.f32.mxu1 %v3562_v62  ;;  %v2130_v48 = vld [vmem:[%s16147_s24 + $0x3768] sm:$0xff]  ;;  %v14867_v3 = vpack.c.bf16 %v2098_v56, %v2097_v34  ;;  %v2201_v54 = vld [vmem:[%s16147_s24 + $0x39a0] sm:$0xff]  ;;  %v14913_v34 = vpack.c.bf16 %v2170_v33, %v2169_v32 }
 0x3a4   : > { %14848 = vmatpush3.bf16.msra.mxu0 %v14847_v63  ;;  %v14899_v58 = vpack.c.bf16 %v2130_v48, %v2129_v57  ;;  %v2202_v49 = vld [vmem:[%s16147_s24 + $0x39a8] sm:$0xff]  ;;  %v2153_v56 = vld [vmem:[%s16147_s24 + $0x3820] sm:$0xff]  ;;  %v2171_v48 = vld [vmem:[%s16147_s24 + $0x38b0] sm:$0xff] }
 0x3a5   : > { %14880 = vmatpush3.bf16.msra.mxu1 %v14879_v55  ;;  %14850 = vmatprep.subr.bf16.mxu0 %v14849_v1  ;;  %v2147_v55 = vld [vmem:[%s16147_s24 + $0x37f0] sm:$0xff]  ;;  %v2148_v1 = vld [vmem:[%s16147_s24 + $0x37f8] sm:$0xff]  ;;  %v2185_v57 = vld [vmem:[%s16147_s24 + $0x3920] sm:$0xff] }
 0x3a6   : > { %14882 = vmatprep.subr.bf16.mxu1 %v14881_v60  ;;  %v343_v60 = vld [vmem:[%s16157_s19 + $0xe0] sm:$0xff] }
 0x3a7   : > { %v3563_v6 = vcombine.high %v343_v60, %v343_v60  ;;  %v18380_v31 = vrot.slane %v343_v60, %v16210_v14  ;;  %v2188_v60 = vld [vmem:[%s16147_s24 + $0x3938] sm:$0xff] }
 0x3a8   : > { %14852 = vmatpush3.bf16.msra.mxu0 %v14851_v10  ;;  %v2131_v10 = vld [vmem:[%s16147_s24 + $0x3770] sm:$0xff] }
 0x3a9   : > { %14884 = vmatpush3.bf16.msra.mxu1 %v14883_v11  ;;  %14854 = vmatprep.subr.bf16.mxu0 %v14853_v15  ;;  %v14901_v15 = vpack.c.bf16 %v2148_v1, %v2147_v55  ;;  %v14903_v27 = vpack.c.bf16 %v2132_v17, %v2131_v10  ;;  %v18385_v37 = vrot.slane %v3563_v6, %v16210_v14  ;;  %v2155_v1 = vld [vmem:[%s16147_s24 + $0x3830] sm:$0xff]  ;;  %v2158_v17 = vld [vmem:[%s16147_s24 + $0x3848] sm:$0xff]  ;;  %v2176_v6 = vld [vmem:[%s16147_s24 + $0x38d8] sm:$0xff] }
 0x3aa   : > { %14886 = vmatprep.subr.bf16.mxu1 %v14885_v18  ;;  %v2197_v18 = vld [vmem:[%s16147_s24 + $0x3980] sm:$0xff]  ;;  %v3578_v35 = vcombine.high %v18380_v31, %v18380_v31  ;;  %v14917_v55 = vpack.c.bf16 %v2172_v0, %v2171_v48 }
 0x3ab   : > { %v14937_v28 = vpack.c.bf16 %v2198_v5, %v2197_v18  ;;  %v2190_v18 = vld [vmem:[%s16147_s24 + $0x3948] sm:$0xff]  ;;  %v2175_v5 = vld [vmem:[%s16147_s24 + $0x38d0] sm:$0xff] }
 0x3ac   : > { %14856 = vmatpush3.bf16.msra.mxu0 %v14855_v24  ;;  %v2149_v24 = vld [vmem:[%s16147_s24 + $0x3800] sm:$0xff] }
 0x3ad   : > { %14888 = vmatpush3.bf16.msra.mxu1 %v14887_v25  ;;  %14858 = vmatprep.subr.bf16.mxu0 %v14857_v22  ;;  %v2150_v25 = vld [vmem:[%s16147_s24 + $0x3808] sm:$0xff]  ;;  %v2181_v22 = vld [vmem:[%s16147_s24 + $0x3900] sm:$0xff] }
 0x3ae   : > { %14890 = vmatprep.subr.bf16.mxu1 %v14889_v19  ;;  %v2168_v19 = vld [vmem:[%s16147_s24 + $0x3898] sm:$0xff]  ;;  %v14907_v40 = vpack.c.bf16 %v2150_v25, %v2149_v24  ;;  %v14955_v24 = vpack.c.bf16 %v2190_v18, %v2189_v12  ;;  %v14925_v25 = vpack.c.bf16 %v2176_v6, %v2175_v5  ;;  %v2231_v12 = vld [vmem:[%s16147_s24 + $0x3a90] sm:$0xff] }
 0x3af   : > { %v2263_v5 = vld [vmem:[%s16147_s24 + $0x3b90] sm:$0xff]  ;;  %v2264_v6 = vld [vmem:[%s16147_s24 + $0x3b98] sm:$0xff] }
 0x3b0   : > { %14860 = vmatpush3.bf16.msra.mxu0 %v14859_v36  ;;  %v14939_v36 = vpack.c.bf16 %v2182_v29, %v2181_v22  ;;  %v2159_v22 = vld [vmem:[%s16147_s24 + $0x3850] sm:$0xff] }
 0x3b1   : > { %14892 = vmatpush3.bf16.msra.mxu1 %v14891_v38  ;;  %14862 = vmatprep.subr.bf16.mxu0 %v14861_v43  ;;  %v14909_v38 = vpack.c.bf16 %v2168_v19, %v2167_v30  ;;  %v2151_v43 = vld [vmem:[%s16147_s24 + $0x3810] sm:$0xff]  ;;  %v2192_v19 = vld [vmem:[%s16147_s24 + $0x3958] sm:$0xff] }
 0x3b2   : > { %v11561_v45 = vpop.f32.mrb[40].mxu0  ;;  %14894 = vmatprep.subr.bf16.mxu1 %v14893_v42  ;;  %v2184_v42 = vld [vmem:[%s16147_s24 + $0x3918] sm:$0xff]  ;;  %v2191_v29 = vld [vmem:[%s16147_s24 + $0x3950] sm:$0xff] }
 0x3b3   : > { %v11562_v62 = vpop.f32.mrb[41].mxu0  ;;  %v11596_v63 = vpop.f32.mrb[40].mxu1 }
 0x3b4   : > { %v11563_v2 = vadd.f32 %v11562_v62, %v11561_v45  ;;  %14864 = vmatpush3.bf16.msra.mxu0 %v14863_v50  ;;  %v11597_v59 = vpop.f32.mrb[41].mxu1  ;;  %v3579_v50 = vcombine.high %v18385_v37, %v18385_v37  ;;  %v14945_v45 = vpack.c.bf16 %v2202_v49, %v2201_v54  ;;  %v2179_v54 = vld [vmem:[%s16147_s24 + $0x38f0] sm:$0xff]  ;;  %v2180_v49 = vld [vmem:[%s16147_s24 + $0x38f8] sm:$0xff] }
 0x3b5   : > { %v11598_v61 = vadd.f32 %v11597_v59, %v11596_v63  ;;  %14896 = vmatpush3.bf16.msra.mxu1 %v14895_v51  ;;  %14866 = vmatprep.subr.bf16.mxu0 %v14865_v39  ;;  %v14911_v51 = vpack.c.bf16 %v2152_v26, %v2151_v43  ;;  %v14943_v39 = vpack.c.bf16 %v2184_v42, %v2183_v53  ;;  %v2187_v59 = vld [vmem:[%s16147_s24 + $0x3930] sm:$0xff]  ;;  %v2161_v53 = vld [vmem:[%s16147_s24 + $0x3860] sm:$0xff] }
 0x3b6   : > { %v6836_v11 = vadd.f32 %v11563_v2, %v18291_v23  ;;  %14898 = vmatprep.subr.bf16.mxu1 %v14897_v47  ;;  %v14871_v23 = vpack.c.bf16 %v2100_v9, %v2099_v7  ;;  %v2186_v47 = vld [vmem:[%s16147_s24 + $0x3928] sm:$0xff]  ;;  %v2156_v2 = vld [vmem:[%s16147_s24 + $0x3838] sm:$0xff]  ;;  %v14951_v10 = vpack.c.bf16 %v2188_v60, %v2187_v59  ;;  %v14959_v43 = vpack.c.bf16 %v2192_v19, %v2191_v29  ;;  %v2193_v42 = vld [vmem:[%s16147_s24 + $0x3960] sm:$0xff] }
 0x3b7   : > { %v14947_v63 = vpack.c.bf16 %v2186_v47, %v2185_v57  ;;  %v2206_v7 = vld [vmem:[%s16147_s24 + $0x39c8] sm:$0xff]  ;;  %v14919_v9 = vpack.c.bf16 %v2156_v2, %v2155_v1  ;;  %v14929_v26 = vpack.c.bf16 %v2178_v20, %v2177_v16  ;;  %v14933_v0 = vpack.c.bf16 %v2180_v49, %v2179_v54  ;;  %v2196_v1 = vld [vmem:[%s16147_s24 + $0x3978] sm:$0xff]  ;;  %v2229_v2 = vld [vmem:[%s16147_s24 + $0x3a80] sm:$0xff] }
 0x3b8   : > { %v18371_v8 = vadd.f32 %v11598_v61, %v6836_v11  ;;  %14868 = vmatpush3.bf16.msra.mxu0 %v14867_v3  ;;  %v2173_v61 = vld [vmem:[%s16147_s24 + $0x38c0] sm:$0xff]  ;;  %v2230_v59 = vld [vmem:[%s16147_s24 + $0x3a88] sm:$0xff]  ;;  %v15005_v29 = vpack.c.bf16 %v2264_v6, %v2263_v5  ;;  %v2236_v54 = vld [vmem:[%s16147_s24 + $0x3ab8] sm:$0xff] }
 0x3b9   : > { %14900 = vmatpush3.bf16.msra.mxu1 %v14899_v58  ;;  %14870 = vmatprep.subr.bf16.mxu0 %v14869_v13  ;;  %v2174_v58 = vld [vmem:[%s16147_s24 + $0x38c8] sm:$0xff]  ;;  %v2205_v13 = vld [vmem:[%s16147_s24 + $0x39c0] sm:$0xff]  ;;  %v2268_v49 = vld [vmem:[%s16147_s24 + $0x3bb8] sm:$0xff] }
 0x3ba   : > { %14902 = vmatprep.subr.bf16.mxu1 %v14901_v15  ;;  %v14921_v11 = vpack.c.bf16 %v2174_v58, %v2173_v61  ;;  %v2157_v15 = vld [vmem:[%s16147_s24 + $0x3840] sm:$0xff]  ;;  %v14953_v4 = vpack.c.bf16 %v2206_v7, %v2205_v13  ;;  %v2262_v60 = vld [vmem:[%s16147_s24 + $0x3b88] sm:$0xff]  ;;  %v14969_v7 = vpack.c.bf16 %v2230_v59, %v2229_v2 }
 0x3bb   : > { %v2233_v19 = vld [vmem:[%s16147_s24 + $0x3aa0] sm:$0xff]  ;;  %v2234_v16 = vld [vmem:[%s16147_s24 + $0x3aa8] sm:$0xff] }
 0x3bc   : > { %14872 = vmatpush3.bf16.msra.mxu0 %v14871_v23  ;;  %v2207_v23 = vld [vmem:[%s16147_s24 + $0x39d0] sm:$0xff]  ;;  %v2253_v2 = vld [vmem:[%s16147_s24 + $0x3b40] sm:$0xff]  ;;  %v2242_v6 = vld [vmem:[%s16147_s24 + $0x3ae8] sm:$0xff] }
 0x3bd   : > { %14904 = vmatpush3.bf16.msra.mxu1 %v14903_v27  ;;  %14906 = vmatprep.subr.bf16.mxu0 %v14905_v21  ;;  %v2208_v27 = vld [vmem:[%s16147_s24 + $0x39d8] sm:$0xff]  ;;  %v14923_v21 = vpack.c.bf16 %v2158_v17, %v2157_v15  ;;  %v2246_v17 = vld [vmem:[%s16147_s24 + $0x3b08] sm:$0xff]  ;;  %v2241_v5 = vld [vmem:[%s16147_s24 + $0x3ae0] sm:$0xff] }
 0x3be   : > { %14938 = vmatprep.subr.bf16.mxu1 %v14937_v28  ;;  %v2160_v28 = vld [vmem:[%s16147_s24 + $0x3858] sm:$0xff]  ;;  %v14957_v30 = vpack.c.bf16 %v2208_v27, %v2207_v23 }
 0x3bf   : > { %7814 = vmatmul.mubr.f32.vlgmr.msra.gmra.mrb[54].mxu0 %v18300_v44  ;;  %v2154_v44 = vld [vmem:[%s16147_s24 + $0x3828] sm:$0xff] }
 0x3c0   : > { %14908 = vmatpush3.bf16.msra.mxu0 %v14907_v40  ;;  %7884 = vmatmul.mubr.f32.vlgmr.msra.gmra.mrb[54].mxu1 %v18305_v52  ;;  %v2203_v52 = vld [vmem:[%s16147_s24 + $0x39b0] sm:$0xff]  ;;  %v14915_v62 = vpack.c.bf16 %v2154_v44, %v2153_v56  ;;  %v2209_v40 = vld [vmem:[%s16147_s24 + $0x39e0] sm:$0xff] }
 0x3c1   : > { %14940 = vmatpush3.bf16.msra.mxu1 %v14939_v36  ;;  %14910 = vmatprep.subr.bf16.mxu0 %v14909_v38  ;;  %v14949_v3 = vpack.c.bf16 %v2204_v46, %v2203_v52  ;;  %v2210_v36 = vld [vmem:[%s16147_s24 + $0x39e8] sm:$0xff]  ;;  %v14927_v38 = vpack.c.bf16 %v2160_v28, %v2159_v22  ;;  %v2163_v52 = vld [vmem:[%s16147_s24 + $0x3870] sm:$0xff]  ;;  %v2164_v46 = vld [vmem:[%s16147_s24 + $0x3878] sm:$0xff] }
 0x3c2   : > { %14942 = vmatprep.subr.bf16.mxu1 %v14941_v41  ;;  %7953 = vmatprep.mubr.f32.mxu0 %v3578_v35  ;;  %v2162_v41 = vld [vmem:[%s16147_s24 + $0x3868] sm:$0xff]  ;;  %v14961_v33 = vpack.c.bf16 %v2210_v36, %v2209_v40  ;;  %v2216_v22 = vld [vmem:[%s16147_s24 + $0x3a18] sm:$0xff]  ;;  %v2247_v28 = vld [vmem:[%s16147_s24 + $0x3b10] sm:$0xff] }
 0x3c3   : > { %8023 = vmatprep.mubr.f32.mxu1 %v3579_v50  ;;  %v2194_v35 = vld [vmem:[%s16147_s24 + $0x3968] sm:$0xff]  ;;  %v14931_v57 = vpack.c.bf16 %v2162_v41, %v2161_v53  ;;  %v2265_v40 = vld [vmem:[%s16147_s24 + $0x3ba0] sm:$0xff]  ;;  %v14977_v53 = vpack.c.bf16 %v2234_v16, %v2233_v19 }
 0x3c4   : > { %14912 = vmatpush3.bf16.msra.mxu0 %v14911_v51  ;;  %v14963_v48 = vpack.c.bf16 %v2194_v35, %v2193_v42  ;;  %v2266_v36 = vld [vmem:[%s16147_s24 + $0x3ba8] sm:$0xff]  ;;  %v2217_v41 = vld [vmem:[%s16147_s24 + $0x3a20] sm:$0xff]  ;;  %v2235_v35 = vld [vmem:[%s16147_s24 + $0x3ab0] sm:$0xff] }
 0x3c5   : > { %14944 = vmatpush3.bf16.msra.mxu1 %v14943_v39  ;;  %14914 = vmatprep.subr.bf16.mxu0 %v14913_v34  ;;  %v2211_v39 = vld [vmem:[%s16147_s24 + $0x39f0] sm:$0xff]  ;;  %v2212_v34 = vld [vmem:[%s16147_s24 + $0x39f8] sm:$0xff]  ;;  %v2249_v42 = vld [vmem:[%s16147_s24 + $0x3b20] sm:$0xff] }
 0x3c6   : > { %14946 = vmatprep.subr.bf16.mxu1 %v14945_v45  ;;  %v344_v45 = vld [vmem:[%s16157_s19 + $0xe8] sm:$0xff] }
 0x3c7   : > { %v3580_v61 = vcombine.high %v344_v45, %v344_v45  ;;  %v18460_v18 = vrot.slane %v344_v45, %v16210_v14  ;;  %v2252_v45 = vld [vmem:[%s16147_s24 + $0x3b38] sm:$0xff] }
 0x3c8   : > { %14916 = vmatpush3.bf16.msra.mxu0 %v14915_v62  ;;  %v2195_v62 = vld [vmem:[%s16147_s24 + $0x3970] sm:$0xff] }
 0x3c9   : > { %14948 = vmatpush3.bf16.msra.mxu1 %v14947_v63  ;;  %14918 = vmatprep.subr.bf16.mxu0 %v14917_v55  ;;  %v14965_v55 = vpack.c.bf16 %v2212_v34, %v2211_v39  ;;  %v14967_v13 = vpack.c.bf16 %v2196_v1, %v2195_v62  ;;  %v18465_v23 = vrot.slane %v3580_v61, %v16210_v14  ;;  %v2219_v34 = vld [vmem:[%s16147_s24 + $0x3a30] sm:$0xff]  ;;  %v2222_v1 = vld [vmem:[%s16147_s24 + $0x3a48] sm:$0xff]  ;;  %v2240_v61 = vld [vmem:[%s16147_s24 + $0x3ad8] sm:$0xff] }
 0x3ca   : > { %14950 = vmatprep.subr.bf16.mxu1 %v14949_v3  ;;  %v2261_v3 = vld [vmem:[%s16147_s24 + $0x3b80] sm:$0xff]  ;;  %v3595_v20 = vcombine.high %v18460_v18, %v18460_v18  ;;  %v14981_v39 = vpack.c.bf16 %v2236_v54, %v2235_v35 }
 0x3cb   : > { %v15001_v15 = vpack.c.bf16 %v2262_v60, %v2261_v3  ;;  %v2254_v3 = vld [vmem:[%s16147_s24 + $0x3b48] sm:$0xff]  ;;  %v2239_v60 = vld [vmem:[%s16147_s24 + $0x3ad0] sm:$0xff] }
 0x3cc   : > { %14920 = vmatpush3.bf16.msra.mxu0 %v14919_v9  ;;  %v2213_v9 = vld [vmem:[%s16147_s24 + $0x3a00] sm:$0xff] }
 0x3cd   : > { %14952 = vmatpush3.bf16.msra.mxu1 %v14951_v10  ;;  %14922 = vmatprep.subr.bf16.mxu0 %v14921_v11  ;;  %v2214_v10 = vld [vmem:[%s16147_s24 + $0x3a08] sm:$0xff]  ;;  %v2245_v11 = vld [vmem:[%s16147_s24 + $0x3b00] sm:$0xff] }
 0x3ce   : > { %14954 = vmatprep.subr.bf16.mxu1 %v14953_v4  ;;  %v2232_v4 = vld [vmem:[%s16147_s24 + $0x3a98] sm:$0xff]  ;;  %v14971_v27 = vpack.c.bf16 %v2214_v10, %v2213_v9  ;;  %v15019_v9 = vpack.c.bf16 %v2254_v3, %v2253_v2  ;;  %v14989_v10 = vpack.c.bf16 %v2240_v61, %v2239_v60  ;;  %v2295_v2 = vld [vmem:[%s16147_s24 + $0x3c90] sm:$0xff] }
 0x3cf   : > { %v2327_v60 = vld [vmem:[%s16147_s24 + $0x3d90] sm:$0xff]  ;;  %v2328_v61 = vld [vmem:[%s16147_s24 + $0x3d98] sm:$0xff] }
 0x3d0   : > { %14924 = vmatpush3.bf16.msra.mxu0 %v14923_v21  ;;  %v15003_v21 = vpack.c.bf16 %v2246_v17, %v2245_v11  ;;  %v2223_v11 = vld [vmem:[%s16147_s24 + $0x3a50] sm:$0xff] }
 0x3d1   : > { %14956 = vmatpush3.bf16.msra.mxu1 %v14955_v24  ;;  %14926 = vmatprep.subr.bf16.mxu0 %v14925_v25  ;;  %v14973_v24 = vpack.c.bf16 %v2232_v4, %v2231_v12  ;;  %v2215_v25 = vld [vmem:[%s16147_s24 + $0x3a10] sm:$0xff]  ;;  %v2256_v4 = vld [vmem:[%s16147_s24 + $0x3b58] sm:$0xff] }
 0x3d2   : > { %v11631_v32 = vpop.f32.mrb[42].mxu0  ;;  %14958 = vmatprep.subr.bf16.mxu1 %v14957_v30  ;;  %v2248_v30 = vld [vmem:[%s16147_s24 + $0x3b18] sm:$0xff]  ;;  %v2255_v17 = vld [vmem:[%s16147_s24 + $0x3b50] sm:$0xff] }
 0x3d3   : > { %v11632_v50 = vpop.f32.mrb[43].mxu0  ;;  %v11666_v51 = vpop.f32.mrb[42].mxu1 }
 0x3d4   : > { %v11633_v56 = vadd.f32 %v11632_v50, %v11631_v32  ;;  %14928 = vmatpush3.bf16.msra.mxu0 %v14927_v38  ;;  %v11667_v44 = vpop.f32.mrb[43].mxu1  ;;  %v3596_v38 = vcombine.high %v18465_v23, %v18465_v23  ;;  %v15009_v32 = vpack.c.bf16 %v2266_v36, %v2265_v40  ;;  %v2243_v40 = vld [vmem:[%s16147_s24 + $0x3af0] sm:$0xff]  ;;  %v2244_v36 = vld [vmem:[%s16147_s24 + $0x3af8] sm:$0xff] }
 0x3d5   : > { %v11668_v47 = vadd.f32 %v11667_v44, %v11666_v51  ;;  %14960 = vmatpush3.bf16.msra.mxu1 %v14959_v43  ;;  %14930 = vmatprep.subr.bf16.mxu0 %v14929_v26  ;;  %v14975_v43 = vpack.c.bf16 %v2216_v22, %v2215_v25  ;;  %v15007_v26 = vpack.c.bf16 %v2248_v30, %v2247_v28  ;;  %v2251_v44 = vld [vmem:[%s16147_s24 + $0x3b30] sm:$0xff]  ;;  %v2225_v28 = vld [vmem:[%s16147_s24 + $0x3a60] sm:$0xff] }
 0x3d6   : > { %v6976_v63 = vadd.f32 %v11633_v56, %v18371_v8  ;;  %14962 = vmatprep.subr.bf16.mxu1 %v14961_v33  ;;  %v14935_v8 = vpack.c.bf16 %v2164_v46, %v2163_v52  ;;  %v2250_v33 = vld [vmem:[%s16147_s24 + $0x3b28] sm:$0xff]  ;;  %v2220_v56 = vld [vmem:[%s16147_s24 + $0x3a38] sm:$0xff]  ;;  %v15015_v62 = vpack.c.bf16 %v2252_v45, %v2251_v44  ;;  %v15023_v25 = vpack.c.bf16 %v2256_v4, %v2255_v17  ;;  %v2257_v30 = vld [vmem:[%s16147_s24 + $0x3b60] sm:$0xff] }
 0x3d7   : > { %v15011_v51 = vpack.c.bf16 %v2250_v33, %v2249_v42  ;;  %v2270_v52 = vld [vmem:[%s16147_s24 + $0x3bc8] sm:$0xff]  ;;  %v14983_v46 = vpack.c.bf16 %v2220_v56, %v2219_v34  ;;  %v14993_v22 = vpack.c.bf16 %v2242_v6, %v2241_v5  ;;  %v14997_v54 = vpack.c.bf16 %v2244_v36, %v2243_v40  ;;  %v2260_v34 = vld [vmem:[%s16147_s24 + $0x3b78] sm:$0xff]  ;;  %v2293_v56 = vld [vmem:[%s16147_s24 + $0x3c80] sm:$0xff] }
 0x3d8   : > { %v18451_v58 = vadd.f32 %v11668_v47, %v6976_v63  ;;  %14932 = vmatpush3.bf16.msra.mxu0 %v14931_v57  ;;  %v2237_v47 = vld [vmem:[%s16147_s24 + $0x3ac0] sm:$0xff]  ;;  %v2294_v44 = vld [vmem:[%s16147_s24 + $0x3c88] sm:$0xff]  ;;  %v15069_v17 = vpack.c.bf16 %v2328_v61, %v2327_v60  ;;  %v2300_v40 = vld [vmem:[%s16147_s24 + $0x3cb8] sm:$0xff] }
 0x3d9   : > { %14964 = vmatpush3.bf16.msra.mxu1 %v14963_v48  ;;  %14934 = vmatprep.subr.bf16.mxu0 %v14933_v0  ;;  %v2238_v48 = vld [vmem:[%s16147_s24 + $0x3ac8] sm:$0xff]  ;;  %v2269_v0 = vld [vmem:[%s16147_s24 + $0x3bc0] sm:$0xff]  ;;  %v2332_v36 = vld [vmem:[%s16147_s24 + $0x3db8] sm:$0xff] }
 0x3da   : > { %14966 = vmatprep.subr.bf16.mxu1 %v14965_v55  ;;  %v14985_v63 = vpack.c.bf16 %v2238_v48, %v2237_v47  ;;  %v2221_v55 = vld [vmem:[%s16147_s24 + $0x3a40] sm:$0xff]  ;;  %v15017_v59 = vpack.c.bf16 %v2270_v52, %v2269_v0  ;;  %v2326_v45 = vld [vmem:[%s16147_s24 + $0x3d88] sm:$0xff]  ;;  %v15033_v52 = vpack.c.bf16 %v2294_v44, %v2293_v56 }
 0x3db   : > { %v2297_v4 = vld [vmem:[%s16147_s24 + $0x3ca0] sm:$0xff]  ;;  %v2298_v5 = vld [vmem:[%s16147_s24 + $0x3ca8] sm:$0xff] }
 0x3dc   : > { %14936 = vmatpush3.bf16.msra.mxu0 %v14935_v8  ;;  %v2271_v8 = vld [vmem:[%s16147_s24 + $0x3bd0] sm:$0xff]  ;;  %v2317_v56 = vld [vmem:[%s16147_s24 + $0x3d40] sm:$0xff]  ;;  %v2306_v61 = vld [vmem:[%s16147_s24 + $0x3ce8] sm:$0xff] }
 0x3dd   : > { %14968 = vmatpush3.bf16.msra.mxu1 %v14967_v13  ;;  %14970 = vmatprep.subr.bf16.mxu0 %v14969_v7  ;;  %v2272_v13 = vld [vmem:[%s16147_s24 + $0x3bd8] sm:$0xff]  ;;  %v14987_v7 = vpack.c.bf16 %v2222_v1, %v2221_v55  ;;  %v2310_v1 = vld [vmem:[%s16147_s24 + $0x3d08] sm:$0xff]  ;;  %v2305_v60 = vld [vmem:[%s16147_s24 + $0x3ce0] sm:$0xff] }
 0x3de   : > { %15002 = vmatprep.subr.bf16.mxu1 %v15001_v15  ;;  %v2224_v15 = vld [vmem:[%s16147_s24 + $0x3a58] sm:$0xff]  ;;  %v15021_v12 = vpack.c.bf16 %v2272_v13, %v2271_v8 }
 0x3df   : > { %7954 = vmatmul.mubr.f32.vlgmr.msra.gmra.mrb[56].mxu0 %v18380_v31  ;;  %v2218_v31 = vld [vmem:[%s16147_s24 + $0x3a28] sm:$0xff] }
 0x3e0   : > { %14972 = vmatpush3.bf16.msra.mxu0 %v14971_v27  ;;  %8024 = vmatmul.mubr.f32.vlgmr.msra.gmra.mrb[56].mxu1 %v18385_v37  ;;  %v2267_v37 = vld [vmem:[%s16147_s24 + $0x3bb0] sm:$0xff]  ;;  %v14979_v50 = vpack.c.bf16 %v2218_v31, %v2217_v41  ;;  %v2273_v27 = vld [vmem:[%s16147_s24 + $0x3be0] sm:$0xff] }
 0x3e1   : > { %15004 = vmatpush3.bf16.msra.mxu1 %v15003_v21  ;;  %14974 = vmatprep.subr.bf16.mxu0 %v14973_v24  ;;  %v15013_v57 = vpack.c.bf16 %v2268_v49, %v2267_v37  ;;  %v2274_v21 = vld [vmem:[%s16147_s24 + $0x3be8] sm:$0xff]  ;;  %v14991_v24 = vpack.c.bf16 %v2224_v15, %v2223_v11  ;;  %v2227_v37 = vld [vmem:[%s16147_s24 + $0x3a70] sm:$0xff]  ;;  %v2228_v49 = vld [vmem:[%s16147_s24 + $0x3a78] sm:$0xff] }
 0x3e2   : > { %15006 = vmatprep.subr.bf16.mxu1 %v15005_v29  ;;  %8093 = vmatprep.mubr.f32.mxu0 %v3595_v20  ;;  %v2226_v29 = vld [vmem:[%s16147_s24 + $0x3a68] sm:$0xff]  ;;  %v15025_v16 = vpack.c.bf16 %v2274_v21, %v2273_v27  ;;  %v2280_v11 = vld [vmem:[%s16147_s24 + $0x3c18] sm:$0xff]  ;;  %v2311_v15 = vld [vmem:[%s16147_s24 + $0x3d10] sm:$0xff] }
 0x3e3   : > { %8163 = vmatprep.mubr.f32.mxu1 %v3596_v38  ;;  %v2258_v20 = vld [vmem:[%s16147_s24 + $0x3b68] sm:$0xff]  ;;  %v14995_v42 = vpack.c.bf16 %v2226_v29, %v2225_v28  ;;  %v2329_v27 = vld [vmem:[%s16147_s24 + $0x3da0] sm:$0xff]  ;;  %v15041_v28 = vpack.c.bf16 %v2298_v5, %v2297_v4 }
 0x3e4   : > { %14976 = vmatpush3.bf16.msra.mxu0 %v14975_v43  ;;  %v15027_v35 = vpack.c.bf16 %v2258_v20, %v2257_v30  ;;  %v2330_v21 = vld [vmem:[%s16147_s24 + $0x3da8] sm:$0xff]  ;;  %v2281_v29 = vld [vmem:[%s16147_s24 + $0x3c20] sm:$0xff]  ;;  %v2299_v20 = vld [vmem:[%s16147_s24 + $0x3cb0] sm:$0xff] }
 0x3e5   : > { %15008 = vmatpush3.bf16.msra.mxu1 %v15007_v26  ;;  %14978 = vmatprep.subr.bf16.mxu0 %v14977_v53  ;;  %v2275_v26 = vld [vmem:[%s16147_s24 + $0x3bf0] sm:$0xff]  ;;  %v2276_v53 = vld [vmem:[%s16147_s24 + $0x3bf8] sm:$0xff]  ;;  %v2313_v30 = vld [vmem:[%s16147_s24 + $0x3d20] sm:$0xff] }
 0x3e6   : > { %15010 = vmatprep.subr.bf16.mxu1 %v15009_v32  ;;  %v345_v32 = vld [vmem:[%s16157_s19 + $0xf0] sm:$0xff] }
 0x3e7   : > { %v3597_v47 = vcombine.high %v345_v32, %v345_v32  ;;  %v18540_v3 = vrot.slane %v345_v32, %v16210_v14  ;;  %v2316_v32 = vld [vmem:[%s16147_s24 + $0x3d38] sm:$0xff] }
 0x3e8   : > { %14980 = vmatpush3.bf16.msra.mxu0 %v14979_v50  ;;  %v2259_v50 = vld [vmem:[%s16147_s24 + $0x3b70] sm:$0xff] }
 0x3e9   : > { %15012 = vmatpush3.bf16.msra.mxu1 %v15011_v51  ;;  %14982 = vmatprep.subr.bf16.mxu0 %v14981_v39  ;;  %v15029_v39 = vpack.c.bf16 %v2276_v53, %v2275_v26  ;;  %v15031_v0 = vpack.c.bf16 %v2260_v34, %v2259_v50  ;;  %v18545_v8 = vrot.slane %v3597_v47, %v16210_v14  ;;  %v2283_v53 = vld [vmem:[%s16147_s24 + $0x3c30] sm:$0xff]  ;;  %v2286_v34 = vld [vmem:[%s16147_s24 + $0x3c48] sm:$0xff]  ;;  %v2304_v47 = vld [vmem:[%s16147_s24 + $0x3cd8] sm:$0xff] }
 0x3ea   : > { %15014 = vmatprep.subr.bf16.mxu1 %v15013_v57  ;;  %v2325_v57 = vld [vmem:[%s16147_s24 + $0x3d80] sm:$0xff]  ;;  %v3612_v6 = vcombine.high %v18540_v3, %v18540_v3  ;;  %v15045_v26 = vpack.c.bf16 %v2300_v40, %v2299_v20 }
 0x3eb   : > { %v15065_v55 = vpack.c.bf16 %v2326_v45, %v2325_v57  ;;  %v2318_v57 = vld [vmem:[%s16147_s24 + $0x3d48] sm:$0xff]  ;;  %v2303_v45 = vld [vmem:[%s16147_s24 + $0x3cd0] sm:$0xff] }
 0x3ec   : > { %14984 = vmatpush3.bf16.msra.mxu0 %v14983_v46  ;;  %v2277_v46 = vld [vmem:[%s16147_s24 + $0x3c00] sm:$0xff] }
 0x3ed   : > { %15016 = vmatpush3.bf16.msra.mxu1 %v15015_v62  ;;  %14986 = vmatprep.subr.bf16.mxu0 %v14985_v63  ;;  %v2278_v62 = vld [vmem:[%s16147_s24 + $0x3c08] sm:$0xff]  ;;  %v2309_v63 = vld [vmem:[%s16147_s24 + $0x3d00] sm:$0xff] }
 0x3ee   : > { %15018 = vmatprep.subr.bf16.mxu1 %v15017_v59  ;;  %v2296_v59 = vld [vmem:[%s16147_s24 + $0x3c98] sm:$0xff]  ;;  %v15035_v13 = vpack.c.bf16 %v2278_v62, %v2277_v46  ;;  %v15083_v46 = vpack.c.bf16 %v2318_v57, %v2317_v56  ;;  %v15053_v62 = vpack.c.bf16 %v2304_v47, %v2303_v45  ;;  %v2359_v56 = vld [vmem:[%s16147_s24 + $0x3e90] sm:$0xff] }
 0x3ef   : > { %v2391_v45 = vld [vmem:[%s16147_s24 + $0x3f90] sm:$0xff]  ;;  %v2392_v47 = vld [vmem:[%s16147_s24 + $0x3f98] sm:$0xff] }
 0x3f0   : > { %14988 = vmatpush3.bf16.msra.mxu0 %v14987_v7  ;;  %v15067_v7 = vpack.c.bf16 %v2310_v1, %v2309_v63  ;;  %v2287_v63 = vld [vmem:[%s16147_s24 + $0x3c50] sm:$0xff] }
 0x3f1   : > { %15020 = vmatpush3.bf16.msra.mxu1 %v15019_v9  ;;  %14990 = vmatprep.subr.bf16.mxu0 %v14989_v10  ;;  %v15037_v9 = vpack.c.bf16 %v2296_v59, %v2295_v2  ;;  %v2279_v10 = vld [vmem:[%s16147_s24 + $0x3c10] sm:$0xff]  ;;  %v2320_v59 = vld [vmem:[%s16147_s24 + $0x3d58] sm:$0xff] }
 0x3f2   : > { %v11701_v19 = vpop.f32.mrb[44].mxu0  ;;  %15022 = vmatprep.subr.bf16.mxu1 %v15021_v12  ;;  %v2312_v12 = vld [vmem:[%s16147_s24 + $0x3d18] sm:$0xff]  ;;  %v2319_v1 = vld [vmem:[%s16147_s24 + $0x3d50] sm:$0xff] }
 0x3f3   : > { %v11702_v38 = vpop.f32.mrb[45].mxu0  ;;  %v11736_v43 = vpop.f32.mrb[44].mxu1 }
 0x3f4   : > { %v11703_v41 = vadd.f32 %v11702_v38, %v11701_v19  ;;  %14992 = vmatpush3.bf16.msra.mxu0 %v14991_v24  ;;  %v11737_v31 = vpop.f32.mrb[45].mxu1  ;;  %v3613_v24 = vcombine.high %v18545_v8, %v18545_v8  ;;  %v15073_v19 = vpack.c.bf16 %v2330_v21, %v2329_v27  ;;  %v2307_v27 = vld [vmem:[%s16147_s24 + $0x3cf0] sm:$0xff]  ;;  %v2308_v21 = vld [vmem:[%s16147_s24 + $0x3cf8] sm:$0xff] }
 0x3f5   : > { %v11738_v33 = vadd.f32 %v11737_v31, %v11736_v43  ;;  %15024 = vmatpush3.bf16.msra.mxu1 %v15023_v25  ;;  %14994 = vmatprep.subr.bf16.mxu0 %v14993_v22  ;;  %v15039_v25 = vpack.c.bf16 %v2280_v11, %v2279_v10  ;;  %v15071_v22 = vpack.c.bf16 %v2312_v12, %v2311_v15  ;;  %v2315_v31 = vld [vmem:[%s16147_s24 + $0x3d30] sm:$0xff]  ;;  %v2289_v15 = vld [vmem:[%s16147_s24 + $0x3c60] sm:$0xff] }
 0x3f6   : > { %v7116_v51 = vadd.f32 %v11703_v41, %v18451_v58  ;;  %15026 = vmatprep.subr.bf16.mxu1 %v15025_v16  ;;  %v14999_v58 = vpack.c.bf16 %v2228_v49, %v2227_v37  ;;  %v2314_v16 = vld [vmem:[%s16147_s24 + $0x3d28] sm:$0xff]  ;;  %v2284_v41 = vld [vmem:[%s16147_s24 + $0x3c38] sm:$0xff]  ;;  %v15079_v50 = vpack.c.bf16 %v2316_v32, %v2315_v31  ;;  %v15087_v10 = vpack.c.bf16 %v2320_v59, %v2319_v1  ;;  %v2321_v12 = vld [vmem:[%s16147_s24 + $0x3d60] sm:$0xff] }
 0x3f7   : > { %v15075_v43 = vpack.c.bf16 %v2314_v16, %v2313_v30  ;;  %v2334_v37 = vld [vmem:[%s16147_s24 + $0x3dc8] sm:$0xff]  ;;  %v15047_v49 = vpack.c.bf16 %v2284_v41, %v2283_v53  ;;  %v15057_v11 = vpack.c.bf16 %v2306_v61, %v2305_v60  ;;  %v15061_v40 = vpack.c.bf16 %v2308_v21, %v2307_v27  ;;  %v2324_v53 = vld [vmem:[%s16147_s24 + $0x3d78] sm:$0xff]  ;;  %v2357_v41 = vld [vmem:[%s16147_s24 + $0x3e80] sm:$0xff] }
 0x3f8   : > { %v18531_v48 = vadd.f32 %v11738_v33, %v7116_v51  ;;  %14996 = vmatpush3.bf16.msra.mxu0 %v14995_v42  ;;  %v2301_v33 = vld [vmem:[%s16147_s24 + $0x3cc0] sm:$0xff]  ;;  %v2358_v31 = vld [vmem:[%s16147_s24 + $0x3e88] sm:$0xff]  ;;  %v15133_v1 = vpack.c.bf16 %v2392_v47, %v2391_v45  ;;  %v2364_v27 = vld [vmem:[%s16147_s24 + $0x3eb8] sm:$0xff] }
 0x3f9   : > { %15028 = vmatpush3.bf16.msra.mxu1 %v15027_v35  ;;  %14998 = vmatprep.subr.bf16.mxu0 %v14997_v54  ;;  %v2302_v35 = vld [vmem:[%s16147_s24 + $0x3cc8] sm:$0xff]  ;;  %v2333_v54 = vld [vmem:[%s16147_s24 + $0x3dc0] sm:$0xff]  ;;  %v2396_v21 = vld [vmem:[%s16147_s24 + $0x3fb8] sm:$0xff] }
 0x3fa   : > { %15030 = vmatprep.subr.bf16.mxu1 %v15029_v39  ;;  %v15049_v51 = vpack.c.bf16 %v2302_v35, %v2301_v33  ;;  %v2285_v39 = vld [vmem:[%s16147_s24 + $0x3c40] sm:$0xff]  ;;  %v15081_v44 = vpack.c.bf16 %v2334_v37, %v2333_v54  ;;  %v2390_v32 = vld [vmem:[%s16147_s24 + $0x3f88] sm:$0xff]  ;;  %v15097_v37 = vpack.c.bf16 %v2358_v31, %v2357_v41 }
 0x3fb   : > { %v2361_v59 = vld [vmem:[%s16147_s24 + $0x3ea0] sm:$0xff]  ;;  %v2362_v60 = vld [vmem:[%s16147_s24 + $0x3ea8] sm:$0xff] }
 0x3fc   : > { %15000 = vmatpush3.bf16.msra.mxu0 %v14999_v58  ;;  %v2335_v58 = vld [vmem:[%s16147_s24 + $0x3dd0] sm:$0xff]  ;;  %v2381_v41 = vld [vmem:[%s16147_s24 + $0x3f40] sm:$0xff]  ;;  %v2370_v47 = vld [vmem:[%s16147_s24 + $0x3ee8] sm:$0xff] }
 0x3fd   : > { %15032 = vmatpush3.bf16.msra.mxu1 %v15031_v0  ;;  %15034 = vmatprep.subr.bf16.mxu0 %v15033_v52  ;;  %v2336_v0 = vld [vmem:[%s16147_s24 + $0x3dd8] sm:$0xff]  ;;  %v15051_v52 = vpack.c.bf16 %v2286_v34, %v2285_v39  ;;  %v2374_v34 = vld [vmem:[%s16147_s24 + $0x3f08] sm:$0xff]  ;;  %v2369_v45 = vld [vmem:[%s16147_s24 + $0x3ee0] sm:$0xff] }
 0x3fe   : > { %15066 = vmatprep.subr.bf16.mxu1 %v15065_v55  ;;  %v2288_v55 = vld [vmem:[%s16147_s24 + $0x3c58] sm:$0xff]  ;;  %v15085_v2 = vpack.c.bf16 %v2336_v0, %v2335_v58 }
 0x3ff   : > { %8094 = vmatmul.mubr.f32.vlgmr.msra.gmra.mrb[58].mxu0 %v18460_v18  ;;  %v2282_v18 = vld [vmem:[%s16147_s24 + $0x3c28] sm:$0xff] }
 0x400   : > { %15036 = vmatpush3.bf16.msra.mxu0 %v15035_v13  ;;  %8164 = vmatmul.mubr.f32.vlgmr.msra.gmra.mrb[58].mxu1 %v18465_v23  ;;  %v2331_v23 = vld [vmem:[%s16147_s24 + $0x3db0] sm:$0xff]  ;;  %v15043_v38 = vpack.c.bf16 %v2282_v18, %v2281_v29  ;;  %v2337_v13 = vld [vmem:[%s16147_s24 + $0x3de0] sm:$0xff] }
 0x401   : > { %15068 = vmatpush3.bf16.msra.mxu1 %v15067_v7  ;;  %15038 = vmatprep.subr.bf16.mxu0 %v15037_v9  ;;  %v15077_v42 = vpack.c.bf16 %v2332_v36, %v2331_v23  ;;  %v2338_v7 = vld [vmem:[%s16147_s24 + $0x3de8] sm:$0xff]  ;;  %v15055_v9 = vpack.c.bf16 %v2288_v55, %v2287_v63  ;;  %v2291_v23 = vld [vmem:[%s16147_s24 + $0x3c70] sm:$0xff]  ;;  %v2292_v36 = vld [vmem:[%s16147_s24 + $0x3c78] sm:$0xff] }
 0x402   : > { %15070 = vmatprep.subr.bf16.mxu1 %v15069_v17  ;;  %8233 = vmatprep.mubr.f32.mxu0 %v3612_v6  ;;  %v2290_v17 = vld [vmem:[%s16147_s24 + $0x3c68] sm:$0xff]  ;;  %v15089_v5 = vpack.c.bf16 %v2338_v7, %v2337_v13  ;;  %v2344_v63 = vld [vmem:[%s16147_s24 + $0x3e18] sm:$0xff]  ;;  %v2375_v55 = vld [vmem:[%s16147_s24 + $0x3f10] sm:$0xff] }
 0x403   : > { %8303 = vmatprep.mubr.f32.mxu1 %v3613_v24  ;;  %v2322_v6 = vld [vmem:[%s16147_s24 + $0x3d68] sm:$0xff]  ;;  %v15059_v30 = vpack.c.bf16 %v2290_v17, %v2289_v15  ;;  %v2393_v13 = vld [vmem:[%s16147_s24 + $0x3fa0] sm:$0xff]  ;;  %v15105_v15 = vpack.c.bf16 %v2362_v60, %v2361_v59 }
 0x404   : > { %15040 = vmatpush3.bf16.msra.mxu0 %v15039_v25  ;;  %v15091_v20 = vpack.c.bf16 %v2322_v6, %v2321_v12  ;;  %v2394_v7 = vld [vmem:[%s16147_s24 + $0x3fa8] sm:$0xff]  ;;  %v2345_v17 = vld [vmem:[%s16147_s24 + $0x3e20] sm:$0xff]  ;;  %v2363_v6 = vld [vmem:[%s16147_s24 + $0x3eb0] sm:$0xff] }
 0x405   : > { %15072 = vmatpush3.bf16.msra.mxu1 %v15071_v22  ;;  %15042 = vmatprep.subr.bf16.mxu0 %v15041_v28  ;;  %v2339_v22 = vld [vmem:[%s16147_s24 + $0x3df0] sm:$0xff]  ;;  %v2340_v28 = vld [vmem:[%s16147_s24 + $0x3df8] sm:$0xff]  ;;  %v2377_v12 = vld [vmem:[%s16147_s24 + $0x3f20] sm:$0xff] }
 0x406   : > { %15074 = vmatprep.subr.bf16.mxu1 %v15073_v19  ;;  %v346_v19 = vld [vmem:[%s16157_s19 + $0xf8] sm:$0xff] }
 0x407   : > { %v3614_v33 = vcombine.high %v346_v19, %v346_v19  ;;  %v18620_v57 = vrot.slane %v346_v19, %v16210_v14  ;;  %v2380_v19 = vld [vmem:[%s16147_s24 + $0x3f38] sm:$0xff] }
 0x408   : > { %15044 = vmatpush3.bf16.msra.mxu0 %v15043_v38  ;;  %v2323_v38 = vld [vmem:[%s16147_s24 + $0x3d70] sm:$0xff] }
 0x409   : > { %15076 = vmatpush3.bf16.msra.mxu1 %v15075_v43  ;;  %15046 = vmatprep.subr.bf16.mxu0 %v15045_v26  ;;  %v15093_v26 = vpack.c.bf16 %v2340_v28, %v2339_v22  ;;  %v15095_v54 = vpack.c.bf16 %v2324_v53, %v2323_v38  ;;  %v18625_v58 = vrot.slane %v3614_v33, %v16210_v14  ;;  %v2347_v28 = vld [vmem:[%s16147_s24 + $0x3e30] sm:$0xff]  ;;  %v2350_v53 = vld [vmem:[%s16147_s24 + $0x3e48] sm:$0xff]  ;;  %v2368_v33 = vld [vmem:[%s16147_s24 + $0x3ed8] sm:$0xff] }
 0x40a   : > { %15078 = vmatprep.subr.bf16.mxu1 %v15077_v42  ;;  %v2389_v42 = vld [vmem:[%s16147_s24 + $0x3f80] sm:$0xff]  ;;  %v3629_v61 = vcombine.high %v18620_v57, %v18620_v57  ;;  %v15109_v22 = vpack.c.bf16 %v2364_v27, %v2363_v6 }
 0x40b   : > { %v15129_v39 = vpack.c.bf16 %v2390_v32, %v2389_v42  ;;  %v2382_v42 = vld [vmem:[%s16147_s24 + $0x3f48] sm:$0xff]  ;;  %v2367_v32 = vld [vmem:[%s16147_s24 + $0x3ed0] sm:$0xff] }
 0x40c   : > { %15048 = vmatpush3.bf16.msra.mxu0 %v15047_v49  ;;  %v2341_v49 = vld [vmem:[%s16147_s24 + $0x3e00] sm:$0xff] }
 0x40d   : > { %15080 = vmatpush3.bf16.msra.mxu1 %v15079_v50  ;;  %15050 = vmatprep.subr.bf16.mxu0 %v15049_v51  ;;  %v2342_v50 = vld [vmem:[%s16147_s24 + $0x3e08] sm:$0xff]  ;;  %v2373_v51 = vld [vmem:[%s16147_s24 + $0x3f00] sm:$0xff] }
 0x40e   : > { %15082 = vmatprep.subr.bf16.mxu1 %v15081_v44  ;;  %v2360_v44 = vld [vmem:[%s16147_s24 + $0x3e98] sm:$0xff]  ;;  %v15099_v0 = vpack.c.bf16 %v2342_v50, %v2341_v49  ;;  %v15147_v49 = vpack.c.bf16 %v2382_v42, %v2381_v41  ;;  %v15117_v50 = vpack.c.bf16 %v2368_v33, %v2367_v32  ;;  %v2423_v41 = vld [vmem:[%s16147_s24 + $0x4090] sm:$0xff] }
 0x40f   : > { %v2455_v32 = vld [vmem:[%s16147_s24 + $0x4190] sm:$0xff]  ;;  %v2456_v33 = vld [vmem:[%s16147_s24 + $0x4198] sm:$0xff] }
 0x410   : > { %15052 = vmatpush3.bf16.msra.mxu0 %v15051_v52  ;;  %v15131_v52 = vpack.c.bf16 %v2374_v34, %v2373_v51  ;;  %v2351_v51 = vld [vmem:[%s16147_s24 + $0x3e50] sm:$0xff] }
 0x411   : > { %15084 = vmatpush3.bf16.msra.mxu1 %v15083_v46  ;;  %15054 = vmatprep.subr.bf16.mxu0 %v15053_v62  ;;  %v15101_v46 = vpack.c.bf16 %v2360_v44, %v2359_v56  ;;  %v2343_v62 = vld [vmem:[%s16147_s24 + $0x3e10] sm:$0xff]  ;;  %v2384_v44 = vld [vmem:[%s16147_s24 + $0x3f58] sm:$0xff] }
 0x412   : > { %v11771_v4 = vpop.f32.mrb[46].mxu0  ;;  %15086 = vmatprep.subr.bf16.mxu1 %v15085_v2  ;;  %v2376_v2 = vld [vmem:[%s16147_s24 + $0x3f18] sm:$0xff]  ;;  %v2383_v34 = vld [vmem:[%s16147_s24 + $0x3f50] sm:$0xff] }
 0x413   : > { %v11772_v24 = vpop.f32.mrb[47].mxu0  ;;  %v11806_v25 = vpop.f32.mrb[46].mxu1 }
 0x414   : > { %v11773_v29 = vadd.f32 %v11772_v24, %v11771_v4  ;;  %15056 = vmatpush3.bf16.msra.mxu0 %v15055_v9  ;;  %v11807_v18 = vpop.f32.mrb[47].mxu1  ;;  %v3630_v9 = vcombine.high %v18625_v58, %v18625_v58  ;;  %v15137_v4 = vpack.c.bf16 %v2394_v7, %v2393_v13  ;;  %v2371_v13 = vld [vmem:[%s16147_s24 + $0x3ef0] sm:$0xff]  ;;  %v2372_v7 = vld [vmem:[%s16147_s24 + $0x3ef8] sm:$0xff] }
 0x415   : > { %v11808_v16 = vadd.f32 %v11807_v18, %v11806_v25  ;;  %15088 = vmatpush3.bf16.msra.mxu1 %v15087_v10  ;;  %15058 = vmatprep.subr.bf16.mxu0 %v15057_v11  ;;  %v15103_v10 = vpack.c.bf16 %v2344_v63, %v2343_v62  ;;  %v15135_v11 = vpack.c.bf16 %v2376_v2, %v2375_v55  ;;  %v2379_v18 = vld [vmem:[%s16147_s24 + $0x3f30] sm:$0xff]  ;;  %v2353_v55 = vld [vmem:[%s16147_s24 + $0x3e60] sm:$0xff] }
 0x416   : > { %v7256_v43 = vadd.f32 %v11773_v29, %v18531_v48  ;;  %15090 = vmatprep.subr.bf16.mxu1 %v15089_v5  ;;  %v15063_v48 = vpack.c.bf16 %v2292_v36, %v2291_v23  ;;  %v2378_v5 = vld [vmem:[%s16147_s24 + $0x3f28] sm:$0xff]  ;;  %v2348_v29 = vld [vmem:[%s16147_s24 + $0x3e38] sm:$0xff]  ;;  %v15143_v38 = vpack.c.bf16 %v2380_v19, %v2379_v18  ;;  %v15151_v62 = vpack.c.bf16 %v2384_v44, %v2383_v34  ;;  %v2385_v2 = vld [vmem:[%s16147_s24 + $0x3f60] sm:$0xff] }
 0x417   : > { %v15139_v25 = vpack.c.bf16 %v2378_v5, %v2377_v12  ;;  %v2398_v23 = vld [vmem:[%s16147_s24 + $0x3fc8] sm:$0xff]  ;;  %v15111_v36 = vpack.c.bf16 %v2348_v29, %v2347_v28  ;;  %v15121_v63 = vpack.c.bf16 %v2370_v47, %v2369_v45  ;;  %v15125_v27 = vpack.c.bf16 %v2372_v7, %v2371_v13  ;;  %v2388_v28 = vld [vmem:[%s16147_s24 + $0x3f78] sm:$0xff]  ;;  %v2421_v29 = vld [vmem:[%s16147_s24 + $0x4080] sm:$0xff] }
 0x418   : > { %v18611_v35 = vadd.f32 %v11808_v16, %v7256_v43  ;;  %15060 = vmatpush3.bf16.msra.mxu0 %v15059_v30  ;;  %v2365_v16 = vld [vmem:[%s16147_s24 + $0x3ec0] sm:$0xff]  ;;  %v2422_v18 = vld [vmem:[%s16147_s24 + $0x4088] sm:$0xff]  ;;  %v15197_v34 = vpack.c.bf16 %v2456_v33, %v2455_v32  ;;  %v2428_v13 = vld [vmem:[%s16147_s24 + $0x40b8] sm:$0xff] }
 0x419   : > { %15092 = vmatpush3.bf16.msra.mxu1 %v15091_v20  ;;  %15062 = vmatprep.subr.bf16.mxu0 %v15061_v40  ;;  %v2366_v20 = vld [vmem:[%s16147_s24 + $0x3ec8] sm:$0xff]  ;;  %v2397_v40 = vld [vmem:[%s16147_s24 + $0x3fc0] sm:$0xff]  ;;  %v2460_v7 = vld [vmem:[%s16147_s24 + $0x41b8] sm:$0xff] }
 0x41a   : > { %15094 = vmatprep.subr.bf16.mxu1 %v15093_v26  ;;  %v15113_v43 = vpack.c.bf16 %v2366_v20, %v2365_v16  ;;  %v2349_v26 = vld [vmem:[%s16147_s24 + $0x3e40] sm:$0xff]  ;;  %v15145_v31 = vpack.c.bf16 %v2398_v23, %v2397_v40  ;;  %v2454_v19 = vld [vmem:[%s16147_s24 + $0x4188] sm:$0xff]  ;;  %v15161_v23 = vpack.c.bf16 %v2422_v18, %v2421_v29 }
 0x41b   : > { %v2425_v44 = vld [vmem:[%s16147_s24 + $0x40a0] sm:$0xff]  ;;  %v2426_v45 = vld [vmem:[%s16147_s24 + $0x40a8] sm:$0xff] }
 0x41c   : > { %15064 = vmatpush3.bf16.msra.mxu0 %v15063_v48  ;;  %v2399_v48 = vld [vmem:[%s16147_s24 + $0x3fd0] sm:$0xff]  ;;  %v2445_v29 = vld [vmem:[%s16147_s24 + $0x4140] sm:$0xff]  ;;  %v2434_v33 = vld [vmem:[%s16147_s24 + $0x40e8] sm:$0xff] }
 0x41d   : > { %15096 = vmatpush3.bf16.msra.mxu1 %v15095_v54  ;;  %15098 = vmatprep.subr.bf16.mxu0 %v15097_v37  ;;  %v2400_v54 = vld [vmem:[%s16147_s24 + $0x3fd8] sm:$0xff]  ;;  %v15115_v37 = vpack.c.bf16 %v2350_v53, %v2349_v26  ;;  %v2438_v53 = vld [vmem:[%s16147_s24 + $0x4108] sm:$0xff]  ;;  %v2433_v32 = vld [vmem:[%s16147_s24 + $0x40e0] sm:$0xff] }
 0x41e   : > { %15130 = vmatprep.subr.bf16.mxu1 %v15129_v39  ;;  %v2352_v39 = vld [vmem:[%s16147_s24 + $0x3e58] sm:$0xff]  ;;  %v15149_v56 = vpack.c.bf16 %v2400_v54, %v2399_v48 }
 0x41f   : > { %8234 = vmatmul.mubr.f32.vlgmr.msra.gmra.mrb[60].mxu0 %v18540_v3  ;;  %v2346_v3 = vld [vmem:[%s16147_s24 + $0x3e28] sm:$0xff] }
 0x420   : > { %15100 = vmatpush3.bf16.msra.mxu0 %v15099_v0  ;;  %8304 = vmatmul.mubr.f32.vlgmr.msra.gmra.mrb[60].mxu1 %v18545_v8  ;;  %v2395_v8 = vld [vmem:[%s16147_s24 + $0x3fb0] sm:$0xff]  ;;  %v15107_v24 = vpack.c.bf16 %v2346_v3, %v2345_v17  ;;  %v2401_v0 = vld [vmem:[%s16147_s24 + $0x3fe0] sm:$0xff] }
 0x421   : > { %15132 = vmatpush3.bf16.msra.mxu1 %v15131_v52  ;;  %15102 = vmatprep.subr.bf16.mxu0 %v15101_v46  ;;  %v15141_v30 = vpack.c.bf16 %v2396_v21, %v2395_v8  ;;  %v2402_v52 = vld [vmem:[%s16147_s24 + $0x3fe8] sm:$0xff]  ;;  %v15119_v46 = vpack.c.bf16 %v2352_v39, %v2351_v51  ;;  %v2355_v8 = vld [vmem:[%s16147_s24 + $0x3e70] sm:$0xff]  ;;  %v2356_v21 = vld [vmem:[%s16147_s24 + $0x3e78] sm:$0xff] }
 0x422   : > { %15134 = vmatprep.subr.bf16.mxu1 %v15133_v1  ;;  %8373 = vmatprep.mubr.f32.mxu0 %v3629_v61  ;;  %v2354_v1 = vld [vmem:[%s16147_s24 + $0x3e68] sm:$0xff]  ;;  %v15153_v60 = vpack.c.bf16 %v2402_v52, %v2401_v0  ;;  %v2408_v51 = vld [vmem:[%s16147_s24 + $0x4018] sm:$0xff]  ;;  %v2439_v39 = vld [vmem:[%s16147_s24 + $0x4110] sm:$0xff] }
 0x423   : > { %8443 = vmatprep.mubr.f32.mxu1 %v3630_v9  ;;  %v2386_v61 = vld [vmem:[%s16147_s24 + $0x3f68] sm:$0xff]  ;;  %v15123_v12 = vpack.c.bf16 %v2354_v1, %v2353_v55  ;;  %v2457_v0 = vld [vmem:[%s16147_s24 + $0x41a0] sm:$0xff]  ;;  %v15169_v55 = vpack.c.bf16 %v2426_v45, %v2425_v44 }
 0x424   : > { %15104 = vmatpush3.bf16.msra.mxu0 %v15103_v10  ;;  %v15155_v6 = vpack.c.bf16 %v2386_v61, %v2385_v2  ;;  %v2458_v52 = vld [vmem:[%s16147_s24 + $0x41a8] sm:$0xff]  ;;  %v2409_v1 = vld [vmem:[%s16147_s24 + $0x4020] sm:$0xff]  ;;  %v2427_v61 = vld [vmem:[%s16147_s24 + $0x40b0] sm:$0xff] }
 0x425   : > { %15136 = vmatpush3.bf16.msra.mxu1 %v15135_v11  ;;  %15106 = vmatprep.subr.bf16.mxu0 %v15105_v15  ;;  %v2403_v11 = vld [vmem:[%s16147_s24 + $0x3ff0] sm:$0xff]  ;;  %v2404_v15 = vld [vmem:[%s16147_s24 + $0x3ff8] sm:$0xff]  ;;  %v2441_v2 = vld [vmem:[%s16147_s24 + $0x4120] sm:$0xff] }
 0x426   : > { %15138 = vmatprep.subr.bf16.mxu1 %v15137_v4  ;;  %v347_v4 = vld [vmem:[%s16157_s19 + $0x100] sm:$0xff] }
 0x427   : > { %v3631_v16 = vcombine.high %v347_v4, %v347_v4  ;;  %v18700_v42 = vrot.slane %v347_v4, %v16210_v14  ;;  %v2444_v4 = vld [vmem:[%s16147_s24 + $0x4138] sm:$0xff] }
 0x428   : > { %15108 = vmatpush3.bf16.msra.mxu0 %v15107_v24  ;;  %v2387_v24 = vld [vmem:[%s16147_s24 + $0x3f70] sm:$0xff] }
 0x429   : > { %15140 = vmatpush3.bf16.msra.mxu1 %v15139_v25  ;;  %15110 = vmatprep.subr.bf16.mxu0 %v15109_v22  ;;  %v15157_v22 = vpack.c.bf16 %v2404_v15, %v2403_v11  ;;  %v15159_v40 = vpack.c.bf16 %v2388_v28, %v2387_v24  ;;  %v18705_v48 = vrot.slane %v3631_v16, %v16210_v14  ;;  %v2411_v15 = vld [vmem:[%s16147_s24 + $0x4030] sm:$0xff]  ;;  %v2414_v28 = vld [vmem:[%s16147_s24 + $0x4048] sm:$0xff]  ;;  %v2432_v16 = vld [vmem:[%s16147_s24 + $0x40d8] sm:$0xff] }
 0x42a   : > { %15142 = vmatprep.subr.bf16.mxu1 %v15141_v30  ;;  %v2453_v30 = vld [vmem:[%s16147_s24 + $0x4180] sm:$0xff]  ;;  %v3646_v47 = vcombine.high %v18700_v42, %v18700_v42  ;;  %v15173_v11 = vpack.c.bf16 %v2428_v13, %v2427_v61 }
 0x42b   : > { %v15193_v26 = vpack.c.bf16 %v2454_v19, %v2453_v30  ;;  %v2446_v30 = vld [vmem:[%s16147_s24 + $0x4148] sm:$0xff]  ;;  %v2431_v19 = vld [vmem:[%s16147_s24 + $0x40d0] sm:$0xff] }
 0x42c   : > { %15112 = vmatpush3.bf16.msra.mxu0 %v15111_v36  ;;  %v2405_v36 = vld [vmem:[%s16147_s24 + $0x4000] sm:$0xff] }
 0x42d   : > { %15144 = vmatpush3.bf16.msra.mxu1 %v15143_v38  ;;  %15114 = vmatprep.subr.bf16.mxu0 %v15113_v43  ;;  %v2406_v38 = vld [vmem:[%s16147_s24 + $0x4008] sm:$0xff]  ;;  %v2437_v43 = vld [vmem:[%s16147_s24 + $0x4100] sm:$0xff] }
 0x42e   : > { %15146 = vmatprep.subr.bf16.mxu1 %v15145_v31  ;;  %v2424_v31 = vld [vmem:[%s16147_s24 + $0x4098] sm:$0xff]  ;;  %v15163_v54 = vpack.c.bf16 %v2406_v38, %v2405_v36  ;;  %v15211_v36 = vpack.c.bf16 %v2446_v30, %v2445_v29  ;;  %v15181_v38 = vpack.c.bf16 %v2432_v16, %v2431_v19  ;;  %v2487_v29 = vld [vmem:[%s16147_s24 + $0x4290] sm:$0xff] }
 0x42f   : > { %v2519_v19 = vld [vmem:[%s16147_s24 + $0x4390] sm:$0xff]  ;;  %v2520_v16 = vld [vmem:[%s16147_s24 + $0x4398] sm:$0xff] }
 0x430   : > { %15116 = vmatpush3.bf16.msra.mxu0 %v15115_v37  ;;  %v15195_v37 = vpack.c.bf16 %v2438_v53, %v2437_v43  ;;  %v2415_v43 = vld [vmem:[%s16147_s24 + $0x4050] sm:$0xff] }
 0x431   : > { %15148 = vmatpush3.bf16.msra.mxu1 %v15147_v49  ;;  %15118 = vmatprep.subr.bf16.mxu0 %v15117_v50  ;;  %v15165_v49 = vpack.c.bf16 %v2424_v31, %v2423_v41  ;;  %v2407_v50 = vld [vmem:[%s16147_s24 + $0x4010] sm:$0xff]  ;;  %v2448_v31 = vld [vmem:[%s16147_s24 + $0x4158] sm:$0xff] }
 0x432   : > { %v11841_v59 = vpop.f32.mrb[48].mxu0  ;;  %15150 = vmatprep.subr.bf16.mxu1 %v15149_v56  ;;  %v2440_v56 = vld [vmem:[%s16147_s24 + $0x4118] sm:$0xff]  ;;  %v2447_v53 = vld [vmem:[%s16147_s24 + $0x4150] sm:$0xff] }
 0x433   : > { %v11842_v9 = vpop.f32.mrb[49].mxu0  ;;  %v11876_v10 = vpop.f32.mrb[48].mxu1 }
 0x434   : > { %v11843_v17 = vadd.f32 %v11842_v9, %v11841_v59  ;;  %15120 = vmatpush3.bf16.msra.mxu0 %v15119_v46  ;;  %v11877_v3 = vpop.f32.mrb[49].mxu1  ;;  %v3647_v46 = vcombine.high %v18705_v48, %v18705_v48  ;;  %v15201_v59 = vpack.c.bf16 %v2458_v52, %v2457_v0  ;;  %v2435_v0 = vld [vmem:[%s16147_s24 + $0x40f0] sm:$0xff]  ;;  %v2436_v52 = vld [vmem:[%s16147_s24 + $0x40f8] sm:$0xff] }
 0x435   : > { %v11878_v5 = vadd.f32 %v11877_v3, %v11876_v10  ;;  %15152 = vmatpush3.bf16.msra.mxu1 %v15151_v62  ;;  %15122 = vmatprep.subr.bf16.mxu0 %v15121_v63  ;;  %v15167_v62 = vpack.c.bf16 %v2408_v51, %v2407_v50  ;;  %v15199_v63 = vpack.c.bf16 %v2440_v56, %v2439_v39  ;;  %v2443_v3 = vld [vmem:[%s16147_s24 + $0x4130] sm:$0xff]  ;;  %v2417_v39 = vld [vmem:[%s16147_s24 + $0x4060] sm:$0xff] }
 0x436   : > { %v7396_v25 = vadd.f32 %v11843_v17, %v18611_v35  ;;  %15154 = vmatprep.subr.bf16.mxu1 %v15153_v60  ;;  %v15127_v35 = vpack.c.bf16 %v2356_v21, %v2355_v8  ;;  %v2442_v60 = vld [vmem:[%s16147_s24 + $0x4128] sm:$0xff]  ;;  %v2412_v17 = vld [vmem:[%s16147_s24 + $0x4038] sm:$0xff]  ;;  %v15207_v24 = vpack.c.bf16 %v2444_v4, %v2443_v3  ;;  %v15215_v50 = vpack.c.bf16 %v2448_v31, %v2447_v53  ;;  %v2449_v56 = vld [vmem:[%s16147_s24 + $0x4160] sm:$0xff] }
 0x437   : > { %v15203_v10 = vpack.c.bf16 %v2442_v60, %v2441_v2  ;;  %v2462_v8 = vld [vmem:[%s16147_s24 + $0x41c8] sm:$0xff]  ;;  %v15175_v21 = vpack.c.bf16 %v2412_v17, %v2411_v15  ;;  %v15185_v51 = vpack.c.bf16 %v2434_v33, %v2433_v32  ;;  %v15189_v13 = vpack.c.bf16 %v2436_v52, %v2435_v0  ;;  %v2452_v15 = vld [vmem:[%s16147_s24 + $0x4178] sm:$0xff]  ;;  %v2485_v17 = vld [vmem:[%s16147_s24 + $0x4280] sm:$0xff] }
 0x438   : > { %v18691_v20 = vadd.f32 %v11878_v5, %v7396_v25  ;;  %15124 = vmatpush3.bf16.msra.mxu0 %v15123_v12  ;;  %v2429_v5 = vld [vmem:[%s16147_s24 + $0x40c0] sm:$0xff]  ;;  %v2486_v3 = vld [vmem:[%s16147_s24 + $0x4288] sm:$0xff]  ;;  %v15261_v53 = vpack.c.bf16 %v2520_v16, %v2519_v19  ;;  %v2492_v0 = vld [vmem:[%s16147_s24 + $0x42b8] sm:$0xff] }
 0x439   : > { %15156 = vmatpush3.bf16.msra.mxu1 %v15155_v6  ;;  %15126 = vmatprep.subr.bf16.mxu0 %v15125_v27  ;;  %v2430_v6 = vld [vmem:[%s16147_s24 + $0x40c8] sm:$0xff]  ;;  %v2461_v27 = vld [vmem:[%s16147_s24 + $0x41c0] sm:$0xff]  ;;  %v2524_v52 = vld [vmem:[%s16147_s24 + $0x43b8] sm:$0xff] }
 0x43a   : > { %15158 = vmatprep.subr.bf16.mxu1 %v15157_v22  ;;  %v15177_v25 = vpack.c.bf16 %v2430_v6, %v2429_v5  ;;  %v2413_v22 = vld [vmem:[%s16147_s24 + $0x4040] sm:$0xff]  ;;  %v15209_v18 = vpack.c.bf16 %v2462_v8, %v2461_v27  ;;  %v2518_v4 = vld [vmem:[%s16147_s24 + $0x4388] sm:$0xff]  ;;  %v15225_v8 = vpack.c.bf16 %v2486_v3, %v2485_v17 }
 0x43b   : > { %v2489_v31 = vld [vmem:[%s16147_s24 + $0x42a0] sm:$0xff]  ;;  %v2490_v32 = vld [vmem:[%s16147_s24 + $0x42a8] sm:$0xff] }
 0x43c   : > { %15128 = vmatpush3.bf16.msra.mxu0 %v15127_v35  ;;  %v2463_v35 = vld [vmem:[%s16147_s24 + $0x41d0] sm:$0xff]  ;;  %v2509_v17 = vld [vmem:[%s16147_s24 + $0x4340] sm:$0xff]  ;;  %v2498_v16 = vld [vmem:[%s16147_s24 + $0x42e8] sm:$0xff] }
 0x43d   : > { %15160 = vmatpush3.bf16.msra.mxu1 %v15159_v40  ;;  %15162 = vmatprep.subr.bf16.mxu0 %v15161_v23  ;;  %v2464_v40 = vld [vmem:[%s16147_s24 + $0x41d8] sm:$0xff]  ;;  %v15179_v23 = vpack.c.bf16 %v2414_v28, %v2413_v22  ;;  %v2502_v28 = vld [vmem:[%s16147_s24 + $0x4308] sm:$0xff]  ;;  %v2497_v19 = vld [vmem:[%s16147_s24 + $0x42e0] sm:$0xff] }
 0x43e   : > { %15194 = vmatprep.subr.bf16.mxu1 %v15193_v26  ;;  %v2416_v26 = vld [vmem:[%s16147_s24 + $0x4058] sm:$0xff]  ;;  %v15213_v41 = vpack.c.bf16 %v2464_v40, %v2463_v35 }
 0x43f   : > { %8374 = vmatmul.mubr.f32.vlgmr.msra.gmra.mrb[62].mxu0 %v18620_v57  ;;  %v2410_v57 = vld [vmem:[%s16147_s24 + $0x4028] sm:$0xff] }
 0x440   : > { %15164 = vmatpush3.bf16.msra.mxu0 %v15163_v54  ;;  %8444 = vmatmul.mubr.f32.vlgmr.msra.gmra.mrb[62].mxu1 %v18625_v58  ;;  %v2459_v58 = vld [vmem:[%s16147_s24 + $0x41b0] sm:$0xff]  ;;  %v15171_v9 = vpack.c.bf16 %v2410_v57, %v2409_v1  ;;  %v2465_v54 = vld [vmem:[%s16147_s24 + $0x41e0] sm:$0xff] }
 0x441   : > { %15196 = vmatpush3.bf16.msra.mxu1 %v15195_v37  ;;  %15166 = vmatprep.subr.bf16.mxu0 %v15165_v49  ;;  %v15205_v12 = vpack.c.bf16 %v2460_v7, %v2459_v58  ;;  %v2466_v37 = vld [vmem:[%s16147_s24 + $0x41e8] sm:$0xff]  ;;  %v15183_v49 = vpack.c.bf16 %v2416_v26, %v2415_v43  ;;  %v2419_v58 = vld [vmem:[%s16147_s24 + $0x4070] sm:$0xff]  ;;  %v2420_v7 = vld [vmem:[%s16147_s24 + $0x4078] sm:$0xff] }
 0x442   : > { %15198 = vmatprep.subr.bf16.mxu1 %v15197_v34  ;;  %8513 = vmatprep.mubr.f32.mxu0 %v3646_v47  ;;  %v2418_v34 = vld [vmem:[%s16147_s24 + $0x4068] sm:$0xff]  ;;  %v15217_v45 = vpack.c.bf16 %v2466_v37, %v2465_v54  ;;  %v2472_v43 = vld [vmem:[%s16147_s24 + $0x4218] sm:$0xff]  ;;  %v2503_v26 = vld [vmem:[%s16147_s24 + $0x4310] sm:$0xff] }
 0x443   : > { %8583 = vmatprep.mubr.f32.mxu1 %v3647_v46  ;;  %v2450_v47 = vld [vmem:[%s16147_s24 + $0x4168] sm:$0xff]  ;;  %v15187_v2 = vpack.c.bf16 %v2418_v34, %v2417_v39  ;;  %v2521_v54 = vld [vmem:[%s16147_s24 + $0x43a0] sm:$0xff]  ;;  %v15233_v39 = vpack.c.bf16 %v2490_v32, %v2489_v31 }
 0x444   : > { %15168 = vmatpush3.bf16.msra.mxu0 %v15167_v62  ;;  %v15219_v61 = vpack.c.bf16 %v2450_v47, %v2449_v56  ;;  %v2522_v37 = vld [vmem:[%s16147_s24 + $0x43a8] sm:$0xff]  ;;  %v2473_v34 = vld [vmem:[%s16147_s24 + $0x4220] sm:$0xff]  ;;  %v2491_v47 = vld [vmem:[%s16147_s24 + $0x42b0] sm:$0xff] }
 0x445   : > { %15200 = vmatpush3.bf16.msra.mxu1 %v15199_v63  ;;  %15170 = vmatprep.subr.bf16.mxu0 %v15169_v55  ;;  %v2467_v63 = vld [vmem:[%s16147_s24 + $0x41f0] sm:$0xff]  ;;  %v2468_v55 = vld [vmem:[%s16147_s24 + $0x41f8] sm:$0xff]  ;;  %v2505_v56 = vld [vmem:[%s16147_s24 + $0x4320] sm:$0xff] }
 0x446   : > { %15202 = vmatprep.subr.bf16.mxu1 %v15201_v59  ;;  %v348_v59 = vld [vmem:[%s16157_s19 + $0x108] sm:$0xff] }
 0x447   : > { %v3648_v5 = vcombine.high %v348_v59, %v348_v59  ;;  %v18780_v30 = vrot.slane %v348_v59, %v16210_v14  ;;  %v2508_v59 = vld [vmem:[%s16147_s24 + $0x4338] sm:$0xff] }
 0x448   : > { %15172 = vmatpush3.bf16.msra.mxu0 %v15171_v9  ;;  %v2451_v9 = vld [vmem:[%s16147_s24 + $0x4170] sm:$0xff] }
 0x449   : > { %15204 = vmatpush3.bf16.msra.mxu1 %v15203_v10  ;;  %15174 = vmatprep.subr.bf16.mxu0 %v15173_v11  ;;  %v15221_v11 = vpack.c.bf16 %v2468_v55, %v2467_v63  ;;  %v15223_v27 = vpack.c.bf16 %v2452_v15, %v2451_v9  ;;  %v18785_v35 = vrot.slane %v3648_v5, %v16210_v14  ;;  %v2475_v55 = vld [vmem:[%s16147_s24 + $0x4230] sm:$0xff]  ;;  %v2478_v15 = vld [vmem:[%s16147_s24 + $0x4248] sm:$0xff]  ;;  %v2496_v5 = vld [vmem:[%s16147_s24 + $0x42d8] sm:$0xff] }
 0x44a   : > { %15206 = vmatprep.subr.bf16.mxu1 %v15205_v12  ;;  %v2517_v12 = vld [vmem:[%s16147_s24 + $0x4380] sm:$0xff]  ;;  %v3663_v33 = vcombine.high %v18780_v30, %v18780_v30  ;;  %v15237_v63 = vpack.c.bf16 %v2492_v0, %v2491_v47 }
 0x44b   : > { %v15257_v22 = vpack.c.bf16 %v2518_v4, %v2517_v12  ;;  %v2510_v12 = vld [vmem:[%s16147_s24 + $0x4348] sm:$0xff]  ;;  %v2495_v4 = vld [vmem:[%s16147_s24 + $0x42d0] sm:$0xff] }
 0x44c   : > { %15176 = vmatpush3.bf16.msra.mxu0 %v15175_v21  ;;  %v2469_v21 = vld [vmem:[%s16147_s24 + $0x4200] sm:$0xff] }
 0x44d   : > { %15208 = vmatpush3.bf16.msra.mxu1 %v15207_v24  ;;  %15178 = vmatprep.subr.bf16.mxu0 %v15177_v25  ;;  %v2470_v24 = vld [vmem:[%s16147_s24 + $0x4208] sm:$0xff]  ;;  %v2501_v25 = vld [vmem:[%s16147_s24 + $0x4300] sm:$0xff] }
 0x44e   : > { %15210 = vmatprep.subr.bf16.mxu1 %v15209_v18  ;;  %v2488_v18 = vld [vmem:[%s16147_s24 + $0x4298] sm:$0xff]  ;;  %v15227_v40 = vpack.c.bf16 %v2470_v24, %v2469_v21  ;;  %v15275_v21 = vpack.c.bf16 %v2510_v12, %v2509_v17  ;;  %v15245_v24 = vpack.c.bf16 %v2496_v5, %v2495_v4  ;;  %v2551_v17 = vld [vmem:[%s16147_s24 + $0x4490] sm:$0xff] }
 0x44f   : > { %v2583_v4 = vld [vmem:[%s16147_s24 + $0x4590] sm:$0xff]  ;;  %v2584_v5 = vld [vmem:[%s16147_s24 + $0x4598] sm:$0xff] }
 0x450   : > { %15180 = vmatpush3.bf16.msra.mxu0 %v15179_v23  ;;  %v15259_v23 = vpack.c.bf16 %v2502_v28, %v2501_v25  ;;  %v2479_v25 = vld [vmem:[%s16147_s24 + $0x4250] sm:$0xff] }
 0x451   : > { %15212 = vmatpush3.bf16.msra.mxu1 %v15211_v36  ;;  %15182 = vmatprep.subr.bf16.mxu0 %v15181_v38  ;;  %v15229_v36 = vpack.c.bf16 %v2488_v18, %v2487_v29  ;;  %v2471_v38 = vld [vmem:[%s16147_s24 + $0x4210] sm:$0xff]  ;;  %v2512_v18 = vld [vmem:[%s16147_s24 + $0x4358] sm:$0xff] }
 0x452   : > { %v11911_v44 = vpop.f32.mrb[50].mxu0  ;;  %15214 = vmatprep.subr.bf16.mxu1 %v15213_v41  ;;  %v2504_v41 = vld [vmem:[%s16147_s24 + $0x4318] sm:$0xff]  ;;  %v2511_v28 = vld [vmem:[%s16147_s24 + $0x4350] sm:$0xff] }
 0x453   : > { %v11912_v46 = vpop.f32.mrb[51].mxu0  ;;  %v11946_v62 = vpop.f32.mrb[50].mxu1 }
 0x454   : > { %v11913_v1 = vadd.f32 %v11912_v46, %v11911_v44  ;;  %15184 = vmatpush3.bf16.msra.mxu0 %v15183_v49  ;;  %v11947_v57 = vpop.f32.mrb[51].mxu1  ;;  %v3664_v49 = vcombine.high %v18785_v35, %v18785_v35  ;;  %v15265_v44 = vpack.c.bf16 %v2522_v37, %v2521_v54  ;;  %v2499_v54 = vld [vmem:[%s16147_s24 + $0x42f0] sm:$0xff]  ;;  %v2500_v37 = vld [vmem:[%s16147_s24 + $0x42f8] sm:$0xff] }
 0x455   : > { %v11948_v60 = vadd.f32 %v11947_v57, %v11946_v62  ;;  %15216 = vmatpush3.bf16.msra.mxu1 %v15215_v50  ;;  %15186 = vmatprep.subr.bf16.mxu0 %v15185_v51  ;;  %v15231_v50 = vpack.c.bf16 %v2472_v43, %v2471_v38  ;;  %v15263_v51 = vpack.c.bf16 %v2504_v41, %v2503_v26  ;;  %v2507_v57 = vld [vmem:[%s16147_s24 + $0x4330] sm:$0xff]  ;;  %v2481_v26 = vld [vmem:[%s16147_s24 + $0x4260] sm:$0xff] }
 0x456   : > { %v7536_v10 = vadd.f32 %v11913_v1, %v18691_v20  ;;  %15218 = vmatprep.subr.bf16.mxu1 %v15217_v45  ;;  %v15191_v20 = vpack.c.bf16 %v2420_v7, %v2419_v58  ;;  %v2506_v45 = vld [vmem:[%s16147_s24 + $0x4328] sm:$0xff]  ;;  %v2476_v1 = vld [vmem:[%s16147_s24 + $0x4238] sm:$0xff]  ;;  %v15271_v9 = vpack.c.bf16 %v2508_v59, %v2507_v57  ;;  %v15279_v38 = vpack.c.bf16 %v2512_v18, %v2511_v28  ;;  %v2513_v41 = vld [vmem:[%s16147_s24 + $0x4360] sm:$0xff] }
 0x457   : > { %v15267_v62 = vpack.c.bf16 %v2506_v45, %v2505_v56  ;;  %v2526_v58 = vld [vmem:[%s16147_s24 + $0x43c8] sm:$0xff]  ;;  %v15239_v7 = vpack.c.bf16 %v2476_v1, %v2475_v55  ;;  %v15249_v43 = vpack.c.bf16 %v2498_v16, %v2497_v19  ;;  %v15253_v0 = vpack.c.bf16 %v2500_v37, %v2499_v54  ;;  %v2516_v55 = vld [vmem:[%s16147_s24 + $0x4378] sm:$0xff]  ;;  %v2549_v1 = vld [vmem:[%s16147_s24 + $0x4480] sm:$0xff] }
 0x458   : > { %v18771_v6 = vadd.f32 %v11948_v60, %v7536_v10  ;;  %15188 = vmatpush3.bf16.msra.mxu0 %v15187_v2  ;;  %v2493_v60 = vld [vmem:[%s16147_s24 + $0x42c0] sm:$0xff]  ;;  %v2550_v57 = vld [vmem:[%s16147_s24 + $0x4488] sm:$0xff]  ;;  %v15325_v28 = vpack.c.bf16 %v2584_v5, %v2583_v4  ;;  %v2556_v54 = vld [vmem:[%s16147_s24 + $0x44b8] sm:$0xff] }
 0x459   : > { %15220 = vmatpush3.bf16.msra.mxu1 %v15219_v61  ;;  %15190 = vmatprep.subr.bf16.mxu0 %v15189_v13  ;;  %v2494_v61 = vld [vmem:[%s16147_s24 + $0x42c8] sm:$0xff]  ;;  %v2525_v13 = vld [vmem:[%s16147_s24 + $0x43c0] sm:$0xff]  ;;  %v2588_v37 = vld [vmem:[%s16147_s24 + $0x45b8] sm:$0xff] }
 0x45a   : > { %15222 = vmatprep.subr.bf16.mxu1 %v15221_v11  ;;  %v15241_v10 = vpack.c.bf16 %v2494_v61, %v2493_v60  ;;  %v2477_v11 = vld [vmem:[%s16147_s24 + $0x4240] sm:$0xff]  ;;  %v15273_v3 = vpack.c.bf16 %v2526_v58, %v2525_v13  ;;  %v2582_v59 = vld [vmem:[%s16147_s24 + $0x4588] sm:$0xff]  ;;  %v15289_v58 = vpack.c.bf16 %v2550_v57, %v2549_v1 }
 0x45b   : > { %v2553_v18 = vld [vmem:[%s16147_s24 + $0x44a0] sm:$0xff]  ;;  %v2554_v19 = vld [vmem:[%s16147_s24 + $0x44a8] sm:$0xff] }
 0x45c   : > { %15192 = vmatpush3.bf16.msra.mxu0 %v15191_v20  ;;  %v2527_v20 = vld [vmem:[%s16147_s24 + $0x43d0] sm:$0xff]  ;;  %v2573_v1 = vld [vmem:[%s16147_s24 + $0x4540] sm:$0xff]  ;;  %v2562_v5 = vld [vmem:[%s16147_s24 + $0x44e8] sm:$0xff] }
 0x45d   : > { %15224 = vmatpush3.bf16.msra.mxu1 %v15223_v27  ;;  %15226 = vmatprep.subr.bf16.mxu0 %v15225_v8  ;;  %v2528_v27 = vld [vmem:[%s16147_s24 + $0x43d8] sm:$0xff]  ;;  %v15243_v8 = vpack.c.bf16 %v2478_v15, %v2477_v11  ;;  %v2566_v15 = vld [vmem:[%s16147_s24 + $0x4508] sm:$0xff]  ;;  %v2561_v4 = vld [vmem:[%s16147_s24 + $0x44e0] sm:$0xff] }
 0x45e   : > { %15258 = vmatprep.subr.bf16.mxu1 %v15257_v22  ;;  %v2480_v22 = vld [vmem:[%s16147_s24 + $0x4258] sm:$0xff]  ;;  %v15277_v29 = vpack.c.bf16 %v2528_v27, %v2527_v20 }
 0x45f   : > { %8514 = vmatmul.mubr.f32.vlgmr.msra.gmra.mrb[64].mxu0 %v18700_v42  ;;  %v2474_v42 = vld [vmem:[%s16147_s24 + $0x4228] sm:$0xff] }
 0x460   : > { %15228 = vmatpush3.bf16.msra.mxu0 %v15227_v40  ;;  %8584 = vmatmul.mubr.f32.vlgmr.msra.gmra.mrb[64].mxu1 %v18705_v48  ;;  %v2523_v48 = vld [vmem:[%s16147_s24 + $0x43b0] sm:$0xff]  ;;  %v15235_v46 = vpack.c.bf16 %v2474_v42, %v2473_v34  ;;  %v2529_v40 = vld [vmem:[%s16147_s24 + $0x43e0] sm:$0xff] }
 0x461   : > { %15260 = vmatpush3.bf16.msra.mxu1 %v15259_v23  ;;  %15230 = vmatprep.subr.bf16.mxu0 %v15229_v36  ;;  %v15269_v2 = vpack.c.bf16 %v2524_v52, %v2523_v48  ;;  %v2530_v23 = vld [vmem:[%s16147_s24 + $0x43e8] sm:$0xff]  ;;  %v15247_v36 = vpack.c.bf16 %v2480_v22, %v2479_v25  ;;  %v2483_v48 = vld [vmem:[%s16147_s24 + $0x4270] sm:$0xff]  ;;  %v2484_v52 = vld [vmem:[%s16147_s24 + $0x4278] sm:$0xff] }
 0x462   : > { %15262 = vmatprep.subr.bf16.mxu1 %v15261_v53  ;;  %8653 = vmatprep.mubr.f32.mxu0 %v3663_v33  ;;  %v2482_v53 = vld [vmem:[%s16147_s24 + $0x4268] sm:$0xff]  ;;  %v15281_v32 = vpack.c.bf16 %v2530_v23, %v2529_v40  ;;  %v2536_v25 = vld [vmem:[%s16147_s24 + $0x4418] sm:$0xff]  ;;  %v2567_v22 = vld [vmem:[%s16147_s24 + $0x4510] sm:$0xff] }
 0x463   : > { %8723 = vmatprep.mubr.f32.mxu1 %v3664_v49  ;;  %v2514_v33 = vld [vmem:[%s16147_s24 + $0x4368] sm:$0xff]  ;;  %v15251_v56 = vpack.c.bf16 %v2482_v53, %v2481_v26  ;;  %v2585_v40 = vld [vmem:[%s16147_s24 + $0x45a0] sm:$0xff]  ;;  %v15297_v26 = vpack.c.bf16 %v2554_v19, %v2553_v18 }
 0x464   : > { %15232 = vmatpush3.bf16.msra.mxu0 %v15231_v50  ;;  %v15283_v47 = vpack.c.bf16 %v2514_v33, %v2513_v41  ;;  %v2586_v23 = vld [vmem:[%s16147_s24 + $0x45a8] sm:$0xff]  ;;  %v2537_v53 = vld [vmem:[%s16147_s24 + $0x4420] sm:$0xff]  ;;  %v2555_v33 = vld [vmem:[%s16147_s24 + $0x44b0] sm:$0xff] }
 0x465   : > { %15264 = vmatpush3.bf16.msra.mxu1 %v15263_v51  ;;  %15234 = vmatprep.subr.bf16.mxu0 %v15233_v39  ;;  %v2531_v51 = vld [vmem:[%s16147_s24 + $0x43f0] sm:$0xff]  ;;  %v2532_v39 = vld [vmem:[%s16147_s24 + $0x43f8] sm:$0xff]  ;;  %v2569_v41 = vld [vmem:[%s16147_s24 + $0x4520] sm:$0xff] }
 0x466   : > { %15266 = vmatprep.subr.bf16.mxu1 %v15265_v44  ;;  %v349_v44 = vld [vmem:[%s16157_s19 + $0x110] sm:$0xff] }
 0x467   : > { %v3665_v60 = vcombine.high %v349_v44, %v349_v44  ;;  %v18860_v12 = vrot.slane %v349_v44, %v16210_v14  ;;  %v2572_v44 = vld [vmem:[%s16147_s24 + $0x4538] sm:$0xff] }
 0x468   : > { %15236 = vmatpush3.bf16.msra.mxu0 %v15235_v46  ;;  %v2515_v46 = vld [vmem:[%s16147_s24 + $0x4370] sm:$0xff] }
 0x469   : > { %15268 = vmatpush3.bf16.msra.mxu1 %v15267_v62  ;;  %15238 = vmatprep.subr.bf16.mxu0 %v15237_v63  ;;  %v15285_v63 = vpack.c.bf16 %v2532_v39, %v2531_v51  ;;  %v15287_v13 = vpack.c.bf16 %v2516_v55, %v2515_v46  ;;  %v18865_v20 = vrot.slane %v3665_v60, %v16210_v14  ;;  %v2539_v39 = vld [vmem:[%s16147_s24 + $0x4430] sm:$0xff]  ;;  %v2542_v55 = vld [vmem:[%s16147_s24 + $0x4448] sm:$0xff]  ;;  %v2560_v60 = vld [vmem:[%s16147_s24 + $0x44d8] sm:$0xff] }
 0x46a   : > { %15270 = vmatprep.subr.bf16.mxu1 %v15269_v2  ;;  %v2581_v2 = vld [vmem:[%s16147_s24 + $0x4580] sm:$0xff]  ;;  %v3680_v16 = vcombine.high %v18860_v12, %v18860_v12  ;;  %v15301_v51 = vpack.c.bf16 %v2556_v54, %v2555_v33 }
 0x46b   : > { %v15321_v11 = vpack.c.bf16 %v2582_v59, %v2581_v2  ;;  %v2574_v2 = vld [vmem:[%s16147_s24 + $0x4548] sm:$0xff]  ;;  %v2559_v59 = vld [vmem:[%s16147_s24 + $0x44d0] sm:$0xff] }
 0x46c   : > { %15240 = vmatpush3.bf16.msra.mxu0 %v15239_v7  ;;  %v2533_v7 = vld [vmem:[%s16147_s24 + $0x4400] sm:$0xff] }
 0x46d   : > { %15272 = vmatpush3.bf16.msra.mxu1 %v15271_v9  ;;  %15242 = vmatprep.subr.bf16.mxu0 %v15241_v10  ;;  %v2534_v9 = vld [vmem:[%s16147_s24 + $0x4408] sm:$0xff]  ;;  %v2565_v10 = vld [vmem:[%s16147_s24 + $0x4500] sm:$0xff] }
 0x46e   : > { %15274 = vmatprep.subr.bf16.mxu1 %v15273_v3  ;;  %v2552_v3 = vld [vmem:[%s16147_s24 + $0x4498] sm:$0xff]  ;;  %v15291_v27 = vpack.c.bf16 %v2534_v9, %v2533_v7  ;;  %v15339_v7 = vpack.c.bf16 %v2574_v2, %v2573_v1  ;;  %v15309_v9 = vpack.c.bf16 %v2560_v60, %v2559_v59  ;;  %v2615_v1 = vld [vmem:[%s16147_s24 + $0x4690] sm:$0xff] }
 0x46f   : > { %v2647_v59 = vld [vmem:[%s16147_s24 + $0x4790] sm:$0xff]  ;;  %v2648_v60 = vld [vmem:[%s16147_s24 + $0x4798] sm:$0xff] }
 0x470   : > { %15244 = vmatpush3.bf16.msra.mxu0 %v15243_v8  ;;  %v15323_v8 = vpack.c.bf16 %v2566_v15, %v2565_v10  ;;  %v2543_v10 = vld [vmem:[%s16147_s24 + $0x4450] sm:$0xff] }
 0x471   : > { %15276 = vmatpush3.bf16.msra.mxu1 %v15275_v21  ;;  %15246 = vmatprep.subr.bf16.mxu0 %v15245_v24  ;;  %v15293_v21 = vpack.c.bf16 %v2552_v3, %v2551_v17  ;;  %v2535_v24 = vld [vmem:[%s16147_s24 + $0x4410] sm:$0xff]  ;;  %v2576_v3 = vld [vmem:[%s16147_s24 + $0x4558] sm:$0xff] }
 0x472   : > { %v11981_v31 = vpop.f32.mrb[52].mxu0  ;;  %15278 = vmatprep.subr.bf16.mxu1 %v15277_v29  ;;  %v2568_v29 = vld [vmem:[%s16147_s24 + $0x4518] sm:$0xff]  ;;  %v2575_v15 = vld [vmem:[%s16147_s24 + $0x4550] sm:$0xff] }
 0x473   : > { %v11982_v49 = vpop.f32.mrb[53].mxu0  ;;  %v12016_v50 = vpop.f32.mrb[52].mxu1 }
 0x474   : > { %v11983_v34 = vadd.f32 %v11982_v49, %v11981_v31  ;;  %15248 = vmatpush3.bf16.msra.mxu0 %v15247_v36  ;;  %v12017_v42 = vpop.f32.mrb[53].mxu1  ;;  %v3681_v36 = vcombine.high %v18865_v20, %v18865_v20  ;;  %v15329_v31 = vpack.c.bf16 %v2586_v23, %v2585_v40  ;;  %v2563_v40 = vld [vmem:[%s16147_s24 + $0x44f0] sm:$0xff]  ;;  %v2564_v23 = vld [vmem:[%s16147_s24 + $0x44f8] sm:$0xff] }
 0x475   : > { %v12018_v45 = vadd.f32 %v12017_v42, %v12016_v50  ;;  %15280 = vmatpush3.bf16.msra.mxu1 %v15279_v38  ;;  %15250 = vmatprep.subr.bf16.mxu0 %v15249_v43  ;;  %v15295_v38 = vpack.c.bf16 %v2536_v25, %v2535_v24  ;;  %v15327_v43 = vpack.c.bf16 %v2568_v29, %v2567_v22  ;;  %v2571_v42 = vld [vmem:[%s16147_s24 + $0x4530] sm:$0xff]  ;;  %v2545_v22 = vld [vmem:[%s16147_s24 + $0x4460] sm:$0xff] }
 0x476   : > { %v7676_v62 = vadd.f32 %v11983_v34, %v18771_v6  ;;  %15282 = vmatprep.subr.bf16.mxu1 %v15281_v32  ;;  %v15255_v6 = vpack.c.bf16 %v2484_v52, %v2483_v48  ;;  %v2570_v32 = vld [vmem:[%s16147_s24 + $0x4528] sm:$0xff]  ;;  %v2540_v34 = vld [vmem:[%s16147_s24 + $0x4438] sm:$0xff]  ;;  %v15335_v46 = vpack.c.bf16 %v2572_v44, %v2571_v42  ;;  %v15343_v24 = vpack.c.bf16 %v2576_v3, %v2575_v15  ;;  %v2577_v29 = vld [vmem:[%s16147_s24 + $0x4560] sm:$0xff] }
 0x477   : > { %v15331_v50 = vpack.c.bf16 %v2570_v32, %v2569_v41  ;;  %v2590_v48 = vld [vmem:[%s16147_s24 + $0x45c8] sm:$0xff]  ;;  %v15303_v52 = vpack.c.bf16 %v2540_v34, %v2539_v39  ;;  %v15313_v25 = vpack.c.bf16 %v2562_v5, %v2561_v4  ;;  %v15317_v54 = vpack.c.bf16 %v2564_v23, %v2563_v40  ;;  %v2580_v39 = vld [vmem:[%s16147_s24 + $0x4578] sm:$0xff]  ;;  %v2613_v34 = vld [vmem:[%s16147_s24 + $0x4680] sm:$0xff] }
 0x478   : > { %v18851_v61 = vadd.f32 %v12018_v45, %v7676_v62  ;;  %15252 = vmatpush3.bf16.msra.mxu0 %v15251_v56  ;;  %v2557_v45 = vld [vmem:[%s16147_s24 + $0x44c0] sm:$0xff]  ;;  %v2614_v42 = vld [vmem:[%s16147_s24 + $0x4688] sm:$0xff]  ;;  %v15389_v15 = vpack.c.bf16 %v2648_v60, %v2647_v59  ;;  %v2620_v40 = vld [vmem:[%s16147_s24 + $0x46b8] sm:$0xff] }
 0x479   : > { %15284 = vmatpush3.bf16.msra.mxu1 %v15283_v47  ;;  %15254 = vmatprep.subr.bf16.mxu0 %v15253_v0  ;;  %v2558_v47 = vld [vmem:[%s16147_s24 + $0x44c8] sm:$0xff]  ;;  %v2589_v0 = vld [vmem:[%s16147_s24 + $0x45c0] sm:$0xff]  ;;  %v2652_v23 = vld [vmem:[%s16147_s24 + $0x47b8] sm:$0xff] }
 0x47a   : > { %15286 = vmatprep.subr.bf16.mxu1 %v15285_v63  ;;  %v15305_v62 = vpack.c.bf16 %v2558_v47, %v2557_v45  ;;  %v2541_v63 = vld [vmem:[%s16147_s24 + $0x4440] sm:$0xff]  ;;  %v15337_v57 = vpack.c.bf16 %v2590_v48, %v2589_v0  ;;  %v2646_v44 = vld [vmem:[%s16147_s24 + $0x4788] sm:$0xff]  ;;  %v15353_v48 = vpack.c.bf16 %v2614_v42, %v2613_v34 }
 0x47b   : > { %v2617_v3 = vld [vmem:[%s16147_s24 + $0x46a0] sm:$0xff]  ;;  %v2618_v4 = vld [vmem:[%s16147_s24 + $0x46a8] sm:$0xff] }
 0x47c   : > { %15256 = vmatpush3.bf16.msra.mxu0 %v15255_v6  ;;  %v2591_v6 = vld [vmem:[%s16147_s24 + $0x45d0] sm:$0xff]  ;;  %v2637_v34 = vld [vmem:[%s16147_s24 + $0x4740] sm:$0xff]  ;;  %v2626_v60 = vld [vmem:[%s16147_s24 + $0x46e8] sm:$0xff] }
 0x47d   : > { %15288 = vmatpush3.bf16.msra.mxu1 %v15287_v13  ;;  %15290 = vmatprep.subr.bf16.mxu0 %v15289_v58  ;;  %v2592_v13 = vld [vmem:[%s16147_s24 + $0x45d8] sm:$0xff]  ;;  %v15307_v58 = vpack.c.bf16 %v2542_v55, %v2541_v63  ;;  %v2630_v55 = vld [vmem:[%s16147_s24 + $0x4708] sm:$0xff]  ;;  %v2625_v59 = vld [vmem:[%s16147_s24 + $0x46e0] sm:$0xff] }
 0x47e   : > { %15322 = vmatprep.subr.bf16.mxu1 %v15321_v11  ;;  %v2544_v11 = vld [vmem:[%s16147_s24 + $0x4458] sm:$0xff]  ;;  %v15341_v17 = vpack.c.bf16 %v2592_v13, %v2591_v6 }
 0x47f   : > { %8654 = vmatmul.mubr.f32.vlgmr.msra.gmra.mrb[66].mxu0 %v18780_v30  ;;  %v2538_v30 = vld [vmem:[%s16147_s24 + $0x4428] sm:$0xff] }
 0x480   : > { %15292 = vmatpush3.bf16.msra.mxu0 %v15291_v27  ;;  %8724 = vmatmul.mubr.f32.vlgmr.msra.gmra.mrb[66].mxu1 %v18785_v35  ;;  %v2587_v35 = vld [vmem:[%s16147_s24 + $0x45b0] sm:$0xff]  ;;  %v15299_v49 = vpack.c.bf16 %v2538_v30, %v2537_v53  ;;  %v2593_v27 = vld [vmem:[%s16147_s24 + $0x45e0] sm:$0xff] }
 0x481   : > { %15324 = vmatpush3.bf16.msra.mxu1 %v15323_v8  ;;  %15294 = vmatprep.subr.bf16.mxu0 %v15293_v21  ;;  %v15333_v56 = vpack.c.bf16 %v2588_v37, %v2587_v35  ;;  %v2594_v8 = vld [vmem:[%s16147_s24 + $0x45e8] sm:$0xff]  ;;  %v15311_v21 = vpack.c.bf16 %v2544_v11, %v2543_v10  ;;  %v2547_v35 = vld [vmem:[%s16147_s24 + $0x4470] sm:$0xff]  ;;  %v2548_v37 = vld [vmem:[%s16147_s24 + $0x4478] sm:$0xff] }
 0x482   : > { %15326 = vmatprep.subr.bf16.mxu1 %v15325_v28  ;;  %8793 = vmatprep.mubr.f32.mxu0 %v3680_v16  ;;  %v2546_v28 = vld [vmem:[%s16147_s24 + $0x4468] sm:$0xff]  ;;  %v15345_v19 = vpack.c.bf16 %v2594_v8, %v2593_v27  ;;  %v2600_v10 = vld [vmem:[%s16147_s24 + $0x4618] sm:$0xff]  ;;  %v2631_v11 = vld [vmem:[%s16147_s24 + $0x4710] sm:$0xff] }
 0x483   : > { %8863 = vmatprep.mubr.f32.mxu1 %v3681_v36  ;;  %v2578_v16 = vld [vmem:[%s16147_s24 + $0x4568] sm:$0xff]  ;;  %v15315_v41 = vpack.c.bf16 %v2546_v28, %v2545_v22  ;;  %v2649_v27 = vld [vmem:[%s16147_s24 + $0x47a0] sm:$0xff]  ;;  %v15361_v22 = vpack.c.bf16 %v2618_v4, %v2617_v3 }
 0x484   : > { %15296 = vmatpush3.bf16.msra.mxu0 %v15295_v38  ;;  %v15347_v33 = vpack.c.bf16 %v2578_v16, %v2577_v29  ;;  %v2650_v8 = vld [vmem:[%s16147_s24 + $0x47a8] sm:$0xff]  ;;  %v2601_v28 = vld [vmem:[%s16147_s24 + $0x4620] sm:$0xff]  ;;  %v2619_v16 = vld [vmem:[%s16147_s24 + $0x46b0] sm:$0xff] }
 0x485   : > { %15328 = vmatpush3.bf16.msra.mxu1 %v15327_v43  ;;  %15298 = vmatprep.subr.bf16.mxu0 %v15297_v26  ;;  %v2595_v43 = vld [vmem:[%s16147_s24 + $0x45f0] sm:$0xff]  ;;  %v2596_v26 = vld [vmem:[%s16147_s24 + $0x45f8] sm:$0xff]  ;;  %v2633_v29 = vld [vmem:[%s16147_s24 + $0x4720] sm:$0xff] }
 0x486   : > { %15330 = vmatprep.subr.bf16.mxu1 %v15329_v31  ;;  %v350_v31 = vld [vmem:[%s16157_s19 + $0x118] sm:$0xff] }
 0x487   : > { %v3682_v45 = vcombine.high %v350_v31, %v350_v31  ;;  %v18940_v2 = vrot.slane %v350_v31, %v16210_v14  ;;  %v2636_v31 = vld [vmem:[%s16147_s24 + $0x4738] sm:$0xff] }
 0x488   : > { %15300 = vmatpush3.bf16.msra.mxu0 %v15299_v49  ;;  %v2579_v49 = vld [vmem:[%s16147_s24 + $0x4570] sm:$0xff] }
 0x489   : > { %15332 = vmatpush3.bf16.msra.mxu1 %v15331_v50  ;;  %15302 = vmatprep.subr.bf16.mxu0 %v15301_v51  ;;  %v15349_v51 = vpack.c.bf16 %v2596_v26, %v2595_v43  ;;  %v15351_v0 = vpack.c.bf16 %v2580_v39, %v2579_v49  ;;  %v18945_v6 = vrot.slane %v3682_v45, %v16210_v14  ;;  %v2603_v26 = vld [vmem:[%s16147_s24 + $0x4630] sm:$0xff]  ;;  %v2606_v39 = vld [vmem:[%s16147_s24 + $0x4648] sm:$0xff]  ;;  %v2624_v45 = vld [vmem:[%s16147_s24 + $0x46d8] sm:$0xff] }
 0x48a   : > { %15334 = vmatprep.subr.bf16.mxu1 %v15333_v56  ;;  %v2645_v56 = vld [vmem:[%s16147_s24 + $0x4780] sm:$0xff]  ;;  %v3697_v5 = vcombine.high %v18940_v2, %v18940_v2  ;;  %v15365_v43 = vpack.c.bf16 %v2620_v40, %v2619_v16 }
 0x48b   : > { %v15385_v63 = vpack.c.bf16 %v2646_v44, %v2645_v56  ;;  %v2638_v56 = vld [vmem:[%s16147_s24 + $0x4748] sm:$0xff]  ;;  %v2623_v44 = vld [vmem:[%s16147_s24 + $0x46d0] sm:$0xff] }
 0x48c   : > { %15304 = vmatpush3.bf16.msra.mxu0 %v15303_v52  ;;  %v2597_v52 = vld [vmem:[%s16147_s24 + $0x4600] sm:$0xff] }
 0x48d   : > { %15336 = vmatpush3.bf16.msra.mxu1 %v15335_v46  ;;  %15306 = vmatprep.subr.bf16.mxu0 %v15305_v62  ;;  %v2598_v46 = vld [vmem:[%s16147_s24 + $0x4608] sm:$0xff]  ;;  %v2629_v62 = vld [vmem:[%s16147_s24 + $0x4700] sm:$0xff] }
 0x48e   : > { %15338 = vmatprep.subr.bf16.mxu1 %v15337_v57  ;;  %v2616_v57 = vld [vmem:[%s16147_s24 + $0x4698] sm:$0xff]  ;;  %v15355_v13 = vpack.c.bf16 %v2598_v46, %v2597_v52  ;;  %v15403_v52 = vpack.c.bf16 %v2638_v56, %v2637_v34  ;;  %v15373_v46 = vpack.c.bf16 %v2624_v45, %v2623_v44  ;;  %v2679_v34 = vld [vmem:[%s16147_s24 + $0x4890] sm:$0xff] }
 0x48f   : > { %v2711_v44 = vld [vmem:[%s16147_s24 + $0x4990] sm:$0xff]  ;;  %v2712_v45 = vld [vmem:[%s16147_s24 + $0x4998] sm:$0xff] }
 0x490   : > { %15308 = vmatpush3.bf16.msra.mxu0 %v15307_v58  ;;  %v15387_v58 = vpack.c.bf16 %v2630_v55, %v2629_v62  ;;  %v2607_v62 = vld [vmem:[%s16147_s24 + $0x4650] sm:$0xff] }
 0x491   : > { %15340 = vmatpush3.bf16.msra.mxu1 %v15339_v7  ;;  %15310 = vmatprep.subr.bf16.mxu0 %v15309_v9  ;;  %v15357_v7 = vpack.c.bf16 %v2616_v57, %v2615_v1  ;;  %v2599_v9 = vld [vmem:[%s16147_s24 + $0x4610] sm:$0xff]  ;;  %v2640_v57 = vld [vmem:[%s16147_s24 + $0x4758] sm:$0xff] }
 0x492   : > { %v12051_v18 = vpop.f32.mrb[54].mxu0  ;;  %15342 = vmatprep.subr.bf16.mxu1 %v15341_v17  ;;  %v2632_v17 = vld [vmem:[%s16147_s24 + $0x4718] sm:$0xff]  ;;  %v2639_v55 = vld [vmem:[%s16147_s24 + $0x4750] sm:$0xff] }
 0x493   : > { %v12052_v36 = vpop.f32.mrb[55].mxu0  ;;  %v12086_v38 = vpop.f32.mrb[54].mxu1 }
 0x494   : > { %v12053_v53 = vadd.f32 %v12052_v36, %v12051_v18  ;;  %15312 = vmatpush3.bf16.msra.mxu0 %v15311_v21  ;;  %v12087_v30 = vpop.f32.mrb[55].mxu1  ;;  %v3698_v21 = vcombine.high %v18945_v6, %v18945_v6  ;;  %v15393_v18 = vpack.c.bf16 %v2650_v8, %v2649_v27  ;;  %v2627_v27 = vld [vmem:[%s16147_s24 + $0x46f0] sm:$0xff]  ;;  %v2628_v8 = vld [vmem:[%s16147_s24 + $0x46f8] sm:$0xff] }
 0x495   : > { %v12088_v32 = vadd.f32 %v12087_v30, %v12086_v38  ;;  %15344 = vmatpush3.bf16.msra.mxu1 %v15343_v24  ;;  %15314 = vmatprep.subr.bf16.mxu0 %v15313_v25  ;;  %v15359_v24 = vpack.c.bf16 %v2600_v10, %v2599_v9  ;;  %v15391_v25 = vpack.c.bf16 %v2632_v17, %v2631_v11  ;;  %v2635_v30 = vld [vmem:[%s16147_s24 + $0x4730] sm:$0xff]  ;;  %v2609_v11 = vld [vmem:[%s16147_s24 + $0x4660] sm:$0xff] }
 0x496   : > { %v7816_v50 = vadd.f32 %v12053_v53, %v18851_v61  ;;  %15346 = vmatprep.subr.bf16.mxu1 %v15345_v19  ;;  %v15319_v61 = vpack.c.bf16 %v2548_v37, %v2547_v35  ;;  %v2634_v19 = vld [vmem:[%s16147_s24 + $0x4728] sm:$0xff]  ;;  %v2604_v53 = vld [vmem:[%s16147_s24 + $0x4638] sm:$0xff]  ;;  %v15399_v49 = vpack.c.bf16 %v2636_v31, %v2635_v30  ;;  %v15407_v9 = vpack.c.bf16 %v2640_v57, %v2639_v55  ;;  %v2641_v17 = vld [vmem:[%s16147_s24 + $0x4760] sm:$0xff] }
 0x497   : > { %v15395_v38 = vpack.c.bf16 %v2634_v19, %v2633_v29  ;;  %v2654_v35 = vld [vmem:[%s16147_s24 + $0x47c8] sm:$0xff]  ;;  %v15367_v37 = vpack.c.bf16 %v2604_v53, %v2603_v26  ;;  %v15377_v10 = vpack.c.bf16 %v2626_v60, %v2625_v59  ;;  %v15381_v40 = vpack.c.bf16 %v2628_v8, %v2627_v27  ;;  %v2644_v26 = vld [vmem:[%s16147_s24 + $0x4778] sm:$0xff]  ;;  %v2677_v53 = vld [vmem:[%s16147_s24 + $0x4880] sm:$0xff] }
 0x498   : > { %v18931_v47 = vadd.f32 %v12088_v32, %v7816_v50  ;;  %15316 = vmatpush3.bf16.msra.mxu0 %v15315_v41  ;;  %v2621_v32 = vld [vmem:[%s16147_s24 + $0x46c0] sm:$0xff]  ;;  %v2678_v30 = vld [vmem:[%s16147_s24 + $0x4888] sm:$0xff]  ;;  %v15453_v55 = vpack.c.bf16 %v2712_v45, %v2711_v44  ;;  %v2684_v27 = vld [vmem:[%s16147_s24 + $0x48b8] sm:$0xff] }
 0x499   : > { %15348 = vmatpush3.bf16.msra.mxu1 %v15347_v33  ;;  %15318 = vmatprep.subr.bf16.mxu0 %v15317_v54  ;;  %v2622_v33 = vld [vmem:[%s16147_s24 + $0x46c8] sm:$0xff]  ;;  %v2653_v54 = vld [vmem:[%s16147_s24 + $0x47c0] sm:$0xff]  ;;  %v2716_v8 = vld [vmem:[%s16147_s24 + $0x49b8] sm:$0xff] }
 0x49a   : > { %15350 = vmatprep.subr.bf16.mxu1 %v15349_v51  ;;  %v15369_v50 = vpack.c.bf16 %v2622_v33, %v2621_v32  ;;  %v2605_v51 = vld [vmem:[%s16147_s24 + $0x4640] sm:$0xff]  ;;  %v15401_v42 = vpack.c.bf16 %v2654_v35, %v2653_v54  ;;  %v2710_v31 = vld [vmem:[%s16147_s24 + $0x4988] sm:$0xff]  ;;  %v15417_v35 = vpack.c.bf16 %v2678_v30, %v2677_v53 }
 0x49b   : > { %v2681_v57 = vld [vmem:[%s16147_s24 + $0x48a0] sm:$0xff]  ;;  %v2682_v59 = vld [vmem:[%s16147_s24 + $0x48a8] sm:$0xff] }
 0x49c   : > { %15320 = vmatpush3.bf16.msra.mxu0 %v15319_v61  ;;  %v2655_v61 = vld [vmem:[%s16147_s24 + $0x47d0] sm:$0xff]  ;;  %v2701_v53 = vld [vmem:[%s16147_s24 + $0x4940] sm:$0xff]  ;;  %v2690_v45 = vld [vmem:[%s16147_s24 + $0x48e8] sm:$0xff] }
 0x49d   : > { %15352 = vmatpush3.bf16.msra.mxu1 %v15351_v0  ;;  %15354 = vmatprep.subr.bf16.mxu0 %v15353_v48  ;;  %v2656_v0 = vld [vmem:[%s16147_s24 + $0x47d8] sm:$0xff]  ;;  %v15371_v48 = vpack.c.bf16 %v2606_v39, %v2605_v51  ;;  %v2694_v39 = vld [vmem:[%s16147_s24 + $0x4908] sm:$0xff]  ;;  %v2689_v44 = vld [vmem:[%s16147_s24 + $0x48e0] sm:$0xff] }
 0x49e   : > { %15386 = vmatprep.subr.bf16.mxu1 %v15385_v63  ;;  %v2608_v63 = vld [vmem:[%s16147_s24 + $0x4658] sm:$0xff]  ;;  %v15405_v1 = vpack.c.bf16 %v2656_v0, %v2655_v61 }
 0x49f   : > { %8794 = vmatmul.mubr.f32.vlgmr.msra.gmra.mrb[68].mxu0 %v18860_v12  ;;  %v2602_v12 = vld [vmem:[%s16147_s24 + $0x4628] sm:$0xff] }
 0x4a0   : > { %15356 = vmatpush3.bf16.msra.mxu0 %v15355_v13  ;;  %8864 = vmatmul.mubr.f32.vlgmr.msra.gmra.mrb[68].mxu1 %v18865_v20  ;;  %v2651_v20 = vld [vmem:[%s16147_s24 + $0x47b0] sm:$0xff]  ;;  %v15363_v36 = vpack.c.bf16 %v2602_v12, %v2601_v28  ;;  %v2657_v13 = vld [vmem:[%s16147_s24 + $0x47e0] sm:$0xff] }
 0x4a1   : > { %15388 = vmatpush3.bf16.msra.mxu1 %v15387_v58  ;;  %15358 = vmatprep.subr.bf16.mxu0 %v15357_v7  ;;  %v15397_v41 = vpack.c.bf16 %v2652_v23, %v2651_v20  ;;  %v2658_v58 = vld [vmem:[%s16147_s24 + $0x47e8] sm:$0xff]  ;;  %v15375_v7 = vpack.c.bf16 %v2608_v63, %v2607_v62  ;;  %v2611_v20 = vld [vmem:[%s16147_s24 + $0x4670] sm:$0xff]  ;;  %v2612_v23 = vld [vmem:[%s16147_s24 + $0x4678] sm:$0xff] }
 0x4a2   : > { %15390 = vmatprep.subr.bf16.mxu1 %v15389_v15  ;;  %8933 = vmatprep.mubr.f32.mxu0 %v3697_v5  ;;  %v2610_v15 = vld [vmem:[%s16147_s24 + $0x4668] sm:$0xff]  ;;  %v15409_v4 = vpack.c.bf16 %v2658_v58, %v2657_v13  ;;  %v2664_v62 = vld [vmem:[%s16147_s24 + $0x4818] sm:$0xff]  ;;  %v2695_v63 = vld [vmem:[%s16147_s24 + $0x4910] sm:$0xff] }
 0x4a3   : > { %9003 = vmatprep.mubr.f32.mxu1 %v3698_v21  ;;  %v2642_v5 = vld [vmem:[%s16147_s24 + $0x4768] sm:$0xff]  ;;  %v15379_v29 = vpack.c.bf16 %v2610_v15, %v2609_v11  ;;  %v2713_v13 = vld [vmem:[%s16147_s24 + $0x49a0] sm:$0xff]  ;;  %v15425_v11 = vpack.c.bf16 %v2682_v59, %v2681_v57 }
 0x4a4   : > { %15360 = vmatpush3.bf16.msra.mxu0 %v15359_v24  ;;  %v15411_v16 = vpack.c.bf16 %v2642_v5, %v2641_v17  ;;  %v2714_v58 = vld [vmem:[%s16147_s24 + $0x49a8] sm:$0xff]  ;;  %v2665_v15 = vld [vmem:[%s16147_s24 + $0x4820] sm:$0xff]  ;;  %v2683_v5 = vld [vmem:[%s16147_s24 + $0x48b0] sm:$0xff] }
 0x4a5   : > { %15392 = vmatpush3.bf16.msra.mxu1 %v15391_v25  ;;  %15362 = vmatprep.subr.bf16.mxu0 %v15361_v22  ;;  %v2659_v25 = vld [vmem:[%s16147_s24 + $0x47f0] sm:$0xff]  ;;  %v2660_v22 = vld [vmem:[%s16147_s24 + $0x47f8] sm:$0xff]  ;;  %v2697_v17 = vld [vmem:[%s16147_s24 + $0x4920] sm:$0xff] }
 0x4a6   : > { %15394 = vmatprep.subr.bf16.mxu1 %v15393_v18  ;;  %v351_v18 = vld [vmem:[%s16157_s19 + $0x120] sm:$0xff] }
 0x4a7   : > { %v3699_v32 = vcombine.high %v351_v18, %v351_v18  ;;  %v19020_v56 = vrot.slane %v351_v18, %v16210_v14  ;;  %v2700_v18 = vld [vmem:[%s16147_s24 + $0x4938] sm:$0xff] }
 0x4a8   : > { %15364 = vmatpush3.bf16.msra.mxu0 %v15363_v36  ;;  %v2643_v36 = vld [vmem:[%s16147_s24 + $0x4770] sm:$0xff] }
 0x4a9   : > { %15396 = vmatpush3.bf16.msra.mxu1 %v15395_v38  ;;  %15366 = vmatprep.subr.bf16.mxu0 %v15365_v43  ;;  %v15413_v43 = vpack.c.bf16 %v2660_v22, %v2659_v25  ;;  %v15415_v54 = vpack.c.bf16 %v2644_v26, %v2643_v36  ;;  %v19025_v61 = vrot.slane %v3699_v32, %v16210_v14  ;;  %v2667_v22 = vld [vmem:[%s16147_s24 + $0x4830] sm:$0xff]  ;;  %v2670_v26 = vld [vmem:[%s16147_s24 + $0x4848] sm:$0xff]  ;;  %v2688_v32 = vld [vmem:[%s16147_s24 + $0x48d8] sm:$0xff] }
 0x4aa   : > { %15398 = vmatprep.subr.bf16.mxu1 %v15397_v41  ;;  %v2709_v41 = vld [vmem:[%s16147_s24 + $0x4980] sm:$0xff]  ;;  %v3714_v60 = vcombine.high %v19020_v56, %v19020_v56  ;;  %v15429_v25 = vpack.c.bf16 %v2684_v27, %v2683_v5 }
 0x4ab   : > { %v15449_v51 = vpack.c.bf16 %v2710_v31, %v2709_v41  ;;  %v2702_v41 = vld [vmem:[%s16147_s24 + $0x4948] sm:$0xff]  ;;  %v2687_v31 = vld [vmem:[%s16147_s24 + $0x48d0] sm:$0xff] }
 0x4ac   : > { %15368 = vmatpush3.bf16.msra.mxu0 %v15367_v37  ;;  %v2661_v37 = vld [vmem:[%s16147_s24 + $0x4800] sm:$0xff] }
 0x4ad   : > { %15400 = vmatpush3.bf16.msra.mxu1 %v15399_v49  ;;  %15370 = vmatprep.subr.bf16.mxu0 %v15369_v50  ;;  %v2662_v49 = vld [vmem:[%s16147_s24 + $0x4808] sm:$0xff]  ;;  %v2693_v50 = vld [vmem:[%s16147_s24 + $0x4900] sm:$0xff] }
 0x4ae   : > { %15402 = vmatprep.subr.bf16.mxu1 %v15401_v42  ;;  %v2680_v42 = vld [vmem:[%s16147_s24 + $0x4898] sm:$0xff]  ;;  %v15419_v0 = vpack.c.bf16 %v2662_v49, %v2661_v37  ;;  %v15467_v37 = vpack.c.bf16 %v2702_v41, %v2701_v53  ;;  %v15437_v49 = vpack.c.bf16 %v2688_v32, %v2687_v31  ;;  %v2743_v53 = vld [vmem:[%s16147_s24 + $0x4a90] sm:$0xff] }
 0x4af   : > { %v2775_v31 = vld [vmem:[%s16147_s24 + $0x4b90] sm:$0xff]  ;;  %v2776_v32 = vld [vmem:[%s16147_s24 + $0x4b98] sm:$0xff] }
 0x4b0   : > { %15372 = vmatpush3.bf16.msra.mxu0 %v15371_v48  ;;  %v15451_v48 = vpack.c.bf16 %v2694_v39, %v2693_v50  ;;  %v2671_v50 = vld [vmem:[%s16147_s24 + $0x4850] sm:$0xff] }
 0x4b1   : > { %15404 = vmatpush3.bf16.msra.mxu1 %v15403_v52  ;;  %15374 = vmatprep.subr.bf16.mxu0 %v15373_v46  ;;  %v15421_v52 = vpack.c.bf16 %v2680_v42, %v2679_v34  ;;  %v2663_v46 = vld [vmem:[%s16147_s24 + $0x4810] sm:$0xff]  ;;  %v2704_v42 = vld [vmem:[%s16147_s24 + $0x4958] sm:$0xff] }
 0x4b2   : > { %v12121_v3 = vpop.f32.mrb[56].mxu0  ;;  %15406 = vmatprep.subr.bf16.mxu1 %v15405_v1  ;;  %v2696_v1 = vld [vmem:[%s16147_s24 + $0x4918] sm:$0xff]  ;;  %v2703_v39 = vld [vmem:[%s16147_s24 + $0x4950] sm:$0xff] }
 0x4b3   : > { %v12122_v21 = vpop.f32.mrb[57].mxu0  ;;  %v12156_v24 = vpop.f32.mrb[56].mxu1 }
 0x4b4   : > { %v12123_v28 = vadd.f32 %v12122_v21, %v12121_v3  ;;  %15376 = vmatpush3.bf16.msra.mxu0 %v15375_v7  ;;  %v12157_v12 = vpop.f32.mrb[57].mxu1  ;;  %v3715_v7 = vcombine.high %v19025_v61, %v19025_v61  ;;  %v15457_v3 = vpack.c.bf16 %v2714_v58, %v2713_v13  ;;  %v2691_v13 = vld [vmem:[%s16147_s24 + $0x48f0] sm:$0xff]  ;;  %v2692_v58 = vld [vmem:[%s16147_s24 + $0x48f8] sm:$0xff] }
 0x4b5   : > { %v12158_v19 = vadd.f32 %v12157_v12, %v12156_v24  ;;  %15408 = vmatpush3.bf16.msra.mxu1 %v15407_v9  ;;  %15378 = vmatprep.subr.bf16.mxu0 %v15377_v10  ;;  %v15423_v9 = vpack.c.bf16 %v2664_v62, %v2663_v46  ;;  %v15455_v10 = vpack.c.bf16 %v2696_v1, %v2695_v63  ;;  %v2699_v12 = vld [vmem:[%s16147_s24 + $0x4930] sm:$0xff]  ;;  %v2673_v63 = vld [vmem:[%s16147_s24 + $0x4860] sm:$0xff] }
 0x4b6   : > { %v7956_v38 = vadd.f32 %v12123_v28, %v18931_v47  ;;  %15410 = vmatprep.subr.bf16.mxu1 %v15409_v4  ;;  %v15383_v47 = vpack.c.bf16 %v2612_v23, %v2611_v20  ;;  %v2698_v4 = vld [vmem:[%s16147_s24 + $0x4928] sm:$0xff]  ;;  %v2668_v28 = vld [vmem:[%s16147_s24 + $0x4838] sm:$0xff]  ;;  %v15463_v36 = vpack.c.bf16 %v2700_v18, %v2699_v12  ;;  %v15471_v46 = vpack.c.bf16 %v2704_v42, %v2703_v39  ;;  %v2705_v1 = vld [vmem:[%s16147_s24 + $0x4960] sm:$0xff] }
 0x4b7   : > { %v15459_v24 = vpack.c.bf16 %v2698_v4, %v2697_v17  ;;  %v2718_v20 = vld [vmem:[%s16147_s24 + $0x49c8] sm:$0xff]  ;;  %v15431_v23 = vpack.c.bf16 %v2668_v28, %v2667_v22  ;;  %v15441_v62 = vpack.c.bf16 %v2690_v45, %v2689_v44  ;;  %v15445_v27 = vpack.c.bf16 %v2692_v58, %v2691_v13  ;;  %v2708_v22 = vld [vmem:[%s16147_s24 + $0x4978] sm:$0xff]  ;;  %v2741_v28 = vld [vmem:[%s16147_s24 + $0x4a80] sm:$0xff] }
 0x4b8   : > { %v19011_v33 = vadd.f32 %v12158_v19, %v7956_v38  ;;  %15380 = vmatpush3.bf16.msra.mxu0 %v15379_v29  ;;  %v2685_v19 = vld [vmem:[%s16147_s24 + $0x48c0] sm:$0xff]  ;;  %v2742_v12 = vld [vmem:[%s16147_s24 + $0x4a88] sm:$0xff]  ;;  %v15517_v39 = vpack.c.bf16 %v2776_v32, %v2775_v31  ;;  %v2748_v13 = vld [vmem:[%s16147_s24 + $0x4ab8] sm:$0xff] }
 0x4b9   : > { %15412 = vmatpush3.bf16.msra.mxu1 %v15411_v16  ;;  %15382 = vmatprep.subr.bf16.mxu0 %v15381_v40  ;;  %v2686_v16 = vld [vmem:[%s16147_s24 + $0x48c8] sm:$0xff]  ;;  %v2717_v40 = vld [vmem:[%s16147_s24 + $0x49c0] sm:$0xff]  ;;  %v2780_v58 = vld [vmem:[%s16147_s24 + $0x4bb8] sm:$0xff] }
 0x4ba   : > { %15414 = vmatprep.subr.bf16.mxu1 %v15413_v43  ;;  %v15433_v38 = vpack.c.bf16 %v2686_v16, %v2685_v19  ;;  %v2669_v43 = vld [vmem:[%s16147_s24 + $0x4840] sm:$0xff]  ;;  %v15465_v30 = vpack.c.bf16 %v2718_v20, %v2717_v40  ;;  %v2774_v18 = vld [vmem:[%s16147_s24 + $0x4b88] sm:$0xff]  ;;  %v15481_v20 = vpack.c.bf16 %v2742_v12, %v2741_v28 }
 0x4bb   : > { %v2745_v42 = vld [vmem:[%s16147_s24 + $0x4aa0] sm:$0xff]  ;;  %v2746_v44 = vld [vmem:[%s16147_s24 + $0x4aa8] sm:$0xff] }
 0x4bc   : > { %15384 = vmatpush3.bf16.msra.mxu0 %v15383_v47  ;;  %v2719_v47 = vld [vmem:[%s16147_s24 + $0x49d0] sm:$0xff]  ;;  %v2765_v28 = vld [vmem:[%s16147_s24 + $0x4b40] sm:$0xff]  ;;  %v2754_v32 = vld [vmem:[%s16147_s24 + $0x4ae8] sm:$0xff] }
 0x4bd   : > { %15416 = vmatpush3.bf16.msra.mxu1 %v15415_v54  ;;  %15418 = vmatprep.subr.bf16.mxu0 %v15417_v35  ;;  %v2720_v54 = vld [vmem:[%s16147_s24 + $0x49d8] sm:$0xff]  ;;  %v15435_v35 = vpack.c.bf16 %v2670_v26, %v2669_v43  ;;  %v2758_v26 = vld [vmem:[%s16147_s24 + $0x4b08] sm:$0xff]  ;;  %v2753_v31 = vld [vmem:[%s16147_s24 + $0x4ae0] sm:$0xff] }
 0x4be   : > { %15450 = vmatprep.subr.bf16.mxu1 %v15449_v51  ;;  %v2672_v51 = vld [vmem:[%s16147_s24 + $0x4858] sm:$0xff]  ;;  %v15469_v34 = vpack.c.bf16 %v2720_v54, %v2719_v47 }
 0x4bf   : > { %8934 = vmatmul.mubr.f32.vlgmr.msra.gmra.mrb[70].mxu0 %v18940_v2  ;;  %v2666_v2 = vld [vmem:[%s16147_s24 + $0x4828] sm:$0xff] }
 0x4c0   : > { %15420 = vmatpush3.bf16.msra.mxu0 %v15419_v0  ;;  %9004 = vmatmul.mubr.f32.vlgmr.msra.gmra.mrb[70].mxu1 %v18945_v6  ;;  %v2715_v6 = vld [vmem:[%s16147_s24 + $0x49b0] sm:$0xff]  ;;  %v15427_v21 = vpack.c.bf16 %v2666_v2, %v2665_v15  ;;  %v2721_v0 = vld [vmem:[%s16147_s24 + $0x49e0] sm:$0xff] }
 0x4c1   : > { %15452 = vmatpush3.bf16.msra.mxu1 %v15451_v48  ;;  %15422 = vmatprep.subr.bf16.mxu0 %v15421_v52  ;;  %v15461_v29 = vpack.c.bf16 %v2716_v8, %v2715_v6  ;;  %v2722_v48 = vld [vmem:[%s16147_s24 + $0x49e8] sm:$0xff]  ;;  %v15439_v52 = vpack.c.bf16 %v2672_v51, %v2671_v50  ;;  %v2675_v6 = vld [vmem:[%s16147_s24 + $0x4870] sm:$0xff]  ;;  %v2676_v8 = vld [vmem:[%s16147_s24 + $0x4878] sm:$0xff] }
 0x4c2   : > { %15454 = vmatprep.subr.bf16.mxu1 %v15453_v55  ;;  %9073 = vmatprep.mubr.f32.mxu0 %v3714_v60  ;;  %v2674_v55 = vld [vmem:[%s16147_s24 + $0x4868] sm:$0xff]  ;;  %v15473_v59 = vpack.c.bf16 %v2722_v48, %v2721_v0  ;;  %v2728_v50 = vld [vmem:[%s16147_s24 + $0x4a18] sm:$0xff]  ;;  %v2759_v51 = vld [vmem:[%s16147_s24 + $0x4b10] sm:$0xff] }
 0x4c3   : > { %9143 = vmatprep.mubr.f32.mxu1 %v3715_v7  ;;  %v2706_v60 = vld [vmem:[%s16147_s24 + $0x4968] sm:$0xff]  ;;  %v15443_v17 = vpack.c.bf16 %v2674_v55, %v2673_v63  ;;  %v2777_v0 = vld [vmem:[%s16147_s24 + $0x4ba0] sm:$0xff]  ;;  %v15489_v63 = vpack.c.bf16 %v2746_v44, %v2745_v42 }
 0x4c4   : > { %15424 = vmatpush3.bf16.msra.mxu0 %v15423_v9  ;;  %v15475_v5 = vpack.c.bf16 %v2706_v60, %v2705_v1  ;;  %v2778_v48 = vld [vmem:[%s16147_s24 + $0x4ba8] sm:$0xff]  ;;  %v2729_v55 = vld [vmem:[%s16147_s24 + $0x4a20] sm:$0xff]  ;;  %v2747_v60 = vld [vmem:[%s16147_s24 + $0x4ab0] sm:$0xff] }
 0x4c5   : > { %15456 = vmatpush3.bf16.msra.mxu1 %v15455_v10  ;;  %15426 = vmatprep.subr.bf16.mxu0 %v15425_v11  ;;  %v2723_v10 = vld [vmem:[%s16147_s24 + $0x49f0] sm:$0xff]  ;;  %v2724_v11 = vld [vmem:[%s16147_s24 + $0x49f8] sm:$0xff]  ;;  %v2761_v1 = vld [vmem:[%s16147_s24 + $0x4b20] sm:$0xff] }
 0x4c6   : > { %15458 = vmatprep.subr.bf16.mxu1 %v15457_v3  ;;  %v352_v3 = vld [vmem:[%s16157_s19 + $0x128] sm:$0xff] }
 0x4c7   : > { %v3716_v19 = vcombine.high %v352_v3, %v352_v3  ;;  %v19100_v41 = vrot.slane %v352_v3, %v16210_v14  ;;  %v2764_v3 = vld [vmem:[%s16147_s24 + $0x4b38] sm:$0xff] }
 0x4c8   : > { %15428 = vmatpush3.bf16.msra.mxu0 %v15427_v21  ;;  %v2707_v21 = vld [vmem:[%s16147_s24 + $0x4970] sm:$0xff] }
 0x4c9   : > { %15460 = vmatpush3.bf16.msra.mxu1 %v15459_v24  ;;  %15430 = vmatprep.subr.bf16.mxu0 %v15429_v25  ;;  %v15477_v25 = vpack.c.bf16 %v2724_v11, %v2723_v10  ;;  %v15479_v40 = vpack.c.bf16 %v2708_v22, %v2707_v21  ;;  %v19105_v47 = vrot.slane %v3716_v19, %v16210_v14  ;;  %v2731_v11 = vld [vmem:[%s16147_s24 + $0x4a30] sm:$0xff]  ;;  %v2734_v22 = vld [vmem:[%s16147_s24 + $0x4a48] sm:$0xff]  ;;  %v2752_v19 = vld [vmem:[%s16147_s24 + $0x4ad8] sm:$0xff] }
 0x4ca   : > { %15462 = vmatprep.subr.bf16.mxu1 %v15461_v29  ;;  %v2773_v29 = vld [vmem:[%s16147_s24 + $0x4b80] sm:$0xff]  ;;  %v3731_v45 = vcombine.high %v19100_v41, %v19100_v41  ;;  %v15493_v10 = vpack.c.bf16 %v2748_v13, %v2747_v60 }
 0x4cb   : > { %v15513_v43 = vpack.c.bf16 %v2774_v18, %v2773_v29  ;;  %v2766_v29 = vld [vmem:[%s16147_s24 + $0x4b48] sm:$0xff]  ;;  %v2751_v18 = vld [vmem:[%s16147_s24 + $0x4ad0] sm:$0xff] }
 0x4cc   : > { %15432 = vmatpush3.bf16.msra.mxu0 %v15431_v23  ;;  %v2725_v23 = vld [vmem:[%s16147_s24 + $0x4a00] sm:$0xff] }
 0x4cd   : > { %15464 = vmatpush3.bf16.msra.mxu1 %v15463_v36  ;;  %15434 = vmatprep.subr.bf16.mxu0 %v15433_v38  ;;  %v2726_v36 = vld [vmem:[%s16147_s24 + $0x4a08] sm:$0xff]  ;;  %v2757_v38 = vld [vmem:[%s16147_s24 + $0x4b00] sm:$0xff] }
 0x4ce   : > { %15466 = vmatprep.subr.bf16.mxu1 %v15465_v30  ;;  %v2744_v30 = vld [vmem:[%s16147_s24 + $0x4a98] sm:$0xff]  ;;  %v15483_v54 = vpack.c.bf16 %v2726_v36, %v2725_v23  ;;  %v15531_v23 = vpack.c.bf16 %v2766_v29, %v2765_v28  ;;  %v15501_v36 = vpack.c.bf16 %v2752_v19, %v2751_v18  ;;  %v2807_v28 = vld [vmem:[%s16147_s24 + $0x4c90] sm:$0xff] }
 0x4cf   : > { %v2839_v18 = vld [vmem:[%s16147_s24 + $0x4d90] sm:$0xff]  ;;  %v2840_v19 = vld [vmem:[%s16147_s24 + $0x4d98] sm:$0xff] }
 0x4d0   : > { %15436 = vmatpush3.bf16.msra.mxu0 %v15435_v35  ;;  %v15515_v35 = vpack.c.bf16 %v2758_v26, %v2757_v38  ;;  %v2735_v38 = vld [vmem:[%s16147_s24 + $0x4a50] sm:$0xff] }
 0x4d1   : > { %15468 = vmatpush3.bf16.msra.mxu1 %v15467_v37  ;;  %15438 = vmatprep.subr.bf16.mxu0 %v15437_v49  ;;  %v15485_v37 = vpack.c.bf16 %v2744_v30, %v2743_v53  ;;  %v2727_v49 = vld [vmem:[%s16147_s24 + $0x4a10] sm:$0xff]  ;;  %v2768_v30 = vld [vmem:[%s16147_s24 + $0x4b58] sm:$0xff] }
 0x4d2   : > { %v12191_v57 = vpop.f32.mrb[58].mxu0  ;;  %15470 = vmatprep.subr.bf16.mxu1 %v15469_v34  ;;  %v2760_v34 = vld [vmem:[%s16147_s24 + $0x4b18] sm:$0xff]  ;;  %v2767_v26 = vld [vmem:[%s16147_s24 + $0x4b50] sm:$0xff] }
 0x4d3   : > { %v12192_v7 = vpop.f32.mrb[59].mxu0  ;;  %v12226_v9 = vpop.f32.mrb[58].mxu1 }
 0x4d4   : > { %v12193_v15 = vadd.f32 %v12192_v7, %v12191_v57  ;;  %15440 = vmatpush3.bf16.msra.mxu0 %v15439_v52  ;;  %v12227_v2 = vpop.f32.mrb[59].mxu1  ;;  %v3732_v52 = vcombine.high %v19105_v47, %v19105_v47  ;;  %v15521_v57 = vpack.c.bf16 %v2778_v48, %v2777_v0  ;;  %v2755_v0 = vld [vmem:[%s16147_s24 + $0x4af0] sm:$0xff]  ;;  %v2756_v48 = vld [vmem:[%s16147_s24 + $0x4af8] sm:$0xff] }
 0x4d5   : > { %v12228_v4 = vadd.f32 %v12227_v2, %v12226_v9  ;;  %15472 = vmatpush3.bf16.msra.mxu1 %v15471_v46  ;;  %15442 = vmatprep.subr.bf16.mxu0 %v15441_v62  ;;  %v15487_v46 = vpack.c.bf16 %v2728_v50, %v2727_v49  ;;  %v15519_v62 = vpack.c.bf16 %v2760_v34, %v2759_v51  ;;  %v2763_v2 = vld [vmem:[%s16147_s24 + $0x4b30] sm:$0xff]  ;;  %v2737_v51 = vld [vmem:[%s16147_s24 + $0x4a60] sm:$0xff] }
 0x4d6   : > { %v8096_v24 = vadd.f32 %v12193_v15, %v19011_v33  ;;  %15474 = vmatprep.subr.bf16.mxu1 %v15473_v59  ;;  %v15447_v33 = vpack.c.bf16 %v2676_v8, %v2675_v6  ;;  %v2762_v59 = vld [vmem:[%s16147_s24 + $0x4b28] sm:$0xff]  ;;  %v2732_v15 = vld [vmem:[%s16147_s24 + $0x4a38] sm:$0xff]  ;;  %v15527_v21 = vpack.c.bf16 %v2764_v3, %v2763_v2  ;;  %v15535_v49 = vpack.c.bf16 %v2768_v30, %v2767_v26  ;;  %v2769_v34 = vld [vmem:[%s16147_s24 + $0x4b60] sm:$0xff] }
 0x4d7   : > { %v15523_v9 = vpack.c.bf16 %v2762_v59, %v2761_v1  ;;  %v2782_v6 = vld [vmem:[%s16147_s24 + $0x4bc8] sm:$0xff]  ;;  %v15495_v8 = vpack.c.bf16 %v2732_v15, %v2731_v11  ;;  %v15505_v50 = vpack.c.bf16 %v2754_v32, %v2753_v31  ;;  %v15509_v13 = vpack.c.bf16 %v2756_v48, %v2755_v0  ;;  %v2772_v11 = vld [vmem:[%s16147_s24 + $0x4b78] sm:$0xff]  ;;  %v2805_v15 = vld [vmem:[%s16147_s24 + $0x4c80] sm:$0xff] }
 0x4d8   : > { %v19091_v16 = vadd.f32 %v12228_v4, %v8096_v24  ;;  %15444 = vmatpush3.bf16.msra.mxu0 %v15443_v17  ;;  %v2749_v4 = vld [vmem:[%s16147_s24 + $0x4ac0] sm:$0xff]  ;;  %v2806_v2 = vld [vmem:[%s16147_s24 + $0x4c88] sm:$0xff]  ;;  %v15581_v26 = vpack.c.bf16 %v2840_v19, %v2839_v18  ;;  %v2812_v0 = vld [vmem:[%s16147_s24 + $0x4cb8] sm:$0xff] }
 0x4d9   : > { %15476 = vmatpush3.bf16.msra.mxu1 %v15475_v5  ;;  %15446 = vmatprep.subr.bf16.mxu0 %v15445_v27  ;;  %v2750_v5 = vld [vmem:[%s16147_s24 + $0x4ac8] sm:$0xff]  ;;  %v2781_v27 = vld [vmem:[%s16147_s24 + $0x4bc0] sm:$0xff]  ;;  %v2844_v48 = vld [vmem:[%s16147_s24 + $0x4db8] sm:$0xff] }
 0x4da   : > { %15478 = vmatprep.subr.bf16.mxu1 %v15477_v25  ;;  %v15497_v24 = vpack.c.bf16 %v2750_v5, %v2749_v4  ;;  %v2733_v25 = vld [vmem:[%s16147_s24 + $0x4a40] sm:$0xff]  ;;  %v15529_v12 = vpack.c.bf16 %v2782_v6, %v2781_v27  ;;  %v2838_v3 = vld [vmem:[%s16147_s24 + $0x4d88] sm:$0xff]  ;;  %v15545_v6 = vpack.c.bf16 %v2806_v2, %v2805_v15 }
 0x4db   : > { %v2809_v30 = vld [vmem:[%s16147_s24 + $0x4ca0] sm:$0xff]  ;;  %v2810_v31 = vld [vmem:[%s16147_s24 + $0x4ca8] sm:$0xff] }
 0x4dc   : > { %15448 = vmatpush3.bf16.msra.mxu0 %v15447_v33  ;;  %v2783_v33 = vld [vmem:[%s16147_s24 + $0x4bd0] sm:$0xff]  ;;  %v2829_v15 = vld [vmem:[%s16147_s24 + $0x4d40] sm:$0xff]  ;;  %v2818_v19 = vld [vmem:[%s16147_s24 + $0x4ce8] sm:$0xff] }
 0x4dd   : > { %15480 = vmatpush3.bf16.msra.mxu1 %v15479_v40  ;;  %15482 = vmatprep.subr.bf16.mxu0 %v15481_v20  ;;  %v2784_v40 = vld [vmem:[%s16147_s24 + $0x4bd8] sm:$0xff]  ;;  %v15499_v20 = vpack.c.bf16 %v2734_v22, %v2733_v25  ;;  %v2822_v22 = vld [vmem:[%s16147_s24 + $0x4d08] sm:$0xff]  ;;  %v2817_v18 = vld [vmem:[%s16147_s24 + $0x4ce0] sm:$0xff] }
 0x4de   : > { %15514 = vmatprep.subr.bf16.mxu1 %v15513_v43  ;;  %v2736_v43 = vld [vmem:[%s16147_s24 + $0x4a58] sm:$0xff]  ;;  %v15533_v53 = vpack.c.bf16 %v2784_v40, %v2783_v33 }
 0x4df   : > { %9074 = vmatmul.mubr.f32.vlgmr.msra.gmra.mrb[72].mxu0 %v19020_v56  ;;  %v2730_v56 = vld [vmem:[%s16147_s24 + $0x4a28] sm:$0xff] }
 0x4e0   : > { %15484 = vmatpush3.bf16.msra.mxu0 %v15483_v54  ;;  %9144 = vmatmul.mubr.f32.vlgmr.msra.gmra.mrb[72].mxu1 %v19025_v61  ;;  %v2779_v61 = vld [vmem:[%s16147_s24 + $0x4bb0] sm:$0xff]  ;;  %v15491_v7 = vpack.c.bf16 %v2730_v56, %v2729_v55  ;;  %v2785_v54 = vld [vmem:[%s16147_s24 + $0x4be0] sm:$0xff] }
 0x4e1   : > { %15516 = vmatpush3.bf16.msra.mxu1 %v15515_v35  ;;  %15486 = vmatprep.subr.bf16.mxu0 %v15485_v37  ;;  %v15525_v17 = vpack.c.bf16 %v2780_v58, %v2779_v61  ;;  %v2786_v35 = vld [vmem:[%s16147_s24 + $0x4be8] sm:$0xff]  ;;  %v15503_v37 = vpack.c.bf16 %v2736_v43, %v2735_v38  ;;  %v2739_v61 = vld [vmem:[%s16147_s24 + $0x4a70] sm:$0xff]  ;;  %v2740_v58 = vld [vmem:[%s16147_s24 + $0x4a78] sm:$0xff] }
 0x4e2   : > { %15518 = vmatprep.subr.bf16.mxu1 %v15517_v39  ;;  %9213 = vmatprep.mubr.f32.mxu0 %v3731_v45  ;;  %v2738_v39 = vld [vmem:[%s16147_s24 + $0x4a68] sm:$0xff]  ;;  %v15537_v44 = vpack.c.bf16 %v2786_v35, %v2785_v54  ;;  %v2792_v38 = vld [vmem:[%s16147_s24 + $0x4c18] sm:$0xff]  ;;  %v2823_v43 = vld [vmem:[%s16147_s24 + $0x4d10] sm:$0xff] }
 0x4e3   : > { %9283 = vmatprep.mubr.f32.mxu1 %v3732_v52  ;;  %v2770_v45 = vld [vmem:[%s16147_s24 + $0x4b68] sm:$0xff]  ;;  %v15507_v1 = vpack.c.bf16 %v2738_v39, %v2737_v51  ;;  %v2841_v54 = vld [vmem:[%s16147_s24 + $0x4da0] sm:$0xff]  ;;  %v15553_v51 = vpack.c.bf16 %v2810_v31, %v2809_v30 }
 0x4e4   : > { %15488 = vmatpush3.bf16.msra.mxu0 %v15487_v46  ;;  %v15539_v60 = vpack.c.bf16 %v2770_v45, %v2769_v34  ;;  %v2842_v35 = vld [vmem:[%s16147_s24 + $0x4da8] sm:$0xff]  ;;  %v2793_v39 = vld [vmem:[%s16147_s24 + $0x4c20] sm:$0xff]  ;;  %v2811_v45 = vld [vmem:[%s16147_s24 + $0x4cb0] sm:$0xff] }
 0x4e5   : > { %15520 = vmatpush3.bf16.msra.mxu1 %v15519_v62  ;;  %15490 = vmatprep.subr.bf16.mxu0 %v15489_v63  ;;  %v2787_v62 = vld [vmem:[%s16147_s24 + $0x4bf0] sm:$0xff]  ;;  %v2788_v63 = vld [vmem:[%s16147_s24 + $0x4bf8] sm:$0xff]  ;;  %v2825_v34 = vld [vmem:[%s16147_s24 + $0x4d20] sm:$0xff] }
 0x4e6   : > { %15522 = vmatprep.subr.bf16.mxu1 %v15521_v57  ;;  %v353_v57 = vld [vmem:[%s16157_s19 + $0x130] sm:$0xff] }
 0x4e7   : > { %v3733_v4 = vcombine.high %v353_v57, %v353_v57  ;;  %v19180_v29 = vrot.slane %v353_v57, %v16210_v14  ;;  %v2828_v57 = vld [vmem:[%s16147_s24 + $0x4d38] sm:$0xff] }
 0x4e8   : > { %15492 = vmatpush3.bf16.msra.mxu0 %v15491_v7  ;;  %v2771_v7 = vld [vmem:[%s16147_s24 + $0x4b70] sm:$0xff] }
 0x4e9   : > { %15524 = vmatpush3.bf16.msra.mxu1 %v15523_v9  ;;  %15494 = vmatprep.subr.bf16.mxu0 %v15493_v10  ;;  %v15541_v10 = vpack.c.bf16 %v2788_v63, %v2787_v62  ;;  %v15543_v27 = vpack.c.bf16 %v2772_v11, %v2771_v7  ;;  %v19185_v33 = vrot.slane %v3733_v4, %v16210_v14  ;;  %v2795_v63 = vld [vmem:[%s16147_s24 + $0x4c30] sm:$0xff]  ;;  %v2798_v11 = vld [vmem:[%s16147_s24 + $0x4c48] sm:$0xff]  ;;  %v2816_v4 = vld [vmem:[%s16147_s24 + $0x4cd8] sm:$0xff] }
 0x4ea   : > { %15526 = vmatprep.subr.bf16.mxu1 %v15525_v17  ;;  %v2837_v17 = vld [vmem:[%s16147_s24 + $0x4d80] sm:$0xff]  ;;  %v3748_v32 = vcombine.high %v19180_v29, %v19180_v29  ;;  %v15557_v62 = vpack.c.bf16 %v2812_v0, %v2811_v45 }
 0x4eb   : > { %v15577_v25 = vpack.c.bf16 %v2838_v3, %v2837_v17  ;;  %v2830_v17 = vld [vmem:[%s16147_s24 + $0x4d48] sm:$0xff]  ;;  %v2815_v3 = vld [vmem:[%s16147_s24 + $0x4cd0] sm:$0xff] }
 0x4ec   : > { %15496 = vmatpush3.bf16.msra.mxu0 %v15495_v8  ;;  %v2789_v8 = vld [vmem:[%s16147_s24 + $0x4c00] sm:$0xff] }
 0x4ed   : > { %15528 = vmatpush3.bf16.msra.mxu1 %v15527_v21  ;;  %15498 = vmatprep.subr.bf16.mxu0 %v15497_v24  ;;  %v2790_v21 = vld [vmem:[%s16147_s24 + $0x4c08] sm:$0xff]  ;;  %v2821_v24 = vld [vmem:[%s16147_s24 + $0x4d00] sm:$0xff] }
 0x4ee   : > { %15530 = vmatprep.subr.bf16.mxu1 %v15529_v12  ;;  %v2808_v12 = vld [vmem:[%s16147_s24 + $0x4c98] sm:$0xff]  ;;  %v15547_v40 = vpack.c.bf16 %v2790_v21, %v2789_v8  ;;  %v15595_v8 = vpack.c.bf16 %v2830_v17, %v2829_v15  ;;  %v15565_v21 = vpack.c.bf16 %v2816_v4, %v2815_v3  ;;  %v2871_v15 = vld [vmem:[%s16147_s24 + $0x4e90] sm:$0xff] }
 0x4ef   : > { %v2903_v3 = vld [vmem:[%s16147_s24 + $0x4f90] sm:$0xff]  ;;  %v2904_v4 = vld [vmem:[%s16147_s24 + $0x4f98] sm:$0xff] }
 0x4f0   : > { %15500 = vmatpush3.bf16.msra.mxu0 %v15499_v20  ;;  %v15579_v20 = vpack.c.bf16 %v2822_v22, %v2821_v24  ;;  %v2799_v24 = vld [vmem:[%s16147_s24 + $0x4c50] sm:$0xff] }
 0x4f1   : > { %15532 = vmatpush3.bf16.msra.mxu1 %v15531_v23  ;;  %15502 = vmatprep.subr.bf16.mxu0 %v15501_v36  ;;  %v15549_v23 = vpack.c.bf16 %v2808_v12, %v2807_v28  ;;  %v2791_v36 = vld [vmem:[%s16147_s24 + $0x4c10] sm:$0xff]  ;;  %v2832_v12 = vld [vmem:[%s16147_s24 + $0x4d58] sm:$0xff] }
 0x4f2   : > { %v12261_v42 = vpop.f32.mrb[60].mxu0  ;;  %15534 = vmatprep.subr.bf16.mxu1 %v15533_v53  ;;  %v2824_v53 = vld [vmem:[%s16147_s24 + $0x4d18] sm:$0xff]  ;;  %v2831_v22 = vld [vmem:[%s16147_s24 + $0x4d50] sm:$0xff] }
 0x4f3   : > { %v12262_v52 = vpop.f32.mrb[61].mxu0  ;;  %v12296_v46 = vpop.f32.mrb[60].mxu1 }
 0x4f4   : > { %v12263_v55 = vadd.f32 %v12262_v52, %v12261_v42  ;;  %15504 = vmatpush3.bf16.msra.mxu0 %v15503_v37  ;;  %v12297_v56 = vpop.f32.mrb[61].mxu1  ;;  %v3749_v37 = vcombine.high %v19185_v33, %v19185_v33  ;;  %v15585_v42 = vpack.c.bf16 %v2842_v35, %v2841_v54  ;;  %v2819_v54 = vld [vmem:[%s16147_s24 + $0x4cf0] sm:$0xff]  ;;  %v2820_v35 = vld [vmem:[%s16147_s24 + $0x4cf8] sm:$0xff] }
 0x4f5   : > { %v12298_v59 = vadd.f32 %v12297_v56, %v12296_v46  ;;  %15536 = vmatpush3.bf16.msra.mxu1 %v15535_v49  ;;  %15506 = vmatprep.subr.bf16.mxu0 %v15505_v50  ;;  %v15551_v49 = vpack.c.bf16 %v2792_v38, %v2791_v36  ;;  %v15583_v50 = vpack.c.bf16 %v2824_v53, %v2823_v43  ;;  %v2827_v56 = vld [vmem:[%s16147_s24 + $0x4d30] sm:$0xff]  ;;  %v2801_v43 = vld [vmem:[%s16147_s24 + $0x4c60] sm:$0xff] }
 0x4f6   : > { %v8236_v9 = vadd.f32 %v12263_v55, %v19091_v16  ;;  %15538 = vmatprep.subr.bf16.mxu1 %v15537_v44  ;;  %v15511_v16 = vpack.c.bf16 %v2740_v58, %v2739_v61  ;;  %v2826_v44 = vld [vmem:[%s16147_s24 + $0x4d28] sm:$0xff]  ;;  %v2796_v55 = vld [vmem:[%s16147_s24 + $0x4c38] sm:$0xff]  ;;  %v15591_v7 = vpack.c.bf16 %v2828_v57, %v2827_v56  ;;  %v15599_v36 = vpack.c.bf16 %v2832_v12, %v2831_v22  ;;  %v2833_v53 = vld [vmem:[%s16147_s24 + $0x4d60] sm:$0xff] }
 0x4f7   : > { %v15587_v46 = vpack.c.bf16 %v2826_v44, %v2825_v34  ;;  %v2846_v61 = vld [vmem:[%s16147_s24 + $0x4dc8] sm:$0xff]  ;;  %v15559_v58 = vpack.c.bf16 %v2796_v55, %v2795_v63  ;;  %v15569_v38 = vpack.c.bf16 %v2818_v19, %v2817_v18  ;;  %v15573_v0 = vpack.c.bf16 %v2820_v35, %v2819_v54  ;;  %v2836_v63 = vld [vmem:[%s16147_s24 + $0x4d78] sm:$0xff]  ;;  %v2869_v55 = vld [vmem:[%s16147_s24 + $0x4e80] sm:$0xff] }
 0x4f8   : > { %v19171_v5 = vadd.f32 %v12298_v59, %v8236_v9  ;;  %15508 = vmatpush3.bf16.msra.mxu0 %v15507_v1  ;;  %v2813_v59 = vld [vmem:[%s16147_s24 + $0x4cc0] sm:$0xff]  ;;  %v2870_v56 = vld [vmem:[%s16147_s24 + $0x4e88] sm:$0xff]  ;;  %v15645_v22 = vpack.c.bf16 %v2904_v4, %v2903_v3  ;;  %v2876_v54 = vld [vmem:[%s16147_s24 + $0x4eb8] sm:$0xff] }
 0x4f9   : > { %15540 = vmatpush3.bf16.msra.mxu1 %v15539_v60  ;;  %15510 = vmatprep.subr.bf16.mxu0 %v15509_v13  ;;  %v2814_v60 = vld [vmem:[%s16147_s24 + $0x4cc8] sm:$0xff]  ;;  %v2845_v13 = vld [vmem:[%s16147_s24 + $0x4dc0] sm:$0xff]  ;;  %v2908_v35 = vld [vmem:[%s16147_s24 + $0x4fb8] sm:$0xff] }
 0x4fa   : > { %15542 = vmatprep.subr.bf16.mxu1 %v15541_v10  ;;  %v15561_v9 = vpack.c.bf16 %v2814_v60, %v2813_v59  ;;  %v2797_v10 = vld [vmem:[%s16147_s24 + $0x4c40] sm:$0xff]  ;;  %v15593_v2 = vpack.c.bf16 %v2846_v61, %v2845_v13  ;;  %v2902_v57 = vld [vmem:[%s16147_s24 + $0x4f88] sm:$0xff]  ;;  %v15609_v61 = vpack.c.bf16 %v2870_v56, %v2869_v55 }
 0x4fb   : > { %v2873_v12 = vld [vmem:[%s16147_s24 + $0x4ea0] sm:$0xff]  ;;  %v2874_v18 = vld [vmem:[%s16147_s24 + $0x4ea8] sm:$0xff] }
 0x4fc   : > { %15512 = vmatpush3.bf16.msra.mxu0 %v15511_v16  ;;  %v2847_v16 = vld [vmem:[%s16147_s24 + $0x4dd0] sm:$0xff]  ;;  %v2893_v55 = vld [vmem:[%s16147_s24 + $0x4f40] sm:$0xff]  ;;  %v2882_v4 = vld [vmem:[%s16147_s24 + $0x4ee8] sm:$0xff] }
 0x4fd   : > { %15544 = vmatpush3.bf16.msra.mxu1 %v15543_v27  ;;  %15546 = vmatprep.subr.bf16.mxu0 %v15545_v6  ;;  %v2848_v27 = vld [vmem:[%s16147_s24 + $0x4dd8] sm:$0xff]  ;;  %v15563_v6 = vpack.c.bf16 %v2798_v11, %v2797_v10  ;;  %v2886_v11 = vld [vmem:[%s16147_s24 + $0x4f08] sm:$0xff]  ;;  %v2881_v3 = vld [vmem:[%s16147_s24 + $0x4ee0] sm:$0xff] }
 0x4fe   : > { %15578 = vmatprep.subr.bf16.mxu1 %v15577_v25  ;;  %v2800_v25 = vld [vmem:[%s16147_s24 + $0x4c58] sm:$0xff]  ;;  %v15597_v28 = vpack.c.bf16 %v2848_v27, %v2847_v16 }
 0x4ff   : > { %9214 = vmatmul.mubr.f32.vlgmr.msra.gmra.mrb[74].mxu0 %v19100_v41  ;;  %v2794_v41 = vld [vmem:[%s16147_s24 + $0x4c28] sm:$0xff] }
 0x500   : > { %15548 = vmatpush3.bf16.msra.mxu0 %v15547_v40  ;;  %9284 = vmatmul.mubr.f32.vlgmr.msra.gmra.mrb[74].mxu1 %v19105_v47  ;;  %v2843_v47 = vld [vmem:[%s16147_s24 + $0x4db0] sm:$0xff]  ;;  %v15555_v52 = vpack.c.bf16 %v2794_v41, %v2793_v39  ;;  %v2849_v40 = vld [vmem:[%s16147_s24 + $0x4de0] sm:$0xff] }
 0x501   : > { %15580 = vmatpush3.bf16.msra.mxu1 %v15579_v20  ;;  %15550 = vmatprep.subr.bf16.mxu0 %v15549_v23  ;;  %v15589_v1 = vpack.c.bf16 %v2844_v48, %v2843_v47  ;;  %v2850_v20 = vld [vmem:[%s16147_s24 + $0x4de8] sm:$0xff]  ;;  %v15567_v23 = vpack.c.bf16 %v2800_v25, %v2799_v24  ;;  %v2803_v47 = vld [vmem:[%s16147_s24 + $0x4c70] sm:$0xff]  ;;  %v2804_v48 = vld [vmem:[%s16147_s24 + $0x4c78] sm:$0xff] }
 0x502   : > { %15582 = vmatprep.subr.bf16.mxu1 %v15581_v26  ;;  %9353 = vmatprep.mubr.f32.mxu0 %v3748_v32  ;;  %v2802_v26 = vld [vmem:[%s16147_s24 + $0x4c68] sm:$0xff]  ;;  %v15601_v31 = vpack.c.bf16 %v2850_v20, %v2849_v40  ;;  %v2856_v24 = vld [vmem:[%s16147_s24 + $0x4e18] sm:$0xff]  ;;  %v2887_v25 = vld [vmem:[%s16147_s24 + $0x4f10] sm:$0xff] }
 0x503   : > { %9423 = vmatprep.mubr.f32.mxu1 %v3749_v37  ;;  %v2834_v32 = vld [vmem:[%s16147_s24 + $0x4d68] sm:$0xff]  ;;  %v15571_v34 = vpack.c.bf16 %v2802_v26, %v2801_v43  ;;  %v2905_v40 = vld [vmem:[%s16147_s24 + $0x4fa0] sm:$0xff]  ;;  %v15617_v43 = vpack.c.bf16 %v2874_v18, %v2873_v12 }
 0x504   : > { %15552 = vmatpush3.bf16.msra.mxu0 %v15551_v49  ;;  %v15603_v45 = vpack.c.bf16 %v2834_v32, %v2833_v53  ;;  %v2906_v20 = vld [vmem:[%s16147_s24 + $0x4fa8] sm:$0xff]  ;;  %v2857_v26 = vld [vmem:[%s16147_s24 + $0x4e20] sm:$0xff]  ;;  %v2875_v32 = vld [vmem:[%s16147_s24 + $0x4eb0] sm:$0xff] }
 0x505   : > { %15584 = vmatpush3.bf16.msra.mxu1 %v15583_v50  ;;  %15554 = vmatprep.subr.bf16.mxu0 %v15553_v51  ;;  %v2851_v50 = vld [vmem:[%s16147_s24 + $0x4df0] sm:$0xff]  ;;  %v2852_v51 = vld [vmem:[%s16147_s24 + $0x4df8] sm:$0xff]  ;;  %v2889_v53 = vld [vmem:[%s16147_s24 + $0x4f20] sm:$0xff] }
 0x506   : > { %15586 = vmatprep.subr.bf16.mxu1 %v15585_v42  ;;  %v354_v42 = vld [vmem:[%s16157_s19 + $0x138] sm:$0xff] }
 0x507   : > { %v3750_v59 = vcombine.high %v354_v42, %v354_v42  ;;  %v19260_v17 = vrot.slane %v354_v42, %v16210_v14  ;;  %v2892_v42 = vld [vmem:[%s16147_s24 + $0x4f38] sm:$0xff] }
 0x508   : > { %15556 = vmatpush3.bf16.msra.mxu0 %v15555_v52  ;;  %v2835_v52 = vld [vmem:[%s16147_s24 + $0x4d70] sm:$0xff] }
 0x509   : > { %15588 = vmatpush3.bf16.msra.mxu1 %v15587_v46  ;;  %15558 = vmatprep.subr.bf16.mxu0 %v15557_v62  ;;  %v15605_v62 = vpack.c.bf16 %v2852_v51, %v2851_v50  ;;  %v15607_v13 = vpack.c.bf16 %v2836_v63, %v2835_v52  ;;  %v19265_v16 = vrot.slane %v3750_v59, %v16210_v14  ;;  %v2859_v51 = vld [vmem:[%s16147_s24 + $0x4e30] sm:$0xff]  ;;  %v2862_v63 = vld [vmem:[%s16147_s24 + $0x4e48] sm:$0xff]  ;;  %v2880_v59 = vld [vmem:[%s16147_s24 + $0x4ed8] sm:$0xff] }
 0x50a   : > { %15590 = vmatprep.subr.bf16.mxu1 %v15589_v1  ;;  %v2901_v1 = vld [vmem:[%s16147_s24 + $0x4f80] sm:$0xff]  ;;  %v3765_v19 = vcombine.high %v19260_v17, %v19260_v17  ;;  %v15621_v50 = vpack.c.bf16 %v2876_v54, %v2875_v32 }
 0x50b   : > { %v15641_v10 = vpack.c.bf16 %v2902_v57, %v2901_v1  ;;  %v2894_v1 = vld [vmem:[%s16147_s24 + $0x4f48] sm:$0xff]  ;;  %v2879_v57 = vld [vmem:[%s16147_s24 + $0x4ed0] sm:$0xff] }
 0x50c   : > { %15560 = vmatpush3.bf16.msra.mxu0 %v15559_v58  ;;  %v2853_v58 = vld [vmem:[%s16147_s24 + $0x4e00] sm:$0xff] }
 0x50d   : > { %15592 = vmatpush3.bf16.msra.mxu1 %v15591_v7  ;;  %15562 = vmatprep.subr.bf16.mxu0 %v15561_v9  ;;  %v2854_v7 = vld [vmem:[%s16147_s24 + $0x4e08] sm:$0xff]  ;;  %v2885_v9 = vld [vmem:[%s16147_s24 + $0x4f00] sm:$0xff] }
 0x50e   : > { %15594 = vmatprep.subr.bf16.mxu1 %v15593_v2  ;;  %v2872_v2 = vld [vmem:[%s16147_s24 + $0x4e98] sm:$0xff]  ;;  %v15611_v27 = vpack.c.bf16 %v2854_v7, %v2853_v58  ;;  %v15659_v58 = vpack.c.bf16 %v2894_v1, %v2893_v55  ;;  %v15629_v7 = vpack.c.bf16 %v2880_v59, %v2879_v57  ;;  %v2935_v55 = vld [vmem:[%s16147_s24 + $0x5090] sm:$0xff] }
 0x50f   : > { %v2967_v57 = vld [vmem:[%s16147_s24 + $0x5190] sm:$0xff]  ;;  %v2968_v59 = vld [vmem:[%s16147_s24 + $0x5198] sm:$0xff] }
 0x510   : > { %15564 = vmatpush3.bf16.msra.mxu0 %v15563_v6  ;;  %v15643_v6 = vpack.c.bf16 %v2886_v11, %v2885_v9  ;;  %v2863_v9 = vld [vmem:[%s16147_s24 + $0x4e50] sm:$0xff] }
 0x511   : > { %15596 = vmatpush3.bf16.msra.mxu1 %v15595_v8  ;;  %15566 = vmatprep.subr.bf16.mxu0 %v15565_v21  ;;  %v15613_v8 = vpack.c.bf16 %v2872_v2, %v2871_v15  ;;  %v2855_v21 = vld [vmem:[%s16147_s24 + $0x4e10] sm:$0xff]  ;;  %v2896_v2 = vld [vmem:[%s16147_s24 + $0x4f58] sm:$0xff] }
 0x512   : > { %v12331_v30 = vpop.f32.mrb[62].mxu0  ;;  %15598 = vmatprep.subr.bf16.mxu1 %v15597_v28  ;;  %v2888_v28 = vld [vmem:[%s16147_s24 + $0x4f18] sm:$0xff]  ;;  %v2895_v11 = vld [vmem:[%s16147_s24 + $0x4f50] sm:$0xff] }
 0x513   : > { %v12332_v37 = vpop.f32.mrb[63].mxu0  ;;  %v12366_v49 = vpop.f32.mrb[62].mxu1 }
 0x514   : > { %v12333_v39 = vadd.f32 %v12332_v37, %v12331_v30  ;;  %15568 = vmatpush3.bf16.msra.mxu0 %v15567_v23  ;;  %v12367_v41 = vpop.f32.mrb[63].mxu1  ;;  %v3766_v23 = vcombine.high %v19265_v16, %v19265_v16  ;;  %v15649_v30 = vpack.c.bf16 %v2906_v20, %v2905_v40  ;;  %v2883_v40 = vld [vmem:[%s16147_s24 + $0x4ef0] sm:$0xff]  ;;  %v2884_v20 = vld [vmem:[%s16147_s24 + $0x4ef8] sm:$0xff] }
 0x515   : > { %v12368_v44 = vadd.f32 %v12367_v41, %v12366_v49  ;;  %15600 = vmatpush3.bf16.msra.mxu1 %v15599_v36  ;;  %15570 = vmatprep.subr.bf16.mxu0 %v15569_v38  ;;  %v15615_v36 = vpack.c.bf16 %v2856_v24, %v2855_v21  ;;  %v15647_v38 = vpack.c.bf16 %v2888_v28, %v2887_v25  ;;  %v2891_v41 = vld [vmem:[%s16147_s24 + $0x4f30] sm:$0xff]  ;;  %v2865_v25 = vld [vmem:[%s16147_s24 + $0x4e60] sm:$0xff] }
 0x516   : > { %v8376_v46 = vadd.f32 %v12333_v39, %v19171_v5  ;;  %15602 = vmatprep.subr.bf16.mxu1 %v15601_v31  ;;  %v15575_v5 = vpack.c.bf16 %v2804_v48, %v2803_v47  ;;  %v2890_v31 = vld [vmem:[%s16147_s24 + $0x4f28] sm:$0xff]  ;;  %v2860_v39 = vld [vmem:[%s16147_s24 + $0x4e38] sm:$0xff]  ;;  %v15655_v52 = vpack.c.bf16 %v2892_v42, %v2891_v41  ;;  %v15663_v21 = vpack.c.bf16 %v2896_v2, %v2895_v11  ;;  %v2897_v28 = vld [vmem:[%s16147_s24 + $0x4f60] sm:$0xff] }
 0x517   : > { %v15651_v49 = vpack.c.bf16 %v2890_v31, %v2889_v53  ;;  %v2910_v47 = vld [vmem:[%s16147_s24 + $0x4fc8] sm:$0xff]  ;;  %v15623_v48 = vpack.c.bf16 %v2860_v39, %v2859_v51  ;;  %v15633_v24 = vpack.c.bf16 %v2882_v4, %v2881_v3  ;;  %v15637_v54 = vpack.c.bf16 %v2884_v20, %v2883_v40  ;;  %v2900_v51 = vld [vmem:[%s16147_s24 + $0x4f78] sm:$0xff]  ;;  %v2933_v39 = vld [vmem:[%s16147_s24 + $0x5080] sm:$0xff] }
 0x518   : > { %v19251_v60 = vadd.f32 %v12368_v44, %v8376_v46  ;;  %15572 = vmatpush3.bf16.msra.mxu0 %v15571_v34  ;;  %v2877_v44 = vld [vmem:[%s16147_s24 + $0x4ec0] sm:$0xff]  ;;  %v2934_v41 = vld [vmem:[%s16147_s24 + $0x5088] sm:$0xff]  ;;  %v15709_v11 = vpack.c.bf16 %v2968_v59, %v2967_v57  ;;  %v2940_v40 = vld [vmem:[%s16147_s24 + $0x50b8] sm:$0xff] }
 0x519   : > { %15604 = vmatpush3.bf16.msra.mxu1 %v15603_v45  ;;  %15574 = vmatprep.subr.bf16.mxu0 %v15573_v0  ;;  %v2878_v45 = vld [vmem:[%s16147_s24 + $0x4ec8] sm:$0xff]  ;;  %v2909_v0 = vld [vmem:[%s16147_s24 + $0x4fc0] sm:$0xff]  ;;  %v2972_v20 = vld [vmem:[%s16147_s24 + $0x51b8] sm:$0xff] }
 0x51a   : > { %15606 = vmatprep.subr.bf16.mxu1 %v15605_v62  ;;  %v15625_v46 = vpack.c.bf16 %v2878_v45, %v2877_v44  ;;  %v2861_v62 = vld [vmem:[%s16147_s24 + $0x4e40] sm:$0xff]  ;;  %v15657_v56 = vpack.c.bf16 %v2910_v47, %v2909_v0  ;;  %v2966_v42 = vld [vmem:[%s16147_s24 + $0x5188] sm:$0xff]  ;;  %v15673_v47 = vpack.c.bf16 %v2934_v41, %v2933_v39 }
 0x51b   : > { %v2937_v2 = vld [vmem:[%s16147_s24 + $0x50a0] sm:$0xff]  ;;  %v2938_v3 = vld [vmem:[%s16147_s24 + $0x50a8] sm:$0xff] }
 0x51c   : > { %15576 = vmatpush3.bf16.msra.mxu0 %v15575_v5  ;;  %v2911_v5 = vld [vmem:[%s16147_s24 + $0x4fd0] sm:$0xff]  ;;  %v2957_v39 = vld [vmem:[%s16147_s24 + $0x5140] sm:$0xff]  ;;  %v2946_v59 = vld [vmem:[%s16147_s24 + $0x50e8] sm:$0xff] }
 0x51d   : > { %15608 = vmatpush3.bf16.msra.mxu1 %v15607_v13  ;;  %15610 = vmatprep.subr.bf16.mxu0 %v15609_v61  ;;  %v2912_v13 = vld [vmem:[%s16147_s24 + $0x4fd8] sm:$0xff]  ;;  %v15627_v61 = vpack.c.bf16 %v2862_v63, %v2861_v62  ;;  %v2950_v63 = vld [vmem:[%s16147_s24 + $0x5108] sm:$0xff]  ;;  %v2945_v57 = vld [vmem:[%s16147_s24 + $0x50e0] sm:$0xff] }
 0x51e   : > { %15642 = vmatprep.subr.bf16.mxu1 %v15641_v10  ;;  %v2864_v10 = vld [vmem:[%s16147_s24 + $0x4e58] sm:$0xff]  ;;  %v15661_v15 = vpack.c.bf16 %v2912_v13, %v2911_v5 }
 0x51f   : > { %9354 = vmatmul.mubr.f32.vlgmr.msra.gmra.mrb[76].mxu0 %v19180_v29  ;;  %v2858_v29 = vld [vmem:[%s16147_s24 + $0x4e28] sm:$0xff] }
 0x520   : > { %15612 = vmatpush3.bf16.msra.mxu0 %v15611_v27  ;;  %9424 = vmatmul.mubr.f32.vlgmr.msra.gmra.mrb[76].mxu1 %v19185_v33  ;;  %v2907_v33 = vld [vmem:[%s16147_s24 + $0x4fb0] sm:$0xff]  ;;  %v15619_v37 = vpack.c.bf16 %v2858_v29, %v2857_v26  ;;  %v2913_v27 = vld [vmem:[%s16147_s24 + $0x4fe0] sm:$0xff] }
 0x521   : > { %15644 = vmatpush3.bf16.msra.mxu1 %v15643_v6  ;;  %15614 = vmatprep.subr.bf16.mxu0 %v15613_v8  ;;  %v15653_v34 = vpack.c.bf16 %v2908_v35, %v2907_v33  ;;  %v2914_v6 = vld [vmem:[%s16147_s24 + $0x4fe8] sm:$0xff]  ;;  %v15631_v8 = vpack.c.bf16 %v2864_v10, %v2863_v9  ;;  %v2867_v33 = vld [vmem:[%s16147_s24 + $0x4e70] sm:$0xff]  ;;  %v2868_v35 = vld [vmem:[%s16147_s24 + $0x4e78] sm:$0xff] }
 0x522   : > { %15646 = vmatprep.subr.bf16.mxu1 %v15645_v22  ;;  %9493 = vmatprep.mubr.f32.mxu0 %v3765_v19  ;;  %v2866_v22 = vld [vmem:[%s16147_s24 + $0x4e68] sm:$0xff]  ;;  %v15665_v18 = vpack.c.bf16 %v2914_v6, %v2913_v27  ;;  %v2920_v9 = vld [vmem:[%s16147_s24 + $0x5018] sm:$0xff]  ;;  %v2951_v10 = vld [vmem:[%s16147_s24 + $0x5110] sm:$0xff] }
 0x523   : > { %9563 = vmatprep.mubr.f32.mxu1 %v3766_v23  ;;  %v2898_v19 = vld [vmem:[%s16147_s24 + $0x4f68] sm:$0xff]  ;;  %v15635_v53 = vpack.c.bf16 %v2866_v22, %v2865_v25  ;;  %v2969_v27 = vld [vmem:[%s16147_s24 + $0x51a0] sm:$0xff]  ;;  %v15681_v25 = vpack.c.bf16 %v2938_v3, %v2937_v2 }
 0x524   : > { %15616 = vmatpush3.bf16.msra.mxu0 %v15615_v36  ;;  %v15667_v32 = vpack.c.bf16 %v2898_v19, %v2897_v28  ;;  %v2970_v6 = vld [vmem:[%s16147_s24 + $0x51a8] sm:$0xff]  ;;  %v2921_v22 = vld [vmem:[%s16147_s24 + $0x5020] sm:$0xff]  ;;  %v2939_v19 = vld [vmem:[%s16147_s24 + $0x50b0] sm:$0xff] }
 0x525   : > { %15648 = vmatpush3.bf16.msra.mxu1 %v15647_v38  ;;  %15618 = vmatprep.subr.bf16.mxu0 %v15617_v43  ;;  %v2915_v38 = vld [vmem:[%s16147_s24 + $0x4ff0] sm:$0xff]  ;;  %v2916_v43 = vld [vmem:[%s16147_s24 + $0x4ff8] sm:$0xff]  ;;  %v2953_v28 = vld [vmem:[%s16147_s24 + $0x5120] sm:$0xff] }
 0x526   : > { %15650 = vmatprep.subr.bf16.mxu1 %v15649_v30  ;;  %v355_v30 = vld [vmem:[%s16157_s19 + $0x140] sm:$0xff] }
 0x527   : > { %v3767_v44 = vcombine.high %v355_v30, %v355_v30  ;;  %v19340_v1 = vrot.slane %v355_v30, %v16210_v14  ;;  %v2956_v30 = vld [vmem:[%s16147_s24 + $0x5138] sm:$0xff] }
 0x528   : > { %15620 = vmatpush3.bf16.msra.mxu0 %v15619_v37  ;;  %v2899_v37 = vld [vmem:[%s16147_s24 + $0x4f70] sm:$0xff] }
 0x529   : > { %15652 = vmatpush3.bf16.msra.mxu1 %v15651_v49  ;;  %15622 = vmatprep.subr.bf16.mxu0 %v15621_v50  ;;  %v15669_v50 = vpack.c.bf16 %v2916_v43, %v2915_v38  ;;  %v15671_v0 = vpack.c.bf16 %v2900_v51, %v2899_v37  ;;  %v19345_v5 = vrot.slane %v3767_v44, %v16210_v14  ;;  %v2923_v43 = vld [vmem:[%s16147_s24 + $0x5030] sm:$0xff]  ;;  %v2926_v51 = vld [vmem:[%s16147_s24 + $0x5048] sm:$0xff]  ;;  %v2944_v44 = vld [vmem:[%s16147_s24 + $0x50d8] sm:$0xff] }
 0x52a   : > { %15654 = vmatprep.subr.bf16.mxu1 %v15653_v34  ;;  %v2965_v34 = vld [vmem:[%s16147_s24 + $0x5180] sm:$0xff]  ;;  %v3782_v4 = vcombine.high %v19340_v1, %v19340_v1  ;;  %v15685_v38 = vpack.c.bf16 %v2940_v40, %v2939_v19 }
 0x52b   : > { %v15705_v62 = vpack.c.bf16 %v2966_v42, %v2965_v34  ;;  %v2958_v34 = vld [vmem:[%s16147_s24 + $0x5148] sm:$0xff]  ;;  %v2943_v42 = vld [vmem:[%s16147_s24 + $0x50d0] sm:$0xff] }
 0x52c   : > { %15624 = vmatpush3.bf16.msra.mxu0 %v15623_v48  ;;  %v2917_v48 = vld [vmem:[%s16147_s24 + $0x5000] sm:$0xff] }
 0x52d   : > { %15656 = vmatpush3.bf16.msra.mxu1 %v15655_v52  ;;  %15626 = vmatprep.subr.bf16.mxu0 %v15625_v46  ;;  %v2918_v52 = vld [vmem:[%s16147_s24 + $0x5008] sm:$0xff]  ;;  %v2949_v46 = vld [vmem:[%s16147_s24 + $0x5100] sm:$0xff] }
 0x52e   : > { %15658 = vmatprep.subr.bf16.mxu1 %v15657_v56  ;;  %v2936_v56 = vld [vmem:[%s16147_s24 + $0x5098] sm:$0xff]  ;;  %v15675_v13 = vpack.c.bf16 %v2918_v52, %v2917_v48  ;;  %v15723_v48 = vpack.c.bf16 %v2958_v34, %v2957_v39  ;;  %v15693_v52 = vpack.c.bf16 %v2944_v44, %v2943_v42  ;;  %v2999_v39 = vld [vmem:[%s16147_s24 + $0x5290] sm:$0xff] }
 0x52f   : > { %v3031_v42 = vld [vmem:[%s16147_s24 + $0x5390] sm:$0xff]  ;;  %v3032_v44 = vld [vmem:[%s16147_s24 + $0x5398] sm:$0xff] }
 0x530   : > { %15628 = vmatpush3.bf16.msra.mxu0 %v15627_v61  ;;  %v15707_v61 = vpack.c.bf16 %v2950_v63, %v2949_v46  ;;  %v2927_v46 = vld [vmem:[%s16147_s24 + $0x5050] sm:$0xff] }
 0x531   : > { %15660 = vmatpush3.bf16.msra.mxu1 %v15659_v58  ;;  %15630 = vmatprep.subr.bf16.mxu0 %v15629_v7  ;;  %v15677_v58 = vpack.c.bf16 %v2936_v56, %v2935_v55  ;;  %v2919_v7 = vld [vmem:[%s16147_s24 + $0x5010] sm:$0xff]  ;;  %v2960_v56 = vld [vmem:[%s16147_s24 + $0x5158] sm:$0xff] }
 0x532   : > { %v12401_v12 = vpop.f32.mrb[64].mxu0  ;;  %15662 = vmatprep.subr.bf16.mxu1 %v15661_v15  ;;  %v2952_v15 = vld [vmem:[%s16147_s24 + $0x5118] sm:$0xff]  ;;  %v2959_v63 = vld [vmem:[%s16147_s24 + $0x5150] sm:$0xff] }
 0x533   : > { %v12402_v23 = vpop.f32.mrb[65].mxu0  ;;  %v12436_v36 = vpop.f32.mrb[64].mxu1 }
 0x534   : > { %v12403_v26 = vadd.f32 %v12402_v23, %v12401_v12  ;;  %15632 = vmatpush3.bf16.msra.mxu0 %v15631_v8  ;;  %v12437_v29 = vpop.f32.mrb[65].mxu1  ;;  %v3783_v8 = vcombine.high %v19345_v5, %v19345_v5  ;;  %v15713_v12 = vpack.c.bf16 %v2970_v6, %v2969_v27  ;;  %v2947_v27 = vld [vmem:[%s16147_s24 + $0x50f0] sm:$0xff]  ;;  %v2948_v6 = vld [vmem:[%s16147_s24 + $0x50f8] sm:$0xff] }
 0x535   : > { %v12438_v31 = vadd.f32 %v12437_v29, %v12436_v36  ;;  %15664 = vmatpush3.bf16.msra.mxu1 %v15663_v21  ;;  %15634 = vmatprep.subr.bf16.mxu0 %v15633_v24  ;;  %v15679_v21 = vpack.c.bf16 %v2920_v9, %v2919_v7  ;;  %v15711_v24 = vpack.c.bf16 %v2952_v15, %v2951_v10  ;;  %v2955_v29 = vld [vmem:[%s16147_s24 + $0x5130] sm:$0xff]  ;;  %v2929_v10 = vld [vmem:[%s16147_s24 + $0x5060] sm:$0xff] }
 0x536   : > { %v8516_v49 = vadd.f32 %v12403_v26, %v19251_v60  ;;  %15666 = vmatprep.subr.bf16.mxu1 %v15665_v18  ;;  %v15639_v60 = vpack.c.bf16 %v2868_v35, %v2867_v33  ;;  %v2954_v18 = vld [vmem:[%s16147_s24 + $0x5128] sm:$0xff]  ;;  %v2924_v26 = vld [vmem:[%s16147_s24 + $0x5038] sm:$0xff]  ;;  %v15719_v37 = vpack.c.bf16 %v2956_v30, %v2955_v29  ;;  %v15727_v7 = vpack.c.bf16 %v2960_v56, %v2959_v63  ;;  %v2961_v15 = vld [vmem:[%s16147_s24 + $0x5160] sm:$0xff] }
 0x537   : > { %v15715_v36 = vpack.c.bf16 %v2954_v18, %v2953_v28  ;;  %v2974_v33 = vld [vmem:[%s16147_s24 + $0x51c8] sm:$0xff]  ;;  %v15687_v35 = vpack.c.bf16 %v2924_v26, %v2923_v43  ;;  %v15697_v9 = vpack.c.bf16 %v2946_v59, %v2945_v57  ;;  %v15701_v40 = vpack.c.bf16 %v2948_v6, %v2947_v27  ;;  %v2964_v43 = vld [vmem:[%s16147_s24 + $0x5178] sm:$0xff]  ;;  %v2997_v26 = vld [vmem:[%s16147_s24 + $0x5280] sm:$0xff] }
 0x538   : > { %v19331_v45 = vadd.f32 %v12438_v31, %v8516_v49  ;;  %15636 = vmatpush3.bf16.msra.mxu0 %v15635_v53  ;;  %v2941_v31 = vld [vmem:[%s16147_s24 + $0x50c0] sm:$0xff]  ;;  %v2998_v29 = vld [vmem:[%s16147_s24 + $0x5288] sm:$0xff]  ;;  %v15773_v63 = vpack.c.bf16 %v3032_v44, %v3031_v42  ;;  %v3036_v27 = vld [vmem:[%s16147_s24 + $0x53b8] sm:$0xff] }
 0x539   : > { %15668 = vmatpush3.bf16.msra.mxu1 %v15667_v32  ;;  %15638 = vmatprep.subr.bf16.mxu0 %v15637_v54  ;;  %v2942_v32 = vld [vmem:[%s16147_s24 + $0x50c8] sm:$0xff]  ;;  %v2973_v54 = vld [vmem:[%s16147_s24 + $0x51c0] sm:$0xff] }
 0x53a   : > { %15670 = vmatprep.subr.bf16.mxu1 %v15669_v50  ;;  %v15689_v49 = vpack.c.bf16 %v2942_v32, %v2941_v31  ;;  %v2925_v50 = vld [vmem:[%s16147_s24 + $0x5040] sm:$0xff]  ;;  %v15721_v41 = vpack.c.bf16 %v2974_v33, %v2973_v54  ;;  %v3030_v30 = vld [vmem:[%s16147_s24 + $0x5388] sm:$0xff]  ;;  %v15737_v33 = vpack.c.bf16 %v2998_v29, %v2997_v26 }
 0x53b   : > { %v3001_v56 = vld [vmem:[%s16147_s24 + $0x52a0] sm:$0xff]  ;;  %v3022_v29 = vld [vmem:[%s16147_s24 + $0x5348] sm:$0xff] }
 0x53c   : > { %15640 = vmatpush3.bf16.msra.mxu0 %v15639_v60  ;;  %v2975_v60 = vld [vmem:[%s16147_s24 + $0x51d0] sm:$0xff]  ;;  %v3033_v59 = vld [vmem:[%s16147_s24 + $0x53a0] sm:$0xff]  ;;  %v3010_v42 = vld [vmem:[%s16147_s24 + $0x52e8] sm:$0xff] }
 0x53d   : > { %15672 = vmatpush3.bf16.msra.mxu1 %v15671_v0  ;;  %15674 = vmatprep.subr.bf16.mxu0 %v15673_v47  ;;  %v2976_v0 = vld [vmem:[%s16147_s24 + $0x51d8] sm:$0xff]  ;;  %v15691_v47 = vpack.c.bf16 %v2926_v51, %v2925_v50  ;;  %v3014_v51 = vld [vmem:[%s16147_s24 + $0x5308] sm:$0xff]  ;;  %v3041_v44 = vld [vmem:[%s16147_s24 + $0x53e0] sm:$0xff] }
 0x53e   : > { %15706 = vmatprep.subr.bf16.mxu1 %v15705_v62  ;;  %v2928_v62 = vld [vmem:[%s16147_s24 + $0x5058] sm:$0xff]  ;;  %v15725_v55 = vpack.c.bf16 %v2976_v0, %v2975_v60 }
 0x53f   : > { %9494 = vmatmul.mubr.f32.vlgmr.msra.gmra.mrb[78].mxu0 %v19260_v17  ;;  %v2922_v17 = vld [vmem:[%s16147_s24 + $0x5028] sm:$0xff] }
 0x540   : > { %15676 = vmatpush3.bf16.msra.mxu0 %v15675_v13  ;;  %9564 = vmatmul.mubr.f32.vlgmr.msra.gmra.mrb[78].mxu1 %v19265_v16  ;;  %v2971_v16 = vld [vmem:[%s16147_s24 + $0x51b0] sm:$0xff]  ;;  %v15683_v23 = vpack.c.bf16 %v2922_v17, %v2921_v22  ;;  %v2977_v13 = vld [vmem:[%s16147_s24 + $0x51e0] sm:$0xff] }
 0x541   : > { %15708 = vmatpush3.bf16.msra.mxu1 %v15707_v61  ;;  %15678 = vmatprep.subr.bf16.mxu0 %v15677_v58  ;;  %v15717_v53 = vpack.c.bf16 %v2972_v20, %v2971_v16  ;;  %v2978_v61 = vld [vmem:[%s16147_s24 + $0x51e8] sm:$0xff]  ;;  %v15695_v58 = vpack.c.bf16 %v2928_v62, %v2927_v46  ;;  %v2931_v16 = vld [vmem:[%s16147_s24 + $0x5070] sm:$0xff]  ;;  %v2932_v20 = vld [vmem:[%s16147_s24 + $0x5078] sm:$0xff] }
 0x542   : > { %15710 = vmatprep.subr.bf16.mxu1 %v15709_v11  ;;  %9633 = vmatprep.mubr.f32.mxu0 %v3782_v4  ;;  %v2930_v11 = vld [vmem:[%s16147_s24 + $0x5068] sm:$0xff]  ;;  %v15729_v3 = vpack.c.bf16 %v2978_v61, %v2977_v13  ;;  %v2984_v46 = vld [vmem:[%s16147_s24 + $0x5218] sm:$0xff]  ;;  %v3015_v62 = vld [vmem:[%s16147_s24 + $0x5310] sm:$0xff] }
 0x543   : > { %9703 = vmatprep.mubr.f32.mxu1 %v3783_v8  ;;  %v2962_v4 = vld [vmem:[%s16147_s24 + $0x5168] sm:$0xff]  ;;  %v15699_v28 = vpack.c.bf16 %v2930_v11, %v2929_v10  ;;  %v2985_v10 = vld [vmem:[%s16147_s24 + $0x5220] sm:$0xff] }
 0x544   : > { %15680 = vmatpush3.bf16.msra.mxu0 %v15679_v21  ;;  %v15731_v19 = vpack.c.bf16 %v2962_v4, %v2961_v15  ;;  %v3034_v13 = vld [vmem:[%s16147_s24 + $0x53a8] sm:$0xff]  ;;  %v3017_v11 = vld [vmem:[%s16147_s24 + $0x5320] sm:$0xff]  ;;  %v3004_v4 = vld [vmem:[%s16147_s24 + $0x52b8] sm:$0xff] }
 0x545   : > { %15712 = vmatpush3.bf16.msra.mxu1 %v15711_v24  ;;  %15682 = vmatprep.subr.bf16.mxu0 %v15681_v25  ;;  %v2979_v24 = vld [vmem:[%s16147_s24 + $0x51f0] sm:$0xff]  ;;  %v2980_v25 = vld [vmem:[%s16147_s24 + $0x51f8] sm:$0xff]  ;;  %v15777_v15 = vpack.c.bf16 %v3034_v13, %v3033_v59 }
 0x546   : > { %15714 = vmatprep.subr.bf16.mxu1 %v15713_v12  ;;  %v356_v12 = vld [vmem:[%s16157_s19 + $0x148] sm:$0xff]  ;;  %v3012_v59 = vld [vmem:[%s16147_s24 + $0x52f8] sm:$0xff] }
 0x547   : > { %v3784_v31 = vcombine.high %v356_v12, %v356_v12  ;;  %v19420_v34 = vrot.slane %v356_v12, %v16210_v14  ;;  %v3005_v12 = vld [vmem:[%s16147_s24 + $0x52c0] sm:$0xff] }
 0x548   : > { %15684 = vmatpush3.bf16.msra.mxu0 %v15683_v23  ;;  %v2963_v23 = vld [vmem:[%s16147_s24 + $0x5170] sm:$0xff] }
 0x549   : > { %15716 = vmatpush3.bf16.msra.mxu1 %v15715_v36  ;;  %15686 = vmatprep.subr.bf16.mxu0 %v15685_v38  ;;  %v15733_v38 = vpack.c.bf16 %v2980_v25, %v2979_v24  ;;  %v15735_v54 = vpack.c.bf16 %v2964_v43, %v2963_v23  ;;  %v19425_v60 = vrot.slane %v3784_v31, %v16210_v14  ;;  %v3002_v14 = vld [vmem:[%s16147_s24 + $0x52a8] sm:$0xff]  ;;  %v2987_v24 = vld [vmem:[%s16147_s24 + $0x5230] sm:$0xff]  ;;  %v2988_v25 = vld [vmem:[%s16147_s24 + $0x5238] sm:$0xff] }
 0x54a   : > { %15718 = vmatprep.subr.bf16.mxu1 %v15717_v53  ;;  %v3029_v53 = vld [vmem:[%s16147_s24 + $0x5380] sm:$0xff]  ;;  %v3799_v57 = vcombine.high %v19420_v34, %v19420_v34  ;;  %v3039_v31 = vld [vmem:[%s16147_s24 + $0x53d0] sm:$0xff] }
 0x54b   : > { %v15769_v50 = vpack.c.bf16 %v3030_v30, %v3029_v53  ;;  %v3800_v61 = vcombine.high %v19425_v60, %v19425_v60  ;;  %v3021_v43 = vld [vmem:[%s16147_s24 + $0x5340] sm:$0xff]  ;;  %v3007_v53 = vld [vmem:[%s16147_s24 + $0x52d0] sm:$0xff]  ;;  %v3008_v30 = vld [vmem:[%s16147_s24 + $0x52d8] sm:$0xff] }
 0x54c   : > { %15688 = vmatpush3.bf16.msra.mxu0 %v15687_v35  ;;  %v2981_v35 = vld [vmem:[%s16147_s24 + $0x5200] sm:$0xff] }
 0x54d   : > { %15720 = vmatpush3.bf16.msra.mxu1 %v15719_v37  ;;  %15690 = vmatprep.subr.bf16.mxu0 %v15689_v49  ;;  %v2982_v37 = vld [vmem:[%s16147_s24 + $0x5208] sm:$0xff]  ;;  %v3013_v49 = vld [vmem:[%s16147_s24 + $0x5300] sm:$0xff] }
 0x54e   : > { %15722 = vmatprep.subr.bf16.mxu1 %v15721_v41  ;;  %v3000_v41 = vld [vmem:[%s16147_s24 + $0x5298] sm:$0xff]  ;;  %v15739_v0 = vpack.c.bf16 %v2982_v37, %v2981_v35  ;;  %v15757_v35 = vpack.c.bf16 %v3008_v30, %v3007_v53  ;;  %v2991_v37 = vld [vmem:[%s16147_s24 + $0x5250] sm:$0xff] }
 0x550   : > { %15692 = vmatpush3.bf16.msra.mxu0 %v15691_v47  ;;  %v15771_v47 = vpack.c.bf16 %v3014_v51, %v3013_v49  ;;  %v2992_v49 = vld [vmem:[%s16147_s24 + $0x5258] sm:$0xff] }
 0x551   : > { %15724 = vmatpush3.bf16.msra.mxu1 %v15723_v48  ;;  %15694 = vmatprep.subr.bf16.mxu0 %v15693_v52  ;;  %v15741_v48 = vpack.c.bf16 %v3000_v41, %v2999_v39  ;;  %v2983_v52 = vld [vmem:[%s16147_s24 + $0x5210] sm:$0xff]  ;;  %v3024_v39 = vld [vmem:[%s16147_s24 + $0x5358] sm:$0xff]  ;;  %v3009_v41 = vld [vmem:[%s16147_s24 + $0x52e0] sm:$0xff] }
 0x552   : > { %v12471_v2 = vpop.f32.mrb[66].mxu0  ;;  %15726 = vmatprep.subr.bf16.mxu1 %v15725_v55  ;;  %v3016_v55 = vld [vmem:[%s16147_s24 + $0x5318] sm:$0xff] }
 0x553   : > { %v12472_v8 = vpop.f32.mrb[67].mxu0  ;;  %v12506_v21 = vpop.f32.mrb[66].mxu1 }
 0x554   : > { %v12473_v22 = vadd.f32 %v12472_v8, %v12471_v2  ;;  %15696 = vmatpush3.bf16.msra.mxu0 %v15695_v58  ;;  %v12507_v17 = vpop.f32.mrb[67].mxu1  ;;  %v15743_v58 = vpack.c.bf16 %v2984_v46, %v2983_v52  ;;  %v3018_v2 = vld [vmem:[%s16147_s24 + $0x5328] sm:$0xff]  ;;  %v15761_v52 = vpack.c.bf16 %v3010_v42, %v3009_v41  ;;  %v2993_v46 = vld [vmem:[%s16147_s24 + $0x5260] sm:$0xff] }
 0x555   : > { %v12508_v18 = vadd.f32 %v12507_v17, %v12506_v21  ;;  %15728 = vmatpush3.bf16.msra.mxu1 %v15727_v7  ;;  %15698 = vmatprep.subr.bf16.mxu0 %v15697_v9  ;;  %v15775_v7 = vpack.c.bf16 %v3016_v55, %v3015_v62  ;;  %v15745_v9 = vpack.c.bf16 %v3002_v14, %v3001_v56  ;;  %v2994_v62 = vld [vmem:[%s16147_s24 + $0x5268] sm:$0xff] }
 0x556   : > { %v8656_v36 = vadd.f32 %v12473_v22, %v19331_v45  ;;  %15730 = vmatprep.subr.bf16.mxu1 %v15729_v3  ;;  %v15703_v45 = vpack.c.bf16 %v2932_v20, %v2931_v16  ;;  %v3003_v3 = vld [vmem:[%s16147_s24 + $0x52b0] sm:$0xff]  ;;  %v15779_v8 = vpack.c.bf16 %v3018_v2, %v3017_v11  ;;  %v15751_v16 = vpack.c.bf16 %v2988_v25, %v2987_v24  ;;  %v3026_v14 = vld [vmem:[%s16147_s24 + $0x5368] sm:$0xff] }
 0x557   : > { %v15749_v21 = vpack.c.bf16 %v3004_v4, %v3003_v3  ;;  %v3019_v22 = vld [vmem:[%s16147_s24 + $0x5330] sm:$0xff]  ;;  %v2996_v4 = vld [vmem:[%s16147_s24 + $0x5278] sm:$0xff] }
 0x558   : > { %v19411_v32 = vadd.f32 %v12508_v18, %v8656_v36  ;;  %15700 = vmatpush3.bf16.msra.mxu0 %v15699_v28  ;;  %v3020_v28 = vld [vmem:[%s16147_s24 + $0x5338] sm:$0xff]  ;;  %v3006_v18 = vld [vmem:[%s16147_s24 + $0x52c8] sm:$0xff]  ;;  %v2989_v36 = vld [vmem:[%s16147_s24 + $0x5240] sm:$0xff] }
 0x559   : > { %15732 = vmatpush3.bf16.msra.mxu1 %v15731_v19  ;;  %15702 = vmatprep.subr.bf16.mxu0 %v15701_v40  ;;  %v3037_v19 = vld [vmem:[%s16147_s24 + $0x53c0] sm:$0xff]  ;;  %v3038_v40 = vld [vmem:[%s16147_s24 + $0x53c8] sm:$0xff]  ;;  %v15783_v20 = vpack.c.bf16 %v3020_v28, %v3019_v22  ;;  %v15753_v23 = vpack.c.bf16 %v3006_v18, %v3005_v12  ;;  %v2995_v3 = vld [vmem:[%s16147_s24 + $0x5270] sm:$0xff] }
 0x55a   : > { %15734 = vmatprep.subr.bf16.mxu1 %v15733_v38  ;;  %v2990_v38 = vld [vmem:[%s16147_s24 + $0x5248] sm:$0xff]  ;;  %v15785_v26 = vpack.c.bf16 %v3038_v40, %v3037_v19  ;;  %v15767_v24 = vpack.c.bf16 %v2996_v4, %v2995_v3  ;;  %v314_v3 = vld [vmem:[#allocation2] sm:$0x3] }
 0x55c   : > { %15704 = vmatpush3.bf16.msra.mxu0 %v15703_v45  ;;  %v3040_v45 = vld [vmem:[%s16147_s24 + $0x53d8] sm:$0xff] }
 0x55d   : > { %15736 = vmatpush3.bf16.msra.mxu1 %v15735_v54  ;;  %15738 = vmatprep.subr.bf16.mxu0 %v15737_v33  ;;  %v15755_v54 = vpack.c.bf16 %v2990_v38, %v2989_v36  ;;  %v15787_v33 = vpack.c.bf16 %v3022_v29, %v3021_v43  ;;  %v15789_v51 = vpack.c.bf16 %v3040_v45, %v3039_v31 }
 0x55e   : > { %15770 = vmatprep.subr.bf16.mxu1 %v15769_v50  ;;  %v3023_v50 = vld [vmem:[%s16147_s24 + $0x5350] sm:$0xff] }
 0x55f   : > { %9634 = vmatmul.mubr.f32.vlgmr.msra.gmra.mrb[80].mxu0 %v19340_v1  ;;  %v2986_v1 = vld [vmem:[%s16147_s24 + $0x5228] sm:$0xff] }
 0x560   : > { %15740 = vmatpush3.bf16.msra.mxu0 %v15739_v0  ;;  %9704 = vmatmul.mubr.f32.vlgmr.msra.gmra.mrb[80].mxu1 %v19345_v5  ;;  %v3035_v5 = vld [vmem:[%s16147_s24 + $0x53b0] sm:$0xff]  ;;  %v15747_v6 = vpack.c.bf16 %v2986_v1, %v2985_v10  ;;  %v3042_v0 = vld [vmem:[%s16147_s24 + $0x53e8] sm:$0xff]  ;;  %v15763_v1 = vpack.c.bf16 %v2994_v62, %v2993_v46 }
 0x561   : > { %15772 = vmatpush3.bf16.msra.mxu1 %v15771_v47  ;;  %15742 = vmatprep.subr.bf16.mxu0 %v15741_v48  ;;  %v15781_v17 = vpack.c.bf16 %v3036_v27, %v3035_v5  ;;  %v15759_v47 = vpack.c.bf16 %v2992_v49, %v2991_v37  ;;  %v15791_v48 = vpack.c.bf16 %v3024_v39, %v3023_v50 }
 0x562   : > { %15774 = vmatprep.subr.bf16.mxu1 %v15773_v63  ;;  %9773 = vmatprep.mubr.f32.mxu0 %v3799_v57  ;;  %v3025_v63 = vld [vmem:[%s16147_s24 + $0x5360] sm:$0xff]  ;;  %v15793_v56 = vpack.c.bf16 %v3042_v0, %v3041_v44  ;;  %v3011_v57 = vld [vmem:[%s16147_s24 + $0x52f0] sm:$0xff] }
 0x563   : > { %9843 = vmatprep.mubr.f32.mxu1 %v3800_v61  ;;  %v15765_v2 = vpack.c.bf16 %v3012_v59, %v3011_v57 }
 0x564   : > { %15744 = vmatpush3.bf16.msra.mxu0 %v15743_v58  ;;  %v3043_v58 = vld [vmem:[%s16147_s24 + $0x53f0] sm:$0xff] }
 0x565   : > { %15776 = vmatpush3.bf16.msra.mxu1 %v15775_v7  ;;  %15746 = vmatprep.subr.bf16.mxu0 %v15745_v9  ;;  %v3044_v7 = vld [vmem:[%s16147_s24 + $0x53f8] sm:$0xff] }
 0x566   : > { %15778 = vmatprep.subr.bf16.mxu1 %v15777_v15  ;;  %v15795_v15 = vpack.c.bf16 %v3026_v14, %v3025_v63  ;;  %v15797_v27 = vpack.c.bf16 %v3044_v7, %v3043_v58 }
 0x568   : > { %15748 = vmatpush3.bf16.msra.mxu0 %v15747_v6  ;;  %v3027_v6 = vld [vmem:[%s16147_s24 + $0x5370] sm:$0xff] }
 0x569   : > { %15780 = vmatpush3.bf16.msra.mxu1 %v15779_v8  ;;  %15750 = vmatprep.subr.bf16.mxu0 %v15749_v21  ;;  %v3028_v8 = vld [vmem:[%s16147_s24 + $0x5378] sm:$0xff] }
 0x56a   : > { %15782 = vmatprep.subr.bf16.mxu1 %v15781_v17  ;;  %v15799_v25 = vpack.c.bf16 %v3028_v8, %v3027_v6  ;;  %v9867_v6 = vld [vmem:[%s19573_s3 + $0x8] sm:$0xff] (!%p10118_p7)  ;;  %v9868_v8 = vld [vmem:[%s19573_s3 + $0x10] sm:$0xff] (!%p10118_p7) }
 0x56c   : > { %15752 = vmatpush3.bf16.msra.mxu0 %v15751_v16 }
 0x56d   : > { %15784 = vmatpush3.bf16.msra.mxu1 %v15783_v20  ;;  %15754 = vmatprep.subr.bf16.mxu0 %v15753_v23 }
 0x56e   : > { %15786 = vmatprep.subr.bf16.mxu1 %v15785_v26 }
 0x570   : > { %15756 = vmatpush3.bf16.msra.mxu0 %v15755_v54 }
 0x571   : > { %15788 = vmatpush3.bf16.msra.mxu1 %v15787_v33  ;;  %15758 = vmatprep.subr.bf16.mxu0 %v15757_v35 }
 0x572   : > { %v12541_v55 = vpop.f32.mrb[68].mxu0  ;;  %15790 = vmatprep.subr.bf16.mxu1 %v15789_v51 }
 0x573   : > { %v12542_v13 = vpop.f32.mrb[69].mxu0  ;;  %v12576_v61 = vpop.f32.mrb[68].mxu1 }
 0x574   : > { %v12543_v9 = vadd.f32 %v12542_v13, %v12541_v55  ;;  %15760 = vmatpush3.bf16.msra.mxu0 %v15759_v47  ;;  %v12577_v10 = vpop.f32.mrb[69].mxu1 }
 0x575   : > { %v12578_v11 = vadd.f32 %v12577_v10, %v12576_v61  ;;  %15792 = vmatpush3.bf16.msra.mxu1 %v15791_v48  ;;  %15762 = vmatprep.subr.bf16.mxu0 %v15761_v52 }
 0x576   : > { %v8796_v5 = vadd.f32 %v12543_v9, %v19411_v32  ;;  %15794 = vmatprep.subr.bf16.mxu1 %v15793_v56 }
 0x578   : > { %v8866_v21 = vadd.f32 %v12578_v11, %v8796_v5  ;;  %15764 = vmatpush3.bf16.msra.mxu0 %v15763_v1 }
 0x579   : > { %15796 = vmatpush3.bf16.msra.mxu1 %v15795_v15  ;;  %15766 = vmatprep.subr.bf16.mxu0 %v15765_v2 }
 0x57a   : > { %15798 = vmatprep.subr.bf16.mxu1 %v15797_v27  ;;  %v9866_v27 = vld [vmem:[%s19573_s3] sm:$0xff] (!%p10118_p7) }
 0x57c   : > { %15768 = vmatpush3.bf16.msra.mxu0 %v15767_v24  ;;  %v15802_v24 = vpack.c.bf16 (!%p10118_p7), %v9867_v6, %v9866_v27 }
 0x57d   : > { %15800 = vmatpush3.bf16.msra.mxu1 %v15799_v25  ;;  %v9869_v25 = vld [vmem:[%s19573_s3 + $0x18] sm:$0xff] (!%p10118_p7) }
 0x57f   : > { %9774 = vmatmul.mubr.f32.vlgmr.msra.gmra.mrb[82].mxu0 %v19420_v34 }
 0x580   : > { %9844 = vmatmul.mubr.f32.vlgmr.msra.gmra.mrb[82].mxu1 %v19425_v60 }
 0x592   : > { %v12611_v22 = vpop.f32.mrb[70].mxu0 }
 0x593   : > { %v12612_v17 = vpop.f32.mrb[71].mxu0  ;;  %v12646_v32 = vpop.f32.mrb[70].mxu1 }
 0x594   : > { %v12613_v28 = vadd.f32 %v12612_v17, %v12611_v22  ;;  %v12647_v12 = vpop.f32.mrb[71].mxu1  ;;  %v16019_v22 = vmov (!%p10118_p7), 0.0   ;;  %v15805_v17 = vpack.c.bf16 (!%p10118_p7), %v9869_v25, %v9868_v8 }
 0x595   : > { %v12648_v18 = vadd.f32 %v12647_v12, %v12646_v32  ;;  %13099 = vmatprep.mubr.msk.f32.mxu0 (!%p10118_p7), %vm16018_vm2, %v16019_v22  ;;  %13110 = vmatprep.mubr.msk.f32.mxu1 (!%p10118_p7), %vm16018_vm2, %v16019_v22  ;;  %v9956_v32 = vld [vmem:[%s19575_s5] sm:$0xff] (!%p10118_p7) }
 0x596   : > { %v8936_v19 = vadd.f32 %v12613_v28, %v8866_v21  ;;  %v16017_v21 = vmov (!%p10118_p7), 0.0|0.0   ;;  %v9957_v28 = vld [vmem:[%s19575_s5 + $0x8] sm:$0xff] (!%p10118_p7)  ;;  %v9870_v12 = vld [vmem:[%s19573_s3 + $0x20] sm:$0xff] (!%p10118_p7) }
 0x597   : > { %15801 = vmatprep.subr.bf16.mxu0 (!%p10118_p7), %v16017_v21  ;;  %15813 = vmatprep.subr.bf16.mxu1 (!%p10118_p7), %v16017_v21 }
 0x598   : > { %v9006_v40 = vadd.f32 %v12648_v18, %v8936_v19  ;;  %15803 = vmatpush3.bf16.msra.mxu0 (!%p10118_p7), %v15802_v24  ;;  %v9871_v18 = vld [vmem:[%s19573_s3 + $0x28] sm:$0xff] (!%p10118_p7)  ;;  %v15814_v19 = vpack.c.bf16 (!%p10118_p7), %v9957_v28, %v9956_v32 }
 0x599   : > { %15804 = vmatprep.subr.bf16.mxu0 (!%p10118_p7), %v16017_v21 }
 0x59a   : > { %15815 = vmatpush3.bf16.msra.mxu1 (!%p10118_p7), %v15814_v19 }
 0x59b   : > { %15816 = vmatprep.subr.bf16.mxu1 (!%p10118_p7), %v16017_v21 }
 0x59c   : > { %15806 = vmatpush3.bf16.msra.mxu0 (!%p10118_p7), %v15805_v17 }
 0x59d   : > { %15807 = vmatprep.subr.bf16.mxu0 (!%p10118_p7), %v16017_v21 }
 0x5b2   : > { %v12681_v16 = vpop.f32.mrb[72].mxu0 }
 0x5b3   : > { %v12682_v20 = vpop.f32.mrb[73].mxu0  ;;  %v12716_v23 = vpop.f32.mrb[72].mxu1 }
 0x5b4   : > { %v12683_v36 = vadd.f32 %v12682_v20, %v12681_v16  ;;  %v12717_v38 = vpop.f32.mrb[73].mxu1  ;;  %v10119_v20 = vld [vmem:[%s19572_s2] ss:$0 sm:$0xff] (!%p10118_p7) }
 0x5b5   : > { %v12718_v43 = vadd.f32 %v12717_v38, %v12716_v23  ;;  %v9872_v23 = vld [vmem:[%s19573_s3 + $0x30] sm:$0xff] (!%p10118_p7) }
 0x5b6   : > { %v9076_v26 = vadd.f32 %v12683_v36, %v9006_v40  ;;  %v15808_v40 = vpack.c.bf16 (!%p10118_p7), %v9871_v18, %v9870_v12  ;;  %v9873_v36 = vld [vmem:[%s19573_s3 + $0x38] sm:$0xff] (!%p10118_p7) }
 0x5b8   : > { %v9146_v29 = vadd.f32 %v12718_v43, %v9076_v26  ;;  %15809 = vmatpush3.bf16.msra.mxu0 (!%p10118_p7), %v15808_v40  ;;  %v15811_v43 = vpack.c.bf16 (!%p10118_p7), %v9873_v36, %v9872_v23 }
 0x5b9   : > { %15810 = vmatprep.subr.bf16.mxu0 (!%p10118_p7), %v16017_v21 }
 0x5bc   : > { %15812 = vmatpush3.bf16.msra.mxu0 (!%p10118_p7), %v15811_v43 }
 0x5d2   : > { %v12751_v53 = vpop.f32.mrb[74].mxu0 }
 0x5d3   : > { %v12752_v34 = vpop.f32.mrb[75].mxu0  ;;  %v12786_v30 = vpop.f32.mrb[74].mxu1 }
 0x5d4   : > { %v12753_v60 = vadd.f32 %v12752_v34, %v12751_v53  ;;  %v12787_v31 = vpop.f32.mrb[75].mxu1  ;;  %v9959_v53 = vld [vmem:[%s19575_s5 + $0x18] sm:$0xff] (!%p10118_p7) }
 0x5d5   : > { %v12788_v45 = vadd.f32 %v12787_v31, %v12786_v30  ;;  %v10120_v30 = vld [vmem:[%s19574_s4] ss:$0 sm:$0xff] (!%p10118_p7) }
 0x5d6   : > { %v9216_v54 = vadd.f32 %v12753_v60, %v9146_v29  ;;  %v9958_v29 = vld [vmem:[%s19575_s5 + $0x10] sm:$0xff] (!%p10118_p7) }
 0x5d7   : > { %v15817_v34 = vpack.c.bf16 (!%p10118_p7), %v9959_v53, %v9958_v29 }
 0x5d8   : > { %v9286_v33 = vadd.f32 %v12788_v45, %v9216_v54 }
 0x5d9   : > { %15818 = vmatpush3.bf16.msra.mxu1 (!%p10118_p7), %v15817_v34 }
 0x5f2   : > { %v12821_v35 = vpop.f32.mrb[76].mxu0 }
 0x5f3   : > { %v12822_v37 = vpop.f32.mrb[77].mxu0  ;;  %v12856_v49 = vpop.f32.mrb[76].mxu1 }
 0x5f4   : > { %v12823_v50 = vadd.f32 %v12822_v37, %v12821_v35  ;;  %v12857_v51 = vpop.f32.mrb[77].mxu1 }
 0x5f5   : > { %v12858_v39 = vadd.f32 %v12857_v51, %v12856_v49 }
 0x5f6   : > { %v9356_v41 = vadd.f32 %v12823_v50, %v9286_v33  ;;  %v10122_v33 = vld [vmem:[%s19576_s6] ss:$0 sm:$0xff] (!%p10118_p7) }
 0x5f8   : > { %v9426_v42 = vadd.f32 %v12858_v39, %v9356_v41 }
 0x612   : > { %v12891_v44 = vpop.f32.mrb[78].mxu0 }
 0x613   : > { %v12892_v0 = vpop.f32.mrb[79].mxu0  ;;  %v12926_v47 = vpop.f32.mrb[78].mxu1 }
 0x614   : > { %v12893_v48 = vadd.f32 %v12892_v0, %v12891_v44  ;;  %v12927_v52 = vpop.f32.mrb[79].mxu1 }
 0x615   : > { %v12928_v46 = vadd.f32 %v12927_v52, %v12926_v47 }
 0x616   : > { %v9496_v62 = vadd.f32 %v12893_v48, %v9426_v42 }
 0x618   : > { %v9566_v63 = vadd.f32 %v12928_v46, %v9496_v62 }
 0x632   : > { %v12961_v55 = vpop.f32.mrb[80].mxu0 }
 0x633   : > { %v12962_v56 = vpop.f32.mrb[81].mxu0  ;;  %v12996_v14 = vpop.f32.mrb[80].mxu1 }
 0x634   : > { %v12963_v57 = vadd.f32 %v12962_v56, %v12961_v55  ;;  %v12997_v59 = vpop.f32.mrb[81].mxu1 }
 0x635   : > { %v12998_v13 = vadd.f32 %v12997_v59, %v12996_v14 }
 0x636   : > { %v9636_v61 = vadd.f32 %v12963_v57, %v9566_v63 }
 0x638   : > { %v9706_v58 = vadd.f32 %v12998_v13, %v9636_v61 }
 0x652   : > { %v13031_v7 = vpop.f32.mrb[82].mxu0 }
 0x653   : > { %v13032_v9 = vpop.f32.mrb[83].mxu0  ;;  %v13066_v10 = vpop.f32.mrb[82].mxu1 }
 0x654   : > { %v13033_v1 = vadd.f32 %v13032_v9, %v13031_v7  ;;  %v13067_v11 = vpop.f32.mrb[83].mxu1 }
 0x655   : > { %v13068_v15 = vadd.f32 %v13067_v11, %v13066_v10 }
 0x656   : > { %v9776_v2 = vadd.f32 %v13033_v1, %v9706_v58  ;;  %9855 = sbr.rel (%p10118_p7) target bundleno = 2071 (0x817), region = 60 }
 0x658   : > { %v9846_v4 = vadd.f32 %v13068_v15, %v9776_v2 }
 0x65a   : > { %v9849_v5 = vadd.f32 %v9846_v4, %v314_v3 }
 0x65c   : > { %9851 = vst.msk [vmem:[#allocation2] sm:$0x3] %vm9850_vm1, %v9849_v5 }
 0x663   : > { %v9856_v16 = vld [vmem:[#allocation2] sm:$0x3] }
 0x664   : > { %v9864_v38 = vadd.f32 %v10119_v20, %v9856_v16 }
 0x666   : > { %v9865_v26 = vmax.f32 %v9864_v38, 0.0 }
 0x668   : > { %13100 = vmatmul.mubr.msk.f32.vlgmr.msra.gmra.mrb[0].mxu0 %vm9881_vm3, %v9865_v26 }
 0x73b   : > { %v9951_v60 = vpop.f32.mrb[0].mxu0 }
 0x73c   : > { %v9952_v31 = vadd.f32 %v10120_v30, %v9951_v60  ;;  %v13101_v45 = vpop.f32.mrb[1].mxu0 }
 0x73e   : > { %v9955_v54 = vmax.f32 %v9952_v31, 0.0 }
 0x740   : > { %13111 = vmatmul.mubr.msk.f32.vlgmr.msra.gmra.mrb[0].mxu1 %vm9967_vm4, %v9955_v54 }
 0x813   : > { %v10037_v35 = vpop.f32.mrb[0].mxu1 }
 0x814   : > { %v10038_v37 = vadd.f32 %v10122_v33, %v10037_v35  ;;  %v13112_v49 = vpop.f32.mrb[1].mxu1 }
 0x816   : > { %10041 = vst [vmem:[#allocation6] sm:$0x3] %v10038_v37 }
 0x817 PF: > { %p15832_p4 = scmp.eq.s32.totalorder %s16080_s28, 6  ;;  %s16020_s24 = smov [#allocation6]  }
 0x818   : > { %s10049_s30 = sshll.u32 %s16020_s24, 4  ;;  %s10050_s30 = int_to_ptr.vmem [resolvable:$true] %s10049_s30 }
 0x819   : > { %s15946_s14 = scalar_lea.vmem %s10050_s30, 32  ;;  %p15953_p12 = scmp.lt.s32.totalorder %s10050_s30, %s10050_s30 }
 0x81a   : > { %p15947_p5 = scmp.ne.s32.totalorder %s10050_s30, %s15946_s14  ;;  %p15954_p0 = scmp.lt.s32.totalorder %s15946_s14, %s15946_s14 }
 0x81c   : > { %p15948_p6 = pnand %p15947_p5, %p15832_p4  ;;  %p15955_p1 = por %p15954_p0, %p15953_p12 }
 0x81e   : > { %p15949_p10 = pneg %p15948_p6 }
 0x820   : > { %p15956_p2 = pnand %p15955_p1, %p15949_p10 }
 0x822   : > { %15959 = shalt.err (!%p15956_p2)
}
 0x823   : > { %s15960_s19 = scalar_lea.hbm %s19577_s7, 32 }
 0x824   : > { %p15961_p11 = scmp.ne.s32.totalorder %s19577_s7, %s15960_s19  ;;  %p15966_p9 = scmp.lt.u32.totalorder %s15960_s19, %s19577_s7 }
 0x826   : > { %p15962_p13 = pnand %p15961_p11, %p15832_p4 }
 0x828   : > { %p15963_p3 = pneg %p15962_p13 }
 0x82a   : > { %p15968_p8 = pnand %p15966_p9, %p15963_p3 }
 0x82c   : > { %15971 = shalt.err (!%p15968_p8)
}
 0x82d   : > { %15824 = dma.vmem_to_hbm [thread:$0]  (%p15832_p4), %s10050_s30, 32, %s19577_s7, [#allocation5]  }
 0x82e   : > { %15993 = dma.done.wait (%p15832_p4), [#allocation5], 32  }
 0x82f   : > { %15995 = vsyncadd (%p15832_p4), [#allocation5], 4294967264 }
 0x830 PF: > { %p18_p7 = scmp.ge.s32.totalorder %s16083_s29, 9   ;;  %s19581_s24 = smov %s16002_s25 }
 0x831   : > { %s19582_s25 = smov %s16006_s26  ;;  %s19583_s26 = smov %s16093_s9 }
 0x832   : > { %s19584_s27 = smov %s16083_s29  ;;  %20 = sbr.rel (!%p18_p7) target bundleno = 4 (0x4), region = 96 }
 0x839   :  { %10062 = vsyncpa [#allocation4], 1 }
 0x83a   :  { %10064 = vsyncpa [#allocation4 + $0x1], 1 }
 0x83b   :  { %10065 = vsyncpa [#allocation5], 1 }
 0x83c   :  { %10067 = vsyncpa [#allocation5 + $0x1], 1 }

</bundles_post_ra>
